<compile_context>
chip_gen: v6e
topology: v6e:2x2x1
jax: 0.10.0
libtpu: 0.0.40
codegen_flags: <defaults>
</compile_context>

<pallas_src>
import functools

import jax
import jax.numpy as jnp
from jax import lax
from jax.experimental import pallas as pl
from jax.experimental.pallas import tpu as pltpu

EPS = 1e-5  # torch.nn.InstanceNorm2d default eps


def _zero_halo(ref, *, pad, H, W, C):
    """Zero only the pad-wide border of a (H+2p, W+2p, C) VMEM scratch."""
    Hp, Wp = H + 2 * pad, W + 2 * pad
    zrow = jnp.zeros((pad, Wp, C), jnp.float32)
    ref[0:pad, :, :] = zrow
    ref[Hp - pad:Hp, :, :] = zrow
    zcol = jnp.zeros((H, pad, C), jnp.float32)
    ref[pad:pad + H, 0:pad, :] = zcol
    ref[pad:pad + H, Wp - pad:Wp, :] = zcol


def _conv_accumulate(src_pad_ref, w_ref, acc_ref, *, H, W, C, K):
    """acc <- sum_{kh,kw} shifted(src_pad) @ w[kh,kw]   (f32, MXU matmuls)."""
    first = True
    for kh in range(K):
        for kw in range(K):
            patch = src_pad_ref[kh:kh + H, kw:kw + W, :]           # (H, W, Cin)
            contrib = jnp.dot(patch.reshape(H * W, C), w_ref[kh, kw],
                              preferred_element_type=jnp.float32)  # (H*W, Cout)
            if first:
                acc_ref[...] = contrib
                first = False
            else:
                acc_ref[...] += contrib


def _instance_norm(a, hw):
    """InstanceNorm2d (affine=False, biased var) with one-pass statistics."""
    inv_hw = 1.0 / float(hw)
    s = jnp.sum(a, axis=0, keepdims=True)                          # (1, C)
    ss = jnp.sum(a * a, axis=0, keepdims=True)                     # (1, C)
    mean = s * inv_hw
    var = jnp.maximum(ss * inv_hw - mean * mean, 0.0)
    return (a - mean) * lax.rsqrt(var + EPS)


def _res_block_kernel(x_ref, w1_ref, w2_ref, o_ref,
                      xpad_ref, hpad_ref, acc_ref, *, H, W, C, K):
    pad = K // 2
    HW = H * W

    # Zero halos every grid step (scratch is per-core; gating on
    # program_id==0 would be wrong under megacore sharding of the batch axis).
    _zero_halo(xpad_ref, pad=pad, H=H, W=W, C=C)
    _zero_halo(hpad_ref, pad=pad, H=H, W=W, C=C)

    # In-kernel zero padding of the input tile.
    xpad_ref[pad:pad + H, pad:pad + W, :] = x_ref[0].astype(jnp.float32)

    # ---- ConvBlock #1: conv3x3 + InstanceNorm + ReLU (bias cancelled) ----
    _conv_accumulate(xpad_ref, w1_ref, acc_ref, H=H, W=W, C=C, K=K)
    y1 = jnp.maximum(_instance_norm(acc_ref[...], HW), 0.0)
    hpad_ref[pad:pad + H, pad:pad + W, :] = y1.reshape(H, W, C)

    # ---- ConvBlock #2: conv3x3 + InstanceNorm (no act) + residual ----
    _conv_accumulate(hpad_ref, w2_ref, acc_ref, H=H, W=W, C=C, K=K)
    y2 = _instance_norm(acc_ref[...], HW)
    out = y2.reshape(H, W, C) + xpad_ref[pad:pad + H, pad:pad + W, :]
    o_ref[...] = out.reshape(1, H, W, C).astype(o_ref.dtype)


def res_block(x, params):
    """Fused ResBlock forward in NHWC.

    x:      (N, H, W, C)
    params: (w1, b1, w2, b2); w* are HWIO (K, K, Cin, Cout).  Biases are
            accepted for API parity but unused: with InstanceNorm2d
            (affine=False) a per-channel bias is exactly cancelled.
    """
    w1, b1, w2, b2 = params
    del b1, b2  # mathematically a no-op under affine-free InstanceNorm
    N, H, W, C = x.shape
    K = w1.shape[0]
    pad = K // 2
    Hp, Wp = H + 2 * pad, W + 2 * pad

    kernel = functools.partial(_res_block_kernel, H=H, W=W, C=C, K=K)

    # Per-grid-step VMEM footprint (double-buffered I/O blocks + weights +
    # scratch); raise the scoped VMEM limit accordingly.
    isz = x.dtype.itemsize
    est = (2 * H * W * C * isz                      # input blocks
           + 2 * H * W * C * isz                    # output blocks
           + 2 * 2 * K * K * C * C * w1.dtype.itemsize
           + 2 * Hp * Wp * C * 4                    # xpad + hpad scratch
           + H * W * C * 4)                         # acc scratch
    vmem_limit = int(min(max(2 * est, 32 * 1024 * 1024), 96 * 1024 * 1024))

    return pl.pallas_call(
        kernel,
        out_shape=jax.ShapeDtypeStruct((N, H, W, C), x.dtype),
        grid_spec=pltpu.PrefetchScalarGridSpec(
            num_scalar_prefetch=0,
            grid=(N,),
            in_specs=[
                pl.BlockSpec((1, H, W, C), lambda n: (n, 0, 0, 0)),
                pl.BlockSpec((K, K, C, C), lambda n: (0, 0, 0, 0)),
                pl.BlockSpec((K, K, C, C), lambda n: (0, 0, 0, 0)),
            ],
            out_specs=pl.BlockSpec((1, H, W, C), lambda n: (n, 0, 0, 0)),
            scratch_shapes=[
                pltpu.VMEM((Hp, Wp, C), jnp.float32),   # padded input
                pltpu.VMEM((Hp, Wp, C), jnp.float32),   # padded intermediate h
                pltpu.VMEM((H * W, C), jnp.float32),    # conv accumulator
            ],
        ),
        compiler_params=pltpu.CompilerParams(
            dimension_semantics=("parallel",),
            vmem_limit_bytes=vmem_limit,
        ),
    )(x, w1, w2)


def res_block_nchw(x, params):
    """PyTorch-layout entry point: x (N, C, H, W), weights OIHW, biases (C,)."""
    w1, b1, w2, b2 = params
    x_nhwc = jnp.transpose(x, (0, 2, 3, 1))
    w1_hwio = jnp.transpose(w1, (2, 3, 1, 0))
    w2_hwio = jnp.transpose(w2, (2, 3, 1, 0))
    out_nhwc = res_block(x_nhwc, (w1_hwio, b1, w2_hwio, b2))
    return jnp.transpose(out_nhwc, (0, 3, 1, 2))


# ---------------------------------------------------------------------------
# Pure-JAX reference (includes the bias, like PyTorch) for correctness check.
# ---------------------------------------------------------------------------
def _instance_norm_ref(y):
    mean = jnp.mean(y, axis=(2, 3), keepdims=True)
    var = jnp.mean((y - mean) ** 2, axis=(2, 3), keepdims=True)
    return (y - mean) * lax.rsqrt(var + EPS)


def _conv_block_ref(x, w, b, apply_relu):
    y = lax.conv_general_dilated(
        x, w, window_strides=(1, 1), padding="SAME",
        dimension_numbers=("NCHW", "OIHW", "NCHW"))
    y = y + b.reshape(1, -1, 1, 1)
    y = _instance_norm_ref(y)
    if apply_relu:
        y = jnp.maximum(y, 0.0)
    return y


def _res_block_ref(x, params):
    w1, b1, w2, b2 = params
    h = _conv_block_ref(x, w1, b1, apply_relu=True)
    return _conv_block_ref(h, w2, b2, apply_relu=False) + x


if __name__ == "__main__":
    N, C, H, W, K = 2, 4, 16, 16, 3  # small synthetic shapes (real model: C=256)

    key = jax.random.PRNGKey(0)
    kx, kw1, kb1, kw2, kb2 = jax.random.split(key, 5)

    x = jax.random.normal(kx, (N, C, H, W), dtype=jnp.float32)
    w1 = 0.1 * jax.random.normal(kw1, (C, C, K, K), dtype=jnp.float32)
    b1 = 0.1 * jax.random.normal(kb1, (C,), dtype=jnp.float32)
    w2 = 0.1 * jax.random.normal(kw2, (C, C, K, K), dtype=jnp.float32)
    b2 = 0.1 * jax.random.normal(kb2, (C,), dtype=jnp.float32)
    params = (w1, b1, w2, b2)

    out = jax.block_until_ready(res_block_nchw(x, params))

    ref = _res_block_ref(x, params)
    assert out.shape == (N, C, H, W)
    max_err = float(jnp.max(jnp.abs(out - ref)))
    assert jnp.allclose(out, ref, atol=1e-4, rtol=1e-4), max_err

    print("KERNEL_OK")
</pallas_src>

<mosaic_0001>
module attributes {stable_mosaic.version = 11 : i64} {
  func.func @_res_block_kernel(%arg0: i32, %arg1: memref<1x16x16x4xf32, #tpu.memory_space<vmem>>, %arg2: memref<3x3x4x4xf32, #tpu.memory_space<vmem>>, %arg3: memref<3x3x4x4xf32, #tpu.memory_space<vmem>>, %arg4: memref<1x16x16x4xf32, #tpu.memory_space<vmem>>, %arg5: memref<18x18x4xf32, #tpu.memory_space<vmem>>, %arg6: memref<18x18x4xf32, #tpu.memory_space<vmem>>, %arg7: memref<256x4xf32, #tpu.memory_space<vmem>>) attributes {dimension_semantics = [#tpu.dimension_semantics<parallel>], iteration_bounds = array<i64: 2>, scalar_prefetch = 0 : i64, scratch_operands = 3 : i64, tpu.core_type = #tpu.core_type<tc>, window_params = [{transform_indices = @transform_0, window_bounds = array<i64: 1, 16, 16, 4>}, {pipeline_mode = #tpu.pipeline_mode<synchronous>, transform_indices = @transform_1, window_bounds = array<i64: 3, 3, 4, 4>}, {pipeline_mode = #tpu.pipeline_mode<synchronous>, transform_indices = @transform_2, window_bounds = array<i64: 3, 3, 4, 4>}, {transform_indices = @transform_3, window_bounds = array<i64: 1, 16, 16, 4>}]} {
    %cst = arith.constant 0.000000e+00 : f32
    %0 = vector.broadcast %cst : f32 to vector<1x18x4xf32>
    %c0 = arith.constant 0 : index
    %c0_0 = arith.constant 0 : index
    %c0_1 = arith.constant 0 : index
    %1 = vector.load %arg5[%c0, %c0_0, %c0_1] : memref<18x18x4xf32, #tpu.memory_space<vmem>>, vector<1x18x4xf32>
    tpu.vector_store %arg5[%c0, %c0_0, %c0_1], %0 {strides = array<i32>} : memref<18x18x4xf32, #tpu.memory_space<vmem>>, vector<1x18x4xf32>,
    %c17 = arith.constant 17 : index
    %c0_2 = arith.constant 0 : index
    %c0_3 = arith.constant 0 : index
    %2 = vector.load %arg5[%c17, %c0_2, %c0_3] : memref<18x18x4xf32, #tpu.memory_space<vmem>>, vector<1x18x4xf32>
    tpu.vector_store %arg5[%c17, %c0_2, %c0_3], %0 {strides = array<i32>} : memref<18x18x4xf32, #tpu.memory_space<vmem>>, vector<1x18x4xf32>,
    %cst_4 = arith.constant 0.000000e+00 : f32
    %3 = vector.broadcast %cst_4 : f32 to vector<16x1x4xf32>
    %c1 = arith.constant 1 : index
    %c0_5 = arith.constant 0 : index
    %c0_6 = arith.constant 0 : index
    %4 = vector.load %arg5[%c1, %c0_5, %c0_6] : memref<18x18x4xf32, #tpu.memory_space<vmem>>, vector<16x1x4xf32>
    tpu.vector_store %arg5[%c1, %c0_5, %c0_6], %3 {strides = array<i32>} : memref<18x18x4xf32, #tpu.memory_space<vmem>>, vector<16x1x4xf32>,
    %c1_7 = arith.constant 1 : index
    %c17_8 = arith.constant 17 : index
    %c0_9 = arith.constant 0 : index
    %5 = vector.load %arg5[%c1_7, %c17_8, %c0_9] : memref<18x18x4xf32, #tpu.memory_space<vmem>>, vector<16x1x4xf32>
    tpu.vector_store %arg5[%c1_7, %c17_8, %c0_9], %3 {strides = array<i32>} : memref<18x18x4xf32, #tpu.memory_space<vmem>>, vector<16x1x4xf32>,
    %cst_10 = arith.constant 0.000000e+00 : f32
    %6 = vector.broadcast %cst_10 : f32 to vector<1x18x4xf32>
    %c0_11 = arith.constant 0 : index
    %c0_12 = arith.constant 0 : index
    %c0_13 = arith.constant 0 : index
    %7 = vector.load %arg6[%c0_11, %c0_12, %c0_13] : memref<18x18x4xf32, #tpu.memory_space<vmem>>, vector<1x18x4xf32>
    tpu.vector_store %arg6[%c0_11, %c0_12, %c0_13], %6 {strides = array<i32>} : memref<18x18x4xf32, #tpu.memory_space<vmem>>, vector<1x18x4xf32>,
    %c17_14 = arith.constant 17 : index
    %c0_15 = arith.constant 0 : index
    %c0_16 = arith.constant 0 : index
    %8 = vector.load %arg6[%c17_14, %c0_15, %c0_16] : memref<18x18x4xf32, #tpu.memory_space<vmem>>, vector<1x18x4xf32>
    tpu.vector_store %arg6[%c17_14, %c0_15, %c0_16], %6 {strides = array<i32>} : memref<18x18x4xf32, #tpu.memory_space<vmem>>, vector<1x18x4xf32>,
    %cst_17 = arith.constant 0.000000e+00 : f32
    %9 = vector.broadcast %cst_17 : f32 to vector<16x1x4xf32>
    %c1_18 = arith.constant 1 : index
    %c0_19 = arith.constant 0 : index
    %c0_20 = arith.constant 0 : index
    %10 = vector.load %arg6[%c1_18, %c0_19, %c0_20] : memref<18x18x4xf32, #tpu.memory_space<vmem>>, vector<16x1x4xf32>
    tpu.vector_store %arg6[%c1_18, %c0_19, %c0_20], %9 {strides = array<i32>} : memref<18x18x4xf32, #tpu.memory_space<vmem>>, vector<16x1x4xf32>,
    %c1_21 = arith.constant 1 : index
    %c17_22 = arith.constant 17 : index
    %c0_23 = arith.constant 0 : index
    %11 = vector.load %arg6[%c1_21, %c17_22, %c0_23] : memref<18x18x4xf32, #tpu.memory_space<vmem>>, vector<16x1x4xf32>
    tpu.vector_store %arg6[%c1_21, %c17_22, %c0_23], %9 {strides = array<i32>} : memref<18x18x4xf32, #tpu.memory_space<vmem>>, vector<16x1x4xf32>,
    %c0_24 = arith.constant 0 : index
    %c0_25 = arith.constant 0 : index
    %c0_26 = arith.constant 0 : index
    %c0_27 = arith.constant 0 : index
    %12 = vector.load %arg1[%c0_24, %c0_25, %c0_26, %c0_27] : memref<1x16x16x4xf32, #tpu.memory_space<vmem>>, vector<1x16x16x4xf32>
    %13 = vector.shape_cast %12 : vector<1x16x16x4xf32> to vector<16x16x4xf32>
    %c1_28 = arith.constant 1 : index
    %c1_29 = arith.constant 1 : index
    %c0_30 = arith.constant 0 : index
    %14 = vector.load %arg5[%c1_28, %c1_29, %c0_30] : memref<18x18x4xf32, #tpu.memory_space<vmem>>, vector<16x16x4xf32>
    tpu.vector_store %arg5[%c1_28, %c1_29, %c0_30], %13 {strides = array<i32>} : memref<18x18x4xf32, #tpu.memory_space<vmem>>, vector<16x16x4xf32>,
    %c0_31 = arith.constant 0 : index
    %c0_32 = arith.constant 0 : index
    %c0_33 = arith.constant 0 : index
    %15 = vector.load %arg5[%c0_31, %c0_32, %c0_33] : memref<18x18x4xf32, #tpu.memory_space<vmem>>, vector<16x16x4xf32>
    %16 = vector.shape_cast %15 : vector<16x16x4xf32> to vector<256x4xf32>
    %c0_34 = arith.constant 0 : index
    %c0_35 = arith.constant 0 : index
    %c0_36 = arith.constant 0 : index
    %c0_37 = arith.constant 0 : index
    %17 = vector.load %arg2[%c0_34, %c0_35, %c0_36, %c0_37] : memref<3x3x4x4xf32, #tpu.memory_space<vmem>>, vector<1x1x4x4xf32>
    %18 = vector.shape_cast %17 : vector<1x1x4x4xf32> to vector<4x4xf32>
    %cst_38 = arith.constant dense<0.000000e+00> : vector<256x4xf32>
    %19 = tpu.matmul %16, %18, %cst_38 {dimension_numbers = #tpu.dot_dimension_numbers<[1], [0], [0], [1], [0, 0, 1, 1], [], []>} : vector<256x4xf32>, vector<4x4xf32>, vector<256x4xf32> -> vector<256x4xf32>
    %c0_39 = arith.constant 0 : index
    %c0_40 = arith.constant 0 : index
    %20 = vector.load %arg7[%c0_39, %c0_40] : memref<256x4xf32, #tpu.memory_space<vmem>>, vector<256x4xf32>
    tpu.vector_store %arg7[%c0_39, %c0_40], %19 {strides = array<i32>} : memref<256x4xf32, #tpu.memory_space<vmem>>, vector<256x4xf32>,
    %c0_41 = arith.constant 0 : index
    %c1_42 = arith.constant 1 : index
    %c0_43 = arith.constant 0 : index
    %21 = vector.load %arg5[%c0_41, %c1_42, %c0_43] : memref<18x18x4xf32, #tpu.memory_space<vmem>>, vector<16x16x4xf32>
    %22 = vector.shape_cast %21 : vector<16x16x4xf32> to vector<256x4xf32>
    %c0_44 = arith.constant 0 : index
    %c1_45 = arith.constant 1 : index
    %c0_46 = arith.constant 0 : index
    %c0_47 = arith.constant 0 : index
    %23 = vector.load %arg2[%c0_44, %c1_45, %c0_46, %c0_47] : memref<3x3x4x4xf32, #tpu.memory_space<vmem>>, vector<1x1x4x4xf32>
    %24 = vector.shape_cast %23 : vector<1x1x4x4xf32> to vector<4x4xf32>
    %cst_48 = arith.constant dense<0.000000e+00> : vector<256x4xf32>
    %25 = tpu.matmul %22, %24, %cst_48 {dimension_numbers = #tpu.dot_dimension_numbers<[1], [0], [0], [1], [0, 0, 1, 1], [], []>} : vector<256x4xf32>, vector<4x4xf32>, vector<256x4xf32> -> vector<256x4xf32>
    %c0_49 = arith.constant 0 : index
    %c0_50 = arith.constant 0 : index
    %26 = vector.load %arg7[%c0_49, %c0_50] : memref<256x4xf32, #tpu.memory_space<vmem>>, vector<256x4xf32>
    %27 = arith.addf %26, %25 : vector<256x4xf32>
    %c0_51 = arith.constant 0 : index
    %c0_52 = arith.constant 0 : index
    %28 = vector.load %arg7[%c0_51, %c0_52] : memref<256x4xf32, #tpu.memory_space<vmem>>, vector<256x4xf32>
    tpu.vector_store %arg7[%c0_51, %c0_52], %27 {strides = array<i32>} : memref<256x4xf32, #tpu.memory_space<vmem>>, vector<256x4xf32>,
    %c0_53 = arith.constant 0 : index
    %c2 = arith.constant 2 : index
    %c0_54 = arith.constant 0 : index
    %29 = vector.load %arg5[%c0_53, %c2, %c0_54] : memref<18x18x4xf32, #tpu.memory_space<vmem>>, vector<16x16x4xf32>
    %30 = vector.shape_cast %29 : vector<16x16x4xf32> to vector<256x4xf32>
    %c0_55 = arith.constant 0 : index
    %c2_56 = arith.constant 2 : index
    %c0_57 = arith.constant 0 : index
    %c0_58 = arith.constant 0 : index
    %31 = vector.load %arg2[%c0_55, %c2_56, %c0_57, %c0_58] : memref<3x3x4x4xf32, #tpu.memory_space<vmem>>, vector<1x1x4x4xf32>
    %32 = vector.shape_cast %31 : vector<1x1x4x4xf32> to vector<4x4xf32>
    %cst_59 = arith.constant dense<0.000000e+00> : vector<256x4xf32>
    %33 = tpu.matmul %30, %32, %cst_59 {dimension_numbers = #tpu.dot_dimension_numbers<[1], [0], [0], [1], [0, 0, 1, 1], [], []>} : vector<256x4xf32>, vector<4x4xf32>, vector<256x4xf32> -> vector<256x4xf32>
    %c0_60 = arith.constant 0 : index
    %c0_61 = arith.constant 0 : index
    %34 = vector.load %arg7[%c0_60, %c0_61] : memref<256x4xf32, #tpu.memory_space<vmem>>, vector<256x4xf32>
    %35 = arith.addf %34, %33 : vector<256x4xf32>
    %c0_62 = arith.constant 0 : index
    %c0_63 = arith.constant 0 : index
    %36 = vector.load %arg7[%c0_62, %c0_63] : memref<256x4xf32, #tpu.memory_space<vmem>>, vector<256x4xf32>
    tpu.vector_store %arg7[%c0_62, %c0_63], %35 {strides = array<i32>} : memref<256x4xf32, #tpu.memory_space<vmem>>, vector<256x4xf32>,
    %c1_64 = arith.constant 1 : index
    %c0_65 = arith.constant 0 : index
    %c0_66 = arith.constant 0 : index
    %37 = vector.load %arg5[%c1_64, %c0_65, %c0_66] : memref<18x18x4xf32, #tpu.memory_space<vmem>>, vector<16x16x4xf32>
    %38 = vector.shape_cast %37 : vector<16x16x4xf32> to vector<256x4xf32>
    %c1_67 = arith.constant 1 : index
    %c0_68 = arith.constant 0 : index
    %c0_69 = arith.constant 0 : index
    %c0_70 = arith.constant 0 : index
    %39 = vector.load %arg2[%c1_67, %c0_68, %c0_69, %c0_70] : memref<3x3x4x4xf32, #tpu.memory_space<vmem>>, vector<1x1x4x4xf32>
    %40 = vector.shape_cast %39 : vector<1x1x4x4xf32> to vector<4x4xf32>
    %cst_71 = arith.constant dense<0.000000e+00> : vector<256x4xf32>
    %41 = tpu.matmul %38, %40, %cst_71 {dimension_numbers = #tpu.dot_dimension_numbers<[1], [0], [0], [1], [0, 0, 1, 1], [], []>} : vector<256x4xf32>, vector<4x4xf32>, vector<256x4xf32> -> vector<256x4xf32>
    %c0_72 = arith.constant 0 : index
    %c0_73 = arith.constant 0 : index
    %42 = vector.load %arg7[%c0_72, %c0_73] : memref<256x4xf32, #tpu.memory_space<vmem>>, vector<256x4xf32>
    %43 = arith.addf %42, %41 : vector<256x4xf32>
    %c0_74 = arith.constant 0 : index
    %c0_75 = arith.constant 0 : index
    %44 = vector.load %arg7[%c0_74, %c0_75] : memref<256x4xf32, #tpu.memory_space<vmem>>, vector<256x4xf32>
    tpu.vector_store %arg7[%c0_74, %c0_75], %43 {strides = array<i32>} : memref<256x4xf32, #tpu.memory_space<vmem>>, vector<256x4xf32>,
    %c1_76 = arith.constant 1 : index
    %c1_77 = arith.constant 1 : index
    %c0_78 = arith.constant 0 : index
    %45 = vector.load %arg5[%c1_76, %c1_77, %c0_78] : memref<18x18x4xf32, #tpu.memory_space<vmem>>, vector<16x16x4xf32>
    %46 = vector.shape_cast %45 : vector<16x16x4xf32> to vector<256x4xf32>
    %c1_79 = arith.constant 1 : index
    %c1_80 = arith.constant 1 : index
    %c0_81 = arith.constant 0 : index
    %c0_82 = arith.constant 0 : index
    %47 = vector.load %arg2[%c1_79, %c1_80, %c0_81, %c0_82] : memref<3x3x4x4xf32, #tpu.memory_space<vmem>>, vector<1x1x4x4xf32>
    %48 = vector.shape_cast %47 : vector<1x1x4x4xf32> to vector<4x4xf32>
    %cst_83 = arith.constant dense<0.000000e+00> : vector<256x4xf32>
    %49 = tpu.matmul %46, %48, %cst_83 {dimension_numbers = #tpu.dot_dimension_numbers<[1], [0], [0], [1], [0, 0, 1, 1], [], []>} : vector<256x4xf32>, vector<4x4xf32>, vector<256x4xf32> -> vector<256x4xf32>
    %c0_84 = arith.constant 0 : index
    %c0_85 = arith.constant 0 : index
    %50 = vector.load %arg7[%c0_84, %c0_85] : memref<256x4xf32, #tpu.memory_space<vmem>>, vector<256x4xf32>
    %51 = arith.addf %50, %49 : vector<256x4xf32>
    %c0_86 = arith.constant 0 : index
    %c0_87 = arith.constant 0 : index
    %52 = vector.load %arg7[%c0_86, %c0_87] : memref<256x4xf32, #tpu.memory_space<vmem>>, vector<256x4xf32>
    tpu.vector_store %arg7[%c0_86, %c0_87], %51 {strides = array<i32>} : memref<256x4xf32, #tpu.memory_space<vmem>>, vector<256x4xf32>,
    %c1_88 = arith.constant 1 : index
    %c2_89 = arith.constant 2 : index
    %c0_90 = arith.constant 0 : index
    %53 = vector.load %arg5[%c1_88, %c2_89, %c0_90] : memref<18x18x4xf32, #tpu.memory_space<vmem>>, vector<16x16x4xf32>
    %54 = vector.shape_cast %53 : vector<16x16x4xf32> to vector<256x4xf32>
    %c1_91 = arith.constant 1 : index
    %c2_92 = arith.constant 2 : index
    %c0_93 = arith.constant 0 : index
    %c0_94 = arith.constant 0 : index
    %55 = vector.load %arg2[%c1_91, %c2_92, %c0_93, %c0_94] : memref<3x3x4x4xf32, #tpu.memory_space<vmem>>, vector<1x1x4x4xf32>
    %56 = vector.shape_cast %55 : vector<1x1x4x4xf32> to vector<4x4xf32>
    %cst_95 = arith.constant dense<0.000000e+00> : vector<256x4xf32>
    %57 = tpu.matmul %54, %56, %cst_95 {dimension_numbers = #tpu.dot_dimension_numbers<[1], [0], [0], [1], [0, 0, 1, 1], [], []>} : vector<256x4xf32>, vector<4x4xf32>, vector<256x4xf32> -> vector<256x4xf32>
    %c0_96 = arith.constant 0 : index
    %c0_97 = arith.constant 0 : index
    %58 = vector.load %arg7[%c0_96, %c0_97] : memref<256x4xf32, #tpu.memory_space<vmem>>, vector<256x4xf32>
    %59 = arith.addf %58, %57 : vector<256x4xf32>
    %c0_98 = arith.constant 0 : index
    %c0_99 = arith.constant 0 : index
    %60 = vector.load %arg7[%c0_98, %c0_99] : memref<256x4xf32, #tpu.memory_space<vmem>>, vector<256x4xf32>
    tpu.vector_store %arg7[%c0_98, %c0_99], %59 {strides = array<i32>} : memref<256x4xf32, #tpu.memory_space<vmem>>, vector<256x4xf32>,
    %c2_100 = arith.constant 2 : index
    %c0_101 = arith.constant 0 : index
    %c0_102 = arith.constant 0 : index
    %61 = vector.load %arg5[%c2_100, %c0_101, %c0_102] : memref<18x18x4xf32, #tpu.memory_space<vmem>>, vector<16x16x4xf32>
    %62 = vector.shape_cast %61 : vector<16x16x4xf32> to vector<256x4xf32>
    %c2_103 = arith.constant 2 : index
    %c0_104 = arith.constant 0 : index
    %c0_105 = arith.constant 0 : index
    %c0_106 = arith.constant 0 : index
    %63 = vector.load %arg2[%c2_103, %c0_104, %c0_105, %c0_106] : memref<3x3x4x4xf32, #tpu.memory_space<vmem>>, vector<1x1x4x4xf32>
    %64 = vector.shape_cast %63 : vector<1x1x4x4xf32> to vector<4x4xf32>
    %cst_107 = arith.constant dense<0.000000e+00> : vector<256x4xf32>
    %65 = tpu.matmul %62, %64, %cst_107 {dimension_numbers = #tpu.dot_dimension_numbers<[1], [0], [0], [1], [0, 0, 1, 1], [], []>} : vector<256x4xf32>, vector<4x4xf32>, vector<256x4xf32> -> vector<256x4xf32>
    %c0_108 = arith.constant 0 : index
    %c0_109 = arith.constant 0 : index
    %66 = vector.load %arg7[%c0_108, %c0_109] : memref<256x4xf32, #tpu.memory_space<vmem>>, vector<256x4xf32>
    %67 = arith.addf %66, %65 : vector<256x4xf32>
    %c0_110 = arith.constant 0 : index
    %c0_111 = arith.constant 0 : index
    %68 = vector.load %arg7[%c0_110, %c0_111] : memref<256x4xf32, #tpu.memory_space<vmem>>, vector<256x4xf32>
    tpu.vector_store %arg7[%c0_110, %c0_111], %67 {strides = array<i32>} : memref<256x4xf32, #tpu.memory_space<vmem>>, vector<256x4xf32>,
    %c2_112 = arith.constant 2 : index
    %c1_113 = arith.constant 1 : index
    %c0_114 = arith.constant 0 : index
    %69 = vector.load %arg5[%c2_112, %c1_113, %c0_114] : memref<18x18x4xf32, #tpu.memory_space<vmem>>, vector<16x16x4xf32>
    %70 = vector.shape_cast %69 : vector<16x16x4xf32> to vector<256x4xf32>
    %c2_115 = arith.constant 2 : index
    %c1_116 = arith.constant 1 : index
    %c0_117 = arith.constant 0 : index
    %c0_118 = arith.constant 0 : index
    %71 = vector.load %arg2[%c2_115, %c1_116, %c0_117, %c0_118] : memref<3x3x4x4xf32, #tpu.memory_space<vmem>>, vector<1x1x4x4xf32>
    %72 = vector.shape_cast %71 : vector<1x1x4x4xf32> to vector<4x4xf32>
    %cst_119 = arith.constant dense<0.000000e+00> : vector<256x4xf32>
    %73 = tpu.matmul %70, %72, %cst_119 {dimension_numbers = #tpu.dot_dimension_numbers<[1], [0], [0], [1], [0, 0, 1, 1], [], []>} : vector<256x4xf32>, vector<4x4xf32>, vector<256x4xf32> -> vector<256x4xf32>
    %c0_120 = arith.constant 0 : index
    %c0_121 = arith.constant 0 : index
    %74 = vector.load %arg7[%c0_120, %c0_121] : memref<256x4xf32, #tpu.memory_space<vmem>>, vector<256x4xf32>
    %75 = arith.addf %74, %73 : vector<256x4xf32>
    %c0_122 = arith.constant 0 : index
    %c0_123 = arith.constant 0 : index
    %76 = vector.load %arg7[%c0_122, %c0_123] : memref<256x4xf32, #tpu.memory_space<vmem>>, vector<256x4xf32>
    tpu.vector_store %arg7[%c0_122, %c0_123], %75 {strides = array<i32>} : memref<256x4xf32, #tpu.memory_space<vmem>>, vector<256x4xf32>,
    %c2_124 = arith.constant 2 : index
    %c2_125 = arith.constant 2 : index
    %c0_126 = arith.constant 0 : index
    %77 = vector.load %arg5[%c2_124, %c2_125, %c0_126] : memref<18x18x4xf32, #tpu.memory_space<vmem>>, vector<16x16x4xf32>
    %78 = vector.shape_cast %77 : vector<16x16x4xf32> to vector<256x4xf32>
    %c2_127 = arith.constant 2 : index
    %c2_128 = arith.constant 2 : index
    %c0_129 = arith.constant 0 : index
    %c0_130 = arith.constant 0 : index
    %79 = vector.load %arg2[%c2_127, %c2_128, %c0_129, %c0_130] : memref<3x3x4x4xf32, #tpu.memory_space<vmem>>, vector<1x1x4x4xf32>
    %80 = vector.shape_cast %79 : vector<1x1x4x4xf32> to vector<4x4xf32>
    %cst_131 = arith.constant dense<0.000000e+00> : vector<256x4xf32>
    %81 = tpu.matmul %78, %80, %cst_131 {dimension_numbers = #tpu.dot_dimension_numbers<[1], [0], [0], [1], [0, 0, 1, 1], [], []>} : vector<256x4xf32>, vector<4x4xf32>, vector<256x4xf32> -> vector<256x4xf32>
    %c0_132 = arith.constant 0 : index
    %c0_133 = arith.constant 0 : index
    %82 = vector.load %arg7[%c0_132, %c0_133] : memref<256x4xf32, #tpu.memory_space<vmem>>, vector<256x4xf32>
    %83 = arith.addf %82, %81 : vector<256x4xf32>
    %c0_134 = arith.constant 0 : index
    %c0_135 = arith.constant 0 : index
    %84 = vector.load %arg7[%c0_134, %c0_135] : memref<256x4xf32, #tpu.memory_space<vmem>>, vector<256x4xf32>
    tpu.vector_store %arg7[%c0_134, %c0_135], %83 {strides = array<i32>} : memref<256x4xf32, #tpu.memory_space<vmem>>, vector<256x4xf32>,
    %c0_136 = arith.constant 0 : index
    %c0_137 = arith.constant 0 : index
    %85 = vector.load %arg7[%c0_136, %c0_137] : memref<256x4xf32, #tpu.memory_space<vmem>>, vector<256x4xf32>
    %cst_138 = arith.constant dense<0.000000e+00> : vector<4xf32>
    %86 = vector.multi_reduction <add>, %85, %cst_138 [0] : vector<256x4xf32> to vector<4xf32>
    %87 = vector.shape_cast %86 : vector<4xf32> to vector<1x4xf32>
    %88 = arith.mulf %85, %85 : vector<256x4xf32>
    %cst_139 = arith.constant dense<0.000000e+00> : vector<4xf32>
    %89 = vector.multi_reduction <add>, %88, %cst_139 [0] : vector<256x4xf32> to vector<4xf32>
    %90 = vector.shape_cast %89 : vector<4xf32> to vector<1x4xf32>
    %cst_140 = arith.constant 3.906250e-03 : f32
    %91 = vector.broadcast %cst_140 : f32 to vector<1x4xf32>
    %92 = arith.mulf %87, %91 : vector<1x4xf32>
    %cst_141 = arith.constant 3.906250e-03 : f32
    %93 = vector.broadcast %cst_141 : f32 to vector<1x4xf32>
    %94 = arith.mulf %90, %93 : vector<1x4xf32>
    %95 = arith.mulf %92, %92 : vector<1x4xf32>
    %96 = arith.subf %94, %95 : vector<1x4xf32>
    %cst_142 = arith.constant 0.000000e+00 : f32
    %97 = vector.broadcast %cst_142 : f32 to vector<1x4xf32>
    %98 = arith.maximumf %96, %97 : vector<1x4xf32>
    %99 = vector.broadcast %92 : vector<1x4xf32> to vector<256x4xf32>
    %100 = arith.subf %85, %99 : vector<256x4xf32>
    %cst_143 = arith.constant 9.99999974E-6 : f32
    %101 = vector.broadcast %cst_143 : f32 to vector<1x4xf32>
    %102 = arith.addf %98, %101 : vector<1x4xf32>
    %103 = math.rsqrt %102 : vector<1x4xf32>
    %104 = vector.broadcast %103 : vector<1x4xf32> to vector<256x4xf32>
    %105 = arith.mulf %100, %104 : vector<256x4xf32>
    %cst_144 = arith.constant 0.000000e+00 : f32
    %106 = vector.broadcast %cst_144 : f32 to vector<256x4xf32>
    %107 = arith.maximumf %105, %106 : vector<256x4xf32>
    %108 = vector.shape_cast %107 : vector<256x4xf32> to vector<16x16x4xf32>
    %c1_145 = arith.constant 1 : index
    %c1_146 = arith.constant 1 : index
    %c0_147 = arith.constant 0 : index
    %109 = vector.load %arg6[%c1_145, %c1_146, %c0_147] : memref<18x18x4xf32, #tpu.memory_space<vmem>>, vector<16x16x4xf32>
    tpu.vector_store %arg6[%c1_145, %c1_146, %c0_147], %108 {strides = array<i32>} : memref<18x18x4xf32, #tpu.memory_space<vmem>>, vector<16x16x4xf32>,
    %c0_148 = arith.constant 0 : index
    %c0_149 = arith.constant 0 : index
    %c0_150 = arith.constant 0 : index
    %110 = vector.load %arg6[%c0_148, %c0_149, %c0_150] : memref<18x18x4xf32, #tpu.memory_space<vmem>>, vector<16x16x4xf32>
    %111 = vector.shape_cast %110 : vector<16x16x4xf32> to vector<256x4xf32>
    %c0_151 = arith.constant 0 : index
    %c0_152 = arith.constant 0 : index
    %c0_153 = arith.constant 0 : index
    %c0_154 = arith.constant 0 : index
    %112 = vector.load %arg3[%c0_151, %c0_152, %c0_153, %c0_154] : memref<3x3x4x4xf32, #tpu.memory_space<vmem>>, vector<1x1x4x4xf32>
    %113 = vector.shape_cast %112 : vector<1x1x4x4xf32> to vector<4x4xf32>
    %cst_155 = arith.constant dense<0.000000e+00> : vector<256x4xf32>
    %114 = tpu.matmul %111, %113, %cst_155 {dimension_numbers = #tpu.dot_dimension_numbers<[1], [0], [0], [1], [0, 0, 1, 1], [], []>} : vector<256x4xf32>, vector<4x4xf32>, vector<256x4xf32> -> vector<256x4xf32>
    %c0_156 = arith.constant 0 : index
    %c0_157 = arith.constant 0 : index
    %115 = vector.load %arg7[%c0_156, %c0_157] : memref<256x4xf32, #tpu.memory_space<vmem>>, vector<256x4xf32>
    tpu.vector_store %arg7[%c0_156, %c0_157], %114 {strides = array<i32>} : memref<256x4xf32, #tpu.memory_space<vmem>>, vector<256x4xf32>,
    %c0_158 = arith.constant 0 : index
    %c1_159 = arith.constant 1 : index
    %c0_160 = arith.constant 0 : index
    %116 = vector.load %arg6[%c0_158, %c1_159, %c0_160] : memref<18x18x4xf32, #tpu.memory_space<vmem>>, vector<16x16x4xf32>
    %117 = vector.shape_cast %116 : vector<16x16x4xf32> to vector<256x4xf32>
    %c0_161 = arith.constant 0 : index
    %c1_162 = arith.constant 1 : index
    %c0_163 = arith.constant 0 : index
    %c0_164 = arith.constant 0 : index
    %118 = vector.load %arg3[%c0_161, %c1_162, %c0_163, %c0_164] : memref<3x3x4x4xf32, #tpu.memory_space<vmem>>, vector<1x1x4x4xf32>
    %119 = vector.shape_cast %118 : vector<1x1x4x4xf32> to vector<4x4xf32>
    %cst_165 = arith.constant dense<0.000000e+00> : vector<256x4xf32>
    %120 = tpu.matmul %117, %119, %cst_165 {dimension_numbers = #tpu.dot_dimension_numbers<[1], [0], [0], [1], [0, 0, 1, 1], [], []>} : vector<256x4xf32>, vector<4x4xf32>, vector<256x4xf32> -> vector<256x4xf32>
    %c0_166 = arith.constant 0 : index
    %c0_167 = arith.constant 0 : index
    %121 = vector.load %arg7[%c0_166, %c0_167] : memref<256x4xf32, #tpu.memory_space<vmem>>, vector<256x4xf32>
    %122 = arith.addf %121, %120 : vector<256x4xf32>
    %c0_168 = arith.constant 0 : index
    %c0_169 = arith.constant 0 : index
    %123 = vector.load %arg7[%c0_168, %c0_169] : memref<256x4xf32, #tpu.memory_space<vmem>>, vector<256x4xf32>
    tpu.vector_store %arg7[%c0_168, %c0_169], %122 {strides = array<i32>} : memref<256x4xf32, #tpu.memory_space<vmem>>, vector<256x4xf32>,
    %c0_170 = arith.constant 0 : index
    %c2_171 = arith.constant 2 : index
    %c0_172 = arith.constant 0 : index
    %124 = vector.load %arg6[%c0_170, %c2_171, %c0_172] : memref<18x18x4xf32, #tpu.memory_space<vmem>>, vector<16x16x4xf32>
    %125 = vector.shape_cast %124 : vector<16x16x4xf32> to vector<256x4xf32>
    %c0_173 = arith.constant 0 : index
    %c2_174 = arith.constant 2 : index
    %c0_175 = arith.constant 0 : index
    %c0_176 = arith.constant 0 : index
    %126 = vector.load %arg3[%c0_173, %c2_174, %c0_175, %c0_176] : memref<3x3x4x4xf32, #tpu.memory_space<vmem>>, vector<1x1x4x4xf32>
    %127 = vector.shape_cast %126 : vector<1x1x4x4xf32> to vector<4x4xf32>
    %cst_177 = arith.constant dense<0.000000e+00> : vector<256x4xf32>
    %128 = tpu.matmul %125, %127, %cst_177 {dimension_numbers = #tpu.dot_dimension_numbers<[1], [0], [0], [1], [0, 0, 1, 1], [], []>} : vector<256x4xf32>, vector<4x4xf32>, vector<256x4xf32> -> vector<256x4xf32>
    %c0_178 = arith.constant 0 : index
    %c0_179 = arith.constant 0 : index
    %129 = vector.load %arg7[%c0_178, %c0_179] : memref<256x4xf32, #tpu.memory_space<vmem>>, vector<256x4xf32>
    %130 = arith.addf %129, %128 : vector<256x4xf32>
    %c0_180 = arith.constant 0 : index
    %c0_181 = arith.constant 0 : index
    %131 = vector.load %arg7[%c0_180, %c0_181] : memref<256x4xf32, #tpu.memory_space<vmem>>, vector<256x4xf32>
    tpu.vector_store %arg7[%c0_180, %c0_181], %130 {strides = array<i32>} : memref<256x4xf32, #tpu.memory_space<vmem>>, vector<256x4xf32>,
    %c1_182 = arith.constant 1 : index
    %c0_183 = arith.constant 0 : index
    %c0_184 = arith.constant 0 : index
    %132 = vector.load %arg6[%c1_182, %c0_183, %c0_184] : memref<18x18x4xf32, #tpu.memory_space<vmem>>, vector<16x16x4xf32>
    %133 = vector.shape_cast %132 : vector<16x16x4xf32> to vector<256x4xf32>
    %c1_185 = arith.constant 1 : index
    %c0_186 = arith.constant 0 : index
    %c0_187 = arith.constant 0 : index
    %c0_188 = arith.constant 0 : index
    %134 = vector.load %arg3[%c1_185, %c0_186, %c0_187, %c0_188] : memref<3x3x4x4xf32, #tpu.memory_space<vmem>>, vector<1x1x4x4xf32>
    %135 = vector.shape_cast %134 : vector<1x1x4x4xf32> to vector<4x4xf32>
    %cst_189 = arith.constant dense<0.000000e+00> : vector<256x4xf32>
    %136 = tpu.matmul %133, %135, %cst_189 {dimension_numbers = #tpu.dot_dimension_numbers<[1], [0], [0], [1], [0, 0, 1, 1], [], []>} : vector<256x4xf32>, vector<4x4xf32>, vector<256x4xf32> -> vector<256x4xf32>
    %c0_190 = arith.constant 0 : index
    %c0_191 = arith.constant 0 : index
    %137 = vector.load %arg7[%c0_190, %c0_191] : memref<256x4xf32, #tpu.memory_space<vmem>>, vector<256x4xf32>
    %138 = arith.addf %137, %136 : vector<256x4xf32>
    %c0_192 = arith.constant 0 : index
    %c0_193 = arith.constant 0 : index
    %139 = vector.load %arg7[%c0_192, %c0_193] : memref<256x4xf32, #tpu.memory_space<vmem>>, vector<256x4xf32>
    tpu.vector_store %arg7[%c0_192, %c0_193], %138 {strides = array<i32>} : memref<256x4xf32, #tpu.memory_space<vmem>>, vector<256x4xf32>,
    %c1_194 = arith.constant 1 : index
    %c1_195 = arith.constant 1 : index
    %c0_196 = arith.constant 0 : index
    %140 = vector.load %arg6[%c1_194, %c1_195, %c0_196] : memref<18x18x4xf32, #tpu.memory_space<vmem>>, vector<16x16x4xf32>
    %141 = vector.shape_cast %140 : vector<16x16x4xf32> to vector<256x4xf32>
    %c1_197 = arith.constant 1 : index
    %c1_198 = arith.constant 1 : index
    %c0_199 = arith.constant 0 : index
    %c0_200 = arith.constant 0 : index
    %142 = vector.load %arg3[%c1_197, %c1_198, %c0_199, %c0_200] : memref<3x3x4x4xf32, #tpu.memory_space<vmem>>, vector<1x1x4x4xf32>
    %143 = vector.shape_cast %142 : vector<1x1x4x4xf32> to vector<4x4xf32>
    %cst_201 = arith.constant dense<0.000000e+00> : vector<256x4xf32>
    %144 = tpu.matmul %141, %143, %cst_201 {dimension_numbers = #tpu.dot_dimension_numbers<[1], [0], [0], [1], [0, 0, 1, 1], [], []>} : vector<256x4xf32>, vector<4x4xf32>, vector<256x4xf32> -> vector<256x4xf32>
    %c0_202 = arith.constant 0 : index
    %c0_203 = arith.constant 0 : index
    %145 = vector.load %arg7[%c0_202, %c0_203] : memref<256x4xf32, #tpu.memory_space<vmem>>, vector<256x4xf32>
    %146 = arith.addf %145, %144 : vector<256x4xf32>
    %c0_204 = arith.constant 0 : index
    %c0_205 = arith.constant 0 : index
    %147 = vector.load %arg7[%c0_204, %c0_205] : memref<256x4xf32, #tpu.memory_space<vmem>>, vector<256x4xf32>
    tpu.vector_store %arg7[%c0_204, %c0_205], %146 {strides = array<i32>} : memref<256x4xf32, #tpu.memory_space<vmem>>, vector<256x4xf32>,
    %c1_206 = arith.constant 1 : index
    %c2_207 = arith.constant 2 : index
    %c0_208 = arith.constant 0 : index
    %148 = vector.load %arg6[%c1_206, %c2_207, %c0_208] : memref<18x18x4xf32, #tpu.memory_space<vmem>>, vector<16x16x4xf32>
    %149 = vector.shape_cast %148 : vector<16x16x4xf32> to vector<256x4xf32>
    %c1_209 = arith.constant 1 : index
    %c2_210 = arith.constant 2 : index
    %c0_211 = arith.constant 0 : index
    %c0_212 = arith.constant 0 : index
    %150 = vector.load %arg3[%c1_209, %c2_210, %c0_211, %c0_212] : memref<3x3x4x4xf32, #tpu.memory_space<vmem>>, vector<1x1x4x4xf32>
    %151 = vector.shape_cast %150 : vector<1x1x4x4xf32> to vector<4x4xf32>
    %cst_213 = arith.constant dense<0.000000e+00> : vector<256x4xf32>
    %152 = tpu.matmul %149, %151, %cst_213 {dimension_numbers = #tpu.dot_dimension_numbers<[1], [0], [0], [1], [0, 0, 1, 1], [], []>} : vector<256x4xf32>, vector<4x4xf32>, vector<256x4xf32> -> vector<256x4xf32>
    %c0_214 = arith.constant 0 : index
    %c0_215 = arith.constant 0 : index
    %153 = vector.load %arg7[%c0_214, %c0_215] : memref<256x4xf32, #tpu.memory_space<vmem>>, vector<256x4xf32>
    %154 = arith.addf %153, %152 : vector<256x4xf32>
    %c0_216 = arith.constant 0 : index
    %c0_217 = arith.constant 0 : index
    %155 = vector.load %arg7[%c0_216, %c0_217] : memref<256x4xf32, #tpu.memory_space<vmem>>, vector<256x4xf32>
    tpu.vector_store %arg7[%c0_216, %c0_217], %154 {strides = array<i32>} : memref<256x4xf32, #tpu.memory_space<vmem>>, vector<256x4xf32>,
    %c2_218 = arith.constant 2 : index
    %c0_219 = arith.constant 0 : index
    %c0_220 = arith.constant 0 : index
    %156 = vector.load %arg6[%c2_218, %c0_219, %c0_220] : memref<18x18x4xf32, #tpu.memory_space<vmem>>, vector<16x16x4xf32>
    %157 = vector.shape_cast %156 : vector<16x16x4xf32> to vector<256x4xf32>
    %c2_221 = arith.constant 2 : index
    %c0_222 = arith.constant 0 : index
    %c0_223 = arith.constant 0 : index
    %c0_224 = arith.constant 0 : index
    %158 = vector.load %arg3[%c2_221, %c0_222, %c0_223, %c0_224] : memref<3x3x4x4xf32, #tpu.memory_space<vmem>>, vector<1x1x4x4xf32>
    %159 = vector.shape_cast %158 : vector<1x1x4x4xf32> to vector<4x4xf32>
    %cst_225 = arith.constant dense<0.000000e+00> : vector<256x4xf32>
    %160 = tpu.matmul %157, %159, %cst_225 {dimension_numbers = #tpu.dot_dimension_numbers<[1], [0], [0], [1], [0, 0, 1, 1], [], []>} : vector<256x4xf32>, vector<4x4xf32>, vector<256x4xf32> -> vector<256x4xf32>
    %c0_226 = arith.constant 0 : index
    %c0_227 = arith.constant 0 : index
    %161 = vector.load %arg7[%c0_226, %c0_227] : memref<256x4xf32, #tpu.memory_space<vmem>>, vector<256x4xf32>
    %162 = arith.addf %161, %160 : vector<256x4xf32>
    %c0_228 = arith.constant 0 : index
    %c0_229 = arith.constant 0 : index
    %163 = vector.load %arg7[%c0_228, %c0_229] : memref<256x4xf32, #tpu.memory_space<vmem>>, vector<256x4xf32>
    tpu.vector_store %arg7[%c0_228, %c0_229], %162 {strides = array<i32>} : memref<256x4xf32, #tpu.memory_space<vmem>>, vector<256x4xf32>,
    %c2_230 = arith.constant 2 : index
    %c1_231 = arith.constant 1 : index
    %c0_232 = arith.constant 0 : index
    %164 = vector.load %arg6[%c2_230, %c1_231, %c0_232] : memref<18x18x4xf32, #tpu.memory_space<vmem>>, vector<16x16x4xf32>
    %165 = vector.shape_cast %164 : vector<16x16x4xf32> to vector<256x4xf32>
    %c2_233 = arith.constant 2 : index
    %c1_234 = arith.constant 1 : index
    %c0_235 = arith.constant 0 : index
    %c0_236 = arith.constant 0 : index
    %166 = vector.load %arg3[%c2_233, %c1_234, %c0_235, %c0_236] : memref<3x3x4x4xf32, #tpu.memory_space<vmem>>, vector<1x1x4x4xf32>
    %167 = vector.shape_cast %166 : vector<1x1x4x4xf32> to vector<4x4xf32>
    %cst_237 = arith.constant dense<0.000000e+00> : vector<256x4xf32>
    %168 = tpu.matmul %165, %167, %cst_237 {dimension_numbers = #tpu.dot_dimension_numbers<[1], [0], [0], [1], [0, 0, 1, 1], [], []>} : vector<256x4xf32>, vector<4x4xf32>, vector<256x4xf32> -> vector<256x4xf32>
    %c0_238 = arith.constant 0 : index
    %c0_239 = arith.constant 0 : index
    %169 = vector.load %arg7[%c0_238, %c0_239] : memref<256x4xf32, #tpu.memory_space<vmem>>, vector<256x4xf32>
    %170 = arith.addf %169, %168 : vector<256x4xf32>
    %c0_240 = arith.constant 0 : index
    %c0_241 = arith.constant 0 : index
    %171 = vector.load %arg7[%c0_240, %c0_241] : memref<256x4xf32, #tpu.memory_space<vmem>>, vector<256x4xf32>
    tpu.vector_store %arg7[%c0_240, %c0_241], %170 {strides = array<i32>} : memref<256x4xf32, #tpu.memory_space<vmem>>, vector<256x4xf32>,
    %c2_242 = arith.constant 2 : index
    %c2_243 = arith.constant 2 : index
    %c0_244 = arith.constant 0 : index
    %172 = vector.load %arg6[%c2_242, %c2_243, %c0_244] : memref<18x18x4xf32, #tpu.memory_space<vmem>>, vector<16x16x4xf32>
    %173 = vector.shape_cast %172 : vector<16x16x4xf32> to vector<256x4xf32>
    %c2_245 = arith.constant 2 : index
    %c2_246 = arith.constant 2 : index
    %c0_247 = arith.constant 0 : index
    %c0_248 = arith.constant 0 : index
    %174 = vector.load %arg3[%c2_245, %c2_246, %c0_247, %c0_248] : memref<3x3x4x4xf32, #tpu.memory_space<vmem>>, vector<1x1x4x4xf32>
    %175 = vector.shape_cast %174 : vector<1x1x4x4xf32> to vector<4x4xf32>
    %cst_249 = arith.constant dense<0.000000e+00> : vector<256x4xf32>
    %176 = tpu.matmul %173, %175, %cst_249 {dimension_numbers = #tpu.dot_dimension_numbers<[1], [0], [0], [1], [0, 0, 1, 1], [], []>} : vector<256x4xf32>, vector<4x4xf32>, vector<256x4xf32> -> vector<256x4xf32>
    %c0_250 = arith.constant 0 : index
    %c0_251 = arith.constant 0 : index
    %177 = vector.load %arg7[%c0_250, %c0_251] : memref<256x4xf32, #tpu.memory_space<vmem>>, vector<256x4xf32>
    %178 = arith.addf %177, %176 : vector<256x4xf32>
    %c0_252 = arith.constant 0 : index
    %c0_253 = arith.constant 0 : index
    %179 = vector.load %arg7[%c0_252, %c0_253] : memref<256x4xf32, #tpu.memory_space<vmem>>, vector<256x4xf32>
    tpu.vector_store %arg7[%c0_252, %c0_253], %178 {strides = array<i32>} : memref<256x4xf32, #tpu.memory_space<vmem>>, vector<256x4xf32>,
    %c0_254 = arith.constant 0 : index
    %c0_255 = arith.constant 0 : index
    %180 = vector.load %arg7[%c0_254, %c0_255] : memref<256x4xf32, #tpu.memory_space<vmem>>, vector<256x4xf32>
    %cst_256 = arith.constant dense<0.000000e+00> : vector<4xf32>
    %181 = vector.multi_reduction <add>, %180, %cst_256 [0] : vector<256x4xf32> to vector<4xf32>
    %182 = vector.shape_cast %181 : vector<4xf32> to vector<1x4xf32>
    %183 = arith.mulf %180, %180 : vector<256x4xf32>
    %cst_257 = arith.constant dense<0.000000e+00> : vector<4xf32>
    %184 = vector.multi_reduction <add>, %183, %cst_257 [0] : vector<256x4xf32> to vector<4xf32>
    %185 = vector.shape_cast %184 : vector<4xf32> to vector<1x4xf32>
    %cst_258 = arith.constant 3.906250e-03 : f32
    %186 = vector.broadcast %cst_258 : f32 to vector<1x4xf32>
    %187 = arith.mulf %182, %186 : vector<1x4xf32>
    %cst_259 = arith.constant 3.906250e-03 : f32
    %188 = vector.broadcast %cst_259 : f32 to vector<1x4xf32>
    %189 = arith.mulf %185, %188 : vector<1x4xf32>
    %190 = arith.mulf %187, %187 : vector<1x4xf32>
    %191 = arith.subf %189, %190 : vector<1x4xf32>
    %cst_260 = arith.constant 0.000000e+00 : f32
    %192 = vector.broadcast %cst_260 : f32 to vector<1x4xf32>
    %193 = arith.maximumf %191, %192 : vector<1x4xf32>
    %194 = vector.broadcast %187 : vector<1x4xf32> to vector<256x4xf32>
    %195 = arith.subf %180, %194 : vector<256x4xf32>
    %cst_261 = arith.constant 9.99999974E-6 : f32
    %196 = vector.broadcast %cst_261 : f32 to vector<1x4xf32>
    %197 = arith.addf %193, %196 : vector<1x4xf32>
    %198 = math.rsqrt %197 : vector<1x4xf32>
    %199 = vector.broadcast %198 : vector<1x4xf32> to vector<256x4xf32>
    %200 = arith.mulf %195, %199 : vector<256x4xf32>
    %201 = vector.shape_cast %200 : vector<256x4xf32> to vector<16x16x4xf32>
    %c1_262 = arith.constant 1 : index
    %c1_263 = arith.constant 1 : index
    %c0_264 = arith.constant 0 : index
    %202 = vector.load %arg5[%c1_262, %c1_263, %c0_264] : memref<18x18x4xf32, #tpu.memory_space<vmem>>, vector<16x16x4xf32>
    %203 = arith.addf %201, %202 : vector<16x16x4xf32>
    %204 = vector.shape_cast %203 : vector<16x16x4xf32> to vector<1x16x16x4xf32>
    %c0_265 = arith.constant 0 : index
    %c0_266 = arith.constant 0 : index
    %c0_267 = arith.constant 0 : index
    %c0_268 = arith.constant 0 : index
    %205 = vector.load %arg4[%c0_265, %c0_266, %c0_267, %c0_268] : memref<1x16x16x4xf32, #tpu.memory_space<vmem>>, vector<1x16x16x4xf32>
    tpu.vector_store %arg4[%c0_265, %c0_266, %c0_267, %c0_268], %204 {strides = array<i32>} : memref<1x16x16x4xf32, #tpu.memory_space<vmem>>, vector<1x16x16x4xf32>,
    return
  }
  func.func @transform_0(%arg0: i32) -> (i32, i32, i32, i32) {
    %c0_i32 = arith.constant 0 : i32
    %c0_i32_0 = arith.constant 0 : i32
    %c0_i32_1 = arith.constant 0 : i32
    %c0_i32_2 = arith.constant 0 : i32
    return %arg0, %c0_i32, %c0_i32_0, %c0_i32_1 : i32, i32, i32, i32
  }
  func.func @transform_1(%arg0: i32) -> (i32, i32, i32, i32) {
    %c0_i32 = arith.constant 0 : i32
    %c0_i32_0 = arith.constant 0 : i32
    %c0_i32_1 = arith.constant 0 : i32
    %c0_i32_2 = arith.constant 0 : i32
    %c0_i32_3 = arith.constant 0 : i32
    return %c0_i32, %c0_i32_0, %c0_i32_1, %c0_i32_2 : i32, i32, i32, i32
  }
  func.func @transform_2(%arg0: i32) -> (i32, i32, i32, i32) {
    %c0_i32 = arith.constant 0 : i32
    %c0_i32_0 = arith.constant 0 : i32
    %c0_i32_1 = arith.constant 0 : i32
    %c0_i32_2 = arith.constant 0 : i32
    %c0_i32_3 = arith.constant 0 : i32
    return %c0_i32, %c0_i32_0, %c0_i32_1, %c0_i32_2 : i32, i32, i32, i32
  }
  func.func @transform_3(%arg0: i32) -> (i32, i32, i32, i32) {
    %c0_i32 = arith.constant 0 : i32
    %c0_i32_0 = arith.constant 0 : i32
    %c0_i32_1 = arith.constant 0 : i32
    %c0_i32_2 = arith.constant 0 : i32
    return %arg0, %c0_i32, %c0_i32_0, %c0_i32_1 : i32, i32, i32, i32
  }
}

</mosaic_0001>

<bundles_post_ra>
// kernel: tpu_custom_call.1
= control target key start
LH: loop header
LB: loop body
LE: loop exit
PB: predicated region body
PF: predicated region fallthrough
CT: control target
= control target key end

     0   :  { %s11314_s12 = smov 0   ;;  %s14440_s0 = inlined_call_operand.vmem [shape: f32[2,16,16,4], index: 0, kind: input, shape index: {}]   ;;  %s14441_s1 = inlined_call_operand.vmem [shape: f32[3,3,4,4], index: 1, kind: input, shape index: {}]   ;;  %s14442_s2 = inlined_call_operand.vmem [shape: f32[3,3,4,4], index: 2, kind: input, shape index: {}]   ;;  %s14443_s3 = inlined_call_operand.vmem [shape: f32[2,16,16,4], index: 3, kind: output, shape index: {}]  }
   0x1 LB: > { %s9124_s13 = sadd.s32 4294967295, %s11291_s12   ;;  %p9128_p0 = scmp.ge.s32.totalorder %s11291_s12, 1  ;;  %s11291_s12 = sphi %s11314_s12, %s13_s12  }
   0x2   : > { %p137_p1 = scmp.lt.s32.totalorder %s11291_s12, 3 }
   0x4   : > { %p138_p2 = pnand %p9128_p0, %p137_p1 }
   0x6   : > { %141 = sbr.rel (%p138_p2) target bundleno = 1216 (0x4c0), region = 32 }
   0xb   : > { %v350_v0 = vld [vmem:[%s14441_s1] sm:$0xf]  ;;  %vm447_vm0 = vcmask 1043456   ;;  %vm171_vm1 = vcmask 31744   ;;  %p11325_p3 = scmp.lt.s32.totalorder %s9124_s13, 1  ;;  %v11293_v1 = vmov 0.0  }
   0xc   : > { %10341 = vmatprep.subr.msk.mxu0 %vm447_vm0, %v350_v0  ;;  %172 = vst.msk [vmem:[#allocation2] sm:$0xff] %vm171_vm1, %v11293_v1  ;;  %173 = vst.msk [vmem:[#allocation2 + $0x8] sm:$0xff] %vm171_vm1, %v11293_v1  ;;  %v11349_v2 = vld [vmem:[%s14441_s1 + $0x8] sm:$0xf]  ;;  %vm181_vm2 = vcmask 24576   ;;  %vm174_vm3 = vcmask 25600  }
   0xd   : > { %177 = vst.msk [vmem:[#allocation2 + $0x198] sm:$0xff] %vm171_vm1, %v11293_v1  ;;  %178 = vst.msk [vmem:[#allocation2 + $0x1a0] sm:$0xff] %vm171_vm1, %v11293_v1  ;;  %v11354_v3 = vld [vmem:[%s14441_s1 + $0x4] sm:$0xf]  ;;  %10342 = vmatpush3.msk.msra.mxu0 %vm447_vm0, %v350_v0  ;;  %s14551_s13 = smov (!%p11325_p3, %s9124_s13), 1 }
   0xe   : > { %214 = vst.msk [vmem:[#allocation3] sm:$0xff] %vm171_vm1, %v11293_v1  ;;  %215 = vst.msk [vmem:[#allocation3 + $0x8] sm:$0xff] %vm171_vm1, %v11293_v1  ;;  %10391 = vmatprep.subr.msk.mxu1 %vm447_vm0, %v11354_v3  ;;  %v9234_v4 = vld [vmem:[%s14441_s1 + $0xc] sm:$0xf]  ;;  %10441 = vmatprep.subr.msk.mxu0 %vm447_vm0, %v11349_v2  ;;  %s9745_s23 = sshll.u32 %s14551_s13, 8 }
   0xf   : > { %218 = vst.msk [vmem:[#allocation3 + $0x198] sm:$0xff] %vm171_vm1, %v11293_v1  ;;  %219 = vst.msk [vmem:[#allocation3 + $0x1a0] sm:$0xff] %vm171_vm1, %v11293_v1  ;;  %10392 = vmatpush3.msk.msra.mxu1 %vm447_vm0, %v11354_v3  ;;  %s11513_s26 = scalar_lea.vmem %s14440_s0, %s9745_s23  ;;  %v11527_v11 = vld [vmem:[%s14441_s1 + $0x10] sm:$0xf]  ;;  %v11532_v12 = vld [vmem:[%s14441_s1 + $0x14] sm:$0xf]  ;;  %s14351_s6 = scalar_lea.vmem %s14443_s3, %s9745_s23 }
  0x10   : > { %182 = vst.msk [vmem:[#allocation2 + $0x18] sm:$0x1] %vm181_vm2, %v11293_v1  ;;  %183 = vst.msk [vmem:[#allocation2 + $0x30] sm:$0x1] %vm181_vm2, %v11293_v1  ;;  %10491 = vmatprep.subr.msk.mxu1 %vm447_vm0, %v9234_v4  ;;  %v254_v5 = vld [vmem:[%s11513_s26] sm:$0xff]  ;;  %v255_v6 = vld [vmem:[%s11513_s26 + $0x8] sm:$0xff] }
  0x11   : > { %184 = vst.msk [vmem:[#allocation2 + $0x48] sm:$0x1] %vm181_vm2, %v11293_v1  ;;  %185 = vst.msk [vmem:[#allocation2 + $0x60] sm:$0x1] %vm181_vm2, %v11293_v1  ;;  %v256_v7 = vld [vmem:[%s11513_s26 + $0x10] sm:$0xff]  ;;  %v257_v8 = vld [vmem:[%s11513_s26 + $0x18] sm:$0xff] }
  0x12   : > { %186 = vst.msk [vmem:[#allocation2 + $0x78] sm:$0x1] %vm181_vm2, %v11293_v1  ;;  %187 = vst.msk [vmem:[#allocation2 + $0x90] sm:$0x1] %vm181_vm2, %v11293_v1  ;;  %v258_v9 = vld [vmem:[%s11513_s26 + $0x20] sm:$0xff]  ;;  %v259_v10 = vld [vmem:[%s11513_s26 + $0x28] sm:$0xff] }
  0x13   : > { %188 = vst.msk [vmem:[#allocation2 + $0xa8] sm:$0x1] %vm181_vm2, %v11293_v1  ;;  %189 = vst.msk [vmem:[#allocation2 + $0xc0] sm:$0x1] %vm181_vm2, %v11293_v1  ;;  %v318_v13 = vld [vmem:[#allocation2] sm:$0xff]  ;;  %v319_v14 = vld [vmem:[#allocation2 + $0x8] sm:$0xff] }
  0x14   : > { %190 = vst.msk [vmem:[#allocation2 + $0xd8] sm:$0x1] %vm181_vm2, %v11293_v1  ;;  %191 = vst.msk [vmem:[#allocation2 + $0xf0] sm:$0x1] %vm181_vm2, %v11293_v1  ;;  %v708_v15 = vld [vmem:[#allocation2 + $0x1] sm:$0xff]  ;;  %10343 = vmatprep.mubr.msk.f32.mxu0 %vm171_vm1, %v318_v13  ;;  %v260_v17 = vld [vmem:[%s11513_s26 + $0x30] sm:$0xff] }
  0x15   : > { %192 = vst.msk [vmem:[#allocation2 + $0x108] sm:$0x1] %vm181_vm2, %v11293_v1  ;;  %193 = vst.msk [vmem:[#allocation2 + $0x120] sm:$0x1] %vm181_vm2, %v11293_v1  ;;  %10393 = vmatprep.mubr.msk.f32.mxu1 %vm171_vm1, %v708_v15  ;;  %v261_v18 = vld [vmem:[%s11513_s26 + $0x38] sm:$0xff]  ;;  %10344 = vmatmul.mubr.msk.f32.vlgmr.msra.gmra.mxu0 %vm171_vm1, %v319_v14  ;;  %v262_v19 = vld [vmem:[%s11513_s26 + $0x40] sm:$0xff] }
  0x16   : > { %194 = vst.msk [vmem:[#allocation2 + $0x138] sm:$0x1] %vm181_vm2, %v11293_v1  ;;  %195 = vst.msk [vmem:[#allocation2 + $0x150] sm:$0x1] %vm181_vm2, %v11293_v1  ;;  %v263_v20 = vld [vmem:[%s11513_s26 + $0x48] sm:$0xff]  ;;  %v264_v21 = vld [vmem:[%s11513_s26 + $0x50] sm:$0xff]  ;;  %10442 = vmatpush3.msk.msra.mxu0 %vm447_vm0, %v11349_v2 }
  0x17   : > { %196 = vst.msk [vmem:[#allocation2 + $0x168] sm:$0x1] %vm181_vm2, %v11293_v1  ;;  %197 = vst.msk [vmem:[#allocation2 + $0x180] sm:$0x1] %vm181_vm2, %v11293_v1  ;;  %v265_v22 = vld [vmem:[%s11513_s26 + $0x58] sm:$0xff]  ;;  %v266_v23 = vld [vmem:[%s11513_s26 + $0x60] sm:$0xff]  ;;  %10541 = vmatprep.subr.msk.mxu0 %vm447_vm0, %v11527_v11 }
  0x18   : > { %198 = vst.msk [vmem:[#allocation2 + $0x29] sm:$0x1] %vm181_vm2, %v11293_v1  ;;  %199 = vst.msk [vmem:[#allocation2 + $0x41] sm:$0x1] %vm181_vm2, %v11293_v1  ;;  %v267_v24 = vld [vmem:[%s11513_s26 + $0x68] sm:$0xff]  ;;  %v268_v25 = vld [vmem:[%s11513_s26 + $0x70] sm:$0xff] }
  0x19   : > { %200 = vst.msk [vmem:[#allocation2 + $0x59] sm:$0x1] %vm181_vm2, %v11293_v1  ;;  %201 = vst.msk [vmem:[#allocation2 + $0x71] sm:$0x1] %vm181_vm2, %v11293_v1  ;;  %v269_v26 = vld [vmem:[%s11513_s26 + $0x78] sm:$0xff]  ;;  %v270_v27 = vld [vmem:[%s11513_s26 + $0x80] sm:$0xff] }
  0x1a   : > { %202 = vst.msk [vmem:[#allocation2 + $0x89] sm:$0x1] %vm181_vm2, %v11293_v1  ;;  %203 = vst.msk [vmem:[#allocation2 + $0xa1] sm:$0x1] %vm181_vm2, %v11293_v1  ;;  %v271_v28 = vld [vmem:[%s11513_s26 + $0x88] sm:$0xff]  ;;  %v272_v29 = vld [vmem:[%s11513_s26 + $0x90] sm:$0xff] }
  0x1b   : > { %204 = vst.msk [vmem:[#allocation2 + $0xb9] sm:$0x1] %vm181_vm2, %v11293_v1  ;;  %205 = vst.msk [vmem:[#allocation2 + $0xd1] sm:$0x1] %vm181_vm2, %v11293_v1  ;;  %v273_v30 = vld [vmem:[%s11513_s26 + $0x98] sm:$0xff]  ;;  %v274_v51 = vld [vmem:[%s11513_s26 + $0xa0] sm:$0xff] }
  0x1c   : > { %206 = vst.msk [vmem:[#allocation2 + $0xe9] sm:$0x1] %vm181_vm2, %v11293_v1  ;;  %207 = vst.msk [vmem:[#allocation2 + $0x101] sm:$0x1] %vm181_vm2, %v11293_v1  ;;  %v275_v52 = vld [vmem:[%s11513_s26 + $0xa8] sm:$0xff]  ;;  %v276_v54 = vld [vmem:[%s11513_s26 + $0xb0] sm:$0xff] }
  0x1d   : > { %208 = vst.msk [vmem:[#allocation2 + $0x119] sm:$0x1] %vm181_vm2, %v11293_v1  ;;  %209 = vst.msk [vmem:[#allocation2 + $0x131] sm:$0x1] %vm181_vm2, %v11293_v1  ;;  %v277_v55 = vld [vmem:[%s11513_s26 + $0xb8] sm:$0xff]  ;;  %v278_v56 = vld [vmem:[%s11513_s26 + $0xc0] sm:$0xff] }
  0x1e   : > { %210 = vst.msk [vmem:[#allocation2 + $0x149] sm:$0x1] %vm181_vm2, %v11293_v1  ;;  %211 = vst.msk [vmem:[#allocation2 + $0x161] sm:$0x1] %vm181_vm2, %v11293_v1  ;;  %v279_v57 = vld [vmem:[%s11513_s26 + $0xc8] sm:$0xff]  ;;  %v280_v58 = vld [vmem:[%s11513_s26 + $0xd0] sm:$0xff] }
  0x1f   : > { %212 = vst.msk [vmem:[#allocation2 + $0x179] sm:$0x1] %vm181_vm2, %v11293_v1  ;;  %213 = vst.msk [vmem:[#allocation2 + $0x191] sm:$0x1] %vm181_vm2, %v11293_v1  ;;  %v281_v59 = vld [vmem:[%s11513_s26 + $0xd8] sm:$0xff]  ;;  %v282_v61 = vld [vmem:[%s11513_s26 + $0xe0] sm:$0xff] }
  0x20   : > { %222 = vst.msk [vmem:[#allocation3 + $0x18] sm:$0x1] %vm181_vm2, %v11293_v1  ;;  %223 = vst.msk [vmem:[#allocation3 + $0x30] sm:$0x1] %vm181_vm2, %v11293_v1  ;;  %v283_v62 = vld [vmem:[%s11513_s26 + $0xe8] sm:$0xff] }
  0x21   : > { %224 = vst.msk [vmem:[#allocation3 + $0x48] sm:$0x1] %vm181_vm2, %v11293_v1  ;;  %225 = vst.msk [vmem:[#allocation3 + $0x60] sm:$0x1] %vm181_vm2, %v11293_v1 }
  0x22   : > { %226 = vst.msk [vmem:[#allocation3 + $0x78] sm:$0x1] %vm181_vm2, %v11293_v1  ;;  %227 = vst.msk [vmem:[#allocation3 + $0x90] sm:$0x1] %vm181_vm2, %v11293_v1 }
  0x23   : > { %228 = vst.msk [vmem:[#allocation3 + $0xa8] sm:$0x1] %vm181_vm2, %v11293_v1  ;;  %229 = vst.msk [vmem:[#allocation3 + $0xc0] sm:$0x1] %vm181_vm2, %v11293_v1 }
  0x24   : > { %230 = vst.msk [vmem:[#allocation3 + $0xd8] sm:$0x1] %vm181_vm2, %v11293_v1  ;;  %231 = vst.msk [vmem:[#allocation3 + $0xf0] sm:$0x1] %vm181_vm2, %v11293_v1 }
  0x25   : > { %232 = vst.msk [vmem:[#allocation3 + $0x108] sm:$0x1] %vm181_vm2, %v11293_v1  ;;  %233 = vst.msk [vmem:[#allocation3 + $0x120] sm:$0x1] %vm181_vm2, %v11293_v1 }
  0x26   : > { %234 = vst.msk [vmem:[#allocation3 + $0x138] sm:$0x1] %vm181_vm2, %v11293_v1  ;;  %235 = vst.msk [vmem:[#allocation3 + $0x150] sm:$0x1] %vm181_vm2, %v11293_v1 }
  0x27   : > { %236 = vst.msk [vmem:[#allocation3 + $0x168] sm:$0x1] %vm181_vm2, %v11293_v1  ;;  %237 = vst.msk [vmem:[#allocation3 + $0x180] sm:$0x1] %vm181_vm2, %v11293_v1 }
  0x28   : > { %238 = vst.msk [vmem:[#allocation3 + $0x29] sm:$0x1] %vm181_vm2, %v11293_v1  ;;  %239 = vst.msk [vmem:[#allocation3 + $0x41] sm:$0x1] %vm181_vm2, %v11293_v1 }
  0x29   : > { %240 = vst.msk [vmem:[#allocation3 + $0x59] sm:$0x1] %vm181_vm2, %v11293_v1  ;;  %241 = vst.msk [vmem:[#allocation3 + $0x71] sm:$0x1] %vm181_vm2, %v11293_v1 }
  0x2a   : > { %242 = vst.msk [vmem:[#allocation3 + $0x89] sm:$0x1] %vm181_vm2, %v11293_v1  ;;  %243 = vst.msk [vmem:[#allocation3 + $0xa1] sm:$0x1] %vm181_vm2, %v11293_v1 }
  0x2b   : > { %244 = vst.msk [vmem:[#allocation3 + $0xb9] sm:$0x1] %vm181_vm2, %v11293_v1  ;;  %245 = vst.msk [vmem:[#allocation3 + $0xd1] sm:$0x1] %vm181_vm2, %v11293_v1 }
  0x2c   : > { %246 = vst.msk [vmem:[#allocation3 + $0xe9] sm:$0x1] %vm181_vm2, %v11293_v1  ;;  %247 = vst.msk [vmem:[#allocation3 + $0x101] sm:$0x1] %vm181_vm2, %v11293_v1 }
  0x2d   : > { %248 = vst.msk [vmem:[#allocation3 + $0x119] sm:$0x1] %vm181_vm2, %v11293_v1  ;;  %249 = vst.msk [vmem:[#allocation3 + $0x131] sm:$0x1] %vm181_vm2, %v11293_v1 }
  0x2e   : > { %250 = vst.msk [vmem:[#allocation3 + $0x149] sm:$0x1] %vm181_vm2, %v11293_v1  ;;  %251 = vst.msk [vmem:[#allocation3 + $0x161] sm:$0x1] %vm181_vm2, %v11293_v1 }
  0x2f   : > { %252 = vst.msk [vmem:[#allocation3 + $0x179] sm:$0x1] %vm181_vm2, %v11293_v1  ;;  %253 = vst.msk [vmem:[#allocation3 + $0x191] sm:$0x1] %vm181_vm2, %v11293_v1 }
  0x30   : > { %175 = vst.msk [vmem:[#allocation2 + $0x10] sm:$0x3] %vm174_vm3, %v11293_v1  ;;  %216 = vst.msk [vmem:[#allocation3 + $0x10] sm:$0x3] %vm174_vm3, %v11293_v1 }
  0x31   : > { %179 = vst.msk [vmem:[#allocation2 + $0x1a8] sm:$0x3] %vm174_vm3, %v11293_v1  ;;  %220 = vst.msk [vmem:[#allocation3 + $0x1a8] sm:$0x3] %vm174_vm3, %v11293_v1 }
  0x32   : > { %286 = vst.msk [vmem:[#allocation2 + $0x19] sm:$0xff] %vm171_vm1, %v254_v5  ;;  %287 = vst.msk [vmem:[#allocation2 + $0x21] sm:$0xff] %vm171_vm1, %v255_v6 }
  0x33   : > { %288 = vst.msk [vmem:[#allocation2 + $0x31] sm:$0xff] %vm171_vm1, %v256_v7  ;;  %289 = vst.msk [vmem:[#allocation2 + $0x39] sm:$0xff] %vm171_vm1, %v257_v8 }
  0x34   : > { %290 = vst.msk [vmem:[#allocation2 + $0x49] sm:$0xff] %vm171_vm1, %v258_v9  ;;  %291 = vst.msk [vmem:[#allocation2 + $0x51] sm:$0xff] %vm171_vm1, %v259_v10 }
  0x35   : > { %292 = vst.msk [vmem:[#allocation2 + $0x61] sm:$0xff] %vm171_vm1, %v260_v17  ;;  %293 = vst.msk [vmem:[#allocation2 + $0x69] sm:$0xff] %vm171_vm1, %v261_v18  ;;  %v284_v17 = vld [vmem:[%s11513_s26 + $0xf0] sm:$0xff]  ;;  %v285_v18 = vld [vmem:[%s11513_s26 + $0xf8] sm:$0xff] }
  0x36   : > { %294 = vst.msk [vmem:[#allocation2 + $0x79] sm:$0xff] %vm171_vm1, %v262_v19  ;;  %295 = vst.msk [vmem:[#allocation2 + $0x81] sm:$0xff] %vm171_vm1, %v263_v20 }
  0x37   : > { %v709_v16 = vld [vmem:[#allocation2 + $0x9] sm:$0xff]  ;;  %296 = vst.msk [vmem:[#allocation2 + $0x91] sm:$0xff] %vm171_vm1, %v264_v21  ;;  %297 = vst.msk [vmem:[#allocation2 + $0x99] sm:$0xff] %vm171_vm1, %v265_v22 }
  0x38   : > { %10394 = vmatmul.mubr.msk.f32.vlgmr.msra.gmra.mxu1 %vm171_vm1, %v709_v16  ;;  %298 = vst.msk [vmem:[#allocation2 + $0xa9] sm:$0xff] %vm171_vm1, %v266_v23  ;;  %299 = vst.msk [vmem:[#allocation2 + $0xb1] sm:$0xff] %vm171_vm1, %v267_v24 }
  0x39   : > { %10492 = vmatpush3.msk.msra.mxu1 %vm447_vm0, %v9234_v4  ;;  %300 = vst.msk [vmem:[#allocation2 + $0xc1] sm:$0xff] %vm171_vm1, %v268_v25  ;;  %301 = vst.msk [vmem:[#allocation2 + $0xc9] sm:$0xff] %vm171_vm1, %v269_v26  ;;  %v11573_v31 = vld [vmem:[#allocation2 + $0x18] sm:$0xff]  ;;  %v11577_v33 = vld [vmem:[#allocation2 + $0x20] sm:$0xff] }
  0x3a   : > { %10591 = vmatprep.subr.msk.mxu1 %vm447_vm0, %v11532_v12  ;;  %302 = vst.msk [vmem:[#allocation2 + $0xd9] sm:$0xff] %vm171_vm1, %v270_v27  ;;  %v11575_v32 = vld [vmem:[#allocation2 + $0x19] sm:$0xff]  ;;  %303 = vst.msk [vmem:[#allocation2 + $0xe1] sm:$0xff] %vm171_vm1, %v271_v28  ;;  %10346 = vmatprep.mubr.msk.f32.mxu0 %vm171_vm1, %v11573_v31  ;;  %v11584_v34 = vld [vmem:[#allocation2 + $0x21] sm:$0xff] }
  0x3b   : > { %304 = vst.msk [vmem:[#allocation2 + $0xf1] sm:$0xff] %vm171_vm1, %v272_v29  ;;  %305 = vst.msk [vmem:[#allocation2 + $0xf9] sm:$0xff] %vm171_vm1, %v273_v30  ;;  %v11586_v35 = vld [vmem:[#allocation2 + $0x30] sm:$0xff]  ;;  %10396 = vmatprep.mubr.msk.f32.mxu1 %vm171_vm1, %v11575_v32  ;;  %10347 = vmatmul.mubr.msk.f32.gmra.mxu0 %vm171_vm1, %v11577_v33  ;;  %v11598_v37 = vld [vmem:[#allocation2 + $0x38] sm:$0xff] }
  0x3c   : > { %14480 = vst [vmem:[#allocation5_spill] sm:$0xff] %v11586_v35  ;;  %v11588_v36 = vld [vmem:[#allocation2 + $0x31] sm:$0xff]  ;;  %10397 = vmatmul.mubr.msk.f32.gmra.mxu1 %vm171_vm1, %v11584_v34  ;;  %10349 = vmatprep.mubr.msk.f32.mxu0 %vm171_vm1, %v11586_v35  ;;  %14481 = vst [vmem:[#allocation6_spill] sm:$0xff] %v11598_v37  ;;  %v11600_v38 = vld [vmem:[#allocation2 + $0x39] sm:$0xff] }
  0x3d   : > { %10399 = vmatprep.mubr.msk.f32.mxu1 %vm171_vm1, %v11588_v36  ;;  %v11604_v39 = vld [vmem:[#allocation2 + $0x48] sm:$0xff]  ;;  %v11614_v41 = vld [vmem:[#allocation2 + $0x50] sm:$0xff]  ;;  %v11620_v43 = vld [vmem:[#allocation2 + $0x60] sm:$0xff]  ;;  %306 = vst.msk [vmem:[#allocation2 + $0x109] sm:$0xff] %vm171_vm1, %v274_v51 }
  0x3e   : > { %14482 = vst [vmem:[#allocation7_spill] sm:$0xff] %v11604_v39  ;;  %v11606_v40 = vld [vmem:[#allocation2 + $0x49] sm:$0xff]  ;;  %14483 = vst [vmem:[#allocation8_spill] sm:$0xff] %v11614_v41  ;;  %v11616_v42 = vld [vmem:[#allocation2 + $0x51] sm:$0xff] }
  0x3f   : > { %10350 = vmatmul.mubr.msk.f32.gmra.mxu0 %vm171_vm1, %v11598_v37  ;;  %14484 = vst [vmem:[#allocation9_spill] sm:$0xff] %v11620_v43  ;;  %v11622_v44 = vld [vmem:[#allocation2 + $0x61] sm:$0xff]  ;;  %v11632_v46 = vld [vmem:[#allocation2 + $0x69] sm:$0xff]  ;;  %v11636_v47 = vld [vmem:[#allocation2 + $0x78] sm:$0xff] }
  0x40   : > { %10400 = vmatmul.mubr.msk.f32.gmra.mxu1 %vm171_vm1, %v11600_v38  ;;  %10352 = vmatprep.mubr.msk.f32.mxu0 %vm171_vm1, %v11604_v39  ;;  %v11630_v45 = vld [vmem:[#allocation2 + $0x68] sm:$0xff]  ;;  %14486 = vst [vmem:[#allocation11_spill] sm:$0xff] %v11636_v47  ;;  %v11638_v48 = vld [vmem:[#allocation2 + $0x79] sm:$0xff]  ;;  %v11648_v53 = vld [vmem:[#allocation2 + $0x90] sm:$0xff] }
  0x41   : > { %10402 = vmatprep.mubr.msk.f32.mxu1 %vm171_vm1, %v11606_v40  ;;  %14485 = vst [vmem:[#allocation10_spill] sm:$0xff] %v11630_v45  ;;  %v11640_v49 = vld [vmem:[#allocation2 + $0x80] sm:$0xff]  ;;  %14488 = vst [vmem:[#allocation13_spill] sm:$0xff] %v11648_v53  ;;  %v11667_v60 = vld [vmem:[#allocation2 + $0x91] sm:$0xff] }
  0x42   : > { %14487 = vst [vmem:[#allocation12_spill] sm:$0xff] %v11640_v49  ;;  %v11642_v50 = vld [vmem:[#allocation2 + $0x81] sm:$0xff]  ;;  %307 = vst.msk [vmem:[#allocation2 + $0x111] sm:$0xff] %vm171_vm1, %v275_v52  ;;  %v11682_v63 = vld [vmem:[#allocation2 + $0x98] sm:$0xff] }
  0x43   : > { %10353 = vmatmul.mubr.msk.f32.gmra.mxu0 %vm171_vm1, %v11614_v41  ;;  %308 = vst.msk [vmem:[#allocation2 + $0x121] sm:$0xff] %vm171_vm1, %v276_v54  ;;  %309 = vst.msk [vmem:[#allocation2 + $0x129] sm:$0xff] %vm171_vm1, %v277_v55  ;;  %v11684_v0 = vld [vmem:[#allocation2 + $0x99] sm:$0xff]  ;;  %v11688_v1 = vld [vmem:[#allocation2 + $0xa8] sm:$0xff] }
  0x44   : > { %10403 = vmatmul.mubr.msk.f32.gmra.mxu1 %vm171_vm1, %v11616_v42  ;;  %10355 = vmatprep.mubr.msk.f32.mxu0 %vm171_vm1, %v11620_v43  ;;  %310 = vst.msk [vmem:[#allocation2 + $0x139] sm:$0xff] %vm171_vm1, %v278_v56  ;;  %311 = vst.msk [vmem:[#allocation2 + $0x141] sm:$0xff] %vm171_vm1, %v279_v57  ;;  %v11690_v2 = vld [vmem:[#allocation2 + $0xa9] sm:$0xff]  ;;  %v11700_v4 = vld [vmem:[#allocation2 + $0xb1] sm:$0xff] }
  0x45   : > { %10405 = vmatprep.mubr.msk.f32.mxu1 %vm171_vm1, %v11622_v44  ;;  %312 = vst.msk [vmem:[#allocation2 + $0x151] sm:$0xff] %vm171_vm1, %v280_v58  ;;  %313 = vst.msk [vmem:[#allocation2 + $0x159] sm:$0xff] %vm171_vm1, %v281_v59  ;;  %v11698_v3 = vld [vmem:[#allocation2 + $0xb0] sm:$0xff]  ;;  %v11704_v5 = vld [vmem:[#allocation2 + $0xc0] sm:$0xff] }
  0x46   : > { %314 = vst.msk [vmem:[#allocation2 + $0x169] sm:$0xff] %vm171_vm1, %v282_v61  ;;  %315 = vst.msk [vmem:[#allocation2 + $0x171] sm:$0xff] %vm171_vm1, %v283_v62  ;;  %v11706_v6 = vld [vmem:[#allocation2 + $0xc1] sm:$0xff]  ;;  %v11716_v8 = vld [vmem:[#allocation2 + $0xc9] sm:$0xff] }
  0x47   : > { %10356 = vmatmul.mubr.msk.f32.gmra.mxu0 %vm171_vm1, %v11630_v45  ;;  %14489 = vst [vmem:[#allocation14_spill] sm:$0xff] %v11682_v63  ;;  %14490 = vst [vmem:[#allocation15_spill] sm:$0xff] %v11688_v1  ;;  %v11714_v7 = vld [vmem:[#allocation2 + $0xc8] sm:$0xff]  ;;  %v11720_v9 = vld [vmem:[#allocation2 + $0xd8] sm:$0xff] }
  0x48   : > { %10406 = vmatmul.mubr.msk.f32.gmra.mxu1 %vm171_vm1, %v11632_v46  ;;  %10358 = vmatprep.mubr.msk.f32.mxu0 %vm171_vm1, %v11636_v47  ;;  %14491 = vst [vmem:[#allocation16_spill] sm:$0xff] %v11698_v3  ;;  %14492 = vst [vmem:[#allocation17_spill] sm:$0xff] %v11704_v5  ;;  %v11722_v10 = vld [vmem:[#allocation2 + $0xd9] sm:$0xff]  ;;  %v11732_v14 = vld [vmem:[#allocation2 + $0xe1] sm:$0xff] }
  0x49   : > { %10408 = vmatprep.mubr.msk.f32.mxu1 %vm171_vm1, %v11638_v48  ;;  %14493 = vst [vmem:[#allocation18_spill] sm:$0xff] %v11714_v7  ;;  %14494 = vst [vmem:[#allocation19_spill] sm:$0xff] %v11720_v9  ;;  %v11730_v13 = vld [vmem:[#allocation2 + $0xe0] sm:$0xff]  ;;  %v11736_v15 = vld [vmem:[#allocation2 + $0xf0] sm:$0xff] }
  0x4a   : > { %14495 = vst [vmem:[#allocation20_spill] sm:$0xff] %v11730_v13  ;;  %14496 = vst [vmem:[#allocation21_spill] sm:$0xff] %v11736_v15  ;;  %v11738_v16 = vld [vmem:[#allocation2 + $0xf1] sm:$0xff]  ;;  %v11750_v20 = vld [vmem:[#allocation2 + $0xf9] sm:$0xff] }
  0x4b   : > { %10359 = vmatmul.mubr.msk.f32.gmra.mxu0 %vm171_vm1, %v11640_v49  ;;  %v11748_v19 = vld [vmem:[#allocation2 + $0xf8] sm:$0xff]  ;;  %316 = vst.msk [vmem:[#allocation2 + $0x181] sm:$0xff] %vm171_vm1, %v284_v17  ;;  %317 = vst.msk [vmem:[#allocation2 + $0x189] sm:$0xff] %vm171_vm1, %v285_v18  ;;  %v11756_v21 = vld [vmem:[#allocation2 + $0x108] sm:$0xff] }
  0x4c   : > { %10409 = vmatmul.mubr.msk.f32.gmra.mxu1 %vm171_vm1, %v11642_v50  ;;  %10361 = vmatprep.mubr.msk.f32.mxu0 %vm171_vm1, %v11648_v53  ;;  %14497 = vst [vmem:[#allocation22_spill] sm:$0xff] %v11748_v19  ;;  %14498 = vst [vmem:[#allocation23_spill] sm:$0xff] %v11756_v21  ;;  %v11758_v22 = vld [vmem:[#allocation2 + $0x109] sm:$0xff]  ;;  %v11768_v24 = vld [vmem:[#allocation2 + $0x111] sm:$0xff] }
  0x4d   : > { %10411 = vmatprep.mubr.msk.f32.mxu1 %vm171_vm1, %v11667_v60  ;;  %v11766_v23 = vld [vmem:[#allocation2 + $0x110] sm:$0xff]  ;;  %v11772_v25 = vld [vmem:[#allocation2 + $0x120] sm:$0xff]  ;;  %v11782_v27 = vld [vmem:[#allocation2 + $0x128] sm:$0xff] }
  0x4e   : > { %14499 = vst [vmem:[#allocation24_spill] sm:$0xff] %v11766_v23  ;;  %v11774_v26 = vld [vmem:[#allocation2 + $0x121] sm:$0xff]  ;;  %v11784_v28 = vld [vmem:[#allocation2 + $0x129] sm:$0xff]  ;;  %v11788_v29 = vld [vmem:[#allocation2 + $0x138] sm:$0xff] }
  0x4f   : > { %10362 = vmatmul.mubr.msk.f32.gmra.mxu0 %vm171_vm1, %v11682_v63  ;;  %v11790_v30 = vld [vmem:[#allocation2 + $0x139] sm:$0xff]  ;;  %v11800_v52 = vld [vmem:[#allocation2 + $0x141] sm:$0xff]  ;;  %v11804_v54 = vld [vmem:[#allocation2 + $0x150] sm:$0xff] }
  0x50   : > { %10412 = vmatmul.mubr.msk.f32.gmra.mxu1 %vm171_vm1, %v11684_v0  ;;  %10364 = vmatprep.mubr.msk.f32.mxu0 %vm171_vm1, %v11688_v1  ;;  %v11798_v51 = vld [vmem:[#allocation2 + $0x140] sm:$0xff]  ;;  %v11806_v55 = vld [vmem:[#allocation2 + $0x151] sm:$0xff]  ;;  %v11820_v58 = vld [vmem:[#allocation2 + $0x168] sm:$0xff] }
  0x51   : > { %10414 = vmatprep.mubr.msk.f32.mxu1 %vm171_vm1, %v11690_v2  ;;  %v11814_v56 = vld [vmem:[#allocation2 + $0x158] sm:$0xff]  ;;  %v11822_v59 = vld [vmem:[#allocation2 + $0x169] sm:$0xff] }
  0x52   : > { %v11816_v57 = vld [vmem:[#allocation2 + $0x159] sm:$0xff]  ;;  %14501 = vst [vmem:[#allocation26_spill] sm:$0xff] %v11822_v59  ;;  %v11830_v61 = vld [vmem:[#allocation2 + $0x170] sm:$0xff]  ;;  %v1162_v17 = vld [vmem:[#allocation2 + $0x2] sm:$0xff] }
  0x53   : > { %10365 = vmatmul.mubr.msk.f32.gmra.mxu0 %vm171_vm1, %v11698_v3  ;;  %14500 = vst [vmem:[#allocation25_spill] sm:$0xff] %v11816_v57  ;;  %v11832_v62 = vld [vmem:[#allocation2 + $0x171] sm:$0xff] }
  0x54   : > { %10415 = vmatmul.mubr.msk.f32.gmra.mxu1 %vm171_vm1, %v11700_v4  ;;  %10367 = vmatprep.mubr.msk.f32.mxu0 %vm171_vm1, %v11704_v5  ;;  %v1163_v18 = vld [vmem:[#allocation2 + $0xa] sm:$0xff] }
  0x55   : > { %10417 = vmatprep.mubr.msk.f32.mxu1 %vm171_vm1, %v11706_v6 }
  0x57   : > { %10368 = vmatmul.mubr.msk.f32.gmra.mxu0 %vm171_vm1, %v11714_v7 }
  0x58   : > { %10418 = vmatmul.mubr.msk.f32.gmra.mxu1 %vm171_vm1, %v11716_v8  ;;  %10370 = vmatprep.mubr.msk.f32.mxu0 %vm171_vm1, %v11720_v9 }
  0x59   : > { %10420 = vmatprep.mubr.msk.f32.mxu1 %vm171_vm1, %v11722_v10 }
  0x5b   : > { %10371 = vmatmul.mubr.msk.f32.gmra.mxu0 %vm171_vm1, %v11730_v13 }
  0x5c   : > { %10421 = vmatmul.mubr.msk.f32.gmra.mxu1 %vm171_vm1, %v11732_v14  ;;  %10373 = vmatprep.mubr.msk.f32.mxu0 %vm171_vm1, %v11736_v15 }
  0x5d   : > { %10423 = vmatprep.mubr.msk.f32.mxu1 %vm171_vm1, %v11738_v16 }
  0x5f   : > { %10374 = vmatmul.mubr.msk.f32.gmra.mxu0 %vm171_vm1, %v11748_v19 }
  0x60   : > { %10424 = vmatmul.mubr.msk.f32.gmra.mxu1 %vm171_vm1, %v11750_v20  ;;  %10376 = vmatprep.mubr.msk.f32.mxu0 %vm171_vm1, %v11756_v21 }
  0x61   : > { %10426 = vmatprep.mubr.msk.f32.mxu1 %vm171_vm1, %v11758_v22 }
  0x63   : > { %10377 = vmatmul.mubr.msk.f32.gmra.mxu0 %vm171_vm1, %v11766_v23 }
  0x64   : > { %10427 = vmatmul.mubr.msk.f32.gmra.mxu1 %vm171_vm1, %v11768_v24  ;;  %10379 = vmatprep.mubr.msk.f32.mxu0 %vm171_vm1, %v11772_v25 }
  0x65   : > { %10429 = vmatprep.mubr.msk.f32.mxu1 %vm171_vm1, %v11774_v26 }
  0x67   : > { %10380 = vmatmul.mubr.msk.f32.gmra.mxu0 %vm171_vm1, %v11782_v27 }
  0x68   : > { %10430 = vmatmul.mubr.msk.f32.gmra.mxu1 %vm171_vm1, %v11784_v28  ;;  %10382 = vmatprep.mubr.msk.f32.mxu0 %vm171_vm1, %v11788_v29 }
  0x69   : > { %10432 = vmatprep.mubr.msk.f32.mxu1 %vm171_vm1, %v11790_v30 }
  0x6b   : > { %10383 = vmatmul.mubr.msk.f32.gmra.mxu0 %vm171_vm1, %v11798_v51 }
  0x6c   : > { %10433 = vmatmul.mubr.msk.f32.gmra.mxu1 %vm171_vm1, %v11800_v52  ;;  %10385 = vmatprep.mubr.msk.f32.mxu0 %vm171_vm1, %v11804_v54 }
  0x6d   : > { %10435 = vmatprep.mubr.msk.f32.mxu1 %vm171_vm1, %v11806_v55 }
  0x6f   : > { %10386 = vmatmul.mubr.msk.f32.gmra.mxu0 %vm171_vm1, %v11814_v56 }
  0x70   : > { %10436 = vmatmul.mubr.msk.f32.gmra.mxu1 %vm171_vm1, %v11816_v57  ;;  %10388 = vmatprep.mubr.msk.f32.mxu0 %vm171_vm1, %v11820_v58  ;;  %v11843_v57 = vld [vmem:[#allocation2 + $0x1a] sm:$0xff] }
  0x71   : > { %10438 = vmatprep.mubr.msk.f32.mxu1 %vm171_vm1, %v11822_v59  ;;  %v11851_v59 = vld [vmem:[%s14441_s1 + $0x18] sm:$0xf] }
  0x73   : > { %10389 = vmatmul.mubr.msk.f32.gmra.mxu0 %vm171_vm1, %v11830_v61 }
  0x74   : > { %10439 = vmatmul.mubr.msk.f32.gmra.mxu1 %vm171_vm1, %v11832_v62  ;;  %10443 = vmatprep.mubr.msk.f32.mxu0 %vm171_vm1, %v1162_v17  ;;  %v11856_v17 = vld [vmem:[%s14441_s1 + $0x1c] sm:$0xf] }
  0x75   : > { %10493 = vmatprep.mubr.msk.f32.mxu1 %vm171_vm1, %v11573_v31  ;;  %v11862_v31 = vld [vmem:[#allocation2 + $0x22] sm:$0xff] }
  0x77   : > { %10444 = vmatmul.mubr.msk.f32.vlgmr.msra.gmra.mxu0 %vm171_vm1, %v1163_v18  ;;  %v11864_v18 = vld [vmem:[#allocation2 + $0x32] sm:$0xff] }
  0x78   : > { %10494 = vmatmul.mubr.msk.f32.vlgmr.msra.gmra.mxu1 %vm171_vm1, %v11577_v33  ;;  %10542 = vmatpush3.msk.msra.mxu0 %vm447_vm0, %v11527_v11  ;;  %v11880_v11 = vld [vmem:[#allocation2 + $0x3a] sm:$0xff]  ;;  %v11892_v33 = vld [vmem:[#allocation2 + $0x52] sm:$0xff] }
  0x79   : > { %10446 = vmatprep.mubr.msk.f32.mxu0 %vm171_vm1, %v11843_v57  ;;  %10496 = vmatprep.mubr.msk.f32.mxu1 %vm171_vm1, %v11586_v35  ;;  %v12030_v35 = vld [vmem:[#allocation2 + $0x180] sm:$0xff] }
  0x7a   : > { %10592 = vmatpush3.msk.msra.mxu1 %vm447_vm0, %v11532_v12  ;;  %10641 = vmatprep.subr.msk.mxu0 %vm447_vm0, %v11851_v59  ;;  %v11884_v12 = vld [vmem:[#allocation2 + $0x4a] sm:$0xff] }
  0x7b   : > { %10691 = vmatprep.subr.msk.mxu1 %vm447_vm0, %v11856_v17  ;;  %10447 = vmatmul.mubr.msk.f32.gmra.mxu0 %vm171_vm1, %v11862_v31 }
  0x7c   : > { %10497 = vmatmul.mubr.msk.f32.gmra.mxu1 %vm171_vm1, %v11598_v37  ;;  %10449 = vmatprep.mubr.msk.f32.mxu0 %vm171_vm1, %v11864_v18  ;;  %v11896_v37 = vld [vmem:[#allocation2 + $0x62] sm:$0xff] }
  0x7d   : > { %10499 = vmatprep.mubr.msk.f32.mxu1 %vm171_vm1, %v11604_v39  ;;  %v11908_v39 = vld [vmem:[#allocation2 + $0x7a] sm:$0xff] }
  0x7f   : > { %10450 = vmatmul.mubr.msk.f32.gmra.mxu0 %vm171_vm1, %v11880_v11 }
  0x80   : > { %10500 = vmatmul.mubr.msk.f32.gmra.mxu1 %vm171_vm1, %v11614_v41  ;;  %10452 = vmatprep.mubr.msk.f32.mxu0 %vm171_vm1, %v11884_v12  ;;  %v11904_v41 = vld [vmem:[#allocation2 + $0x6a] sm:$0xff] }
  0x81   : > { %10502 = vmatprep.mubr.msk.f32.mxu1 %vm171_vm1, %v11620_v43  ;;  %v11920_v43 = vld [vmem:[#allocation2 + $0x92] sm:$0xff] }
  0x83   : > { %10453 = vmatmul.mubr.msk.f32.gmra.mxu0 %vm171_vm1, %v11892_v33 }
  0x84   : > { %10503 = vmatmul.mubr.msk.f32.gmra.mxu1 %vm171_vm1, %v11630_v45  ;;  %10455 = vmatprep.mubr.msk.f32.mxu0 %vm171_vm1, %v11896_v37  ;;  %v11916_v45 = vld [vmem:[#allocation2 + $0x82] sm:$0xff] }
  0x85   : > { %10505 = vmatprep.mubr.msk.f32.mxu1 %vm171_vm1, %v11636_v47  ;;  %v11932_v47 = vld [vmem:[#allocation2 + $0xaa] sm:$0xff] }
  0x87   : > { %10456 = vmatmul.mubr.msk.f32.gmra.mxu0 %vm171_vm1, %v11904_v41 }
  0x88   : > { %10506 = vmatmul.mubr.msk.f32.gmra.mxu1 %vm171_vm1, %v11640_v49  ;;  %10458 = vmatprep.mubr.msk.f32.mxu0 %vm171_vm1, %v11908_v39  ;;  %v11928_v49 = vld [vmem:[#allocation2 + $0x9a] sm:$0xff] }
  0x89   : > { %10508 = vmatprep.mubr.msk.f32.mxu1 %vm171_vm1, %v11648_v53  ;;  %v11944_v53 = vld [vmem:[#allocation2 + $0xc2] sm:$0xff] }
  0x8b   : > { %10459 = vmatmul.mubr.msk.f32.gmra.mxu0 %vm171_vm1, %v11916_v45 }
  0x8c   : > { %10509 = vmatmul.mubr.msk.f32.gmra.mxu1 %vm171_vm1, %v11682_v63  ;;  %10461 = vmatprep.mubr.msk.f32.mxu0 %vm171_vm1, %v11920_v43  ;;  %v11940_v63 = vld [vmem:[#allocation2 + $0xb2] sm:$0xff] }
  0x8d   : > { %10511 = vmatprep.mubr.msk.f32.mxu1 %vm171_vm1, %v11688_v1  ;;  %v11956_v1 = vld [vmem:[#allocation2 + $0xda] sm:$0xff] }
  0x8f   : > { %10462 = vmatmul.mubr.msk.f32.gmra.mxu0 %vm171_vm1, %v11928_v49 }
  0x90   : > { %10512 = vmatmul.mubr.msk.f32.gmra.mxu1 %vm171_vm1, %v11698_v3  ;;  %10464 = vmatprep.mubr.msk.f32.mxu0 %vm171_vm1, %v11932_v47  ;;  %v11952_v3 = vld [vmem:[#allocation2 + $0xca] sm:$0xff] }
  0x91   : > { %10514 = vmatprep.mubr.msk.f32.mxu1 %vm171_vm1, %v11704_v5  ;;  %v11968_v5 = vld [vmem:[#allocation2 + $0xf2] sm:$0xff] }
  0x93   : > { %10465 = vmatmul.mubr.msk.f32.gmra.mxu0 %vm171_vm1, %v11940_v63 }
  0x94   : > { %10515 = vmatmul.mubr.msk.f32.gmra.mxu1 %vm171_vm1, %v11714_v7  ;;  %10467 = vmatprep.mubr.msk.f32.mxu0 %vm171_vm1, %v11944_v53  ;;  %v11964_v7 = vld [vmem:[#allocation2 + $0xe2] sm:$0xff] }
  0x95   : > { %10517 = vmatprep.mubr.msk.f32.mxu1 %vm171_vm1, %v11720_v9  ;;  %v11980_v9 = vld [vmem:[#allocation2 + $0x10a] sm:$0xff] }
  0x97   : > { %10468 = vmatmul.mubr.msk.f32.gmra.mxu0 %vm171_vm1, %v11952_v3 }
  0x98   : > { %10518 = vmatmul.mubr.msk.f32.gmra.mxu1 %vm171_vm1, %v11730_v13  ;;  %10470 = vmatprep.mubr.msk.f32.mxu0 %vm171_vm1, %v11956_v1  ;;  %v11976_v13 = vld [vmem:[#allocation2 + $0xfa] sm:$0xff] }
  0x99   : > { %10520 = vmatprep.mubr.msk.f32.mxu1 %vm171_vm1, %v11736_v15  ;;  %v11992_v15 = vld [vmem:[#allocation2 + $0x122] sm:$0xff] }
  0x9b   : > { %10471 = vmatmul.mubr.msk.f32.gmra.mxu0 %vm171_vm1, %v11964_v7 }
  0x9c   : > { %10521 = vmatmul.mubr.msk.f32.gmra.mxu1 %vm171_vm1, %v11748_v19  ;;  %10473 = vmatprep.mubr.msk.f32.mxu0 %vm171_vm1, %v11968_v5  ;;  %v11988_v19 = vld [vmem:[#allocation2 + $0x112] sm:$0xff] }
  0x9d   : > { %10523 = vmatprep.mubr.msk.f32.mxu1 %vm171_vm1, %v11756_v21  ;;  %v12004_v21 = vld [vmem:[#allocation2 + $0x13a] sm:$0xff] }
  0x9f   : > { %10474 = vmatmul.mubr.msk.f32.gmra.mxu0 %vm171_vm1, %v11976_v13 }
  0xa0   : > { %10524 = vmatmul.mubr.msk.f32.gmra.mxu1 %vm171_vm1, %v11766_v23  ;;  %10476 = vmatprep.mubr.msk.f32.mxu0 %vm171_vm1, %v11980_v9  ;;  %v12000_v23 = vld [vmem:[#allocation2 + $0x12a] sm:$0xff] }
  0xa1   : > { %10526 = vmatprep.mubr.msk.f32.mxu1 %vm171_vm1, %v11772_v25  ;;  %v12012_v25 = vld [vmem:[#allocation2 + $0x142] sm:$0xff] }
  0xa3   : > { %10477 = vmatmul.mubr.msk.f32.gmra.mxu0 %vm171_vm1, %v11988_v19 }
  0xa4   : > { %10527 = vmatmul.mubr.msk.f32.gmra.mxu1 %vm171_vm1, %v11782_v27  ;;  %10479 = vmatprep.mubr.msk.f32.mxu0 %vm171_vm1, %v11992_v15  ;;  %v12016_v27 = vld [vmem:[#allocation2 + $0x152] sm:$0xff] }
  0xa5   : > { %10529 = vmatprep.mubr.msk.f32.mxu1 %vm171_vm1, %v11788_v29  ;;  %v12024_v29 = vld [vmem:[#allocation2 + $0x15a] sm:$0xff] }
  0xa7   : > { %10480 = vmatmul.mubr.msk.f32.gmra.mxu0 %vm171_vm1, %v12000_v23 }
  0xa8   : > { %10530 = vmatmul.mubr.msk.f32.gmra.mxu1 %vm171_vm1, %v11798_v51  ;;  %10482 = vmatprep.mubr.msk.f32.mxu0 %vm171_vm1, %v12004_v21  ;;  %v12028_v51 = vld [vmem:[#allocation2 + $0x16a] sm:$0xff] }
  0xa9   : > { %10532 = vmatprep.mubr.msk.f32.mxu1 %vm171_vm1, %v11804_v54  ;;  %v12038_v54 = vld [vmem:[#allocation2 + $0x172] sm:$0xff] }
  0xab   : > { %10483 = vmatmul.mubr.msk.f32.gmra.mxu0 %vm171_vm1, %v12012_v25 }
  0xac   : > { %10533 = vmatmul.mubr.msk.f32.gmra.mxu1 %vm171_vm1, %v11814_v56  ;;  %10485 = vmatprep.mubr.msk.f32.mxu0 %vm171_vm1, %v12016_v27  ;;  %v12042_v56 = vld [vmem:[#allocation2 + $0x188] sm:$0xff] }
  0xad   : > { %10535 = vmatprep.mubr.msk.f32.mxu1 %vm171_vm1, %v11820_v58  ;;  %v12059_v58 = vld [vmem:[%s14441_s1 + $0x20] sm:$0xf] }
  0xaf   : > { %10486 = vmatmul.mubr.msk.f32.gmra.mxu0 %vm171_vm1, %v12024_v29 }
  0xb0   : > { %10536 = vmatmul.mubr.msk.f32.gmra.mxu1 %vm171_vm1, %v11830_v61  ;;  %10488 = vmatprep.mubr.msk.f32.mxu0 %vm171_vm1, %v12028_v51  ;;  %v14513_v61 = vld [vmem:[#allocation14_spill] sm:$0xff] }
  0xb1   : > { %10538 = vmatprep.mubr.msk.f32.mxu1 %vm171_vm1, %v12030_v35 }
  0xb3   : > { %10489 = vmatmul.mubr.msk.f32.gmra.mxu0 %vm171_vm1, %v12038_v54 }
  0xb4   : > { %10539 = vmatmul.mubr.msk.f32.gmra.mxu1 %vm171_vm1, %v12042_v56  ;;  %10543 = vmatprep.mubr.msk.f32.mxu0 %vm171_vm1, %v11575_v32  ;;  %v14502_v32 = vld [vmem:[#allocation25_spill] sm:$0xff] }
  0xb5   : > { %10593 = vmatprep.mubr.msk.f32.mxu1 %vm171_vm1, %v11843_v57 }
  0xb7   : > { %10544 = vmatmul.mubr.msk.f32.vlgmr.msra.gmra.mxu0 %vm171_vm1, %v11584_v34  ;;  %v14503_v34 = vld [vmem:[#allocation26_spill] sm:$0xff] }
  0xb8   : > { %10594 = vmatmul.mubr.msk.f32.vlgmr.msra.gmra.mxu1 %vm171_vm1, %v11862_v31  ;;  %10642 = vmatpush3.msk.msra.mxu0 %vm447_vm0, %v11851_v59  ;;  %v14514_v31 = vld [vmem:[#allocation15_spill] sm:$0xff] }
  0xb9   : > { %10546 = vmatprep.mubr.msk.f32.mxu0 %vm171_vm1, %v11588_v36  ;;  %10596 = vmatprep.mubr.msk.f32.mxu1 %vm171_vm1, %v11864_v18  ;;  %v3444_v18 = vld [vmem:[#allocation2 + $0xb1] sm:$0xff] }
  0xba   : > { %10692 = vmatpush3.msk.msra.mxu1 %vm447_vm0, %v11856_v17  ;;  %10741 = vmatprep.subr.msk.mxu0 %vm447_vm0, %v12059_v58 }
  0xbb   : > { %10547 = vmatmul.mubr.msk.f32.gmra.mxu0 %vm171_vm1, %v11600_v38 }
  0xbc   : > { %10597 = vmatmul.mubr.msk.f32.gmra.mxu1 %vm171_vm1, %v11880_v11  ;;  %10549 = vmatprep.mubr.msk.f32.mxu0 %vm171_vm1, %v11606_v40 }
  0xbd   : > { %10599 = vmatprep.mubr.msk.f32.mxu1 %vm171_vm1, %v11884_v12 }
  0xbf   : > { %10550 = vmatmul.mubr.msk.f32.gmra.mxu0 %vm171_vm1, %v11616_v42 }
  0xc0   : > { %10600 = vmatmul.mubr.msk.f32.gmra.mxu1 %vm171_vm1, %v11892_v33  ;;  %10552 = vmatprep.mubr.msk.f32.mxu0 %vm171_vm1, %v11622_v44  ;;  %v14504_v44 = vld [vmem:[#allocation5_spill] sm:$0xff] }
  0xc1   : > { %10602 = vmatprep.mubr.msk.f32.mxu1 %vm171_vm1, %v11896_v37  ;;  %v12175_v37 = vld [vmem:[#allocation2 + $0x181] sm:$0xff] }
  0xc3   : > { %10553 = vmatmul.mubr.msk.f32.gmra.mxu0 %vm171_vm1, %v11632_v46 }
  0xc4   : > { %10603 = vmatmul.mubr.msk.f32.gmra.mxu1 %vm171_vm1, %v11904_v41  ;;  %10555 = vmatprep.mubr.msk.f32.mxu0 %vm171_vm1, %v11638_v48  ;;  %v12181_v41 = vld [vmem:[#allocation2 + $0x189] sm:$0xff] }
  0xc5   : > { %10605 = vmatprep.mubr.msk.f32.mxu1 %vm171_vm1, %v11908_v39  ;;  %v2554_v39 = vld [vmem:[#allocation2 + $0x182] sm:$0xff] }
  0xc6   : > { %v14505_v48 = vld [vmem:[#allocation6_spill] sm:$0xff] }
  0xc7   : > { %10556 = vmatmul.mubr.msk.f32.gmra.mxu0 %vm171_vm1, %v11642_v50  ;;  %v3437_v50 = vld [vmem:[#allocation2 + $0x61] sm:$0xff] }
  0xc8   : > { %10606 = vmatmul.mubr.msk.f32.gmra.mxu1 %vm171_vm1, %v11916_v45  ;;  %10558 = vmatprep.mubr.msk.f32.mxu0 %vm171_vm1, %v11667_v60  ;;  %v14507_v60 = vld [vmem:[#allocation8_spill] sm:$0xff] }
  0xc9   : > { %10608 = vmatprep.mubr.msk.f32.mxu1 %vm171_vm1, %v11920_v43  ;;  %v2555_v43 = vld [vmem:[#allocation2 + $0x18a] sm:$0xff] }
  0xcb   : > { %10559 = vmatmul.mubr.msk.f32.gmra.mxu0 %vm171_vm1, %v11684_v0  ;;  %v3438_v0 = vld [vmem:[#allocation2 + $0x69] sm:$0xff] }
  0xcc   : > { %10609 = vmatmul.mubr.msk.f32.gmra.mxu1 %vm171_vm1, %v11928_v49  ;;  %10561 = vmatprep.mubr.msk.f32.mxu0 %vm171_vm1, %v11690_v2  ;;  %v14506_v49 = vld [vmem:[#allocation7_spill] sm:$0xff] }
  0xcd   : > { %10611 = vmatprep.mubr.msk.f32.mxu1 %vm171_vm1, %v11932_v47 }
  0xcf   : > { %10562 = vmatmul.mubr.msk.f32.gmra.mxu0 %vm171_vm1, %v11700_v4 }
  0xd0   : > { %10612 = vmatmul.mubr.msk.f32.gmra.mxu1 %vm171_vm1, %v11940_v63  ;;  %10564 = vmatprep.mubr.msk.f32.mxu0 %vm171_vm1, %v11706_v6 }
  0xd1   : > { %10614 = vmatprep.mubr.msk.f32.mxu1 %vm171_vm1, %v11944_v53 }
  0xd3   : > { %10565 = vmatmul.mubr.msk.f32.gmra.mxu0 %vm171_vm1, %v11716_v8 }
  0xd4   : > { %10615 = vmatmul.mubr.msk.f32.gmra.mxu1 %vm171_vm1, %v11952_v3  ;;  %10567 = vmatprep.mubr.msk.f32.mxu0 %vm171_vm1, %v11722_v10  ;;  %v3439_v3 = vld [vmem:[#allocation2 + $0x79] sm:$0xff]  ;;  %v3440_v10 = vld [vmem:[#allocation2 + $0x81] sm:$0xff] }
  0xd5   : > { %10617 = vmatprep.mubr.msk.f32.mxu1 %vm171_vm1, %v11956_v1  ;;  %v10345_v45 = vpop.f32.mrf.mxu0 }
  0xd6   : > { %677 = vst.msk [vmem:[#allocation4 + $0x8] sm:$0xff] %vm171_vm1, %v10345_v45 }
  0xd7   : > { %10568 = vmatmul.mubr.msk.f32.gmra.mxu0 %vm171_vm1, %v11732_v14  ;;  %v517_v47 = vpop.f32.mrf.mxu0 }
  0xd8   : > { %10618 = vmatmul.mubr.msk.f32.gmra.mxu1 %vm171_vm1, %v11964_v7  ;;  %10570 = vmatprep.mubr.msk.f32.mxu0 %vm171_vm1, %v11738_v16  ;;  %676 = vst.msk [vmem:[#allocation4] sm:$0xff] %vm171_vm1, %v517_v47  ;;  %v14509_v7 = vld [vmem:[#allocation10_spill] sm:$0xff] }
  0xd9   : > { %10620 = vmatprep.mubr.msk.f32.mxu1 %vm171_vm1, %v11968_v5 }
  0xdb   : > { %10571 = vmatmul.mubr.msk.f32.gmra.mxu0 %vm171_vm1, %v11750_v20  ;;  %v14511_v20 = vld [vmem:[#allocation12_spill] sm:$0xff] }
  0xdc   : > { %10621 = vmatmul.mubr.msk.f32.gmra.mxu1 %vm171_vm1, %v11976_v13  ;;  %10573 = vmatprep.mubr.msk.f32.mxu0 %vm171_vm1, %v11758_v22 }
  0xdd   : > { %10623 = vmatprep.mubr.msk.f32.mxu1 %vm171_vm1, %v11980_v9  ;;  %v1067_v2 = vld [vmem:[#allocation4 + $0x8] sm:$0xff]  ;;  %v14510_v9 = vld [vmem:[#allocation11_spill] sm:$0xff] }
  0xdf   : > { %10574 = vmatmul.mubr.msk.f32.gmra.mxu0 %vm171_vm1, %v11768_v24  ;;  %v1066_v6 = vld [vmem:[#allocation4] sm:$0xff] }
  0xe0   : > { %10624 = vmatmul.mubr.msk.f32.gmra.mxu1 %vm171_vm1, %v11988_v19  ;;  %10576 = vmatprep.mubr.msk.f32.mxu0 %vm171_vm1, %v11774_v26  ;;  %v3442_v24 = vld [vmem:[#allocation2 + $0x99] sm:$0xff] }
  0xe1   : > { %10626 = vmatprep.mubr.msk.f32.mxu1 %vm171_vm1, %v11992_v15  ;;  %v3441_v15 = vld [vmem:[#allocation2 + $0x91] sm:$0xff] }
  0xe3   : > { %10577 = vmatmul.mubr.msk.f32.gmra.mxu0 %vm171_vm1, %v11784_v28 }
  0xe4   : > { %10627 = vmatmul.mubr.msk.f32.gmra.mxu1 %vm171_vm1, %v12000_v23  ;;  %10579 = vmatprep.mubr.msk.f32.mxu0 %vm171_vm1, %v11790_v30  ;;  %v14512_v23 = vld [vmem:[#allocation13_spill] sm:$0xff] }
  0xe5   : > { %10629 = vmatprep.mubr.msk.f32.mxu1 %vm171_vm1, %v12004_v21 }
  0xe7   : > { %10580 = vmatmul.mubr.msk.f32.gmra.mxu0 %vm171_vm1, %v11800_v52  ;;  %v3443_v52 = vld [vmem:[#allocation2 + $0xa9] sm:$0xff] }
  0xe8   : > { %10630 = vmatmul.mubr.msk.f32.gmra.mxu1 %vm171_vm1, %v12012_v25  ;;  %10582 = vmatprep.mubr.msk.f32.mxu0 %vm171_vm1, %v11806_v55  ;;  %v3445_v25 = vld [vmem:[#allocation2 + $0xc1] sm:$0xff] }
  0xe9   : > { %10632 = vmatprep.mubr.msk.f32.mxu1 %vm171_vm1, %v12016_v27 }
  0xeb   : > { %10583 = vmatmul.mubr.msk.f32.gmra.mxu0 %vm171_vm1, %v14502_v32 }
  0xec   : > { %10633 = vmatmul.mubr.msk.f32.gmra.mxu1 %vm171_vm1, %v12024_v29  ;;  %10585 = vmatprep.mubr.msk.f32.mxu0 %vm171_vm1, %v14503_v34  ;;  %v14516_v34 = vld [vmem:[#allocation17_spill] sm:$0xff] }
  0xed   : > { %10635 = vmatprep.mubr.msk.f32.mxu1 %vm171_vm1, %v12028_v51 }
  0xef   : > { %10586 = vmatmul.mubr.msk.f32.gmra.mxu0 %vm171_vm1, %v11832_v62 }
  0xf0   : > { %10636 = vmatmul.mubr.msk.f32.gmra.mxu1 %vm171_vm1, %v12038_v54  ;;  %10588 = vmatprep.mubr.msk.f32.mxu0 %vm171_vm1, %v12175_v37  ;;  %v14515_v54 = vld [vmem:[#allocation16_spill] sm:$0xff] }
  0xf1   : > { %10638 = vmatprep.mubr.msk.f32.mxu1 %vm171_vm1, %v2554_v39  ;;  %v3446_v39 = vld [vmem:[#allocation2 + $0xc9] sm:$0xff] }
  0xf3   : > { %10589 = vmatmul.mubr.msk.f32.gmra.mxu0 %vm171_vm1, %v12181_v41 }
  0xf4   : > { %10639 = vmatmul.mubr.msk.f32.gmra.mxu1 %vm171_vm1, %v2555_v43  ;;  %10643 = vmatprep.mubr.msk.f32.mxu0 %vm171_vm1, %v14504_v44 }
  0xf5   : > { %10693 = vmatprep.mubr.msk.f32.mxu1 %vm171_vm1, %v11588_v36 }
  0xf7   : > { %10644 = vmatmul.mubr.msk.f32.vlgmr.msra.gmra.mxu0 %vm171_vm1, %v14505_v48 }
  0xf8   : > { %v10395_v46 = vpop.f32.mrf.mxu1  ;;  %10694 = vmatmul.mubr.msk.f32.vlgmr.msra.gmra.mxu1 %vm171_vm1, %v11600_v38  ;;  %10742 = vmatpush3.msk.msra.mxu0 %vm447_vm0, %v12059_v58  ;;  %v14508_v38 = vld [vmem:[#allocation9_spill] sm:$0xff] }
  0xf9   : > { %10646 = vmatprep.mubr.msk.f32.mxu0 %vm171_vm1, %v14506_v49  ;;  %10696 = vmatprep.mubr.msk.f32.mxu1 %vm171_vm1, %v11606_v40  ;;  %v1099_v4 = vadd.f32 %v10395_v46, %v1067_v2  ;;  %v3447_v46 = vld [vmem:[#allocation2 + $0xd9] sm:$0xff]  ;;  %v3449_v2 = vld [vmem:[#allocation2 + $0xf1] sm:$0xff] }
  0xfa   : > { %v907_v36 = vpop.f32.mrf.mxu1 }
  0xfb   : > { %v10348_v53 = vpop.f32.mrf.mxu0  ;;  %10647 = vmatmul.mubr.msk.f32.gmra.mxu0 %vm171_vm1, %v14507_v60  ;;  %1131 = vst.msk [vmem:[#allocation4 + $0x8] sm:$0xff] %vm171_vm1, %v1099_v4  ;;  %v1098_v8 = vadd.f32 %v1066_v6, %v907_v36  ;;  %v14517_v36 = vld [vmem:[#allocation18_spill] sm:$0xff]  ;;  %v14518_v60 = vld [vmem:[#allocation19_spill] sm:$0xff] }
  0xfc   : > { %v10398_v63 = vpop.f32.mrf.mxu1  ;;  %10697 = vmatmul.mubr.msk.f32.gmra.mxu1 %vm171_vm1, %v11616_v42  ;;  %679 = vst.msk [vmem:[#allocation4 + $0x18] sm:$0xff] %vm171_vm1, %v10348_v53  ;;  %10649 = vmatprep.mubr.msk.f32.mxu0 %vm171_vm1, %v14508_v38 }
  0xfd   : > { %10699 = vmatprep.mubr.msk.f32.mxu1 %vm171_vm1, %v3437_v50  ;;  %v527_v1 = vpop.f32.mrf.mxu0  ;;  %1130 = vst.msk [vmem:[#allocation4] sm:$0xff] %vm171_vm1, %v1098_v8  ;;  %v3450_v8 = vld [vmem:[#allocation2 + $0xf9] sm:$0xff] }
  0xfe   : > { %v917_v40 = vpop.f32.mrf.mxu1  ;;  %678 = vst.msk [vmem:[#allocation4 + $0x10] sm:$0xff] %vm171_vm1, %v527_v1 }
  0xff   : > { %v10351_v5 = vpop.f32.mrf.mxu0  ;;  %10650 = vmatmul.mubr.msk.f32.gmra.mxu0 %vm171_vm1, %v14509_v7 }
 0x100   : > { %v10401_v42 = vpop.f32.mrf.mxu1  ;;  %10700 = vmatmul.mubr.msk.f32.gmra.mxu1 %vm171_vm1, %v3438_v0  ;;  %681 = vst.msk [vmem:[#allocation4 + $0x28] sm:$0xff] %vm171_vm1, %v10351_v5  ;;  %10652 = vmatprep.mubr.msk.f32.mxu0 %vm171_vm1, %v14510_v9  ;;  %v14519_v5 = vld [vmem:[#allocation20_spill] sm:$0xff] }
 0x101   : > { %10702 = vmatprep.mubr.msk.f32.mxu1 %vm171_vm1, %v3439_v3  ;;  %v537_v13 = vpop.f32.mrf.mxu0 }
 0x102   : > { %v927_v14 = vpop.f32.mrf.mxu1  ;;  %680 = vst.msk [vmem:[#allocation4 + $0x20] sm:$0xff] %vm171_vm1, %v537_v13 }
 0x103   : > { %v10354_v16 = vpop.f32.mrf.mxu0  ;;  %v1069_v19 = vld [vmem:[#allocation4 + $0x18] sm:$0xff]  ;;  %10653 = vmatmul.mubr.msk.f32.gmra.mxu0 %vm171_vm1, %v14511_v20  ;;  %v14521_v20 = vld [vmem:[#allocation22_spill] sm:$0xff] }
 0x104   : > { %v10404_v21 = vpop.f32.mrf.mxu1  ;;  %10703 = vmatmul.mubr.msk.f32.gmra.mxu1 %vm171_vm1, %v3440_v10  ;;  %683 = vst.msk [vmem:[#allocation4 + $0x38] sm:$0xff] %vm171_vm1, %v10354_v16  ;;  %v1101_v22 = vadd.f32 %v10398_v63, %v1069_v19  ;;  %10655 = vmatprep.mubr.msk.f32.mxu0 %vm171_vm1, %v14512_v23  ;;  %v3448_v63 = vld [vmem:[#allocation2 + $0xe1] sm:$0xff]  ;;  %v14522_v23 = vld [vmem:[#allocation23_spill] sm:$0xff] }
 0x105   : > { %10705 = vmatprep.mubr.msk.f32.mxu1 %vm171_vm1, %v3441_v15  ;;  %v547_v26 = vpop.f32.mrf.mxu0  ;;  %v1068_v28 = vld [vmem:[#allocation4 + $0x10] sm:$0xff] }
 0x106   : > { %v937_v30 = vpop.f32.mrf.mxu1  ;;  %1133 = vst.msk [vmem:[#allocation4 + $0x18] sm:$0xff] %vm171_vm1, %v1101_v22  ;;  %682 = vst.msk [vmem:[#allocation4 + $0x30] sm:$0xff] %vm171_vm1, %v547_v26  ;;  %v1100_v55 = vadd.f32 %v1068_v28, %v917_v40 }
 0x107   : > { %v10357_v57 = vpop.f32.mrf.mxu0  ;;  %v1071_v59 = vld [vmem:[#allocation4 + $0x28] sm:$0xff]  ;;  %10656 = vmatmul.mubr.msk.f32.gmra.mxu0 %vm171_vm1, %v14513_v61 }
 0x108   : > { %v10407_v62 = vpop.f32.mrf.mxu1  ;;  %10706 = vmatmul.mubr.msk.f32.gmra.mxu1 %vm171_vm1, %v3442_v24  ;;  %1132 = vst.msk [vmem:[#allocation4 + $0x10] sm:$0xff] %vm171_vm1, %v1100_v55  ;;  %685 = vst.msk [vmem:[#allocation4 + $0x48] sm:$0xff] %vm171_vm1, %v10357_v57  ;;  %v1103_v17 = vadd.f32 %v10401_v42, %v1071_v59  ;;  %10658 = vmatprep.mubr.msk.f32.mxu0 %vm171_vm1, %v14514_v31  ;;  %v14520_v42 = vld [vmem:[#allocation21_spill] sm:$0xff]  ;;  %v3452_v24 = vld [vmem:[#allocation2 + $0x111] sm:$0xff] }
 0x109   : > { %10708 = vmatprep.mubr.msk.f32.mxu1 %vm171_vm1, %v3443_v52  ;;  %v557_v11 = vpop.f32.mrf.mxu0  ;;  %v1070_v12 = vld [vmem:[#allocation4 + $0x20] sm:$0xff] }
 0x10a   : > { %v947_v33 = vpop.f32.mrf.mxu1  ;;  %1135 = vst.msk [vmem:[#allocation4 + $0x28] sm:$0xff] %vm171_vm1, %v1103_v17  ;;  %684 = vst.msk [vmem:[#allocation4 + $0x40] sm:$0xff] %vm171_vm1, %v557_v11  ;;  %v1102_v27 = vadd.f32 %v1070_v12, %v927_v14  ;;  %v3451_v14 = vld [vmem:[#allocation2 + $0x109] sm:$0xff]  ;;  %v3453_v55 = vld [vmem:[#allocation2 + $0x121] sm:$0xff] }
 0x10b   : > { %v10360_v29 = vpop.f32.mrf.mxu0  ;;  %v1073_v51 = vld [vmem:[#allocation4 + $0x38] sm:$0xff]  ;;  %10659 = vmatmul.mubr.msk.f32.gmra.mxu0 %vm171_vm1, %v14515_v54  ;;  %v3454_v11 = vld [vmem:[#allocation2 + $0x129] sm:$0xff] }
 0x10c   : > { %v10410_v58 = vpop.f32.mrf.mxu1  ;;  %10709 = vmatmul.mubr.msk.f32.gmra.mxu1 %vm171_vm1, %v3444_v18  ;;  %1134 = vst.msk [vmem:[#allocation4 + $0x20] sm:$0xff] %vm171_vm1, %v1102_v27  ;;  %687 = vst.msk [vmem:[#allocation4 + $0x58] sm:$0xff] %vm171_vm1, %v10360_v29  ;;  %v1105_v32 = vadd.f32 %v10404_v21, %v1073_v51  ;;  %10661 = vmatprep.mubr.msk.f32.mxu0 %vm171_vm1, %v14516_v34  ;;  %v3000_v18 = vld [vmem:[#allocation2 + $0x128] sm:$0xff]  ;;  %v3455_v29 = vld [vmem:[#allocation2 + $0x139] sm:$0xff] }
 0x10d   : > { %10711 = vmatprep.mubr.msk.f32.mxu1 %vm171_vm1, %v3445_v25  ;;  %v567_v43 = vpop.f32.mrf.mxu0  ;;  %v1072_v44 = vld [vmem:[#allocation4 + $0x30] sm:$0xff]  ;;  %v3001_v25 = vld [vmem:[#allocation2 + $0x138] sm:$0xff] }
 0x10e   : > { %v957_v45 = vpop.f32.mrf.mxu1  ;;  %1137 = vst.msk [vmem:[#allocation4 + $0x38] sm:$0xff] %vm171_vm1, %v1105_v32  ;;  %686 = vst.msk [vmem:[#allocation4 + $0x50] sm:$0xff] %vm171_vm1, %v567_v43  ;;  %v1104_v47 = vadd.f32 %v1072_v44, %v937_v30  ;;  %v2999_v30 = vld [vmem:[#allocation2 + $0x120] sm:$0xff] }
 0x10f   : > { %v10363_v48 = vpop.f32.mrf.mxu0  ;;  %v1075_v49 = vld [vmem:[#allocation4 + $0x48] sm:$0xff]  ;;  %10662 = vmatmul.mubr.msk.f32.gmra.mxu0 %vm171_vm1, %v14517_v36 }
 0x110   : > { %v10413_v50 = vpop.f32.mrf.mxu1  ;;  %10712 = vmatmul.mubr.msk.f32.gmra.mxu1 %vm171_vm1, %v3446_v39  ;;  %1136 = vst.msk [vmem:[#allocation4 + $0x30] sm:$0xff] %vm171_vm1, %v1104_v47  ;;  %689 = vst.msk [vmem:[#allocation4 + $0x68] sm:$0xff] %vm171_vm1, %v10363_v48  ;;  %v1107_v53 = vadd.f32 %v10407_v62, %v1075_v49  ;;  %10664 = vmatprep.mubr.msk.f32.mxu0 %vm171_vm1, %v14518_v60  ;;  %v14523_v62 = vld [vmem:[#allocation24_spill] sm:$0xff]  ;;  %v3002_v39 = vld [vmem:[#allocation2 + $0x140] sm:$0xff] }
 0x111   : > { %10714 = vmatprep.mubr.msk.f32.mxu1 %vm171_vm1, %v3447_v46  ;;  %v577_v38 = vpop.f32.mrf.mxu0  ;;  %v1074_v0 = vld [vmem:[#allocation4 + $0x40] sm:$0xff]  ;;  %v3003_v46 = vld [vmem:[#allocation2 + $0x150] sm:$0xff] }
 0x112   : > { %v967_v1 = vpop.f32.mrf.mxu1  ;;  %1139 = vst.msk [vmem:[#allocation4 + $0x48] sm:$0xff] %vm171_vm1, %v1107_v53  ;;  %688 = vst.msk [vmem:[#allocation4 + $0x60] sm:$0xff] %vm171_vm1, %v577_v38  ;;  %v1106_v40 = vadd.f32 %v1074_v0, %v947_v33  ;;  %v3456_v43 = vld [vmem:[#allocation2 + $0x141] sm:$0xff]  ;;  %v3457_v48 = vld [vmem:[#allocation2 + $0x151] sm:$0xff] }
 0x113   : > { %v10366_v3 = vpop.f32.mrf.mxu0  ;;  %v1077_v4 = vld [vmem:[#allocation4 + $0x58] sm:$0xff]  ;;  %10665 = vmatmul.mubr.msk.f32.gmra.mxu0 %vm171_vm1, %v14519_v5 }
 0x114   : > { %v10416_v6 = vpop.f32.mrf.mxu1  ;;  %10715 = vmatmul.mubr.msk.f32.gmra.mxu1 %vm171_vm1, %v3448_v63  ;;  %1138 = vst.msk [vmem:[#allocation4 + $0x40] sm:$0xff] %vm171_vm1, %v1106_v40  ;;  %691 = vst.msk [vmem:[#allocation4 + $0x78] sm:$0xff] %vm171_vm1, %v10366_v3  ;;  %v1109_v7 = vadd.f32 %v10410_v58, %v1077_v4  ;;  %10667 = vmatprep.mubr.msk.f32.mxu0 %vm171_vm1, %v14520_v42  ;;  %v3004_v63 = vld [vmem:[#allocation2 + $0x158] sm:$0xff]  ;;  %v3459_v3 = vld [vmem:[#allocation2 + $0x169] sm:$0xff] }
 0x115   : > { %10717 = vmatprep.mubr.msk.f32.mxu1 %vm171_vm1, %v3449_v2  ;;  %v587_v9 = vpop.f32.mrf.mxu0  ;;  %v1076_v10 = vld [vmem:[#allocation4 + $0x50] sm:$0xff]  ;;  %v3458_v38 = vld [vmem:[#allocation2 + $0x159] sm:$0xff]  ;;  %v3005_v2 = vld [vmem:[#allocation2 + $0x168] sm:$0xff] }
 0x116   : > { %v977_v13 = vpop.f32.mrf.mxu1  ;;  %1141 = vst.msk [vmem:[#allocation4 + $0x58] sm:$0xff] %vm171_vm1, %v1109_v7  ;;  %690 = vst.msk [vmem:[#allocation4 + $0x70] sm:$0xff] %vm171_vm1, %v587_v9  ;;  %v1108_v15 = vadd.f32 %v1076_v10, %v957_v45  ;;  %v3460_v9 = vld [vmem:[#allocation2 + $0x171] sm:$0xff] }
 0x117   : > { %v10369_v16 = vpop.f32.mrf.mxu0  ;;  %v1079_v19 = vld [vmem:[#allocation4 + $0x68] sm:$0xff]  ;;  %10668 = vmatmul.mubr.msk.f32.gmra.mxu0 %vm171_vm1, %v14521_v20 }
 0x118   : > { %v10419_v21 = vpop.f32.mrf.mxu1  ;;  %10718 = vmatmul.mubr.msk.f32.gmra.mxu1 %vm171_vm1, %v3450_v8  ;;  %1140 = vst.msk [vmem:[#allocation4 + $0x50] sm:$0xff] %vm171_vm1, %v1108_v15  ;;  %693 = vst.msk [vmem:[#allocation4 + $0x88] sm:$0xff] %vm171_vm1, %v10369_v16  ;;  %v1111_v22 = vadd.f32 %v10413_v50, %v1079_v19  ;;  %10670 = vmatprep.mubr.msk.f32.mxu0 %vm171_vm1, %v14522_v23  ;;  %v3006_v8 = vld [vmem:[#allocation2 + $0x170] sm:$0xff] }
 0x119   : > { %10720 = vmatprep.mubr.msk.f32.mxu1 %vm171_vm1, %v3451_v14  ;;  %v597_v26 = vpop.f32.mrf.mxu0  ;;  %v1078_v28 = vld [vmem:[#allocation4 + $0x60] sm:$0xff] }
 0x11a   : > { %v987_v52 = vpop.f32.mrf.mxu1  ;;  %1143 = vst.msk [vmem:[#allocation4 + $0x68] sm:$0xff] %vm171_vm1, %v1111_v22  ;;  %692 = vst.msk [vmem:[#allocation4 + $0x80] sm:$0xff] %vm171_vm1, %v597_v26  ;;  %v1110_v57 = vadd.f32 %v1078_v28, %v967_v1  ;;  %v3463_v28 = vld [vmem:[#allocation2 + $0x199] sm:$0xff] }
 0x11b   : > { %v10372_v59 = vpop.f32.mrf.mxu0  ;;  %v1081_v61 = vld [vmem:[#allocation4 + $0x78] sm:$0xff]  ;;  %10671 = vmatmul.mubr.msk.f32.gmra.mxu0 %vm171_vm1, %v14523_v62 }
 0x11c   : > { %v10422_v17 = vpop.f32.mrf.mxu1  ;;  %10721 = vmatmul.mubr.msk.f32.gmra.mxu1 %vm171_vm1, %v3452_v24  ;;  %1142 = vst.msk [vmem:[#allocation4 + $0x60] sm:$0xff] %vm171_vm1, %v1110_v57  ;;  %695 = vst.msk [vmem:[#allocation4 + $0x98] sm:$0xff] %vm171_vm1, %v10372_v59  ;;  %v1113_v31 = vadd.f32 %v10416_v6, %v1081_v61  ;;  %10673 = vmatprep.mubr.msk.f32.mxu0 %vm171_vm1, %v2999_v30  ;;  %v3009_v24 = vld [vmem:[#allocation2 + $0x198] sm:$0xff]  ;;  %v3464_v59 = vld [vmem:[#allocation2 + $0x1a1] sm:$0xff] }
 0x11d   : > { %10723 = vmatprep.mubr.msk.f32.mxu1 %vm171_vm1, %v3453_v55  ;;  %v607_v12 = vpop.f32.mrf.mxu0  ;;  %v1080_v33 = vld [vmem:[#allocation4 + $0x70] sm:$0xff] }
 0x11e   : > { %v997_v27 = vpop.f32.mrf.mxu1  ;;  %1145 = vst.msk [vmem:[#allocation4 + $0x78] sm:$0xff] %vm171_vm1, %v1113_v31  ;;  %694 = vst.msk [vmem:[#allocation4 + $0x90] sm:$0xff] %vm171_vm1, %v607_v12  ;;  %v1112_v51 = vadd.f32 %v1080_v33, %v977_v13  ;;  %v3888_v33 = vld [vmem:[#allocation2 + $0x3a] sm:$0xff] }
 0x11f   : > { %v10375_v54 = vpop.f32.mrf.mxu0  ;;  %v1083_v58 = vld [vmem:[#allocation4 + $0x88] sm:$0xff]  ;;  %10674 = vmatmul.mubr.msk.f32.gmra.mxu0 %vm171_vm1, %v3000_v18 }
 0x120   : > { %v10425_v32 = vpop.f32.mrf.mxu1  ;;  %10724 = vmatmul.mubr.msk.f32.gmra.mxu1 %vm171_vm1, %v3454_v11  ;;  %1144 = vst.msk [vmem:[#allocation4 + $0x70] sm:$0xff] %vm171_vm1, %v1112_v51  ;;  %697 = vst.msk [vmem:[#allocation4 + $0xa8] sm:$0xff] %vm171_vm1, %v10375_v54  ;;  %v1115_v34 = vadd.f32 %v10419_v21, %v1083_v58  ;;  %10676 = vmatprep.mubr.msk.f32.mxu0 %vm171_vm1, %v3001_v25 }
 0x121   : > { %10726 = vmatprep.mubr.msk.f32.mxu1 %vm171_vm1, %v3455_v29  ;;  %v617_v44 = vpop.f32.mrf.mxu0  ;;  %v1082_v45 = vld [vmem:[#allocation4 + $0x80] sm:$0xff]  ;;  %v3889_v29 = vld [vmem:[#allocation2 + $0x4a] sm:$0xff] }
 0x122   : > { %v1007_v47 = vpop.f32.mrf.mxu1  ;;  %1147 = vst.msk [vmem:[#allocation4 + $0x88] sm:$0xff] %vm171_vm1, %v1115_v34  ;;  %696 = vst.msk [vmem:[#allocation4 + $0xa0] sm:$0xff] %vm171_vm1, %v617_v44  ;;  %v1114_v49 = vadd.f32 %v1082_v45, %v987_v52  ;;  %v1521_v34 = vld [vmem:[#allocation4 + $0x8] sm:$0xff]  ;;  %v3890_v45 = vld [vmem:[#allocation2 + $0x52] sm:$0xff] }
 0x123   : > { %v10378_v36 = vpop.f32.mrf.mxu0  ;;  %v1085_v50 = vld [vmem:[#allocation4 + $0x98] sm:$0xff]  ;;  %10677 = vmatmul.mubr.msk.f32.gmra.mxu0 %vm171_vm1, %v3002_v39 }
 0x124   : > { %v10428_v53 = vpop.f32.mrf.mxu1  ;;  %10727 = vmatmul.mubr.msk.f32.gmra.mxu1 %vm171_vm1, %v3456_v43  ;;  %1146 = vst.msk [vmem:[#allocation4 + $0x80] sm:$0xff] %vm171_vm1, %v1114_v49  ;;  %699 = vst.msk [vmem:[#allocation4 + $0xb8] sm:$0xff] %vm171_vm1, %v10378_v36  ;;  %v1117_v60 = vadd.f32 %v10422_v17, %v1085_v50  ;;  %10679 = vmatprep.mubr.msk.f32.mxu0 %vm171_vm1, %v3003_v46  ;;  %v3887_v17 = vld [vmem:[#allocation2 + $0x32] sm:$0xff]  ;;  %v3891_v49 = vld [vmem:[#allocation2 + $0x62] sm:$0xff] }
 0x125   : > { %10729 = vmatprep.mubr.msk.f32.mxu1 %vm171_vm1, %v3457_v48  ;;  %v627_v0 = vpop.f32.mrf.mxu0  ;;  %v1084_v1 = vld [vmem:[#allocation4 + $0x90] sm:$0xff]  ;;  %v1520_v48 = vld [vmem:[#allocation4] sm:$0xff] }
 0x126   : > { %v1017_v40 = vpop.f32.mrf.mxu1  ;;  %1149 = vst.msk [vmem:[#allocation4 + $0x98] sm:$0xff] %vm171_vm1, %v1117_v60  ;;  %698 = vst.msk [vmem:[#allocation4 + $0xb0] sm:$0xff] %vm171_vm1, %v627_v0  ;;  %v1116_v4 = vadd.f32 %v1084_v1, %v997_v27 }
 0x127   : > { %v10381_v5 = vpop.f32.mrf.mxu0  ;;  %v1087_v6 = vld [vmem:[#allocation4 + $0xa8] sm:$0xff]  ;;  %10680 = vmatmul.mubr.msk.f32.gmra.mxu0 %vm171_vm1, %v3004_v63 }
 0x128   : > { %v10431_v7 = vpop.f32.mrf.mxu1  ;;  %10730 = vmatmul.mubr.msk.f32.gmra.mxu1 %vm171_vm1, %v3458_v38  ;;  %1148 = vst.msk [vmem:[#allocation4 + $0x90] sm:$0xff] %vm171_vm1, %v1116_v4  ;;  %701 = vst.msk [vmem:[#allocation4 + $0xc8] sm:$0xff] %vm171_vm1, %v10381_v5  ;;  %v1119_v42 = vadd.f32 %v10425_v32, %v1087_v6  ;;  %10682 = vmatprep.mubr.msk.f32.mxu0 %vm171_vm1, %v3005_v2  ;;  %v1523_v38 = vld [vmem:[#allocation4 + $0x18] sm:$0xff]  ;;  %v1522_v5 = vld [vmem:[#allocation4 + $0x10] sm:$0xff] }
 0x129   : > { %10732 = vmatprep.mubr.msk.f32.mxu1 %vm171_vm1, %v3459_v3  ;;  %v637_v10 = vpop.f32.mrf.mxu0  ;;  %v1086_v13 = vld [vmem:[#allocation4 + $0xa0] sm:$0xff] }
 0x12a   : > { %v1027_v14 = vpop.f32.mrf.mxu1  ;;  %1151 = vst.msk [vmem:[#allocation4 + $0xa8] sm:$0xff] %vm171_vm1, %v1119_v42  ;;  %700 = vst.msk [vmem:[#allocation4 + $0xc0] sm:$0xff] %vm171_vm1, %v637_v10  ;;  %v1118_v15 = vadd.f32 %v1086_v13, %v1007_v47  ;;  %v3893_v6 = vld [vmem:[#allocation2 + $0x7a] sm:$0xff]  ;;  %v1525_v10 = vld [vmem:[#allocation4 + $0x28] sm:$0xff] }
 0x12b   : > { %v10384_v16 = vpop.f32.mrf.mxu0  ;;  %v1089_v19 = vld [vmem:[#allocation4 + $0xb8] sm:$0xff]  ;;  %10683 = vmatmul.mubr.msk.f32.gmra.mxu0 %vm171_vm1, %v3006_v8 }
 0x12c   : > { %v10434_v20 = vpop.f32.mrf.mxu1  ;;  %10733 = vmatmul.mubr.msk.f32.gmra.mxu1 %vm171_vm1, %v3460_v9  ;;  %1150 = vst.msk [vmem:[#allocation4 + $0xa0] sm:$0xff] %vm171_vm1, %v1118_v15  ;;  %703 = vst.msk [vmem:[#allocation4 + $0xd8] sm:$0xff] %vm171_vm1, %v10384_v16  ;;  %v1121_v21 = vadd.f32 %v10428_v53, %v1089_v19  ;;  %10685 = vmatprep.mubr.msk.f32.mxu0 %vm171_vm1, %v12030_v35  ;;  %v3894_v15 = vld [vmem:[#allocation2 + $0x82] sm:$0xff] }
 0x12d   : > { %10735 = vmatprep.mubr.msk.f32.mxu1 %vm171_vm1, %v12175_v37  ;;  %v647_v22 = vpop.f32.mrf.mxu0  ;;  %v1088_v23 = vld [vmem:[#allocation4 + $0xb0] sm:$0xff]  ;;  %v3010_v37 = vld [vmem:[#allocation2 + $0x1a0] sm:$0xff] }
 0x12e   : > { %v1037_v26 = vpop.f32.mrf.mxu1  ;;  %1153 = vst.msk [vmem:[#allocation4 + $0xb8] sm:$0xff] %vm171_vm1, %v1121_v21  ;;  %702 = vst.msk [vmem:[#allocation4 + $0xd0] sm:$0xff] %vm171_vm1, %v647_v22  ;;  %v1120_v30 = vadd.f32 %v1088_v23, %v1017_v40  ;;  %v3892_v40 = vld [vmem:[#allocation2 + $0x6a] sm:$0xff]  ;;  %v1524_v19 = vld [vmem:[#allocation4 + $0x20] sm:$0xff] }
 0x12f   : > { %v10387_v52 = vpop.f32.mrf.mxu0  ;;  %v1091_v55 = vld [vmem:[#allocation4 + $0xc8] sm:$0xff]  ;;  %10686 = vmatmul.mubr.msk.f32.gmra.mxu0 %vm171_vm1, %v12042_v56  ;;  %v3895_v21 = vld [vmem:[#allocation2 + $0x92] sm:$0xff] }
 0x130   : > { %v10437_v57 = vpop.f32.mrf.mxu1  ;;  %10736 = vmatmul.mubr.msk.f32.gmra.mxu1 %vm171_vm1, %v12181_v41  ;;  %1152 = vst.msk [vmem:[#allocation4 + $0xb0] sm:$0xff] %vm171_vm1, %v1120_v30  ;;  %705 = vst.msk [vmem:[#allocation4 + $0xe8] sm:$0xff] %vm171_vm1, %v10387_v52  ;;  %v1123_v35 = vadd.f32 %v10431_v7, %v1091_v55  ;;  %10688 = vmatprep.mubr.msk.f32.mxu0 %vm171_vm1, %v3009_v24 }
 0x131   : > { %10738 = vmatprep.mubr.msk.f32.mxu1 %vm171_vm1, %v3463_v28  ;;  %v657_v61 = vpop.f32.mrf.mxu0  ;;  %v1090_v62 = vld [vmem:[#allocation4 + $0xc0] sm:$0xff]  ;;  %v1527_v28 = vld [vmem:[#allocation4 + $0x38] sm:$0xff] }
 0x132   : > { %v1047_v31 = vpop.f32.mrf.mxu1  ;;  %1155 = vst.msk [vmem:[#allocation4 + $0xc8] sm:$0xff] %vm171_vm1, %v1123_v35  ;;  %704 = vst.msk [vmem:[#allocation4 + $0xe0] sm:$0xff] %vm171_vm1, %v657_v61  ;;  %v1122_v56 = vadd.f32 %v1090_v62, %v1027_v14  ;;  %v3896_v35 = vld [vmem:[#allocation2 + $0x9a] sm:$0xff]  ;;  %v3897_v62 = vld [vmem:[#allocation2 + $0xaa] sm:$0xff] }
 0x133   : > { %v10390_v41 = vpop.f32.mrf.mxu0  ;;  %v1093_v18 = vld [vmem:[#allocation4 + $0xd8] sm:$0xff]  ;;  %10689 = vmatmul.mubr.msk.f32.gmra.mxu0 %vm171_vm1, %v3010_v37 }
 0x134   : > { %v10440_v11 = vpop.f32.mrf.mxu1  ;;  %10739 = vmatmul.mubr.msk.f32.gmra.mxu1 %vm171_vm1, %v3464_v59  ;;  %1154 = vst.msk [vmem:[#allocation4 + $0xc0] sm:$0xff] %vm171_vm1, %v1122_v56  ;;  %707 = vst.msk [vmem:[#allocation4 + $0xf8] sm:$0xff] %vm171_vm1, %v10390_v41  ;;  %v1125_v12 = vadd.f32 %v10434_v20, %v1093_v18  ;;  %10743 = vmatprep.mubr.msk.f32.mxu0 %vm171_vm1, %v3887_v17  ;;  %v1526_v59 = vld [vmem:[#allocation4 + $0x30] sm:$0xff]  ;;  %v1529_v18 = vld [vmem:[#allocation4 + $0x48] sm:$0xff] }
 0x135   : > { %v667_v25 = vpop.f32.mrf.mxu0  ;;  %v1092_v27 = vld [vmem:[#allocation4 + $0xd0] sm:$0xff] }
 0x136   : > { %v1057_v51 = vpop.f32.mrf.mxu1  ;;  %1157 = vst.msk [vmem:[#allocation4 + $0xd8] sm:$0xff] %vm171_vm1, %v1125_v12  ;;  %706 = vst.msk [vmem:[#allocation4 + $0xf0] sm:$0xff] %vm171_vm1, %v667_v25  ;;  %v1124_v54 = vadd.f32 %v1092_v27, %v1037_v26  ;;  %v3898_v27 = vld [vmem:[#allocation2 + $0xb2] sm:$0xff] }
 0x137   : > { %v1095_v58 = vld [vmem:[#allocation4 + $0xe8] sm:$0xff]  ;;  %v10445_v32 = vpop.f32.mrf.mxu0  ;;  %10744 = vmatmul.mubr.msk.f32.vlgmr.msra.gmra.mxu0 %vm171_vm1, %v3888_v33 }
 0x138   : > { %v10495_v39 = vpop.f32.mrf.mxu1  ;;  %1156 = vst.msk [vmem:[#allocation4 + $0xd0] sm:$0xff] %vm171_vm1, %v1124_v54  ;;  %v1127_v43 = vadd.f32 %v10437_v57, %v1095_v58  ;;  %v1553_v44 = vadd.f32 %v10445_v32, %v1521_v34  ;;  %10746 = vmatprep.mubr.msk.f32.mxu0 %vm171_vm1, %v3889_v29  ;;  %v3899_v58 = vld [vmem:[#allocation2 + $0xc2] sm:$0xff] }
 0x139   : > { %v1094_v46 = vld [vmem:[#allocation4 + $0xe0] sm:$0xff]  ;;  %v1361_v47 = vpop.f32.mrf.mxu0 }
 0x13a   : > { %v1815_v36 = vpop.f32.mrf.mxu1  ;;  %1159 = vst.msk [vmem:[#allocation4 + $0xe8] sm:$0xff] %vm171_vm1, %v1127_v43  ;;  %1585 = vst.msk [vmem:[#allocation4 + $0x8] sm:$0xff] %vm171_vm1, %v1553_v44  ;;  %v1126_v50 = vadd.f32 %v1094_v46, %v1047_v31  ;;  %v1552_v53 = vadd.f32 %v1520_v48, %v1361_v47  ;;  %v1531_v44 = vld [vmem:[#allocation4 + $0x58] sm:$0xff] }
 0x13b   : > { %v1097_v60 = vld [vmem:[#allocation4 + $0xf8] sm:$0xff]  ;;  %v10448_v63 = vpop.f32.mrf.mxu0  ;;  %10747 = vmatmul.mubr.msk.f32.gmra.mxu0 %vm171_vm1, %v3890_v45 }
 0x13c   : > { %v10498_v0 = vpop.f32.mrf.mxu1  ;;  %1158 = vst.msk [vmem:[#allocation4 + $0xe0] sm:$0xff] %vm171_vm1, %v1126_v50  ;;  %1584 = vst.msk [vmem:[#allocation4] sm:$0xff] %vm171_vm1, %v1552_v53  ;;  %v1129_v1 = vadd.f32 %v10440_v11, %v1097_v60  ;;  %v1555_v2 = vadd.f32 %v10448_v63, %v1523_v38  ;;  %10749 = vmatprep.mubr.msk.f32.mxu0 %vm171_vm1, %v3891_v49  ;;  %v3900_v49 = vld [vmem:[#allocation2 + $0xca] sm:$0xff]  ;;  %v3901_v60 = vld [vmem:[#allocation2 + $0xda] sm:$0xff] }
 0x13d   : > { %v1096_v3 = vld [vmem:[#allocation4 + $0xf0] sm:$0xff]  ;;  %v1371_v4 = vpop.f32.mrf.mxu0 }
 0x13e   : > { %v1825_v7 = vpop.f32.mrf.mxu1  ;;  %1161 = vst.msk [vmem:[#allocation4 + $0xf8] sm:$0xff] %vm171_vm1, %v1129_v1  ;;  %1587 = vst.msk [vmem:[#allocation4 + $0x18] sm:$0xff] %vm171_vm1, %v1555_v2  ;;  %v1128_v42 = vadd.f32 %v1096_v3, %v1057_v51  ;;  %v1554_v8 = vadd.f32 %v1522_v5, %v1371_v4  ;;  %v1528_v51 = vld [vmem:[#allocation4 + $0x40] sm:$0xff]  ;;  %v1530_v50 = vld [vmem:[#allocation4 + $0x50] sm:$0xff] }
 0x13f   : > { %v10451_v9 = vpop.f32.mrf.mxu0  ;;  %10750 = vmatmul.mubr.msk.f32.gmra.mxu0 %vm171_vm1, %v3892_v40  ;;  %v1533_v2 = vld [vmem:[#allocation4 + $0x68] sm:$0xff] }
 0x140   : > { %v10501_v13 = vpop.f32.mrf.mxu1  ;;  %1160 = vst.msk [vmem:[#allocation4 + $0xf0] sm:$0xff] %vm171_vm1, %v1128_v42  ;;  %1586 = vst.msk [vmem:[#allocation4 + $0x10] sm:$0xff] %vm171_vm1, %v1554_v8  ;;  %v1557_v14 = vadd.f32 %v10451_v9, %v1525_v10  ;;  %10752 = vmatprep.mubr.msk.f32.mxu0 %vm171_vm1, %v3893_v6  ;;  %v3902_v6 = vld [vmem:[#allocation2 + $0xe2] sm:$0xff]  ;;  %v3903_v9 = vld [vmem:[#allocation2 + $0xf2] sm:$0xff] }
 0x141   : > { %v1381_v16 = vpop.f32.mrf.mxu0  ;;  %v1975_v20 = vld [vmem:[#allocation4 + $0x8] sm:$0xff]  ;;  %v1532_v42 = vld [vmem:[#allocation4 + $0x60] sm:$0xff] }
 0x142   : > { %v1835_v22 = vpop.f32.mrf.mxu1  ;;  %1589 = vst.msk [vmem:[#allocation4 + $0x28] sm:$0xff] %vm171_vm1, %v1557_v14  ;;  %v1556_v23 = vadd.f32 %v1524_v19, %v1381_v16  ;;  %v2007_v24 = vadd.f32 %v10495_v39, %v1975_v20  ;;  %v1535_v16 = vld [vmem:[#allocation4 + $0x78] sm:$0xff] }
 0x143   : > { %v10454_v26 = vpop.f32.mrf.mxu0  ;;  %v1974_v30 = vld [vmem:[#allocation4] sm:$0xff]  ;;  %10753 = vmatmul.mubr.msk.f32.gmra.mxu0 %vm171_vm1, %v3894_v15 }
 0x144   : > { %v10504_v52 = vpop.f32.mrf.mxu1  ;;  %1588 = vst.msk [vmem:[#allocation4 + $0x20] sm:$0xff] %vm171_vm1, %v1556_v23  ;;  %2039 = vst.msk [vmem:[#allocation4 + $0x8] sm:$0xff] %vm171_vm1, %v2007_v24  ;;  %v1559_v55 = vadd.f32 %v10454_v26, %v1527_v28  ;;  %v2006_v57 = vadd.f32 %v1974_v30, %v1815_v36  ;;  %10755 = vmatprep.mubr.msk.f32.mxu0 %vm171_vm1, %v3895_v21  ;;  %v3904_v23 = vld [vmem:[#allocation2 + $0xfa] sm:$0xff]  ;;  %v1534_v26 = vld [vmem:[#allocation4 + $0x70] sm:$0xff] }
 0x145   : > { %v1391_v37 = vpop.f32.mrf.mxu0  ;;  %v1977_v61 = vld [vmem:[#allocation4 + $0x18] sm:$0xff]  ;;  %v3905_v30 = vld [vmem:[#allocation2 + $0x10a] sm:$0xff] }
 0x146   : > { %v1845_v17 = vpop.f32.mrf.mxu1  ;;  %1591 = vst.msk [vmem:[#allocation4 + $0x38] sm:$0xff] %vm171_vm1, %v1559_v55  ;;  %2038 = vst.msk [vmem:[#allocation4] sm:$0xff] %vm171_vm1, %v2006_v57  ;;  %v1558_v31 = vadd.f32 %v1526_v59, %v1391_v37  ;;  %v2009_v56 = vadd.f32 %v10498_v0, %v1977_v61  ;;  %v1537_v37 = vld [vmem:[#allocation4 + $0x88] sm:$0xff] }
 0x147   : > { %v10457_v41 = vpop.f32.mrf.mxu0  ;;  %v1976_v11 = vld [vmem:[#allocation4 + $0x10] sm:$0xff]  ;;  %10756 = vmatmul.mubr.msk.f32.gmra.mxu0 %vm171_vm1, %v3896_v35 }
 0x148   : > { %v10507_v12 = vpop.f32.mrf.mxu1  ;;  %1590 = vst.msk [vmem:[#allocation4 + $0x30] sm:$0xff] %vm171_vm1, %v1558_v31  ;;  %2041 = vst.msk [vmem:[#allocation4 + $0x18] sm:$0xff] %vm171_vm1, %v2009_v56  ;;  %v1561_v33 = vadd.f32 %v10457_v41, %v1529_v18  ;;  %v2008_v25 = vadd.f32 %v1976_v11, %v1825_v7  ;;  %10758 = vmatprep.mubr.msk.f32.mxu0 %vm171_vm1, %v3897_v62  ;;  %v3906_v31 = vld [vmem:[#allocation2 + $0x112] sm:$0xff]  ;;  %v1536_v41 = vld [vmem:[#allocation4 + $0x80] sm:$0xff] }
 0x149   : > { %v1401_v29 = vpop.f32.mrf.mxu0  ;;  %v1979_v54 = vld [vmem:[#allocation4 + $0x28] sm:$0xff] }
 0x14a   : > { %v1855_v32 = vpop.f32.mrf.mxu1  ;;  %1593 = vst.msk [vmem:[#allocation4 + $0x48] sm:$0xff] %vm171_vm1, %v1561_v33  ;;  %2040 = vst.msk [vmem:[#allocation4 + $0x10] sm:$0xff] %vm171_vm1, %v2008_v25  ;;  %v1560_v34 = vadd.f32 %v1528_v51, %v1401_v29  ;;  %v2011_v39 = vadd.f32 %v10501_v13, %v1979_v54  ;;  %v3907_v11 = vld [vmem:[#allocation2 + $0x122] sm:$0xff]  ;;  %v1539_v29 = vld [vmem:[#allocation4 + $0x98] sm:$0xff] }
 0x14b   : > { %v10460_v43 = vpop.f32.mrf.mxu0  ;;  %v1978_v45 = vld [vmem:[#allocation4 + $0x20] sm:$0xff]  ;;  %10759 = vmatmul.mubr.msk.f32.gmra.mxu0 %vm171_vm1, %v3898_v27 }
 0x14c   : > { %v10510_v46 = vpop.f32.mrf.mxu1  ;;  %1592 = vst.msk [vmem:[#allocation4 + $0x40] sm:$0xff] %vm171_vm1, %v1560_v34  ;;  %2043 = vst.msk [vmem:[#allocation4 + $0x28] sm:$0xff] %vm171_vm1, %v2011_v39  ;;  %v1563_v47 = vadd.f32 %v10460_v43, %v1531_v44  ;;  %v2010_v48 = vadd.f32 %v1978_v45, %v1835_v22  ;;  %10761 = vmatprep.mubr.msk.f32.mxu0 %vm171_vm1, %v3899_v58  ;;  %v3908_v34 = vld [vmem:[#allocation2 + $0x12a] sm:$0xff]  ;;  %v3909_v45 = vld [vmem:[#allocation2 + $0x13a] sm:$0xff] }
 0x14d   : > { %v1411_v36 = vpop.f32.mrf.mxu0  ;;  %v1981_v53 = vld [vmem:[#allocation4 + $0x38] sm:$0xff]  ;;  %v1538_v43 = vld [vmem:[#allocation4 + $0x90] sm:$0xff] }
 0x14e   : > { %v1865_v63 = vpop.f32.mrf.mxu1  ;;  %1595 = vst.msk [vmem:[#allocation4 + $0x58] sm:$0xff] %vm171_vm1, %v1563_v47  ;;  %2042 = vst.msk [vmem:[#allocation4 + $0x20] sm:$0xff] %vm171_vm1, %v2010_v48  ;;  %v1562_v38 = vadd.f32 %v1530_v50, %v1411_v36  ;;  %v2013_v0 = vadd.f32 %v10504_v52, %v1981_v53  ;;  %v1541_v36 = vld [vmem:[#allocation4 + $0xa8] sm:$0xff] }
 0x14f   : > { %v10463_v1 = vpop.f32.mrf.mxu0  ;;  %v1980_v40 = vld [vmem:[#allocation4 + $0x30] sm:$0xff]  ;;  %10762 = vmatmul.mubr.msk.f32.gmra.mxu0 %vm171_vm1, %v3900_v49 }
 0x150   : > { %v10513_v3 = vpop.f32.mrf.mxu1  ;;  %1594 = vst.msk [vmem:[#allocation4 + $0x50] sm:$0xff] %vm171_vm1, %v1562_v38  ;;  %2045 = vst.msk [vmem:[#allocation4 + $0x38] sm:$0xff] %vm171_vm1, %v2013_v0  ;;  %v1565_v4 = vadd.f32 %v10463_v1, %v1533_v2  ;;  %v2012_v5 = vadd.f32 %v1980_v40, %v1845_v17  ;;  %10764 = vmatprep.mubr.msk.f32.mxu0 %vm171_vm1, %v3901_v60  ;;  %v3910_v38 = vld [vmem:[#allocation2 + $0x142] sm:$0xff]  ;;  %v3911_v40 = vld [vmem:[#allocation2 + $0x152] sm:$0xff] }
 0x151   : > { %v1421_v7 = vpop.f32.mrf.mxu0  ;;  %v1983_v8 = vld [vmem:[#allocation4 + $0x48] sm:$0xff]  ;;  %v1540_v1 = vld [vmem:[#allocation4 + $0xa0] sm:$0xff] }
 0x152   : > { %v1875_v10 = vpop.f32.mrf.mxu1  ;;  %1597 = vst.msk [vmem:[#allocation4 + $0x68] sm:$0xff] %vm171_vm1, %v1565_v4  ;;  %2044 = vst.msk [vmem:[#allocation4 + $0x30] sm:$0xff] %vm171_vm1, %v2012_v5  ;;  %v1564_v13 = vadd.f32 %v1532_v42, %v1421_v7  ;;  %v2015_v14 = vadd.f32 %v10507_v12, %v1983_v8  ;;  %v1543_v7 = vld [vmem:[#allocation4 + $0xb8] sm:$0xff] }
 0x153   : > { %v10466_v15 = vpop.f32.mrf.mxu0  ;;  %v1982_v19 = vld [vmem:[#allocation4 + $0x40] sm:$0xff]  ;;  %10765 = vmatmul.mubr.msk.f32.gmra.mxu0 %vm171_vm1, %v3902_v6 }
 0x154   : > { %v10516_v20 = vpop.f32.mrf.mxu1  ;;  %1596 = vst.msk [vmem:[#allocation4 + $0x60] sm:$0xff] %vm171_vm1, %v1564_v13  ;;  %2047 = vst.msk [vmem:[#allocation4 + $0x48] sm:$0xff] %vm171_vm1, %v2015_v14  ;;  %v1567_v21 = vadd.f32 %v10466_v15, %v1535_v16  ;;  %v2014_v22 = vadd.f32 %v1982_v19, %v1855_v32  ;;  %10767 = vmatprep.mubr.msk.f32.mxu0 %vm171_vm1, %v3903_v9  ;;  %v3912_v13 = vld [vmem:[#allocation2 + $0x15a] sm:$0xff]  ;;  %v1542_v15 = vld [vmem:[#allocation4 + $0xb0] sm:$0xff] }
 0x155   : > { %v1431_v24 = vpop.f32.mrf.mxu0  ;;  %v1985_v28 = vld [vmem:[#allocation4 + $0x58] sm:$0xff]  ;;  %v3913_v19 = vld [vmem:[#allocation2 + $0x16a] sm:$0xff] }
 0x156   : > { %v1885_v52 = vpop.f32.mrf.mxu1  ;;  %1599 = vst.msk [vmem:[#allocation4 + $0x78] sm:$0xff] %vm171_vm1, %v1567_v21  ;;  %2046 = vst.msk [vmem:[#allocation4 + $0x40] sm:$0xff] %vm171_vm1, %v2014_v22  ;;  %v1566_v55 = vadd.f32 %v1534_v26, %v1431_v24  ;;  %v2017_v57 = vadd.f32 %v10510_v46, %v1985_v28  ;;  %v1545_v24 = vld [vmem:[#allocation4 + $0xc8] sm:$0xff] }
 0x157   : > { %v10469_v35 = vpop.f32.mrf.mxu0  ;;  %v1984_v59 = vld [vmem:[#allocation4 + $0x50] sm:$0xff]  ;;  %10768 = vmatmul.mubr.msk.f32.gmra.mxu0 %vm171_vm1, %v3904_v23 }
 0x158   : > { %v10519_v61 = vpop.f32.mrf.mxu1  ;;  %1598 = vst.msk [vmem:[#allocation4 + $0x70] sm:$0xff] %vm171_vm1, %v1566_v55  ;;  %2049 = vst.msk [vmem:[#allocation4 + $0x58] sm:$0xff] %vm171_vm1, %v2017_v57  ;;  %v1569_v62 = vadd.f32 %v10469_v35, %v1537_v37  ;;  %v2016_v17 = vadd.f32 %v1984_v59, %v1865_v63  ;;  %10770 = vmatprep.mubr.msk.f32.mxu0 %vm171_vm1, %v3905_v30  ;;  %v3914_v55 = vld [vmem:[#allocation2 + $0x172] sm:$0xff]  ;;  %v1544_v35 = vld [vmem:[#allocation4 + $0xc0] sm:$0xff] }
 0x159   : > { %v1441_v56 = vpop.f32.mrf.mxu0  ;;  %v1987_v18 = vld [vmem:[#allocation4 + $0x68] sm:$0xff] }
 0x15a   : > { %v1895_v12 = vpop.f32.mrf.mxu1  ;;  %1601 = vst.msk [vmem:[#allocation4 + $0x88] sm:$0xff] %vm171_vm1, %v1569_v62  ;;  %2048 = vst.msk [vmem:[#allocation4 + $0x50] sm:$0xff] %vm171_vm1, %v2016_v17  ;;  %v1568_v33 = vadd.f32 %v1536_v41, %v1441_v56  ;;  %v2019_v25 = vadd.f32 %v10513_v3, %v1987_v18  ;;  %v3915_v59 = vld [vmem:[#allocation2 + $0x182] sm:$0xff]  ;;  %v1547_v56 = vld [vmem:[#allocation4 + $0xd8] sm:$0xff] }
 0x15b   : > { %v10472_v27 = vpop.f32.mrf.mxu0  ;;  %v1986_v51 = vld [vmem:[#allocation4 + $0x60] sm:$0xff]  ;;  %10771 = vmatmul.mubr.msk.f32.gmra.mxu0 %vm171_vm1, %v3906_v31 }
 0x15c   : > { %v10522_v54 = vpop.f32.mrf.mxu1  ;;  %1600 = vst.msk [vmem:[#allocation4 + $0x80] sm:$0xff] %vm171_vm1, %v1568_v33  ;;  %2051 = vst.msk [vmem:[#allocation4 + $0x68] sm:$0xff] %vm171_vm1, %v2019_v25  ;;  %v1571_v58 = vadd.f32 %v10472_v27, %v1539_v29  ;;  %v2018_v32 = vadd.f32 %v1986_v51, %v1875_v10  ;;  %10773 = vmatprep.mubr.msk.f32.mxu0 %vm171_vm1, %v3907_v11  ;;  %v3916_v33 = vld [vmem:[#allocation2 + $0x18a] sm:$0xff]  ;;  %v3917_v51 = vld [vmem:[#allocation2 + $0x19a] sm:$0xff] }
 0x15d   : > { %v1451_v39 = vpop.f32.mrf.mxu0  ;;  %v1989_v44 = vld [vmem:[#allocation4 + $0x78] sm:$0xff]  ;;  %v1546_v27 = vld [vmem:[#allocation4 + $0xd0] sm:$0xff] }
 0x15e   : > { %v1905_v46 = vpop.f32.mrf.mxu1  ;;  %1603 = vst.msk [vmem:[#allocation4 + $0x98] sm:$0xff] %vm171_vm1, %v1571_v58  ;;  %2050 = vst.msk [vmem:[#allocation4 + $0x60] sm:$0xff] %vm171_vm1, %v2018_v32  ;;  %v1570_v47 = vadd.f32 %v1538_v43, %v1451_v39  ;;  %v2021_v48 = vadd.f32 %v10516_v20, %v1989_v44  ;;  %v1549_v39 = vld [vmem:[#allocation4 + $0xe8] sm:$0xff] }
 0x15f   : > { %v10475_v49 = vpop.f32.mrf.mxu0  ;;  %v1988_v50 = vld [vmem:[#allocation4 + $0x70] sm:$0xff]  ;;  %10774 = vmatmul.mubr.msk.f32.gmra.mxu0 %vm171_vm1, %v3908_v34 }
 0x160   : > { %v10525_v53 = vpop.f32.mrf.mxu1  ;;  %1602 = vst.msk [vmem:[#allocation4 + $0x90] sm:$0xff] %vm171_vm1, %v1570_v47  ;;  %2053 = vst.msk [vmem:[#allocation4 + $0x78] sm:$0xff] %vm171_vm1, %v2021_v48  ;;  %v1573_v60 = vadd.f32 %v10475_v49, %v1541_v36  ;;  %v2020_v63 = vadd.f32 %v1988_v50, %v1885_v52  ;;  %10776 = vmatprep.mubr.msk.f32.mxu0 %vm171_vm1, %v3909_v45  ;;  %v3918_v47 = vld [vmem:[#allocation2 + $0x1a2] sm:$0xff] }
 0x161   : > { %v1461_v0 = vpop.f32.mrf.mxu0  ;;  %v1991_v2 = vld [vmem:[#allocation4 + $0x88] sm:$0xff]  ;;  %v1548_v49 = vld [vmem:[#allocation4 + $0xe0] sm:$0xff] }
 0x162   : > { %v1915_v3 = vpop.f32.mrf.mxu1  ;;  %1605 = vst.msk [vmem:[#allocation4 + $0xa8] sm:$0xff] %vm171_vm1, %v1573_v60  ;;  %2052 = vst.msk [vmem:[#allocation4 + $0x70] sm:$0xff] %vm171_vm1, %v2020_v63  ;;  %v1572_v4 = vadd.f32 %v1540_v1, %v1461_v0  ;;  %v2023_v5 = vadd.f32 %v10519_v61, %v1991_v2 }
 0x163   : > { %v10478_v6 = vpop.f32.mrf.mxu0  ;;  %v1990_v42 = vld [vmem:[#allocation4 + $0x80] sm:$0xff]  ;;  %10777 = vmatmul.mubr.msk.f32.gmra.mxu0 %vm171_vm1, %v3910_v38  ;;  %v1551_v38 = vld [vmem:[#allocation4 + $0xf8] sm:$0xff] }
 0x164   : > { %v10528_v8 = vpop.f32.mrf.mxu1  ;;  %1604 = vst.msk [vmem:[#allocation4 + $0xa0] sm:$0xff] %vm171_vm1, %v1572_v4  ;;  %2055 = vst.msk [vmem:[#allocation4 + $0x88] sm:$0xff] %vm171_vm1, %v2023_v5  ;;  %v1575_v9 = vadd.f32 %v10478_v6, %v1543_v7  ;;  %v2022_v10 = vadd.f32 %v1990_v42, %v1895_v12  ;;  %10779 = vmatprep.mubr.msk.f32.mxu0 %vm171_vm1, %v3911_v40  ;;  %v1550_v4 = vld [vmem:[#allocation4 + $0xf0] sm:$0xff] }
 0x165   : > { %v1471_v14 = vpop.f32.mrf.mxu0  ;;  %v1993_v16 = vld [vmem:[#allocation4 + $0x98] sm:$0xff] }
 0x166   : > { %v1925_v20 = vpop.f32.mrf.mxu1  ;;  %1607 = vst.msk [vmem:[#allocation4 + $0xb8] sm:$0xff] %vm171_vm1, %v1575_v9  ;;  %2054 = vst.msk [vmem:[#allocation4 + $0x80] sm:$0xff] %vm171_vm1, %v2022_v10  ;;  %v1574_v21 = vadd.f32 %v1542_v15, %v1471_v14  ;;  %v2025_v22 = vadd.f32 %v10522_v54, %v1993_v16  ;;  %v2429_v10 = vld [vmem:[#allocation4 + $0x8] sm:$0xff] }
 0x167   : > { %v10481_v23 = vpop.f32.mrf.mxu0  ;;  %v1992_v26 = vld [vmem:[#allocation4 + $0x90] sm:$0xff]  ;;  %10780 = vmatmul.mubr.msk.f32.gmra.mxu0 %vm171_vm1, %v3912_v13 }
 0x168   : > { %v10531_v28 = vpop.f32.mrf.mxu1  ;;  %1606 = vst.msk [vmem:[#allocation4 + $0xb0] sm:$0xff] %vm171_vm1, %v1574_v21  ;;  %2057 = vst.msk [vmem:[#allocation4 + $0x98] sm:$0xff] %vm171_vm1, %v2025_v22  ;;  %v1577_v30 = vadd.f32 %v10481_v23, %v1545_v24  ;;  %v2024_v52 = vadd.f32 %v1992_v26, %v1905_v46  ;;  %10782 = vmatprep.mubr.msk.f32.mxu0 %vm171_vm1, %v3913_v19 }
 0x169   : > { %v1481_v57 = vpop.f32.mrf.mxu0  ;;  %v1995_v37 = vld [vmem:[#allocation4 + $0xa8] sm:$0xff] }
 0x16a   : > { %v1935_v61 = vpop.f32.mrf.mxu1  ;;  %1609 = vst.msk [vmem:[#allocation4 + $0xc8] sm:$0xff] %vm171_vm1, %v1577_v30  ;;  %2056 = vst.msk [vmem:[#allocation4 + $0x90] sm:$0xff] %vm171_vm1, %v2024_v52  ;;  %v1576_v62 = vadd.f32 %v1544_v35, %v1481_v57  ;;  %v2027_v17 = vadd.f32 %v10525_v53, %v1995_v37  ;;  %v2430_v37 = vld [vmem:[#allocation4 + $0x10] sm:$0xff] }
 0x16b   : > { %v10484_v31 = vpop.f32.mrf.mxu0  ;;  %v1994_v41 = vld [vmem:[#allocation4 + $0xa0] sm:$0xff]  ;;  %10783 = vmatmul.mubr.msk.f32.gmra.mxu0 %vm171_vm1, %v3914_v55 }
 0x16c   : > { %v10534_v18 = vpop.f32.mrf.mxu1  ;;  %1608 = vst.msk [vmem:[#allocation4 + $0xc0] sm:$0xff] %vm171_vm1, %v1576_v62  ;;  %2059 = vst.msk [vmem:[#allocation4 + $0xa8] sm:$0xff] %vm171_vm1, %v2027_v17  ;;  %v1579_v11 = vadd.f32 %v10484_v31, %v1547_v56  ;;  %v2026_v12 = vadd.f32 %v1994_v41, %v1915_v3  ;;  %10785 = vmatprep.mubr.msk.f32.mxu0 %vm171_vm1, %v3915_v59  ;;  %v2433_v56 = vld [vmem:[#allocation4 + $0x28] sm:$0xff] }
 0x16d   : > { %v1491_v25 = vpop.f32.mrf.mxu0  ;;  %v1997_v29 = vld [vmem:[#allocation4 + $0xb8] sm:$0xff] }
 0x16e   : > { %v1945_v54 = vpop.f32.mrf.mxu1  ;;  %1611 = vst.msk [vmem:[#allocation4 + $0xd8] sm:$0xff] %vm171_vm1, %v1579_v11  ;;  %2058 = vst.msk [vmem:[#allocation4 + $0xa0] sm:$0xff] %vm171_vm1, %v2026_v12  ;;  %v1578_v58 = vadd.f32 %v1546_v27, %v1491_v25  ;;  %v2029_v32 = vadd.f32 %v10528_v8, %v1997_v29 }
 0x16f   : > { %v10487_v34 = vpop.f32.mrf.mxu0  ;;  %v1996_v43 = vld [vmem:[#allocation4 + $0xb0] sm:$0xff]  ;;  %10786 = vmatmul.mubr.msk.f32.gmra.mxu0 %vm171_vm1, %v3916_v33  ;;  %v2432_v33 = vld [vmem:[#allocation4 + $0x20] sm:$0xff] }
 0x170   : > { %v10537_v44 = vpop.f32.mrf.mxu1  ;;  %1610 = vst.msk [vmem:[#allocation4 + $0xd0] sm:$0xff] %vm171_vm1, %v1578_v58  ;;  %2061 = vst.msk [vmem:[#allocation4 + $0xb8] sm:$0xff] %vm171_vm1, %v2029_v32  ;;  %v1581_v45 = vadd.f32 %v10487_v34, %v1549_v39  ;;  %v2028_v46 = vadd.f32 %v1996_v43, %v1925_v20  ;;  %10788 = vmatprep.mubr.msk.f32.mxu0 %vm171_vm1, %v3917_v51  ;;  %v2428_v20 = vld [vmem:[#allocation4] sm:$0xff]  ;;  %v2435_v58 = vld [vmem:[#allocation4 + $0x38] sm:$0xff] }
 0x171   : > { %v1501_v48 = vpop.f32.mrf.mxu0  ;;  %v1999_v36 = vld [vmem:[#allocation4 + $0xc8] sm:$0xff] }
 0x172   : > { %v1955_v50 = vpop.f32.mrf.mxu1  ;;  %1613 = vst.msk [vmem:[#allocation4 + $0xe8] sm:$0xff] %vm171_vm1, %v1581_v45  ;;  %2060 = vst.msk [vmem:[#allocation4 + $0xb0] sm:$0xff] %vm171_vm1, %v2028_v46  ;;  %v1580_v53 = vadd.f32 %v1548_v49, %v1501_v48  ;;  %v2031_v60 = vadd.f32 %v10531_v28, %v1999_v36  ;;  %v2431_v28 = vld [vmem:[#allocation4 + $0x18] sm:$0xff]  ;;  %v2434_v45 = vld [vmem:[#allocation4 + $0x30] sm:$0xff] }
 0x173   : > { %v10490_v63 = vpop.f32.mrf.mxu0  ;;  %v1998_v0 = vld [vmem:[#allocation4 + $0xc0] sm:$0xff]  ;;  %10789 = vmatmul.mubr.msk.f32.gmra.mxu0 %vm171_vm1, %v3918_v47 }
 0x174   : > { %v10540_v1 = vpop.f32.mrf.mxu1  ;;  %1612 = vst.msk [vmem:[#allocation4 + $0xe0] sm:$0xff] %vm171_vm1, %v1580_v53  ;;  %2063 = vst.msk [vmem:[#allocation4 + $0xc8] sm:$0xff] %vm171_vm1, %v2031_v60  ;;  %v1583_v2 = vadd.f32 %v10490_v63, %v1551_v38  ;;  %v2030_v40 = vadd.f32 %v1998_v0, %v1935_v61 }
 0x175   : > { %v1511_v3 = vpop.f32.mrf.mxu0  ;;  %v2001_v5 = vld [vmem:[#allocation4 + $0xd8] sm:$0xff] }
 0x176   : > { %v1965_v6 = vpop.f32.mrf.mxu1  ;;  %1615 = vst.msk [vmem:[#allocation4 + $0xf8] sm:$0xff] %vm171_vm1, %v1583_v2  ;;  %2062 = vst.msk [vmem:[#allocation4 + $0xc0] sm:$0xff] %vm171_vm1, %v2030_v40  ;;  %v1582_v7 = vadd.f32 %v1550_v4, %v1511_v3  ;;  %v2033_v42 = vadd.f32 %v10534_v18, %v2001_v5 }
 0x177   : > { %v2000_v8 = vld [vmem:[#allocation4 + $0xd0] sm:$0xff]  ;;  %v10545_v9 = vpop.f32.mrf.mxu0 }
 0x178   : > { %v10595_v13 = vpop.f32.mrf.mxu1  ;;  %1614 = vst.msk [vmem:[#allocation4 + $0xf0] sm:$0xff] %vm171_vm1, %v1582_v7  ;;  %2065 = vst.msk [vmem:[#allocation4 + $0xd8] sm:$0xff] %vm171_vm1, %v2033_v42  ;;  %v2032_v14 = vadd.f32 %v2000_v8, %v1945_v54  ;;  %v2461_v15 = vadd.f32 %v10545_v9, %v2429_v10 }
 0x179   : > { %v2003_v16 = vld [vmem:[#allocation4 + $0xe8] sm:$0xff]  ;;  %v2269_v19 = vpop.f32.mrf.mxu0 }
 0x17a   : > { %v2723_v21 = vpop.f32.mrf.mxu1  ;;  %2064 = vst.msk [vmem:[#allocation4 + $0xd0] sm:$0xff] %vm171_vm1, %v2032_v14  ;;  %2493 = vst.msk [vmem:[#allocation4 + $0x8] sm:$0xff] %vm171_vm1, %v2461_v15  ;;  %v2035_v22 = vadd.f32 %v10537_v44, %v2003_v16  ;;  %v2460_v23 = vadd.f32 %v2428_v20, %v2269_v19 }
 0x17b   : > { %v2002_v24 = vld [vmem:[#allocation4 + $0xe0] sm:$0xff]  ;;  %v10548_v26 = vpop.f32.mrf.mxu0 }
 0x17c   : > { %v10598_v30 = vpop.f32.mrf.mxu1  ;;  %2067 = vst.msk [vmem:[#allocation4 + $0xe8] sm:$0xff] %vm171_vm1, %v2035_v22  ;;  %2492 = vst.msk [vmem:[#allocation4] sm:$0xff] %vm171_vm1, %v2460_v23  ;;  %v2034_v52 = vadd.f32 %v2002_v24, %v1955_v50  ;;  %v2463_v55 = vadd.f32 %v10548_v26, %v2431_v28  ;;  %v2437_v50 = vld [vmem:[#allocation4 + $0x48] sm:$0xff] }
 0x17d   : > { %v2005_v57 = vld [vmem:[#allocation4 + $0xf8] sm:$0xff]  ;;  %v2279_v35 = vpop.f32.mrf.mxu0 }
 0x17e   : > { %v2733_v59 = vpop.f32.mrf.mxu1  ;;  %2066 = vst.msk [vmem:[#allocation4 + $0xe0] sm:$0xff] %vm171_vm1, %v2034_v52  ;;  %2495 = vst.msk [vmem:[#allocation4 + $0x18] sm:$0xff] %vm171_vm1, %v2463_v55  ;;  %v2037_v61 = vadd.f32 %v10540_v1, %v2005_v57  ;;  %v2462_v62 = vadd.f32 %v2430_v37, %v2279_v35  ;;  %v2436_v1 = vld [vmem:[#allocation4 + $0x40] sm:$0xff] }
 0x17f   : > { %v2004_v17 = vld [vmem:[#allocation4 + $0xf0] sm:$0xff]  ;;  %v10551_v31 = vpop.f32.mrf.mxu0 }
 0x180   : > { %v10601_v41 = vpop.f32.mrf.mxu1  ;;  %2069 = vst.msk [vmem:[#allocation4 + $0xf8] sm:$0xff] %vm171_vm1, %v2037_v61  ;;  %2494 = vst.msk [vmem:[#allocation4 + $0x10] sm:$0xff] %vm171_vm1, %v2462_v62  ;;  %v2036_v18 = vadd.f32 %v2004_v17, %v1965_v6  ;;  %v2465_v11 = vadd.f32 %v10551_v31, %v2433_v56  ;;  %v2439_v6 = vld [vmem:[#allocation4 + $0x58] sm:$0xff] }
 0x181   : > { %v2289_v12 = vpop.f32.mrf.mxu0  ;;  %v2883_v25 = vld [vmem:[#allocation4 + $0x8] sm:$0xff] }
 0x182   : > { %v2743_v27 = vpop.f32.mrf.mxu1  ;;  %2068 = vst.msk [vmem:[#allocation4 + $0xf0] sm:$0xff] %vm171_vm1, %v2036_v18  ;;  %2497 = vst.msk [vmem:[#allocation4 + $0x28] sm:$0xff] %vm171_vm1, %v2465_v11  ;;  %v2464_v29 = vadd.f32 %v2432_v33, %v2289_v12  ;;  %v2915_v51 = vadd.f32 %v10595_v13, %v2883_v25  ;;  %v2438_v13 = vld [vmem:[#allocation4 + $0x50] sm:$0xff] }
 0x183   : > { %v10554_v54 = vpop.f32.mrf.mxu0  ;;  %v2882_v32 = vld [vmem:[#allocation4] sm:$0xff] }
 0x184   : > { %v10604_v34 = vpop.f32.mrf.mxu1  ;;  %2496 = vst.msk [vmem:[#allocation4 + $0x20] sm:$0xff] %vm171_vm1, %v2464_v29  ;;  %2947 = vst.msk [vmem:[#allocation4 + $0x8] sm:$0xff] %vm171_vm1, %v2915_v51  ;;  %v2467_v39 = vadd.f32 %v10554_v54, %v2435_v58  ;;  %v2914_v43 = vadd.f32 %v2882_v32, %v2723_v21  ;;  %v2441_v21 = vld [vmem:[#allocation4 + $0x68] sm:$0xff] }
 0x185   : > { %v2299_v44 = vpop.f32.mrf.mxu0  ;;  %v2885_v46 = vld [vmem:[#allocation4 + $0x18] sm:$0xff] }
 0x186   : > { %v2753_v47 = vpop.f32.mrf.mxu1  ;;  %2499 = vst.msk [vmem:[#allocation4 + $0x38] sm:$0xff] %vm171_vm1, %v2467_v39  ;;  %2946 = vst.msk [vmem:[#allocation4] sm:$0xff] %vm171_vm1, %v2914_v43  ;;  %v2466_v48 = vadd.f32 %v2434_v45, %v2299_v44  ;;  %v2917_v49 = vadd.f32 %v10598_v30, %v2885_v46  ;;  %v2440_v30 = vld [vmem:[#allocation4 + $0x60] sm:$0xff] }
 0x187   : > { %v10557_v36 = vpop.f32.mrf.mxu0  ;;  %v2884_v53 = vld [vmem:[#allocation4 + $0x10] sm:$0xff] }
 0x188   : > { %v10607_v60 = vpop.f32.mrf.mxu1  ;;  %2498 = vst.msk [vmem:[#allocation4 + $0x30] sm:$0xff] %vm171_vm1, %v2466_v48  ;;  %2949 = vst.msk [vmem:[#allocation4 + $0x18] sm:$0xff] %vm171_vm1, %v2917_v49  ;;  %v2469_v63 = vadd.f32 %v10557_v36, %v2437_v50  ;;  %v2916_v38 = vadd.f32 %v2884_v53, %v2733_v59  ;;  %v2443_v59 = vld [vmem:[#allocation4 + $0x78] sm:$0xff] }
 0x189   : > { %v2309_v0 = vpop.f32.mrf.mxu0  ;;  %v2887_v2 = vld [vmem:[#allocation4 + $0x28] sm:$0xff] }
 0x18a   : > { %v2763_v40 = vpop.f32.mrf.mxu1  ;;  %2501 = vst.msk [vmem:[#allocation4 + $0x48] sm:$0xff] %vm171_vm1, %v2469_v63  ;;  %2948 = vst.msk [vmem:[#allocation4 + $0x10] sm:$0xff] %vm171_vm1, %v2916_v38  ;;  %v2468_v3 = vadd.f32 %v2436_v1, %v2309_v0  ;;  %v2919_v4 = vadd.f32 %v10601_v41, %v2887_v2  ;;  %v2442_v41 = vld [vmem:[#allocation4 + $0x70] sm:$0xff] }
 0x18b   : > { %v10560_v5 = vpop.f32.mrf.mxu0  ;;  %v2886_v7 = vld [vmem:[#allocation4 + $0x20] sm:$0xff] }
 0x18c   : > { %v10610_v42 = vpop.f32.mrf.mxu1  ;;  %2500 = vst.msk [vmem:[#allocation4 + $0x40] sm:$0xff] %vm171_vm1, %v2468_v3  ;;  %2951 = vst.msk [vmem:[#allocation4 + $0x28] sm:$0xff] %vm171_vm1, %v2919_v4  ;;  %v2471_v8 = vadd.f32 %v10560_v5, %v2439_v6  ;;  %v2918_v9 = vadd.f32 %v2886_v7, %v2743_v27  ;;  %v2445_v27 = vld [vmem:[#allocation4 + $0x88] sm:$0xff] }
 0x18d   : > { %v2319_v10 = vpop.f32.mrf.mxu0  ;;  %v2889_v14 = vld [vmem:[#allocation4 + $0x38] sm:$0xff] }
 0x18e   : > { %v2773_v15 = vpop.f32.mrf.mxu1  ;;  %2503 = vst.msk [vmem:[#allocation4 + $0x58] sm:$0xff] %vm171_vm1, %v2471_v8  ;;  %2950 = vst.msk [vmem:[#allocation4 + $0x20] sm:$0xff] %vm171_vm1, %v2918_v9  ;;  %v2470_v16 = vadd.f32 %v2438_v13, %v2319_v10  ;;  %v2921_v19 = vadd.f32 %v10604_v34, %v2889_v14  ;;  %v2444_v34 = vld [vmem:[#allocation4 + $0x80] sm:$0xff] }
 0x18f   : > { %v10563_v20 = vpop.f32.mrf.mxu0  ;;  %v2888_v22 = vld [vmem:[#allocation4 + $0x30] sm:$0xff] }
 0x190   : > { %v10613_v23 = vpop.f32.mrf.mxu1  ;;  %2502 = vst.msk [vmem:[#allocation4 + $0x50] sm:$0xff] %vm171_vm1, %v2470_v16  ;;  %2953 = vst.msk [vmem:[#allocation4 + $0x38] sm:$0xff] %vm171_vm1, %v2921_v19  ;;  %v2473_v24 = vadd.f32 %v10563_v20, %v2441_v21  ;;  %v2920_v26 = vadd.f32 %v2888_v22, %v2753_v47  ;;  %v2447_v47 = vld [vmem:[#allocation4 + $0x98] sm:$0xff] }
 0x191   : > { %v2329_v28 = vpop.f32.mrf.mxu0  ;;  %v2891_v52 = vld [vmem:[#allocation4 + $0x48] sm:$0xff] }
 0x192   : > { %v2783_v55 = vpop.f32.mrf.mxu1  ;;  %2505 = vst.msk [vmem:[#allocation4 + $0x68] sm:$0xff] %vm171_vm1, %v2473_v24  ;;  %2952 = vst.msk [vmem:[#allocation4 + $0x30] sm:$0xff] %vm171_vm1, %v2920_v26  ;;  %v2472_v57 = vadd.f32 %v2440_v30, %v2329_v28  ;;  %v2923_v35 = vadd.f32 %v10607_v60, %v2891_v52  ;;  %v2446_v60 = vld [vmem:[#allocation4 + $0x90] sm:$0xff] }
 0x193   : > { %v10566_v37 = vpop.f32.mrf.mxu0  ;;  %v2890_v61 = vld [vmem:[#allocation4 + $0x40] sm:$0xff] }
 0x194   : > { %v10616_v62 = vpop.f32.mrf.mxu1  ;;  %2504 = vst.msk [vmem:[#allocation4 + $0x60] sm:$0xff] %vm171_vm1, %v2472_v57  ;;  %2955 = vst.msk [vmem:[#allocation4 + $0x48] sm:$0xff] %vm171_vm1, %v2923_v35  ;;  %v2475_v17 = vadd.f32 %v10566_v37, %v2443_v59  ;;  %v2922_v31 = vadd.f32 %v2890_v61, %v2763_v40  ;;  %v2449_v40 = vld [vmem:[#allocation4 + $0xa8] sm:$0xff] }
 0x195   : > { %v2339_v56 = vpop.f32.mrf.mxu0  ;;  %v2893_v18 = vld [vmem:[#allocation4 + $0x58] sm:$0xff] }
 0x196   : > { %v2793_v11 = vpop.f32.mrf.mxu1  ;;  %2507 = vst.msk [vmem:[#allocation4 + $0x78] sm:$0xff] %vm171_vm1, %v2475_v17  ;;  %2954 = vst.msk [vmem:[#allocation4 + $0x40] sm:$0xff] %vm171_vm1, %v2922_v31  ;;  %v2474_v12 = vadd.f32 %v2442_v41, %v2339_v56  ;;  %v2925_v33 = vadd.f32 %v10610_v42, %v2893_v18  ;;  %v2448_v42 = vld [vmem:[#allocation4 + $0xa0] sm:$0xff] }
 0x197   : > { %v10569_v25 = vpop.f32.mrf.mxu0  ;;  %v2892_v29 = vld [vmem:[#allocation4 + $0x50] sm:$0xff] }
 0x198   : > { %v10619_v51 = vpop.f32.mrf.mxu1  ;;  %2506 = vst.msk [vmem:[#allocation4 + $0x70] sm:$0xff] %vm171_vm1, %v2474_v12  ;;  %2957 = vst.msk [vmem:[#allocation4 + $0x58] sm:$0xff] %vm171_vm1, %v2925_v33  ;;  %v2477_v54 = vadd.f32 %v10569_v25, %v2445_v27  ;;  %v2924_v58 = vadd.f32 %v2892_v29, %v2773_v15  ;;  %v2451_v15 = vld [vmem:[#allocation4 + $0xb8] sm:$0xff] }
 0x199   : > { %v2349_v32 = vpop.f32.mrf.mxu0  ;;  %v2895_v39 = vld [vmem:[#allocation4 + $0x68] sm:$0xff] }
 0x19a   : > { %v2803_v43 = vpop.f32.mrf.mxu1  ;;  %2509 = vst.msk [vmem:[#allocation4 + $0x88] sm:$0xff] %vm171_vm1, %v2477_v54  ;;  %2956 = vst.msk [vmem:[#allocation4 + $0x50] sm:$0xff] %vm171_vm1, %v2924_v58  ;;  %v2476_v44 = vadd.f32 %v2444_v34, %v2349_v32  ;;  %v2927_v45 = vadd.f32 %v10613_v23, %v2895_v39  ;;  %v2450_v23 = vld [vmem:[#allocation4 + $0xb0] sm:$0xff] }
 0x19b   : > { %v10572_v46 = vpop.f32.mrf.mxu0  ;;  %v2894_v48 = vld [vmem:[#allocation4 + $0x60] sm:$0xff] }
 0x19c   : > { %v10622_v49 = vpop.f32.mrf.mxu1  ;;  %2508 = vst.msk [vmem:[#allocation4 + $0x80] sm:$0xff] %vm171_vm1, %v2476_v44  ;;  %2959 = vst.msk [vmem:[#allocation4 + $0x68] sm:$0xff] %vm171_vm1, %v2927_v45  ;;  %v2479_v36 = vadd.f32 %v10572_v46, %v2447_v47  ;;  %v2926_v50 = vadd.f32 %v2894_v48, %v2783_v55  ;;  %v2453_v55 = vld [vmem:[#allocation4 + $0xc8] sm:$0xff] }
 0x19d   : > { %v2359_v53 = vpop.f32.mrf.mxu0  ;;  %v2897_v63 = vld [vmem:[#allocation4 + $0x78] sm:$0xff] }
 0x19e   : > { %v2813_v38 = vpop.f32.mrf.mxu1  ;;  %2511 = vst.msk [vmem:[#allocation4 + $0x98] sm:$0xff] %vm171_vm1, %v2479_v36  ;;  %2958 = vst.msk [vmem:[#allocation4 + $0x60] sm:$0xff] %vm171_vm1, %v2926_v50  ;;  %v2478_v0 = vadd.f32 %v2446_v60, %v2359_v53  ;;  %v2929_v1 = vadd.f32 %v10616_v62, %v2897_v63  ;;  %v2452_v62 = vld [vmem:[#allocation4 + $0xc0] sm:$0xff] }
 0x19f   : > { %v10575_v2 = vpop.f32.mrf.mxu0  ;;  %v2896_v3 = vld [vmem:[#allocation4 + $0x70] sm:$0xff] }
 0x1a0   : > { %v10625_v4 = vpop.f32.mrf.mxu1  ;;  %2510 = vst.msk [vmem:[#allocation4 + $0x90] sm:$0xff] %vm171_vm1, %v2478_v0  ;;  %2961 = vst.msk [vmem:[#allocation4 + $0x78] sm:$0xff] %vm171_vm1, %v2929_v1  ;;  %v2481_v5 = vadd.f32 %v10575_v2, %v2449_v40  ;;  %v2928_v6 = vadd.f32 %v2896_v3, %v2793_v11  ;;  %v2455_v11 = vld [vmem:[#allocation4 + $0xd8] sm:$0xff] }
 0x1a1   : > { %v2369_v7 = vpop.f32.mrf.mxu0  ;;  %v2899_v8 = vld [vmem:[#allocation4 + $0x88] sm:$0xff] }
 0x1a2   : > { %v2823_v9 = vpop.f32.mrf.mxu1  ;;  %2513 = vst.msk [vmem:[#allocation4 + $0xa8] sm:$0xff] %vm171_vm1, %v2481_v5  ;;  %2960 = vst.msk [vmem:[#allocation4 + $0x70] sm:$0xff] %vm171_vm1, %v2928_v6  ;;  %v2480_v10 = vadd.f32 %v2448_v42, %v2369_v7  ;;  %v2931_v13 = vadd.f32 %v10619_v51, %v2899_v8  ;;  %v2454_v51 = vld [vmem:[#allocation4 + $0xd0] sm:$0xff] }
 0x1a3   : > { %v10578_v14 = vpop.f32.mrf.mxu0  ;;  %v2898_v16 = vld [vmem:[#allocation4 + $0x80] sm:$0xff] }
 0x1a4   : > { %v10628_v19 = vpop.f32.mrf.mxu1  ;;  %2512 = vst.msk [vmem:[#allocation4 + $0xa0] sm:$0xff] %vm171_vm1, %v2480_v10  ;;  %2963 = vst.msk [vmem:[#allocation4 + $0x88] sm:$0xff] %vm171_vm1, %v2931_v13  ;;  %v2483_v20 = vadd.f32 %v10578_v14, %v2451_v15  ;;  %v2930_v21 = vadd.f32 %v2898_v16, %v2803_v43  ;;  %v2457_v43 = vld [vmem:[#allocation4 + $0xe8] sm:$0xff] }
 0x1a5   : > { %v2379_v22 = vpop.f32.mrf.mxu0  ;;  %v2901_v24 = vld [vmem:[#allocation4 + $0x98] sm:$0xff]  ;;  %v3338_v10 = vld [vmem:[#allocation4 + $0x8] sm:$0xff] }
 0x1a6   : > { %v2833_v26 = vpop.f32.mrf.mxu1  ;;  %2515 = vst.msk [vmem:[#allocation4 + $0xb8] sm:$0xff] %vm171_vm1, %v2483_v20  ;;  %2962 = vst.msk [vmem:[#allocation4 + $0x80] sm:$0xff] %vm171_vm1, %v2930_v21  ;;  %v2482_v28 = vadd.f32 %v2450_v23, %v2379_v22  ;;  %v2933_v30 = vadd.f32 %v10622_v49, %v2901_v24  ;;  %v2456_v49 = vld [vmem:[#allocation4 + $0xe0] sm:$0xff] }
 0x1a7   : > { %v10581_v52 = vpop.f32.mrf.mxu0  ;;  %v2900_v57 = vld [vmem:[#allocation4 + $0x90] sm:$0xff]  ;;  %v3337_v20 = vld [vmem:[#allocation4] sm:$0xff] }
 0x1a8   : > { %v10631_v35 = vpop.f32.mrf.mxu1  ;;  %2514 = vst.msk [vmem:[#allocation4 + $0xb0] sm:$0xff] %vm171_vm1, %v2482_v28  ;;  %2965 = vst.msk [vmem:[#allocation4 + $0x98] sm:$0xff] %vm171_vm1, %v2933_v30  ;;  %v2485_v37 = vadd.f32 %v10581_v52, %v2453_v55  ;;  %v2932_v59 = vadd.f32 %v2900_v57, %v2813_v38  ;;  %v2459_v38 = vld [vmem:[#allocation4 + $0xf8] sm:$0xff] }
 0x1a9   : > { %v2389_v61 = vpop.f32.mrf.mxu0  ;;  %v2903_v17 = vld [vmem:[#allocation4 + $0xa8] sm:$0xff]  ;;  %v3340_v28 = vld [vmem:[#allocation4 + $0x18] sm:$0xff] }
 0x1aa   : > { %v2843_v31 = vpop.f32.mrf.mxu1  ;;  %2517 = vst.msk [vmem:[#allocation4 + $0xc8] sm:$0xff] %vm171_vm1, %v2485_v37  ;;  %2964 = vst.msk [vmem:[#allocation4 + $0x90] sm:$0xff] %vm171_vm1, %v2932_v59  ;;  %v2484_v56 = vadd.f32 %v2452_v62, %v2389_v61  ;;  %v2935_v41 = vadd.f32 %v10625_v4, %v2903_v17  ;;  %v2458_v4 = vld [vmem:[#allocation4 + $0xf0] sm:$0xff] }
 0x1ab   : > { %v10584_v18 = vpop.f32.mrf.mxu0  ;;  %v2902_v12 = vld [vmem:[#allocation4 + $0xa0] sm:$0xff]  ;;  %v3339_v37 = vld [vmem:[#allocation4 + $0x10] sm:$0xff] }
 0x1ac   : > { %v10634_v33 = vpop.f32.mrf.mxu1  ;;  %2516 = vst.msk [vmem:[#allocation4 + $0xc0] sm:$0xff] %vm171_vm1, %v2484_v56  ;;  %2967 = vst.msk [vmem:[#allocation4 + $0xa8] sm:$0xff] %vm171_vm1, %v2935_v41  ;;  %v2487_v25 = vadd.f32 %v10584_v18, %v2455_v11  ;;  %v2934_v27 = vadd.f32 %v2902_v12, %v2823_v9  ;;  %v3342_v56 = vld [vmem:[#allocation4 + $0x28] sm:$0xff]  ;;  %v4710_v18 = vld [vmem:[%s14442_s2] sm:$0xf] }
 0x1ad   : > { %v2399_v29 = vpop.f32.mrf.mxu0  ;;  %v2905_v54 = vld [vmem:[#allocation4 + $0xb8] sm:$0xff]  ;;  %10791 = vmatprep.subr.msk.mxu1 %vm447_vm0, %v4710_v18 }
 0x1ae   : > { %v2853_v58 = vpop.f32.mrf.mxu1  ;;  %2519 = vst.msk [vmem:[#allocation4 + $0xd8] sm:$0xff] %vm171_vm1, %v2487_v25  ;;  %2966 = vst.msk [vmem:[#allocation4 + $0xa0] sm:$0xff] %vm171_vm1, %v2934_v27  ;;  %v2486_v32 = vadd.f32 %v2454_v51, %v2399_v29  ;;  %v2937_v34 = vadd.f32 %v10628_v19, %v2905_v54  ;;  %v3341_v25 = vld [vmem:[#allocation4 + $0x20] sm:$0xff]  ;;  %10792 = vmatpush3.msk.msra.mxu1 %vm447_vm0, %v4710_v18  ;;  %v3351_v18 = vld [vmem:[#allocation4 + $0x70] sm:$0xff] }
 0x1af   : > { %v10587_v39 = vpop.f32.mrf.mxu0  ;;  %v2904_v44 = vld [vmem:[#allocation4 + $0xb0] sm:$0xff] }
 0x1b0   : > { %v10637_v45 = vpop.f32.mrf.mxu1  ;;  %2518 = vst.msk [vmem:[#allocation4 + $0xd0] sm:$0xff] %vm171_vm1, %v2486_v32  ;;  %2969 = vst.msk [vmem:[#allocation4 + $0xb8] sm:$0xff] %vm171_vm1, %v2937_v34  ;;  %v2489_v46 = vadd.f32 %v10587_v39, %v2457_v43  ;;  %v2936_v47 = vadd.f32 %v2904_v44, %v2833_v26  ;;  %v3344_v32 = vld [vmem:[#allocation4 + $0x38] sm:$0xff] }
 0x1b1   : > { %v2409_v48 = vpop.f32.mrf.mxu0  ;;  %v2907_v36 = vld [vmem:[#allocation4 + $0xc8] sm:$0xff] }
 0x1b2   : > { %v2863_v50 = vpop.f32.mrf.mxu1  ;;  %2521 = vst.msk [vmem:[#allocation4 + $0xe8] sm:$0xff] %vm171_vm1, %v2489_v46  ;;  %2968 = vst.msk [vmem:[#allocation4 + $0xb0] sm:$0xff] %vm171_vm1, %v2936_v47  ;;  %v2488_v53 = vadd.f32 %v2456_v49, %v2409_v48  ;;  %v2939_v60 = vadd.f32 %v10631_v35, %v2907_v36  ;;  %v3343_v46 = vld [vmem:[#allocation4 + $0x30] sm:$0xff] }
 0x1b3   : > { %v10590_v63 = vpop.f32.mrf.mxu0  ;;  %v2906_v0 = vld [vmem:[#allocation4 + $0xc0] sm:$0xff] }
 0x1b4   : > { %v10640_v1 = vpop.f32.mrf.mxu1  ;;  %2520 = vst.msk [vmem:[#allocation4 + $0xe0] sm:$0xff] %vm171_vm1, %v2488_v53  ;;  %2971 = vst.msk [vmem:[#allocation4 + $0xc8] sm:$0xff] %vm171_vm1, %v2939_v60  ;;  %v2491_v2 = vadd.f32 %v10590_v63, %v2459_v38  ;;  %v2938_v40 = vadd.f32 %v2906_v0, %v2843_v31  ;;  %v3346_v53 = vld [vmem:[#allocation4 + $0x48] sm:$0xff] }
 0x1b5   : > { %v2419_v3 = vpop.f32.mrf.mxu0  ;;  %v2909_v5 = vld [vmem:[#allocation4 + $0xd8] sm:$0xff] }
 0x1b6   : > { %v2873_v6 = vpop.f32.mrf.mxu1  ;;  %2523 = vst.msk [vmem:[#allocation4 + $0xf8] sm:$0xff] %vm171_vm1, %v2491_v2  ;;  %2970 = vst.msk [vmem:[#allocation4 + $0xc0] sm:$0xff] %vm171_vm1, %v2938_v40  ;;  %v2490_v7 = vadd.f32 %v2458_v4, %v2419_v3  ;;  %v2941_v42 = vadd.f32 %v10634_v33, %v2909_v5  ;;  %v3345_v2 = vld [vmem:[#allocation4 + $0x40] sm:$0xff] }
 0x1b7   : > { %v2908_v8 = vld [vmem:[#allocation4 + $0xd0] sm:$0xff]  ;;  %v10645_v9 = vpop.f32.mrf.mxu0 }
 0x1b8   : > { %v10695_v13 = vpop.f32.mrf.mxu1  ;;  %2522 = vst.msk [vmem:[#allocation4 + $0xf0] sm:$0xff] %vm171_vm1, %v2490_v7  ;;  %2973 = vst.msk [vmem:[#allocation4 + $0xd8] sm:$0xff] %vm171_vm1, %v2941_v42  ;;  %v2940_v14 = vadd.f32 %v2908_v8, %v2853_v58  ;;  %v3370_v15 = vadd.f32 %v10645_v9, %v3338_v10  ;;  %v3348_v7 = vld [vmem:[#allocation4 + $0x58] sm:$0xff] }
 0x1b9   : > { %v2911_v16 = vld [vmem:[#allocation4 + $0xe8] sm:$0xff]  ;;  %v3178_v19 = vpop.f32.mrf.mxu0 }
 0x1ba   : > { %v3632_v21 = vpop.f32.mrf.mxu1  ;;  %2972 = vst.msk [vmem:[#allocation4 + $0xd0] sm:$0xff] %vm171_vm1, %v2940_v14  ;;  %3402 = vst.msk [vmem:[#allocation4 + $0x8] sm:$0xff] %vm171_vm1, %v3370_v15  ;;  %v2943_v22 = vadd.f32 %v10637_v45, %v2911_v16  ;;  %v3369_v23 = vadd.f32 %v3337_v20, %v3178_v19  ;;  %v3347_v14 = vld [vmem:[#allocation4 + $0x50] sm:$0xff] }
 0x1bb   : > { %v2910_v24 = vld [vmem:[#allocation4 + $0xe0] sm:$0xff]  ;;  %v10648_v26 = vpop.f32.mrf.mxu0 }
 0x1bc   : > { %v10698_v30 = vpop.f32.mrf.mxu1  ;;  %2975 = vst.msk [vmem:[#allocation4 + $0xe8] sm:$0xff] %vm171_vm1, %v2943_v22  ;;  %3401 = vst.msk [vmem:[#allocation4] sm:$0xff] %vm171_vm1, %v3369_v23  ;;  %v2942_v52 = vadd.f32 %v2910_v24, %v2863_v50  ;;  %v3372_v55 = vadd.f32 %v10648_v26, %v3340_v28  ;;  %v3350_v22 = vld [vmem:[#allocation4 + $0x68] sm:$0xff] }
 0x1bd   : > { %v2913_v57 = vld [vmem:[#allocation4 + $0xf8] sm:$0xff]  ;;  %v3188_v35 = vpop.f32.mrf.mxu0 }
 0x1be   : > { %v3642_v59 = vpop.f32.mrf.mxu1  ;;  %2974 = vst.msk [vmem:[#allocation4 + $0xe0] sm:$0xff] %vm171_vm1, %v2942_v52  ;;  %3404 = vst.msk [vmem:[#allocation4 + $0x18] sm:$0xff] %vm171_vm1, %v3372_v55  ;;  %v2945_v61 = vadd.f32 %v10640_v1, %v2913_v57  ;;  %v3371_v62 = vadd.f32 %v3339_v37, %v3188_v35  ;;  %v3349_v52 = vld [vmem:[#allocation4 + $0x60] sm:$0xff] }
 0x1bf   : > { %v2912_v17 = vld [vmem:[#allocation4 + $0xf0] sm:$0xff]  ;;  %v10651_v31 = vpop.f32.mrf.mxu0 }
 0x1c0   : > { %v10701_v41 = vpop.f32.mrf.mxu1  ;;  %2977 = vst.msk [vmem:[#allocation4 + $0xf8] sm:$0xff] %vm171_vm1, %v2945_v61  ;;  %3403 = vst.msk [vmem:[#allocation4 + $0x10] sm:$0xff] %vm171_vm1, %v3371_v62  ;;  %v2944_v11 = vadd.f32 %v2912_v17, %v2873_v6  ;;  %v3374_v12 = vadd.f32 %v10651_v31, %v3342_v56  ;;  %v3352_v61 = vld [vmem:[#allocation4 + $0x78] sm:$0xff] }
 0x1c1   : > { %v3198_v33 = vpop.f32.mrf.mxu0  ;;  %v3792_v27 = vld [vmem:[#allocation4 + $0x8] sm:$0xff] }
 0x1c2   : > { %v3652_v29 = vpop.f32.mrf.mxu1  ;;  %2976 = vst.msk [vmem:[#allocation4 + $0xf0] sm:$0xff] %vm171_vm1, %v2944_v11  ;;  %3406 = vst.msk [vmem:[#allocation4 + $0x28] sm:$0xff] %vm171_vm1, %v3374_v12  ;;  %v3373_v51 = vadd.f32 %v3341_v25, %v3198_v33  ;;  %v3824_v54 = vadd.f32 %v10695_v13, %v3792_v27 }
 0x1c3   : > { %v10654_v58 = vpop.f32.mrf.mxu0  ;;  %v3791_v34 = vld [vmem:[#allocation4] sm:$0xff] }
 0x1c4   : > { %v10704_v39 = vpop.f32.mrf.mxu1  ;;  %3405 = vst.msk [vmem:[#allocation4 + $0x20] sm:$0xff] %vm171_vm1, %v3373_v51  ;;  %3856 = vst.msk [vmem:[#allocation4 + $0x8] sm:$0xff] %vm171_vm1, %v3824_v54  ;;  %v3376_v43 = vadd.f32 %v10654_v58, %v3344_v32  ;;  %v3823_v44 = vadd.f32 %v3791_v34, %v3632_v21 }
 0x1c5   : > { %v3208_v45 = vpop.f32.mrf.mxu0  ;;  %v3794_v47 = vld [vmem:[#allocation4 + $0x18] sm:$0xff] }
 0x1c6   : > { %v3662_v48 = vpop.f32.mrf.mxu1  ;;  %3408 = vst.msk [vmem:[#allocation4 + $0x38] sm:$0xff] %vm171_vm1, %v3376_v43  ;;  %3855 = vst.msk [vmem:[#allocation4] sm:$0xff] %vm171_vm1, %v3823_v44  ;;  %v3375_v49 = vadd.f32 %v3343_v46, %v3208_v45  ;;  %v3826_v36 = vadd.f32 %v10698_v30, %v3794_v47 }
 0x1c7   : > { %v10657_v50 = vpop.f32.mrf.mxu0  ;;  %v3793_v60 = vld [vmem:[#allocation4 + $0x10] sm:$0xff] }
 0x1c8   : > { %v10707_v63 = vpop.f32.mrf.mxu1  ;;  %3407 = vst.msk [vmem:[#allocation4 + $0x30] sm:$0xff] %vm171_vm1, %v3375_v49  ;;  %3858 = vst.msk [vmem:[#allocation4 + $0x18] sm:$0xff] %vm171_vm1, %v3826_v36  ;;  %v3378_v38 = vadd.f32 %v10657_v50, %v3346_v53  ;;  %v3825_v0 = vadd.f32 %v3793_v60, %v3642_v59  ;;  %v9471_v50 = vld [vmem:[%s14442_s2 + $0x4] sm:$0xf] }
 0x1c9   : > { %v3218_v1 = vpop.f32.mrf.mxu0  ;;  %v3796_v40 = vld [vmem:[#allocation4 + $0x28] sm:$0xff]  ;;  %10841 = vmatprep.subr.msk.mxu0 %vm447_vm0, %v9471_v50 }
 0x1ca   : > { %v3672_v3 = vpop.f32.mrf.mxu1  ;;  %3410 = vst.msk [vmem:[#allocation4 + $0x48] sm:$0xff] %vm171_vm1, %v3378_v38  ;;  %3857 = vst.msk [vmem:[#allocation4 + $0x10] sm:$0xff] %vm171_vm1, %v3825_v0  ;;  %v3377_v4 = vadd.f32 %v3345_v2, %v3218_v1  ;;  %v3828_v5 = vadd.f32 %v10701_v41, %v3796_v40  ;;  %v4679_v38 = vld [vmem:[#allocation3 + $0x8] sm:$0xff]  ;;  %v3355_v2 = vld [vmem:[#allocation4 + $0x90] sm:$0xff]  ;;  %10842 = vmatpush3.msk.msra.mxu0 %vm447_vm0, %v9471_v50 }
 0x1cb   : > { %v10660_v6 = vpop.f32.mrf.mxu0  ;;  %v3795_v42 = vld [vmem:[#allocation4 + $0x20] sm:$0xff]  ;;  %v5067_v0 = vld [vmem:[#allocation3 + $0x1] sm:$0xff] }
 0x1cc   : > { %v10710_v8 = vpop.f32.mrf.mxu1  ;;  %3409 = vst.msk [vmem:[#allocation4 + $0x40] sm:$0xff] %vm171_vm1, %v3377_v4  ;;  %3860 = vst.msk [vmem:[#allocation4 + $0x28] sm:$0xff] %vm171_vm1, %v3828_v5  ;;  %v3380_v9 = vadd.f32 %v10660_v6, %v3348_v7  ;;  %v3827_v10 = vadd.f32 %v3795_v42, %v3652_v29  ;;  %v3354_v29 = vld [vmem:[#allocation4 + $0x88] sm:$0xff]  ;;  %10843 = vmatprep.mubr.msk.f32.mxu0 %vm171_vm1, %v5067_v0  ;;  %v5068_v7 = vld [vmem:[#allocation3 + $0x9] sm:$0xff] }
 0x1cd   : > { %v3228_v13 = vpop.f32.mrf.mxu0  ;;  %v3798_v15 = vld [vmem:[#allocation4 + $0x38] sm:$0xff]  ;;  %v9505_v4 = vld [vmem:[%s14442_s2 + $0x8] sm:$0xf]  ;;  %10844 = vmatmul.mubr.msk.f32.vlgmr.msra.gmra.mxu0 %vm171_vm1, %v5068_v7 }
 0x1ce   : > { %v3682_v16 = vpop.f32.mrf.mxu1  ;;  %3412 = vst.msk [vmem:[#allocation4 + $0x58] sm:$0xff] %vm171_vm1, %v3380_v9  ;;  %3859 = vst.msk [vmem:[#allocation4 + $0x20] sm:$0xff] %vm171_vm1, %v3827_v10  ;;  %v3379_v19 = vadd.f32 %v3347_v14, %v3228_v13  ;;  %v3830_v20 = vadd.f32 %v10704_v39, %v3798_v15  ;;  %v3353_v39 = vld [vmem:[#allocation4 + $0x80] sm:$0xff]  ;;  %10891 = vmatprep.subr.msk.mxu1 %vm447_vm0, %v9505_v4 }
 0x1cf   : > { %v10663_v21 = vpop.f32.mrf.mxu0  ;;  %v3797_v23 = vld [vmem:[#allocation4 + $0x30] sm:$0xff] }
 0x1d0   : > { %v10713_v24 = vpop.f32.mrf.mxu1  ;;  %3411 = vst.msk [vmem:[#allocation4 + $0x50] sm:$0xff] %vm171_vm1, %v3379_v19  ;;  %3862 = vst.msk [vmem:[#allocation4 + $0x38] sm:$0xff] %vm171_vm1, %v3830_v20  ;;  %v3382_v26 = vadd.f32 %v10663_v21, %v3350_v22  ;;  %v3829_v28 = vadd.f32 %v3797_v23, %v3662_v48  ;;  %v3356_v48 = vld [vmem:[#allocation4 + $0x98] sm:$0xff] }
 0x1d1   : > { %v3238_v30 = vpop.f32.mrf.mxu0  ;;  %v3800_v55 = vld [vmem:[#allocation4 + $0x48] sm:$0xff] }
 0x1d2   : > { %v3692_v57 = vpop.f32.mrf.mxu1  ;;  %3414 = vst.msk [vmem:[#allocation4 + $0x68] sm:$0xff] %vm171_vm1, %v3382_v26  ;;  %3861 = vst.msk [vmem:[#allocation4 + $0x30] sm:$0xff] %vm171_vm1, %v3829_v28  ;;  %v3381_v35 = vadd.f32 %v3349_v52, %v3238_v30  ;;  %v3832_v37 = vadd.f32 %v10707_v63, %v3800_v55  ;;  %v4678_v63 = vld [vmem:[#allocation3] sm:$0xff] }
 0x1d3   : > { %v10666_v59 = vpop.f32.mrf.mxu0  ;;  %v3799_v62 = vld [vmem:[#allocation4 + $0x40] sm:$0xff]  ;;  %10793 = vmatprep.mubr.msk.f32.mxu1 %vm171_vm1, %v4678_v63 }
 0x1d4   : > { %v10716_v17 = vpop.f32.mrf.mxu1  ;;  %3413 = vst.msk [vmem:[#allocation4 + $0x60] sm:$0xff] %vm171_vm1, %v3381_v35  ;;  %3864 = vst.msk [vmem:[#allocation4 + $0x48] sm:$0xff] %vm171_vm1, %v3832_v37  ;;  %v3384_v31 = vadd.f32 %v10666_v59, %v3352_v61  ;;  %v3831_v56 = vadd.f32 %v3799_v62, %v3672_v3  ;;  %10794 = vmatmul.mubr.msk.f32.vlgmr.msra.gmra.mxu1 %vm171_vm1, %v4679_v38  ;;  %v3365_v38 = vld [vmem:[#allocation4 + $0xe0] sm:$0xff] }
 0x1d5   : > { %v3248_v41 = vpop.f32.mrf.mxu0  ;;  %v3802_v11 = vld [vmem:[#allocation4 + $0x58] sm:$0xff]  ;;  %10892 = vmatpush3.msk.msra.mxu1 %vm447_vm0, %v9505_v4 }
 0x1d6   : > { %v3702_v12 = vpop.f32.mrf.mxu1  ;;  %3416 = vst.msk [vmem:[#allocation4 + $0x78] sm:$0xff] %vm171_vm1, %v3384_v31  ;;  %3863 = vst.msk [vmem:[#allocation4 + $0x40] sm:$0xff] %vm171_vm1, %v3831_v56  ;;  %v3383_v33 = vadd.f32 %v3351_v18, %v3248_v41  ;;  %v3834_v25 = vadd.f32 %v10710_v8, %v3802_v11  ;;  %v3358_v8 = vld [vmem:[#allocation4 + $0xa8] sm:$0xff]  ;;  %v3368_v4 = vld [vmem:[#allocation4 + $0xf8] sm:$0xff] }
 0x1d7   : > { %v10669_v27 = vpop.f32.mrf.mxu0  ;;  %v3801_v51 = vld [vmem:[#allocation4 + $0x50] sm:$0xff] }
 0x1d8   : > { %v10719_v54 = vpop.f32.mrf.mxu1  ;;  %3415 = vst.msk [vmem:[#allocation4 + $0x70] sm:$0xff] %vm171_vm1, %v3383_v33  ;;  %3866 = vst.msk [vmem:[#allocation4 + $0x58] sm:$0xff] %vm171_vm1, %v3834_v25  ;;  %v3386_v58 = vadd.f32 %v10669_v27, %v3354_v29  ;;  %v3833_v32 = vadd.f32 %v3801_v51, %v3682_v16  ;;  %v3357_v16 = vld [vmem:[#allocation4 + $0xa0] sm:$0xff] }
 0x1d9   : > { %v3258_v34 = vpop.f32.mrf.mxu0  ;;  %v3804_v43 = vld [vmem:[#allocation4 + $0x68] sm:$0xff] }
 0x1da   : > { %v3712_v44 = vpop.f32.mrf.mxu1  ;;  %3418 = vst.msk [vmem:[#allocation4 + $0x88] sm:$0xff] %vm171_vm1, %v3386_v58  ;;  %3865 = vst.msk [vmem:[#allocation4 + $0x50] sm:$0xff] %vm171_vm1, %v3833_v32  ;;  %v3385_v45 = vadd.f32 %v3353_v39, %v3258_v34  ;;  %v3836_v46 = vadd.f32 %v10713_v24, %v3804_v43  ;;  %v3360_v24 = vld [vmem:[#allocation4 + $0xb8] sm:$0xff] }
 0x1db   : > { %v10672_v47 = vpop.f32.mrf.mxu0  ;;  %v3803_v49 = vld [vmem:[#allocation4 + $0x60] sm:$0xff] }
 0x1dc   : > { %v10722_v36 = vpop.f32.mrf.mxu1  ;;  %3417 = vst.msk [vmem:[#allocation4 + $0x80] sm:$0xff] %vm171_vm1, %v3385_v45  ;;  %3868 = vst.msk [vmem:[#allocation4 + $0x68] sm:$0xff] %vm171_vm1, %v3836_v46  ;;  %v3388_v53 = vadd.f32 %v10672_v47, %v3356_v48  ;;  %v3835_v60 = vadd.f32 %v3803_v49, %v3692_v57  ;;  %v3359_v57 = vld [vmem:[#allocation4 + $0xb0] sm:$0xff] }
 0x1dd   : > { %v3268_v1 = vpop.f32.mrf.mxu0  ;;  %v3806_v40 = vld [vmem:[#allocation4 + $0x78] sm:$0xff] }
 0x1de   : > { %v3722_v3 = vpop.f32.mrf.mxu1  ;;  %3420 = vst.msk [vmem:[#allocation4 + $0x98] sm:$0xff] %vm171_vm1, %v3388_v53  ;;  %3867 = vst.msk [vmem:[#allocation4 + $0x60] sm:$0xff] %vm171_vm1, %v3835_v60  ;;  %v3387_v5 = vadd.f32 %v3355_v2, %v3268_v1  ;;  %v3838_v6 = vadd.f32 %v10716_v17, %v3806_v40  ;;  %v3362_v17 = vld [vmem:[#allocation4 + $0xc8] sm:$0xff] }
 0x1df   : > { %v10675_v42 = vpop.f32.mrf.mxu0  ;;  %v3805_v9 = vld [vmem:[#allocation4 + $0x70] sm:$0xff] }
 0x1e0   : > { %v10725_v10 = vpop.f32.mrf.mxu1  ;;  %3419 = vst.msk [vmem:[#allocation4 + $0x90] sm:$0xff] %vm171_vm1, %v3387_v5  ;;  %3870 = vst.msk [vmem:[#allocation4 + $0x78] sm:$0xff] %vm171_vm1, %v3838_v6  ;;  %v3390_v13 = vadd.f32 %v10675_v42, %v3358_v8  ;;  %v3837_v14 = vadd.f32 %v3805_v9, %v3702_v12  ;;  %v3361_v12 = vld [vmem:[#allocation4 + $0xc0] sm:$0xff]  ;;  %v3367_v8 = vld [vmem:[#allocation4 + $0xf0] sm:$0xff] }
 0x1e1   : > { %v3278_v15 = vpop.f32.mrf.mxu0  ;;  %v3808_v19 = vld [vmem:[#allocation4 + $0x88] sm:$0xff] }
 0x1e2   : > { %v3732_v20 = vpop.f32.mrf.mxu1  ;;  %3422 = vst.msk [vmem:[#allocation4 + $0xa8] sm:$0xff] %vm171_vm1, %v3390_v13  ;;  %3869 = vst.msk [vmem:[#allocation4 + $0x70] sm:$0xff] %vm171_vm1, %v3837_v14  ;;  %v3389_v21 = vadd.f32 %v3357_v16, %v3278_v15  ;;  %v3840_v22 = vadd.f32 %v10719_v54, %v3808_v19  ;;  %v3364_v54 = vld [vmem:[#allocation4 + $0xd8] sm:$0xff]  ;;  %v4246_v19 = vld [vmem:[#allocation4 + $0x8] sm:$0xff] }
 0x1e3   : > { %v10678_v23 = vpop.f32.mrf.mxu0  ;;  %v3807_v26 = vld [vmem:[#allocation4 + $0x80] sm:$0xff] }
 0x1e4   : > { %v10728_v28 = vpop.f32.mrf.mxu1  ;;  %3421 = vst.msk [vmem:[#allocation4 + $0xa0] sm:$0xff] %vm171_vm1, %v3389_v21  ;;  %3872 = vst.msk [vmem:[#allocation4 + $0x88] sm:$0xff] %vm171_vm1, %v3840_v22  ;;  %v3392_v30 = vadd.f32 %v10678_v23, %v3360_v24  ;;  %v3839_v52 = vadd.f32 %v3807_v26, %v3712_v44  ;;  %v3363_v44 = vld [vmem:[#allocation4 + $0xd0] sm:$0xff]  ;;  %v4245_v24 = vld [vmem:[#allocation4] sm:$0xff] }
 0x1e5   : > { %v3288_v55 = vpop.f32.mrf.mxu0  ;;  %v3810_v35 = vld [vmem:[#allocation4 + $0x98] sm:$0xff] }
 0x1e6   : > { %v3742_v37 = vpop.f32.mrf.mxu1  ;;  %3424 = vst.msk [vmem:[#allocation4 + $0xb8] sm:$0xff] %vm171_vm1, %v3392_v30  ;;  %3871 = vst.msk [vmem:[#allocation4 + $0x80] sm:$0xff] %vm171_vm1, %v3839_v52  ;;  %v3391_v59 = vadd.f32 %v3359_v57, %v3288_v55  ;;  %v3842_v61 = vadd.f32 %v10722_v36, %v3810_v35  ;;  %v3366_v36 = vld [vmem:[#allocation4 + $0xe8] sm:$0xff]  ;;  %v4248_v57 = vld [vmem:[#allocation4 + $0x18] sm:$0xff] }
 0x1e7   : > { %v10681_v62 = vpop.f32.mrf.mxu0  ;;  %v3809_v31 = vld [vmem:[#allocation4 + $0x90] sm:$0xff] }
 0x1e8   : > { %v10731_v56 = vpop.f32.mrf.mxu1  ;;  %3423 = vst.msk [vmem:[#allocation4 + $0xb0] sm:$0xff] %vm171_vm1, %v3391_v59  ;;  %3874 = vst.msk [vmem:[#allocation4 + $0x98] sm:$0xff] %vm171_vm1, %v3842_v61  ;;  %v3394_v41 = vadd.f32 %v10681_v62, %v3362_v17  ;;  %v3841_v18 = vadd.f32 %v3809_v31, %v3722_v3  ;;  %v4247_v62 = vld [vmem:[#allocation4 + $0x10] sm:$0xff] }
 0x1e9   : > { %v3298_v11 = vpop.f32.mrf.mxu0  ;;  %v3812_v33 = vld [vmem:[#allocation4 + $0xa8] sm:$0xff] }
 0x1ea   : > { %v3752_v25 = vpop.f32.mrf.mxu1  ;;  %3426 = vst.msk [vmem:[#allocation4 + $0xc8] sm:$0xff] %vm171_vm1, %v3394_v41  ;;  %3873 = vst.msk [vmem:[#allocation4 + $0x90] sm:$0xff] %vm171_vm1, %v3841_v18  ;;  %v3393_v27 = vadd.f32 %v3361_v12, %v3298_v11  ;;  %v3844_v29 = vadd.f32 %v10725_v10, %v3812_v33  ;;  %v4250_v11 = vld [vmem:[#allocation4 + $0x28] sm:$0xff] }
 0x1eb   : > { %v10684_v51 = vpop.f32.mrf.mxu0  ;;  %v3811_v58 = vld [vmem:[#allocation4 + $0xa0] sm:$0xff] }
 0x1ec   : > { %v10734_v32 = vpop.f32.mrf.mxu1  ;;  %3425 = vst.msk [vmem:[#allocation4 + $0xc0] sm:$0xff] %vm171_vm1, %v3393_v27  ;;  %3876 = vst.msk [vmem:[#allocation4 + $0xa8] sm:$0xff] %vm171_vm1, %v3844_v29  ;;  %v3396_v34 = vadd.f32 %v10684_v51, %v3364_v54  ;;  %v3843_v39 = vadd.f32 %v3811_v58, %v3732_v20  ;;  %v4249_v29 = vld [vmem:[#allocation4 + $0x20] sm:$0xff] }
 0x1ed   : > { %v3308_v43 = vpop.f32.mrf.mxu0  ;;  %v3814_v45 = vld [vmem:[#allocation4 + $0xb8] sm:$0xff] }
 0x1ee   : > { %v3762_v46 = vpop.f32.mrf.mxu1  ;;  %3428 = vst.msk [vmem:[#allocation4 + $0xd8] sm:$0xff] %vm171_vm1, %v3396_v34  ;;  %3875 = vst.msk [vmem:[#allocation4 + $0xa0] sm:$0xff] %vm171_vm1, %v3843_v39  ;;  %v3395_v47 = vadd.f32 %v3363_v44, %v3308_v43  ;;  %v3846_v48 = vadd.f32 %v10728_v28, %v3814_v45 }
 0x1ef   : > { %v10687_v49 = vpop.f32.mrf.mxu0  ;;  %v3813_v50 = vld [vmem:[#allocation4 + $0xb0] sm:$0xff] }
 0x1f0   : > { %3427 = vst.msk [vmem:[#allocation4 + $0xd0] sm:$0xff] %vm171_vm1, %v3395_v47  ;;  %3878 = vst.msk [vmem:[#allocation4 + $0xb8] sm:$0xff] %vm171_vm1, %v3846_v48  ;;  %v3398_v53 = vadd.f32 %v10687_v49, %v3366_v36  ;;  %v3845_v60 = vadd.f32 %v3813_v50, %v3742_v37  ;;  %v10737_v1 = vpop.f32.mrf.mxu1  ;;  %v4251_v47 = vld [vmem:[#allocation4 + $0x30] sm:$0xff] }
 0x1f1   : > { %v3318_v63 = vpop.f32.mrf.mxu0  ;;  %v3816_v0 = vld [vmem:[#allocation4 + $0xc8] sm:$0xff] }
 0x1f2   : > { %3430 = vst.msk [vmem:[#allocation4 + $0xe8] sm:$0xff] %vm171_vm1, %v3398_v53  ;;  %3877 = vst.msk [vmem:[#allocation4 + $0xb0] sm:$0xff] %vm171_vm1, %v3845_v60  ;;  %v3397_v2 = vadd.f32 %v3365_v38, %v3318_v63  ;;  %v3848_v40 = vadd.f32 %v10731_v56, %v3816_v0  ;;  %v3772_v10 = vpop.f32.mrf.mxu1  ;;  %v4254_v38 = vld [vmem:[#allocation4 + $0x48] sm:$0xff] }
 0x1f3   : > { %v10690_v3 = vpop.f32.mrf.mxu0  ;;  %v3815_v5 = vld [vmem:[#allocation4 + $0xc0] sm:$0xff] }
 0x1f4   : > { %3429 = vst.msk [vmem:[#allocation4 + $0xe0] sm:$0xff] %vm171_vm1, %v3397_v2  ;;  %3880 = vst.msk [vmem:[#allocation4 + $0xc8] sm:$0xff] %vm171_vm1, %v3848_v40  ;;  %v3400_v6 = vadd.f32 %v10690_v3, %v3368_v4  ;;  %v3847_v7 = vadd.f32 %v3815_v5, %v3752_v25  ;;  %v10740_v26 = vpop.f32.mrf.mxu1 }
 0x1f5   : > { %v3328_v42 = vpop.f32.mrf.mxu0  ;;  %v3818_v9 = vld [vmem:[#allocation4 + $0xd8] sm:$0xff] }
 0x1f6   : > { %3432 = vst.msk [vmem:[#allocation4 + $0xf8] sm:$0xff] %vm171_vm1, %v3400_v6  ;;  %3879 = vst.msk [vmem:[#allocation4 + $0xc0] sm:$0xff] %vm171_vm1, %v3847_v7  ;;  %v3399_v13 = vadd.f32 %v3367_v8, %v3328_v42  ;;  %v3850_v14 = vadd.f32 %v10734_v32, %v3818_v9  ;;  %v3782_v17 = vpop.f32.mrf.mxu1  ;;  %v4252_v32 = vld [vmem:[#allocation4 + $0x38] sm:$0xff]  ;;  %v4253_v7 = vld [vmem:[#allocation4 + $0x40] sm:$0xff] }
 0x1f7   : > { %v3817_v15 = vld [vmem:[#allocation4 + $0xd0] sm:$0xff]  ;;  %v10745_v16 = vpop.f32.mrf.mxu0 }
 0x1f8   : > { %3431 = vst.msk [vmem:[#allocation4 + $0xf0] sm:$0xff] %vm171_vm1, %v3399_v13  ;;  %3882 = vst.msk [vmem:[#allocation4 + $0xd8] sm:$0xff] %vm171_vm1, %v3850_v14  ;;  %v3849_v20 = vadd.f32 %v3817_v15, %v3762_v46  ;;  %v4278_v21 = vadd.f32 %v10745_v16, %v4246_v19  ;;  %v4256_v19 = vld [vmem:[#allocation4 + $0x58] sm:$0xff] }
 0x1f9   : > { %v3820_v22 = vld [vmem:[#allocation4 + $0xe8] sm:$0xff]  ;;  %v4086_v23 = vpop.f32.mrf.mxu0 }
 0x1fa   : > { %3881 = vst.msk [vmem:[#allocation4 + $0xd0] sm:$0xff] %vm171_vm1, %v3849_v20  ;;  %4310 = vst.msk [vmem:[#allocation4 + $0x8] sm:$0xff] %vm171_vm1, %v4278_v21  ;;  %v3852_v28 = vadd.f32 %v10737_v1, %v3820_v22  ;;  %v4277_v30 = vadd.f32 %v4245_v24, %v4086_v23 }
 0x1fb   : > { %v3819_v52 = vld [vmem:[#allocation4 + $0xe0] sm:$0xff]  ;;  %v10748_v55 = vpop.f32.mrf.mxu0 }
 0x1fc   : > { %3884 = vst.msk [vmem:[#allocation4 + $0xe8] sm:$0xff] %vm171_vm1, %v3852_v28  ;;  %4309 = vst.msk [vmem:[#allocation4] sm:$0xff] %vm171_vm1, %v4277_v30  ;;  %v3851_v35 = vadd.f32 %v3819_v52, %v3772_v10  ;;  %v4280_v37 = vadd.f32 %v10748_v55, %v4248_v57  ;;  %v4255_v52 = vld [vmem:[#allocation4 + $0x50] sm:$0xff] }
 0x1fd   : > { %v3822_v59 = vld [vmem:[#allocation4 + $0xf8] sm:$0xff]  ;;  %v4096_v61 = vpop.f32.mrf.mxu0 }
 0x1fe   : > { %3883 = vst.msk [vmem:[#allocation4 + $0xe0] sm:$0xff] %vm171_vm1, %v3851_v35  ;;  %4312 = vst.msk [vmem:[#allocation4 + $0x18] sm:$0xff] %vm171_vm1, %v4280_v37  ;;  %v3854_v31 = vadd.f32 %v10740_v26, %v3822_v59  ;;  %v4279_v56 = vadd.f32 %v4247_v62, %v4096_v61 }
 0x1ff   : > { %v3821_v41 = vld [vmem:[#allocation4 + $0xf0] sm:$0xff]  ;;  %v10751_v18 = vpop.f32.mrf.mxu0 }
 0x200   : > { %3886 = vst.msk [vmem:[#allocation4 + $0xf8] sm:$0xff] %vm171_vm1, %v3854_v31  ;;  %4311 = vst.msk [vmem:[#allocation4 + $0x10] sm:$0xff] %vm171_vm1, %v4279_v56  ;;  %v3853_v12 = vadd.f32 %v3821_v41, %v3782_v17  ;;  %v4282_v33 = vadd.f32 %v10751_v18, %v4250_v11  ;;  %v4258_v31 = vld [vmem:[#allocation4 + $0x68] sm:$0xff] }
 0x201   : > { %v12593_v25 = vld [vmem:[#allocation4 + $0x8] sm:$0xff]  ;;  %v4106_v27 = vpop.f32.mrf.mxu0 }
 0x202   : > { %3885 = vst.msk [vmem:[#allocation4 + $0xf0] sm:$0xff] %vm171_vm1, %v3853_v12  ;;  %4314 = vst.msk [vmem:[#allocation4 + $0x28] sm:$0xff] %vm171_vm1, %v4282_v33  ;;  %v4281_v51 = vadd.f32 %v4249_v29, %v4106_v27  ;;  %v4443_v34 = vmul.f32 %v12593_v25, %v12593_v25  ;;  %v4374_v48 = vsel %vm171_vm1, %v12593_v25, 0.0 }
 0x203   : > { %v12597_v54 = vld [vmem:[#allocation4] sm:$0xff]  ;;  %v10754_v58 = vpop.f32.mrf.mxu0 }
 0x204   : > { %v4373_v39 = vsel %vm171_vm1, %v12597_v54, 0.0  ;;  %v4442_v43 = vmul.f32 %v12597_v54, %v12597_v54  ;;  %4313 = vst.msk [vmem:[#allocation4 + $0x20] sm:$0xff] %vm171_vm1, %v4281_v51  ;;  %v4284_v44 = vadd.f32 %v10754_v58, %v4252_v32  ;;  %v4475_v0 = vsel %vm171_vm1, %v4443_v34, 0.0  ;;  %v4257_v51 = vld [vmem:[#allocation4 + $0x60] sm:$0xff] }
 0x205   : > { %v12606_v45 = vld [vmem:[#allocation4 + $0x18] sm:$0xff]  ;;  %v4116_v46 = vpop.f32.mrf.mxu0  ;;  %v4375_v50 = vadd.f32 %v4374_v48, %v4373_v39 }
 0x206   : > { %v4474_v49 = vsel %vm171_vm1, %v4442_v43, 0.0  ;;  %4316 = vst.msk [vmem:[#allocation4 + $0x38] sm:$0xff] %vm171_vm1, %v4284_v44  ;;  %v4283_v36 = vadd.f32 %v4251_v47, %v4116_v46  ;;  %v4445_v53 = vmul.f32 %v12606_v45, %v12606_v45  ;;  %v4378_v42 = vsel %vm171_vm1, %v12606_v45, 0.0  ;;  %v4260_v48 = vld [vmem:[#allocation4 + $0x78] sm:$0xff] }
 0x207   : > { %v12614_v60 = vld [vmem:[#allocation4 + $0x10] sm:$0xff]  ;;  %v10757_v63 = vpop.f32.mrf.mxu0  ;;  %v4476_v3 = vadd.f32 %v4475_v0, %v4474_v49 }
 0x208   : > { %v4376_v1 = vsel %vm171_vm1, %v12614_v60, 0.0  ;;  %v4444_v2 = vmul.f32 %v12614_v60, %v12614_v60  ;;  %4315 = vst.msk [vmem:[#allocation4 + $0x30] sm:$0xff] %vm171_vm1, %v4283_v36  ;;  %v4286_v40 = vadd.f32 %v10757_v63, %v4254_v38  ;;  %v4479_v10 = vsel %vm171_vm1, %v4445_v53, 0.0 }
 0x209   : > { %v4377_v4 = vadd.f32 %v4376_v1, %v4375_v50  ;;  %v12622_v5 = vld [vmem:[#allocation4 + $0x28] sm:$0xff]  ;;  %v4126_v6 = vpop.f32.mrf.mxu0 }
 0x20a   : > { %v4477_v8 = vsel %vm171_vm1, %v4444_v2, 0.0  ;;  %4318 = vst.msk [vmem:[#allocation4 + $0x48] sm:$0xff] %vm171_vm1, %v4286_v40  ;;  %v4285_v9 = vadd.f32 %v4253_v7, %v4126_v6  ;;  %v4447_v20 = vmul.f32 %v12622_v5, %v12622_v5  ;;  %v4382_v55 = vsel %vm171_vm1, %v12622_v5, 0.0  ;;  %v4259_v2 = vld [vmem:[#allocation4 + $0x70] sm:$0xff] }
 0x20b   : > { %v4478_v13 = vadd.f32 %v4477_v8, %v4476_v3  ;;  %v12629_v14 = vld [vmem:[#allocation4 + $0x20] sm:$0xff]  ;;  %v4379_v15 = vadd.f32 %v4378_v42, %v4377_v4  ;;  %v10760_v16 = vpop.f32.mrf.mxu0 }
 0x20c   : > { %v4380_v21 = vsel %vm171_vm1, %v12629_v14, 0.0  ;;  %v4446_v22 = vmul.f32 %v12629_v14, %v12629_v14  ;;  %4317 = vst.msk [vmem:[#allocation4 + $0x40] sm:$0xff] %vm171_vm1, %v4285_v9  ;;  %v4288_v23 = vadd.f32 %v10760_v16, %v4256_v19  ;;  %v4483_v56 = vsel %vm171_vm1, %v4447_v20, 0.0 }
 0x20d   : > { %v4381_v24 = vadd.f32 %v4380_v21, %v4379_v15  ;;  %v4480_v26 = vadd.f32 %v4479_v10, %v4478_v13  ;;  %v12638_v28 = vld [vmem:[#allocation4 + $0x38] sm:$0xff]  ;;  %v4136_v30 = vpop.f32.mrf.mxu0  ;;  %v4262_v10 = vld [vmem:[#allocation4 + $0x88] sm:$0xff] }
 0x20e   : > { %v4481_v57 = vsel %vm171_vm1, %v4446_v22, 0.0  ;;  %4320 = vst.msk [vmem:[#allocation4 + $0x58] sm:$0xff] %vm171_vm1, %v4288_v23  ;;  %v4287_v35 = vadd.f32 %v4255_v52, %v4136_v30  ;;  %v4449_v59 = vmul.f32 %v12638_v28, %v12638_v28  ;;  %v4386_v58 = vsel %vm171_vm1, %v12638_v28, 0.0 }
 0x20f   : > { %v4482_v37 = vadd.f32 %v4481_v57, %v4480_v26  ;;  %v12646_v61 = vld [vmem:[#allocation4 + $0x30] sm:$0xff]  ;;  %v4383_v62 = vadd.f32 %v4382_v55, %v4381_v24  ;;  %v10763_v17 = vpop.f32.mrf.mxu0  ;;  %v4261_v24 = vld [vmem:[#allocation4 + $0x80] sm:$0xff] }
 0x210   : > { %v4384_v41 = vsel %vm171_vm1, %v12646_v61, 0.0  ;;  %v4448_v18 = vmul.f32 %v12646_v61, %v12646_v61  ;;  %4319 = vst.msk [vmem:[#allocation4 + $0x50] sm:$0xff] %vm171_vm1, %v4287_v35  ;;  %v4290_v11 = vadd.f32 %v10763_v17, %v4258_v31  ;;  %v4487_v39 = vsel %vm171_vm1, %v4449_v59, 0.0 }
 0x211   : > { %v4385_v12 = vadd.f32 %v4384_v41, %v4383_v62  ;;  %v4484_v33 = vadd.f32 %v4483_v56, %v4482_v37  ;;  %v12654_v27 = vld [vmem:[#allocation4 + $0x48] sm:$0xff]  ;;  %v4146_v29 = vpop.f32.mrf.mxu0  ;;  %v4264_v62 = vld [vmem:[#allocation4 + $0x98] sm:$0xff] }
 0x212   : > { %v4485_v32 = vsel %vm171_vm1, %v4448_v18, 0.0  ;;  %4322 = vst.msk [vmem:[#allocation4 + $0x68] sm:$0xff] %vm171_vm1, %v4290_v11  ;;  %v4289_v34 = vadd.f32 %v4257_v51, %v4146_v29  ;;  %v4451_v49 = vmul.f32 %v12654_v27, %v12654_v27  ;;  %v4390_v40 = vsel %vm171_vm1, %v12654_v27, 0.0  ;;  %v4263_v29 = vld [vmem:[#allocation4 + $0x90] sm:$0xff] }
 0x213   : > { %v4486_v43 = vadd.f32 %v4485_v32, %v4484_v33  ;;  %v12661_v44 = vld [vmem:[#allocation4 + $0x40] sm:$0xff]  ;;  %v4387_v46 = vadd.f32 %v4386_v58, %v4385_v12  ;;  %v10766_v47 = vpop.f32.mrf.mxu0 }
 0x214   : > { %v4388_v36 = vsel %vm171_vm1, %v12661_v44, 0.0  ;;  %v4450_v50 = vmul.f32 %v12661_v44, %v12661_v44  ;;  %4321 = vst.msk [vmem:[#allocation4 + $0x60] sm:$0xff] %vm171_vm1, %v4289_v34  ;;  %v4292_v53 = vadd.f32 %v10766_v47, %v4260_v48  ;;  %v4491_v13 = vsel %vm171_vm1, %v4451_v49, 0.0  ;;  %v4266_v48 = vld [vmem:[#allocation4 + $0xa8] sm:$0xff] }
 0x215   : > { %v4389_v63 = vadd.f32 %v4388_v36, %v4387_v46  ;;  %v4488_v38 = vadd.f32 %v4487_v39, %v4486_v43  ;;  %v12670_v0 = vld [vmem:[#allocation4 + $0x58] sm:$0xff]  ;;  %v4156_v1 = vpop.f32.mrf.mxu0 }
 0x216   : > { %v4489_v3 = vsel %vm171_vm1, %v4450_v50, 0.0  ;;  %4324 = vst.msk [vmem:[#allocation4 + $0x78] sm:$0xff] %vm171_vm1, %v4292_v53  ;;  %v4291_v4 = vadd.f32 %v4259_v2, %v4156_v1  ;;  %v4453_v7 = vmul.f32 %v12670_v0, %v12670_v0  ;;  %v4394_v26 = vsel %vm171_vm1, %v12670_v0, 0.0 }
 0x217   : > { %v4490_v6 = vadd.f32 %v4489_v3, %v4488_v38  ;;  %v12678_v42 = vld [vmem:[#allocation4 + $0x50] sm:$0xff]  ;;  %v4391_v8 = vadd.f32 %v4390_v40, %v4389_v63  ;;  %v10769_v9 = vpop.f32.mrf.mxu0  ;;  %v4265_v40 = vld [vmem:[#allocation4 + $0xa0] sm:$0xff] }
 0x218   : > { %v4392_v15 = vsel %vm171_vm1, %v12678_v42, 0.0  ;;  %v4452_v16 = vmul.f32 %v12678_v42, %v12678_v42  ;;  %4323 = vst.msk [vmem:[#allocation4 + $0x70] sm:$0xff] %vm171_vm1, %v4291_v4  ;;  %v4294_v19 = vadd.f32 %v10769_v9, %v4262_v10  ;;  %v4495_v55 = vsel %vm171_vm1, %v4453_v7, 0.0 }
 0x219   : > { %v4393_v20 = vadd.f32 %v4392_v15, %v4391_v8  ;;  %v4492_v21 = vadd.f32 %v4491_v13, %v4490_v6  ;;  %v12686_v22 = vld [vmem:[#allocation4 + $0x68] sm:$0xff]  ;;  %v4166_v23 = vpop.f32.mrf.mxu0  ;;  %v4268_v15 = vld [vmem:[#allocation4 + $0xb8] sm:$0xff] }
 0x21a   : > { %v4493_v30 = vsel %vm171_vm1, %v4452_v16, 0.0  ;;  %4326 = vst.msk [vmem:[#allocation4 + $0x88] sm:$0xff] %vm171_vm1, %v4294_v19  ;;  %v4293_v52 = vadd.f32 %v4261_v24, %v4166_v23  ;;  %v4455_v17 = vmul.f32 %v12686_v22, %v12686_v22  ;;  %v4398_v51 = vsel %vm171_vm1, %v12686_v22, 0.0 }
 0x21b   : > { %v4494_v57 = vadd.f32 %v4493_v30, %v4492_v21  ;;  %v12693_v35 = vld [vmem:[#allocation4 + $0x60] sm:$0xff]  ;;  %v4395_v37 = vadd.f32 %v4394_v26, %v4393_v20  ;;  %v10772_v59 = vpop.f32.mrf.mxu0 }
 0x21c   : > { %v4396_v31 = vsel %vm171_vm1, %v12693_v35, 0.0  ;;  %v4454_v56 = vmul.f32 %v12693_v35, %v12693_v35  ;;  %4325 = vst.msk [vmem:[#allocation4 + $0x80] sm:$0xff] %vm171_vm1, %v4293_v52  ;;  %v4296_v41 = vadd.f32 %v10772_v59, %v4264_v62  ;;  %v4499_v49 = vsel %vm171_vm1, %v4455_v17, 0.0  ;;  %v4267_v52 = vld [vmem:[#allocation4 + $0xb0] sm:$0xff] }
 0x21d   : > { %v4397_v18 = vadd.f32 %v4396_v31, %v4395_v37  ;;  %v4496_v11 = vadd.f32 %v4495_v55, %v4494_v57  ;;  %v12702_v12 = vld [vmem:[#allocation4 + $0x78] sm:$0xff]  ;;  %v4176_v33 = vpop.f32.mrf.mxu0 }
 0x21e   : > { %v4497_v58 = vsel %vm171_vm1, %v4454_v56, 0.0  ;;  %4328 = vst.msk [vmem:[#allocation4 + $0x98] sm:$0xff] %vm171_vm1, %v4296_v41  ;;  %v4295_v32 = vadd.f32 %v4263_v29, %v4176_v33  ;;  %v4457_v39 = vmul.f32 %v12702_v12, %v12702_v12  ;;  %v4402_v3 = vsel %vm171_vm1, %v12702_v12, 0.0  ;;  %v4270_v41 = vld [vmem:[#allocation4 + $0xc8] sm:$0xff] }
 0x21f   : > { %v4498_v34 = vadd.f32 %v4497_v58, %v4496_v11  ;;  %v12710_v43 = vld [vmem:[#allocation4 + $0x70] sm:$0xff]  ;;  %v4399_v46 = vadd.f32 %v4398_v51, %v4397_v18  ;;  %v10775_v47 = vpop.f32.mrf.mxu0  ;;  %v9539_v18 = vld [vmem:[%s14442_s2 + $0xc] sm:$0xf] }
 0x220   : > { %v4400_v36 = vsel %vm171_vm1, %v12710_v43, 0.0  ;;  %v4456_v50 = vmul.f32 %v12710_v43, %v12710_v43  ;;  %4327 = vst.msk [vmem:[#allocation4 + $0x90] sm:$0xff] %vm171_vm1, %v4295_v32  ;;  %v4298_v53 = vadd.f32 %v10775_v47, %v4266_v48  ;;  %v4503_v7 = vsel %vm171_vm1, %v4457_v39, 0.0  ;;  %10941 = vmatprep.subr.msk.mxu0 %vm447_vm0, %v9539_v18 }
 0x221   : > { %v4401_v63 = vadd.f32 %v4400_v36, %v4399_v46  ;;  %v4500_v38 = vadd.f32 %v4499_v49, %v4498_v34  ;;  %v12718_v1 = vld [vmem:[#allocation4 + $0x88] sm:$0xff]  ;;  %v4186_v2 = vpop.f32.mrf.mxu0  ;;  %v4269_v46 = vld [vmem:[#allocation4 + $0xc0] sm:$0xff]  ;;  %10942 = vmatpush3.msk.msra.mxu0 %vm447_vm0, %v9539_v18 }
 0x222   : > { %v4501_v4 = vsel %vm171_vm1, %v4456_v50, 0.0  ;;  %4330 = vst.msk [vmem:[#allocation4 + $0xa8] sm:$0xff] %vm171_vm1, %v4298_v53  ;;  %v4297_v6 = vadd.f32 %v4265_v40, %v4186_v2  ;;  %v4459_v16 = vmul.f32 %v12718_v1, %v12718_v1  ;;  %v4406_v55 = vsel %vm171_vm1, %v12718_v1, 0.0  ;;  %v4272_v2 = vld [vmem:[#allocation4 + $0xd8] sm:$0xff] }
 0x223   : > { %v4502_v8 = vadd.f32 %v4501_v4, %v4500_v38  ;;  %v12725_v9 = vld [vmem:[#allocation4 + $0x80] sm:$0xff]  ;;  %v4403_v10 = vadd.f32 %v4402_v3, %v4401_v63  ;;  %v10778_v13 = vpop.f32.mrf.mxu0 }
 0x224   : > { %v4404_v19 = vsel %vm171_vm1, %v12725_v9, 0.0  ;;  %v4458_v20 = vmul.f32 %v12725_v9, %v12725_v9  ;;  %4329 = vst.msk [vmem:[#allocation4 + $0xa0] sm:$0xff] %vm171_vm1, %v4297_v6  ;;  %v4300_v21 = vadd.f32 %v10778_v13, %v4268_v15  ;;  %v4507_v11 = vsel %vm171_vm1, %v4459_v16, 0.0  ;;  %v4271_v15 = vld [vmem:[#allocation4 + $0xd0] sm:$0xff] }
 0x225   : > { %v4405_v23 = vadd.f32 %v4404_v19, %v4403_v10  ;;  %v4504_v24 = vadd.f32 %v4503_v7, %v4502_v8  ;;  %v12734_v26 = vld [vmem:[#allocation4 + $0x98] sm:$0xff]  ;;  %v4196_v30 = vpop.f32.mrf.mxu0 }
 0x226   : > { %v4505_v57 = vsel %vm171_vm1, %v4458_v20, 0.0  ;;  %4332 = vst.msk [vmem:[#allocation4 + $0xb8] sm:$0xff] %vm171_vm1, %v4300_v21  ;;  %v4299_v37 = vadd.f32 %v4267_v52, %v4196_v30  ;;  %v4461_v62 = vmul.f32 %v12734_v26, %v12734_v26  ;;  %v4410_v47 = vsel %vm171_vm1, %v12734_v26, 0.0 }
 0x227   : > { %v4506_v59 = vadd.f32 %v4505_v57, %v4504_v24  ;;  %v12742_v17 = vld [vmem:[#allocation4 + $0x90] sm:$0xff]  ;;  %v4407_v31 = vadd.f32 %v4406_v55, %v4405_v23  ;;  %v10781_v56 = vpop.f32.mrf.mxu0  ;;  %v4274_v55 = vld [vmem:[#allocation4 + $0xe8] sm:$0xff] }
 0x228   : > { %v4408_v33 = vsel %vm171_vm1, %v12742_v17, 0.0  ;;  %v4460_v29 = vmul.f32 %v12742_v17, %v12742_v17  ;;  %4331 = vst.msk [vmem:[#allocation4 + $0xb0] sm:$0xff] %vm171_vm1, %v4299_v37  ;;  %v4302_v51 = vadd.f32 %v10781_v56, %v4270_v41  ;;  %v4511_v36 = vsel %vm171_vm1, %v4461_v62, 0.0  ;;  %v12784_v57 = vld [vmem:[%s14442_s2 + $0x10] sm:$0xf] }
 0x229   : > { %v4409_v58 = vadd.f32 %v4408_v33, %v4407_v31  ;;  %v4508_v32 = vadd.f32 %v4507_v11, %v4506_v59  ;;  %v12754_v34 = vld [vmem:[#allocation4 + $0xa8] sm:$0xff]  ;;  %v4206_v39 = vpop.f32.mrf.mxu0  ;;  %10991 = vmatprep.subr.msk.mxu1 %vm447_vm0, %v12784_v57  ;;  %v4273_v33 = vld [vmem:[#allocation4 + $0xe0] sm:$0xff] }
 0x22a   : > { %v4509_v48 = vsel %vm171_vm1, %v4460_v29, 0.0  ;;  %4334 = vst.msk [vmem:[#allocation4 + $0xc8] sm:$0xff] %vm171_vm1, %v4302_v51  ;;  %v4301_v49 = vadd.f32 %v4269_v46, %v4206_v39  ;;  %v4463_v40 = vmul.f32 %v12754_v34, %v12754_v34  ;;  %v4414_v16 = vsel %vm171_vm1, %v12754_v34, 0.0 }
 0x22b   : > { %v4510_v50 = vadd.f32 %v4509_v48, %v4508_v32  ;;  %v12762_v53 = vld [vmem:[#allocation4 + $0xa0] sm:$0xff]  ;;  %v4411_v63 = vadd.f32 %v4410_v47, %v4409_v58  ;;  %v10784_v38 = vpop.f32.mrf.mxu0 }
 0x22c   : > { %v4412_v3 = vsel %vm171_vm1, %v12762_v53, 0.0  ;;  %v4462_v4 = vmul.f32 %v12762_v53, %v12762_v53  ;;  %4333 = vst.msk [vmem:[#allocation4 + $0xc0] sm:$0xff] %vm171_vm1, %v4301_v49  ;;  %v4304_v6 = vadd.f32 %v10784_v38, %v4272_v2  ;;  %v4515_v37 = vsel %vm171_vm1, %v4463_v40, 0.0  ;;  %v4276_v49 = vld [vmem:[#allocation4 + $0xf8] sm:$0xff] }
 0x22d   : > { %v4413_v7 = vadd.f32 %v4412_v3, %v4411_v63  ;;  %v4512_v8 = vadd.f32 %v4511_v36, %v4510_v50  ;;  %v12771_v10 = vld [vmem:[#allocation4 + $0xb8] sm:$0xff]  ;;  %v4216_v13 = vpop.f32.mrf.mxu0 }
 0x22e   : > { %v4513_v19 = vsel %vm171_vm1, %v4462_v4, 0.0  ;;  %4336 = vst.msk [vmem:[#allocation4 + $0xd8] sm:$0xff] %vm171_vm1, %v4304_v6  ;;  %v4303_v20 = vadd.f32 %v4271_v15, %v4216_v13  ;;  %v4465_v23 = vmul.f32 %v12771_v10, %v12771_v10  ;;  %v4418_v29 = vsel %vm171_vm1, %v12771_v10, 0.0  ;;  %v4275_v6 = vld [vmem:[#allocation4 + $0xf0] sm:$0xff] }
 0x22f   : > { %v4514_v21 = vadd.f32 %v4513_v19, %v4512_v8  ;;  %v12779_v24 = vld [vmem:[#allocation4 + $0xb0] sm:$0xff]  ;;  %v4415_v30 = vadd.f32 %v4414_v16, %v4413_v7  ;;  %v10787_v52 = vpop.f32.mrf.mxu0 }
 0x230   : > { %v4416_v59 = vsel %vm171_vm1, %v12779_v24, 0.0  ;;  %v4464_v62 = vmul.f32 %v12779_v24, %v12779_v24  ;;  %4335 = vst.msk [vmem:[#allocation4 + $0xd0] sm:$0xff] %vm171_vm1, %v4303_v20  ;;  %v4306_v31 = vadd.f32 %v10787_v52, %v4274_v55  ;;  %v4519_v32 = vsel %vm171_vm1, %v4465_v23, 0.0 }
 0x231   : > { %v4417_v56 = vadd.f32 %v4416_v59, %v4415_v30  ;;  %v4516_v41 = vadd.f32 %v4515_v37, %v4514_v21  ;;  %v12794_v18 = vld [vmem:[#allocation4 + $0xc8] sm:$0xff]  ;;  %v4226_v11 = vpop.f32.mrf.mxu0 }
 0x232   : > { %v4517_v51 = vsel %vm171_vm1, %v4464_v62, 0.0  ;;  %4338 = vst.msk [vmem:[#allocation4 + $0xe8] sm:$0xff] %vm171_vm1, %v4306_v31  ;;  %v4305_v58 = vadd.f32 %v4273_v33, %v4226_v11  ;;  %v4467_v36 = vmul.f32 %v12794_v18, %v12794_v18  ;;  %v4422_v7 = vsel %vm171_vm1, %v12794_v18, 0.0 }
 0x233   : > { %v4518_v39 = vadd.f32 %v4517_v51, %v4516_v41  ;;  %v12801_v46 = vld [vmem:[#allocation4 + $0xc0] sm:$0xff]  ;;  %v4419_v47 = vadd.f32 %v4418_v29, %v4417_v56  ;;  %v10790_v48 = vpop.f32.mrf.mxu0 }
 0x234   : > { %v4420_v50 = vsel %vm171_vm1, %v12801_v46, 0.0  ;;  %v4466_v63 = vmul.f32 %v12801_v46, %v12801_v46  ;;  %4337 = vst.msk [vmem:[#allocation4 + $0xe0] sm:$0xff] %vm171_vm1, %v4305_v58  ;;  %v4308_v38 = vadd.f32 %v10790_v48, %v4276_v49  ;;  %v4523_v20 = vsel %vm171_vm1, %v4467_v36, 0.0 }
 0x235   : > { %v4421_v2 = vadd.f32 %v4420_v50, %v4419_v47  ;;  %v4520_v40 = vadd.f32 %v4519_v32, %v4518_v39  ;;  %v12810_v3 = vld [vmem:[#allocation4 + $0xd8] sm:$0xff]  ;;  %v4236_v4 = vpop.f32.mrf.mxu0 }
 0x236   : > { %v4521_v8 = vsel %vm171_vm1, %v4466_v63, 0.0  ;;  %4340 = vst.msk [vmem:[#allocation4 + $0xf8] sm:$0xff] %vm171_vm1, %v4308_v38  ;;  %v4307_v13 = vadd.f32 %v4275_v6, %v4236_v4  ;;  %v4469_v21 = vmul.f32 %v12810_v3, %v12810_v3  ;;  %v4426_v59 = vsel %vm171_vm1, %v12810_v3, 0.0 }
 0x237   : > { %v4522_v15 = vadd.f32 %v4521_v8, %v4520_v40  ;;  %v12816_v16 = vld [vmem:[#allocation4 + $0xd0] sm:$0xff]  ;;  %v4423_v19 = vadd.f32 %v4422_v7, %v4421_v2 }
 0x238   : > { %v4424_v23 = vsel %vm171_vm1, %v12816_v16, 0.0  ;;  %v4468_v30 = vmul.f32 %v12816_v16, %v12816_v16  ;;  %4339 = vst.msk [vmem:[#allocation4 + $0xf0] sm:$0xff] %vm171_vm1, %v4307_v13  ;;  %v4527_v11 = vsel %vm171_vm1, %v4469_v21, 0.0 }
 0x239   : > { %v4425_v52 = vadd.f32 %v4424_v23, %v4423_v19  ;;  %v4524_v55 = vadd.f32 %v4523_v20, %v4522_v15  ;;  %v12826_v37 = vld [vmem:[#allocation4 + $0xe8] sm:$0xff] }
 0x23a   : > { %v4525_v62 = vsel %vm171_vm1, %v4468_v30, 0.0  ;;  %v4471_v33 = vmul.f32 %v12826_v37, %v12826_v37  ;;  %v4430_v47 = vsel %vm171_vm1, %v12826_v37, 0.0 }
 0x23b   : > { %v4526_v31 = vadd.f32 %v4525_v62, %v4524_v55  ;;  %v12831_v56 = vld [vmem:[#allocation4 + $0xe0] sm:$0xff]  ;;  %v4427_v41 = vadd.f32 %v4426_v59, %v4425_v52 }
 0x23c   : > { %v4428_v29 = vsel %vm171_vm1, %v12831_v56, 0.0  ;;  %v4470_v51 = vmul.f32 %v12831_v56, %v12831_v56  ;;  %v4531_v63 = vsel %vm171_vm1, %v4471_v33, 0.0 }
 0x23d   : > { %v4429_v58 = vadd.f32 %v4428_v29, %v4427_v41  ;;  %v4528_v32 = vadd.f32 %v4527_v11, %v4526_v31  ;;  %v12840_v39 = vld [vmem:[#allocation4 + $0xf8] sm:$0xff] }
 0x23e   : > { %v4529_v48 = vsel %vm171_vm1, %v4470_v51, 0.0  ;;  %v4473_v38 = vmul.f32 %v12840_v39, %v12840_v39  ;;  %v4434_v7 = vsel %vm171_vm1, %v12840_v39, 0.0 }
 0x23f   : > { %v4530_v49 = vadd.f32 %v4529_v48, %v4528_v32  ;;  %v12845_v36 = vld [vmem:[#allocation4 + $0xf0] sm:$0xff]  ;;  %v4431_v50 = vadd.f32 %v4430_v47, %v4429_v58 }
 0x240   : > { %v4432_v2 = vsel %vm171_vm1, %v12845_v36, 0.0  ;;  %v4472_v40 = vmul.f32 %v12845_v36, %v12845_v36  ;;  %v4535_v19 = vsel %vm171_vm1, %v4473_v38, 0.0 }
 0x241   : > { %v4433_v4 = vadd.f32 %v4432_v2, %v4431_v50  ;;  %v4532_v6 = vadd.f32 %v4531_v63, %v4530_v49 }
 0x242   : > { %v4533_v8 = vsel %vm171_vm1, %v4472_v40, 0.0 }
 0x243   : > { %v4435_v13 = vadd.f32 %v4434_v7, %v4433_v4  ;;  %v4534_v15 = vadd.f32 %v4533_v8, %v4532_v6 }
 0x245   : > { %v4436_v20 = vrot.slane %v4435_v13, 4  ;;  %v4536_v21 = vadd.f32 %v4535_v19, %v4534_v15 }
 0x247   : > { %v4437_v23 = vadd.f32 %v4436_v20, %v4435_v13  ;;  %v4537_v30 = vrot.slane %v4536_v21, 4 }
 0x249   : > { %v4438_v52 = vrot.slane %v4437_v23, 2  ;;  %v4538_v55 = vadd.f32 %v4537_v30, %v4536_v21 }
 0x24b   : > { %v4439_v59 = vadd.f32 %v4438_v52, %v4437_v23  ;;  %v4539_v62 = vrot.slane %v4538_v55, 2 }
 0x24d   : > { %v4440_v31 = vrot.slane %v4439_v59, 1  ;;  %v4540_v41 = vadd.f32 %v4539_v62, %v4538_v55 }
 0x24f   : > { %v4441_v11 = vadd.f32 %v4440_v31, %v4439_v59  ;;  %v4541_v33 = vrot.slane %v4540_v41, 1 }
 0x251   : > { %v4542_v29 = vadd.f32 %v4541_v33, %v4540_v41  ;;  %v12858_v51 = vmul.f32 0.00390625, %v4441_v11 }
 0x253   : > { %v4544_v58 = vmul.f32 0.00390625, %v4542_v29  ;;  %v4545_v32 = vmul.f32 %v12858_v51, %v12858_v51  ;;  %v4549_v50 = vsub.f32 %v12593_v25, %v12858_v51  ;;  %v4551_v63 = vsub.f32 %v12606_v45, %v12858_v51 }
 0x254   : > { %v4553_v38 = vsub.f32 %v12622_v5, %v12858_v51  ;;  %v4555_v2 = vsub.f32 %v12638_v28, %v12858_v51  ;;  %v4557_v40 = vsub.f32 %v12654_v27, %v12858_v51  ;;  %v4559_v4 = vsub.f32 %v12670_v0, %v12858_v51 }
 0x255   : > { %v4546_v47 = vsub.f32 %v4544_v58, %v4545_v32  ;;  %v4561_v6 = vsub.f32 %v12686_v22, %v12858_v51  ;;  %v4563_v25 = vsub.f32 %v12702_v12, %v12858_v51  ;;  %v4565_v45 = vsub.f32 %v12718_v1, %v12858_v51 }
 0x256   : > { %v4567_v5 = vsub.f32 %v12734_v26, %v12858_v51  ;;  %v4569_v28 = vsub.f32 %v12754_v34, %v12858_v51  ;;  %v4571_v27 = vsub.f32 %v12771_v10, %v12858_v51  ;;  %v4573_v0 = vsub.f32 %v12794_v18, %v12858_v51 }
 0x257   : > { %v4547_v48 = vmax.f32 %v4546_v47, 0.0  ;;  %v4575_v22 = vsub.f32 %v12810_v3, %v12858_v51  ;;  %v4577_v12 = vsub.f32 %v12826_v37, %v12858_v51  ;;  %v4579_v7 = vsub.f32 %v12840_v39, %v12858_v51 }
 0x258   : > { %v4548_v8 = vsub.f32 %v12597_v54, %v12858_v51  ;;  %v4550_v13 = vsub.f32 %v12614_v60, %v12858_v51  ;;  %v4552_v15 = vsub.f32 %v12629_v14, %v12858_v51  ;;  %v4554_v19 = vsub.f32 %v12646_v61, %v12858_v51 }
 0x259   : > { %v4580_v49 = vadd.f32 1e-05, %v4547_v48  ;;  %v4556_v20 = vsub.f32 %v12661_v44, %v12858_v51  ;;  %v4558_v21 = vsub.f32 %v12678_v42, %v12858_v51  ;;  %v4560_v23 = vsub.f32 %v12693_v35, %v12858_v51  ;;  %v12921_v42 = vld [vmem:[%s14442_s2 + $0x14] sm:$0xf] }
 0x25a   : > { %v4562_v54 = vsub.f32 %v12710_v43, %v12858_v51  ;;  %v4564_v60 = vsub.f32 %v12725_v9, %v12858_v51  ;;  %v4566_v14 = vsub.f32 %v12742_v17, %v12858_v51  ;;  %v4568_v61 = vsub.f32 %v12762_v53, %v12858_v51  ;;  %11041 = vmatprep.subr.msk.mxu0 %vm447_vm0, %v12921_v42 }
 0x25b   : > { %11250 = vrsqrt.f32 %v4580_v49  ;;  %v4570_v44 = vsub.f32 %v12779_v24, %v12858_v51  ;;  %v4572_v43 = vsub.f32 %v12801_v46, %v12858_v51  ;;  %v4574_v9 = vsub.f32 %v12816_v16, %v12858_v51 }
 0x25c   : > { %v4576_v17 = vsub.f32 %v12831_v56, %v12858_v51  ;;  %v4578_v53 = vsub.f32 %v12845_v36, %v12858_v51 }
 0x268   : > { %v12923_v35 = vpop.eup %11250 }
 0x269   : > { %v4582_v24 = vmul.f32 %v12923_v35, %v4548_v8  ;;  %v4583_v30 = vmul.f32 %v12923_v35, %v4549_v50  ;;  %v4584_v52 = vmul.f32 %v12923_v35, %v4550_v13  ;;  %v4585_v55 = vmul.f32 %v12923_v35, %v4551_v63 }
 0x26a   : > { %v4586_v59 = vmul.f32 %v12923_v35, %v4552_v15  ;;  %v4587_v62 = vmul.f32 %v12923_v35, %v4553_v38  ;;  %v4588_v31 = vmul.f32 %v12923_v35, %v4554_v19  ;;  %v4589_v41 = vmul.f32 %v12923_v35, %v4555_v2 }
 0x26b   : > { %v4614_v11 = vmax.f32 %v4582_v24, 0.0  ;;  %v4615_v33 = vmax.f32 %v4583_v30, 0.0  ;;  %v4616_v29 = vmax.f32 %v4584_v52, 0.0  ;;  %v4617_v58 = vmax.f32 %v4585_v55, 0.0 }
 0x26c   : > { %v4618_v32 = vmax.f32 %v4586_v59, 0.0  ;;  %v4619_v47 = vmax.f32 %v4587_v62, 0.0  ;;  %v4620_v48 = vmax.f32 %v4588_v31, 0.0  ;;  %v4621_v49 = vmax.f32 %v4589_v41, 0.0 }
 0x26d   : > { %4646 = vst.msk [vmem:[#allocation3 + $0x19] sm:$0xff] %vm171_vm1, %v4614_v11  ;;  %4647 = vst.msk [vmem:[#allocation3 + $0x21] sm:$0xff] %vm171_vm1, %v4615_v33  ;;  %v4590_v50 = vmul.f32 %v12923_v35, %v4556_v20  ;;  %v4591_v63 = vmul.f32 %v12923_v35, %v4557_v40  ;;  %v4592_v38 = vmul.f32 %v12923_v35, %v4558_v21 }
 0x26e   : > { %4648 = vst.msk [vmem:[#allocation3 + $0x31] sm:$0xff] %vm171_vm1, %v4616_v29  ;;  %4649 = vst.msk [vmem:[#allocation3 + $0x39] sm:$0xff] %vm171_vm1, %v4617_v58  ;;  %v4593_v2 = vmul.f32 %v12923_v35, %v4559_v4  ;;  %v4594_v8 = vmul.f32 %v12923_v35, %v4560_v23  ;;  %v4595_v13 = vmul.f32 %v12923_v35, %v4561_v6 }
 0x26f   : > { %4650 = vst.msk [vmem:[#allocation3 + $0x49] sm:$0xff] %vm171_vm1, %v4618_v32  ;;  %4651 = vst.msk [vmem:[#allocation3 + $0x51] sm:$0xff] %vm171_vm1, %v4619_v47  ;;  %v4596_v15 = vmul.f32 %v12923_v35, %v4562_v54  ;;  %v4597_v40 = vmul.f32 %v12923_v35, %v4563_v25  ;;  %v4622_v19 = vmax.f32 %v4590_v50, 0.0  ;;  %v4623_v20 = vmax.f32 %v4591_v63, 0.0 }
 0x270   : > { %4652 = vst.msk [vmem:[#allocation3 + $0x61] sm:$0xff] %vm171_vm1, %v4620_v48  ;;  %4653 = vst.msk [vmem:[#allocation3 + $0x69] sm:$0xff] %vm171_vm1, %v4621_v49  ;;  %v4624_v21 = vmax.f32 %v4592_v38, 0.0  ;;  %v4625_v4 = vmax.f32 %v4593_v2, 0.0  ;;  %v4626_v24 = vmax.f32 %v4594_v8, 0.0  ;;  %v4627_v30 = vmax.f32 %v4595_v13, 0.0 }
 0x271   : > { %v4628_v52 = vmax.f32 %v4596_v15, 0.0  ;;  %v4629_v55 = vmax.f32 %v4597_v40, 0.0  ;;  %4654 = vst.msk [vmem:[#allocation3 + $0x79] sm:$0xff] %vm171_vm1, %v4622_v19  ;;  %4655 = vst.msk [vmem:[#allocation3 + $0x81] sm:$0xff] %vm171_vm1, %v4623_v20  ;;  %v4598_v6 = vmul.f32 %v12923_v35, %v4564_v60  ;;  %v4599_v25 = vmul.f32 %v12923_v35, %v4565_v45 }
 0x272   : > { %4656 = vst.msk [vmem:[#allocation3 + $0x91] sm:$0xff] %vm171_vm1, %v4624_v21  ;;  %4657 = vst.msk [vmem:[#allocation3 + $0x99] sm:$0xff] %vm171_vm1, %v4625_v4  ;;  %v4600_v23 = vmul.f32 %v12923_v35, %v4566_v14  ;;  %v4601_v54 = vmul.f32 %v12923_v35, %v4567_v5  ;;  %v4602_v60 = vmul.f32 %v12923_v35, %v4568_v61 }
 0x273   : > { %4658 = vst.msk [vmem:[#allocation3 + $0xa9] sm:$0xff] %vm171_vm1, %v4626_v24  ;;  %4659 = vst.msk [vmem:[#allocation3 + $0xb1] sm:$0xff] %vm171_vm1, %v4627_v30  ;;  %v4603_v1 = vmul.f32 %v12923_v35, %v4569_v28  ;;  %v4604_v45 = vmul.f32 %v12923_v35, %v4570_v44  ;;  %v4605_v26 = vmul.f32 %v12923_v35, %v4571_v27  ;;  %v4630_v5 = vmax.f32 %v4598_v6, 0.0 }
 0x274   : > { %4660 = vst.msk [vmem:[#allocation3 + $0xc1] sm:$0xff] %vm171_vm1, %v4628_v52  ;;  %4661 = vst.msk [vmem:[#allocation3 + $0xc9] sm:$0xff] %vm171_vm1, %v4629_v55  ;;  %v4631_v14 = vmax.f32 %v4599_v25, 0.0  ;;  %v4632_v59 = vmax.f32 %v4600_v23, 0.0  ;;  %v4633_v62 = vmax.f32 %v4601_v54, 0.0  ;;  %v12987_v31 = vld [vmem:[#allocation3 + $0x18] sm:$0xff]  ;;  %v4606_v10 = vmul.f32 %v12923_v35, %v4572_v43 }
 0x275   : > { %v12989_v41 = vld [vmem:[#allocation3 + $0x19] sm:$0xff]  ;;  %v4634_v34 = vmax.f32 %v4602_v60, 0.0  ;;  %v4635_v11 = vmax.f32 %v4603_v1, 0.0  ;;  %v4636_v28 = vmax.f32 %v4604_v45, 0.0  ;;  %10796 = vmatprep.mubr.msk.f32.mxu1 %vm171_vm1, %v12987_v31  ;;  %v13001_v27 = vld [vmem:[#allocation3 + $0x21] sm:$0xff]  ;;  %4662 = vst.msk [vmem:[#allocation3 + $0xd9] sm:$0xff] %vm171_vm1, %v4630_v5  ;;  %v4607_v46 = vmul.f32 %v12923_v35, %v4573_v0 }
 0x276   : > { %v12991_v61 = vld [vmem:[#allocation3 + $0x20] sm:$0xff]  ;;  %10846 = vmatprep.mubr.msk.f32.mxu0 %vm171_vm1, %v12989_v41  ;;  %4663 = vst.msk [vmem:[#allocation3 + $0xe1] sm:$0xff] %vm171_vm1, %v4631_v14  ;;  %4664 = vst.msk [vmem:[#allocation3 + $0xf1] sm:$0xff] %vm171_vm1, %v4632_v59  ;;  %v4637_v44 = vmax.f32 %v4605_v26, 0.0  ;;  %v4608_v43 = vmul.f32 %v12923_v35, %v4574_v9  ;;  %v4609_v33 = vmul.f32 %v12923_v35, %v4575_v22  ;;  %v13023_v29 = vld [vmem:[#allocation3 + $0x30] sm:$0xff]  ;;  %v4638_v16 = vmax.f32 %v4606_v10, 0.0 }
 0x277   : > { %4665 = vst.msk [vmem:[#allocation3 + $0xf9] sm:$0xff] %vm171_vm1, %v4633_v62  ;;  %10797 = vmatmul.mubr.msk.f32.gmra.mxu1 %vm171_vm1, %v12991_v61  ;;  %10847 = vmatmul.mubr.msk.f32.gmra.mxu0 %vm171_vm1, %v13001_v27  ;;  %14524 = vst [vmem:[#allocation25_spill] sm:$0xff] %v13023_v29  ;;  %v13025_v18 = vld [vmem:[#allocation3 + $0x31] sm:$0xff]  ;;  %v4610_v3 = vmul.f32 %v12923_v35, %v4576_v17  ;;  %v4611_v0 = vmul.f32 %v12923_v35, %v4577_v12  ;;  %v4639_v56 = vmax.f32 %v4607_v46, 0.0  ;;  %v13054_v32 = vld [vmem:[#allocation3 + $0x39] sm:$0xff] }
 0x278   : > { %4666 = vst.msk [vmem:[#allocation3 + $0x109] sm:$0xff] %vm171_vm1, %v4634_v34  ;;  %4667 = vst.msk [vmem:[#allocation3 + $0x111] sm:$0xff] %vm171_vm1, %v4635_v11  ;;  %v4612_v22 = vmul.f32 %v12923_v35, %v4578_v53  ;;  %10799 = vmatprep.mubr.msk.f32.mxu1 %vm171_vm1, %v13023_v29  ;;  %10849 = vmatprep.mubr.msk.f32.mxu0 %vm171_vm1, %v13025_v18  ;;  %v4640_v9 = vmax.f32 %v4608_v43, 0.0  ;;  %v4641_v17 = vmax.f32 %v4609_v33, 0.0  ;;  %v13052_v58 = vld [vmem:[#allocation3 + $0x38] sm:$0xff]  ;;  %v13063_v39 = vld [vmem:[#allocation3 + $0x48] sm:$0xff] }
 0x279   : > { %4668 = vst.msk [vmem:[#allocation3 + $0x121] sm:$0xff] %vm171_vm1, %v4636_v28  ;;  %4669 = vst.msk [vmem:[#allocation3 + $0x129] sm:$0xff] %vm171_vm1, %v4637_v44  ;;  %v4613_v37 = vmul.f32 %v12923_v35, %v4579_v7  ;;  %v4642_v36 = vmax.f32 %v4610_v3, 0.0  ;;  %v4643_v12 = vmax.f32 %v4611_v0, 0.0  ;;  %v13065_v51 = vld [vmem:[#allocation3 + $0x49] sm:$0xff]  ;;  %v13077_v35 = vld [vmem:[#allocation3 + $0x51] sm:$0xff] }
 0x27a   : > { %4670 = vst.msk [vmem:[#allocation3 + $0x139] sm:$0xff] %vm171_vm1, %v4638_v16  ;;  %v4644_v53 = vmax.f32 %v4612_v22, 0.0  ;;  %14525 = vst [vmem:[#allocation26_spill] sm:$0xff] %v13052_v58  ;;  %v13075_v7 = vld [vmem:[#allocation3 + $0x50] sm:$0xff]  ;;  %v13083_v48 = vld [vmem:[#allocation3 + $0x60] sm:$0xff] }
 0x27b   : > { %4671 = vst.msk [vmem:[#allocation3 + $0x141] sm:$0xff] %vm171_vm1, %v4639_v56  ;;  %4672 = vst.msk [vmem:[#allocation3 + $0x151] sm:$0xff] %vm171_vm1, %v4640_v9  ;;  %v4645_v47 = vmax.f32 %v4613_v37, 0.0  ;;  %10800 = vmatmul.mubr.msk.f32.gmra.mxu1 %vm171_vm1, %v13052_v58  ;;  %10850 = vmatmul.mubr.msk.f32.gmra.mxu0 %vm171_vm1, %v13054_v32  ;;  %v13085_v49 = vld [vmem:[#allocation3 + $0x61] sm:$0xff]  ;;  %v13093_v63 = vld [vmem:[#allocation3 + $0x69] sm:$0xff] }
 0x27c   : > { %4673 = vst.msk [vmem:[#allocation3 + $0x159] sm:$0xff] %vm171_vm1, %v4641_v17  ;;  %4674 = vst.msk [vmem:[#allocation3 + $0x169] sm:$0xff] %vm171_vm1, %v4642_v36  ;;  %10802 = vmatprep.mubr.msk.f32.mxu1 %vm171_vm1, %v13063_v39  ;;  %10852 = vmatprep.mubr.msk.f32.mxu0 %vm171_vm1, %v13065_v51  ;;  %v13091_v50 = vld [vmem:[#allocation3 + $0x68] sm:$0xff]  ;;  %v13099_v38 = vld [vmem:[#allocation3 + $0x78] sm:$0xff] }
 0x27d   : > { %4675 = vst.msk [vmem:[#allocation3 + $0x171] sm:$0xff] %vm171_vm1, %v4643_v12  ;;  %4676 = vst.msk [vmem:[#allocation3 + $0x181] sm:$0xff] %vm171_vm1, %v4644_v53  ;;  %v13101_v2 = vld [vmem:[#allocation3 + $0x79] sm:$0xff]  ;;  %v13109_v13 = vld [vmem:[#allocation3 + $0x81] sm:$0xff] }
 0x27e   : > { %4677 = vst.msk [vmem:[#allocation3 + $0x189] sm:$0xff] %vm171_vm1, %v4645_v47  ;;  %14526 = vst [vmem:[#allocation5_spill] sm:$0xff] %v13099_v38  ;;  %v13107_v8 = vld [vmem:[#allocation3 + $0x80] sm:$0xff]  ;;  %v13115_v15 = vld [vmem:[#allocation3 + $0x90] sm:$0xff] }
 0x27f   : > { %10803 = vmatmul.mubr.msk.f32.gmra.mxu1 %vm171_vm1, %v13075_v7  ;;  %10853 = vmatmul.mubr.msk.f32.gmra.mxu0 %vm171_vm1, %v13077_v35  ;;  %14527 = vst [vmem:[#allocation6_spill] sm:$0xff] %v13107_v8  ;;  %14528 = vst [vmem:[#allocation7_spill] sm:$0xff] %v13115_v15  ;;  %v13117_v40 = vld [vmem:[#allocation3 + $0x91] sm:$0xff]  ;;  %v13125_v20 = vld [vmem:[#allocation3 + $0x99] sm:$0xff] }
 0x280   : > { %10805 = vmatprep.mubr.msk.f32.mxu1 %vm171_vm1, %v13083_v48  ;;  %10855 = vmatprep.mubr.msk.f32.mxu0 %vm171_vm1, %v13085_v49  ;;  %v13123_v19 = vld [vmem:[#allocation3 + $0x98] sm:$0xff]  ;;  %v13131_v21 = vld [vmem:[#allocation3 + $0xa8] sm:$0xff]  ;;  %v13139_v24 = vld [vmem:[#allocation3 + $0xb0] sm:$0xff] }
 0x281   : > { %14529 = vst [vmem:[#allocation8_spill] sm:$0xff] %v13123_v19  ;;  %14530 = vst [vmem:[#allocation9_spill] sm:$0xff] %v13131_v21  ;;  %v13133_v4 = vld [vmem:[#allocation3 + $0xa9] sm:$0xff]  ;;  %v13141_v30 = vld [vmem:[#allocation3 + $0xb1] sm:$0xff] }
 0x282   : > { %v13147_v52 = vld [vmem:[#allocation3 + $0xc0] sm:$0xff]  ;;  %v13155_v6 = vld [vmem:[#allocation3 + $0xc8] sm:$0xff]  ;;  %v13163_v23 = vld [vmem:[#allocation3 + $0xd8] sm:$0xff] }
 0x283   : > { %10806 = vmatmul.mubr.msk.f32.gmra.mxu1 %vm171_vm1, %v13091_v50  ;;  %10856 = vmatmul.mubr.msk.f32.gmra.mxu0 %vm171_vm1, %v13093_v63  ;;  %14531 = vst [vmem:[#allocation10_spill] sm:$0xff] %v13147_v52  ;;  %v13149_v55 = vld [vmem:[#allocation3 + $0xc1] sm:$0xff]  ;;  %v13157_v25 = vld [vmem:[#allocation3 + $0xc9] sm:$0xff]  ;;  %v13165_v54 = vld [vmem:[#allocation3 + $0xd9] sm:$0xff] }
 0x284   : > { %10808 = vmatprep.mubr.msk.f32.mxu1 %vm171_vm1, %v13099_v38  ;;  %10858 = vmatprep.mubr.msk.f32.mxu0 %vm171_vm1, %v13101_v2  ;;  %v13171_v60 = vld [vmem:[#allocation3 + $0xe0] sm:$0xff]  ;;  %v13179_v45 = vld [vmem:[#allocation3 + $0xf0] sm:$0xff]  ;;  %v13187_v5 = vld [vmem:[#allocation3 + $0xf8] sm:$0xff] }
 0x285   : > { %v13173_v1 = vld [vmem:[#allocation3 + $0xe1] sm:$0xff]  ;;  %v13181_v26 = vld [vmem:[#allocation3 + $0xf1] sm:$0xff]  ;;  %v13189_v14 = vld [vmem:[#allocation3 + $0xf9] sm:$0xff] }
 0x286   : > { %v13195_v59 = vld [vmem:[#allocation3 + $0x108] sm:$0xff]  ;;  %v13203_v34 = vld [vmem:[#allocation3 + $0x110] sm:$0xff]  ;;  %v13211_v28 = vld [vmem:[#allocation3 + $0x120] sm:$0xff] }
 0x287   : > { %10809 = vmatmul.mubr.msk.f32.gmra.mxu1 %vm171_vm1, %v13107_v8  ;;  %10859 = vmatmul.mubr.msk.f32.gmra.mxu0 %vm171_vm1, %v13109_v13  ;;  %v13197_v62 = vld [vmem:[#allocation3 + $0x109] sm:$0xff]  ;;  %v13205_v11 = vld [vmem:[#allocation3 + $0x111] sm:$0xff]  ;;  %v13213_v10 = vld [vmem:[#allocation3 + $0x121] sm:$0xff] }
 0x288   : > { %10811 = vmatprep.mubr.msk.f32.mxu1 %vm171_vm1, %v13115_v15  ;;  %10861 = vmatprep.mubr.msk.f32.mxu0 %vm171_vm1, %v13117_v40  ;;  %v13219_v44 = vld [vmem:[#allocation3 + $0x128] sm:$0xff]  ;;  %v13227_v43 = vld [vmem:[#allocation3 + $0x138] sm:$0xff]  ;;  %v13235_v16 = vld [vmem:[#allocation3 + $0x140] sm:$0xff] }
 0x289   : > { %v13221_v46 = vld [vmem:[#allocation3 + $0x129] sm:$0xff]  ;;  %v13229_v33 = vld [vmem:[#allocation3 + $0x139] sm:$0xff]  ;;  %v13237_v3 = vld [vmem:[#allocation3 + $0x141] sm:$0xff] }
 0x28a   : > { %14532 = vst [vmem:[#allocation11_spill] sm:$0xff] %v13237_v3  ;;  %v13243_v0 = vld [vmem:[#allocation3 + $0x150] sm:$0xff]  ;;  %v13251_v56 = vld [vmem:[#allocation3 + $0x158] sm:$0xff]  ;;  %v13259_v17 = vld [vmem:[#allocation3 + $0x168] sm:$0xff] }
 0x28b   : > { %10812 = vmatmul.mubr.msk.f32.gmra.mxu1 %vm171_vm1, %v13123_v19  ;;  %10862 = vmatmul.mubr.msk.f32.gmra.mxu0 %vm171_vm1, %v13125_v20  ;;  %v13245_v22 = vld [vmem:[#allocation3 + $0x151] sm:$0xff]  ;;  %v13253_v9 = vld [vmem:[#allocation3 + $0x159] sm:$0xff]  ;;  %v13261_v37 = vld [vmem:[#allocation3 + $0x169] sm:$0xff] }
 0x28c   : > { %10814 = vmatprep.mubr.msk.f32.mxu1 %vm171_vm1, %v13131_v21  ;;  %10864 = vmatprep.mubr.msk.f32.mxu0 %vm171_vm1, %v13133_v4  ;;  %14533 = vst [vmem:[#allocation12_spill] sm:$0xff] %v13245_v22  ;;  %14534 = vst [vmem:[#allocation13_spill] sm:$0xff] %v13253_v9  ;;  %v5521_v36 = vld [vmem:[#allocation3 + $0x2] sm:$0xff]  ;;  %v13267_v12 = vld [vmem:[#allocation3 + $0x170] sm:$0xff] }
 0x28d   : > { %14535 = vst [vmem:[#allocation14_spill] sm:$0xff] %v13261_v37  ;;  %v13269_v53 = vld [vmem:[#allocation3 + $0x171] sm:$0xff] }
 0x28e   : > { %14536 = vst [vmem:[#allocation15_spill] sm:$0xff] %v13269_v53  ;;  %v5522_v47 = vld [vmem:[#allocation3 + $0xa] sm:$0xff] }
 0x28f   : > { %10815 = vmatmul.mubr.msk.f32.gmra.mxu1 %vm171_vm1, %v13139_v24  ;;  %10865 = vmatmul.mubr.msk.f32.gmra.mxu0 %vm171_vm1, %v13141_v30 }
 0x290   : > { %10817 = vmatprep.mubr.msk.f32.mxu1 %vm171_vm1, %v13147_v52  ;;  %10867 = vmatprep.mubr.msk.f32.mxu0 %vm171_vm1, %v13149_v55 }
 0x293   : > { %10818 = vmatmul.mubr.msk.f32.gmra.mxu1 %vm171_vm1, %v13155_v6  ;;  %10868 = vmatmul.mubr.msk.f32.gmra.mxu0 %vm171_vm1, %v13157_v25 }
 0x294   : > { %10820 = vmatprep.mubr.msk.f32.mxu1 %vm171_vm1, %v13163_v23  ;;  %10870 = vmatprep.mubr.msk.f32.mxu0 %vm171_vm1, %v13165_v54 }
 0x297   : > { %10821 = vmatmul.mubr.msk.f32.gmra.mxu1 %vm171_vm1, %v13171_v60  ;;  %10871 = vmatmul.mubr.msk.f32.gmra.mxu0 %vm171_vm1, %v13173_v1 }
 0x298   : > { %10823 = vmatprep.mubr.msk.f32.mxu1 %vm171_vm1, %v13179_v45  ;;  %10873 = vmatprep.mubr.msk.f32.mxu0 %vm171_vm1, %v13181_v26 }
 0x29b   : > { %10824 = vmatmul.mubr.msk.f32.gmra.mxu1 %vm171_vm1, %v13187_v5  ;;  %10874 = vmatmul.mubr.msk.f32.gmra.mxu0 %vm171_vm1, %v13189_v14 }
 0x29c   : > { %10826 = vmatprep.mubr.msk.f32.mxu1 %vm171_vm1, %v13195_v59  ;;  %10876 = vmatprep.mubr.msk.f32.mxu0 %vm171_vm1, %v13197_v62 }
 0x29f   : > { %10827 = vmatmul.mubr.msk.f32.gmra.mxu1 %vm171_vm1, %v13203_v34  ;;  %10877 = vmatmul.mubr.msk.f32.gmra.mxu0 %vm171_vm1, %v13205_v11 }
 0x2a0   : > { %10829 = vmatprep.mubr.msk.f32.mxu1 %vm171_vm1, %v13211_v28  ;;  %10879 = vmatprep.mubr.msk.f32.mxu0 %vm171_vm1, %v13213_v10 }
 0x2a3   : > { %10830 = vmatmul.mubr.msk.f32.gmra.mxu1 %vm171_vm1, %v13219_v44  ;;  %10880 = vmatmul.mubr.msk.f32.gmra.mxu0 %vm171_vm1, %v13221_v46 }
 0x2a4   : > { %10832 = vmatprep.mubr.msk.f32.mxu1 %vm171_vm1, %v13227_v43  ;;  %10882 = vmatprep.mubr.msk.f32.mxu0 %vm171_vm1, %v13229_v33 }
 0x2a7   : > { %10833 = vmatmul.mubr.msk.f32.gmra.mxu1 %vm171_vm1, %v13235_v16  ;;  %10883 = vmatmul.mubr.msk.f32.gmra.mxu0 %vm171_vm1, %v13237_v3 }
 0x2a8   : > { %10835 = vmatprep.mubr.msk.f32.mxu1 %vm171_vm1, %v13243_v0  ;;  %10885 = vmatprep.mubr.msk.f32.mxu0 %vm171_vm1, %v13245_v22  ;;  %v13282_v22 = vld [vmem:[#allocation3 + $0x1a] sm:$0xff] }
 0x2ab   : > { %10836 = vmatmul.mubr.msk.f32.gmra.mxu1 %vm171_vm1, %v13251_v56  ;;  %10886 = vmatmul.mubr.msk.f32.gmra.mxu0 %vm171_vm1, %v13253_v9  ;;  %v10795_v9 = vpop.f32.mrf.mxu1 }
 0x2ac   : > { %10838 = vmatprep.mubr.msk.f32.mxu1 %vm171_vm1, %v13259_v17  ;;  %10888 = vmatprep.mubr.msk.f32.mxu0 %vm171_vm1, %v13261_v37  ;;  %5036 = vst.msk [vmem:[#allocation4 + $0x8] sm:$0xff] %vm171_vm1, %v10795_v9  ;;  %v10845_v9 = vpop.f32.mrf.mxu0 }
 0x2ad   : > { %v4876_v37 = vpop.f32.mrf.mxu1 }
 0x2ae   : > { %5035 = vst.msk [vmem:[#allocation4] sm:$0xff] %vm171_vm1, %v4876_v37 }
 0x2af   : > { %10839 = vmatmul.mubr.msk.f32.gmra.mxu1 %vm171_vm1, %v13267_v12  ;;  %10889 = vmatmul.mubr.msk.f32.gmra.mxu0 %vm171_vm1, %v13269_v53  ;;  %v13287_v53 = vld [vmem:[%s14442_s2 + $0x18] sm:$0xf] }
 0x2b0   : > { %10943 = vmatprep.mubr.msk.f32.mxu0 %vm171_vm1, %v12987_v31  ;;  %10893 = vmatprep.mubr.msk.f32.mxu1 %vm171_vm1, %v5521_v36  ;;  %v13292_v31 = vld [vmem:[%s14442_s2 + $0x1c] sm:$0xf]  ;;  %v13319_v36 = vld [vmem:[#allocation3 + $0x3a] sm:$0xff] }
 0x2b3   : > { %10894 = vmatmul.mubr.msk.f32.vlgmr.msra.gmra.mxu1 %vm171_vm1, %v5522_v47  ;;  %10944 = vmatmul.mubr.msk.f32.vlgmr.msra.gmra.mxu0 %vm171_vm1, %v12991_v61  ;;  %v13303_v61 = vld [vmem:[#allocation3 + $0x22] sm:$0xff]  ;;  %v5266_v47 = vpop.f32.mrf.mxu0 }
 0x2b4   : > { %10992 = vmatpush3.msk.msra.mxu1 %vm447_vm0, %v12784_v57  ;;  %10896 = vmatprep.mubr.msk.f32.mxu1 %vm171_vm1, %v13282_v22  ;;  %v13313_v57 = vld [vmem:[#allocation3 + $0x32] sm:$0xff] }
 0x2b5   : > { %10946 = vmatprep.mubr.msk.f32.mxu0 %vm171_vm1, %v13023_v29  ;;  %11042 = vmatpush3.msk.msra.mxu0 %vm447_vm0, %v12921_v42  ;;  %v5426_v42 = vld [vmem:[#allocation4 + $0x8] sm:$0xff]  ;;  %v5425_v29 = vld [vmem:[#allocation4] sm:$0xff] }
 0x2b6   : > { %11091 = vmatprep.subr.msk.mxu1 %vm447_vm0, %v13287_v53  ;;  %11141 = vmatprep.subr.msk.mxu0 %vm447_vm0, %v13292_v31  ;;  %v5458_v37 = vadd.f32 %v10845_v9, %v5426_v42  ;;  %v5457_v3 = vadd.f32 %v5425_v29, %v5266_v47  ;;  %v13333_v9 = vld [vmem:[#allocation3 + $0x52] sm:$0xff]  ;;  %v13339_v42 = vld [vmem:[#allocation3 + $0x62] sm:$0xff]  ;;  %v13345_v29 = vld [vmem:[#allocation3 + $0x6a] sm:$0xff] }
 0x2b7   : > { %10897 = vmatmul.mubr.msk.f32.gmra.mxu1 %vm171_vm1, %v13303_v61  ;;  %10947 = vmatmul.mubr.msk.f32.gmra.mxu0 %vm171_vm1, %v13052_v58  ;;  %v13325_v58 = vld [vmem:[#allocation3 + $0x4a] sm:$0xff]  ;;  %v13363_v47 = vld [vmem:[#allocation3 + $0x92] sm:$0xff] }
 0x2b8   : > { %10899 = vmatprep.mubr.msk.f32.mxu1 %vm171_vm1, %v13313_v57  ;;  %10949 = vmatprep.mubr.msk.f32.mxu0 %vm171_vm1, %v13063_v39  ;;  %5490 = vst.msk [vmem:[#allocation4 + $0x8] sm:$0xff] %vm171_vm1, %v5458_v37  ;;  %5489 = vst.msk [vmem:[#allocation4] sm:$0xff] %vm171_vm1, %v5457_v3  ;;  %v13351_v3 = vld [vmem:[#allocation3 + $0x7a] sm:$0xff]  ;;  %v13357_v37 = vld [vmem:[#allocation3 + $0x82] sm:$0xff] }
 0x2bb   : > { %10900 = vmatmul.mubr.msk.f32.gmra.mxu1 %vm171_vm1, %v13319_v36  ;;  %10950 = vmatmul.mubr.msk.f32.gmra.mxu0 %vm171_vm1, %v13075_v7 }
 0x2bc   : > { %10902 = vmatprep.mubr.msk.f32.mxu1 %vm171_vm1, %v13325_v58  ;;  %10952 = vmatprep.mubr.msk.f32.mxu0 %vm171_vm1, %v13083_v48 }
 0x2bf   : > { %10903 = vmatmul.mubr.msk.f32.gmra.mxu1 %vm171_vm1, %v13333_v9  ;;  %10953 = vmatmul.mubr.msk.f32.gmra.mxu0 %vm171_vm1, %v13091_v50 }
 0x2c0   : > { %10905 = vmatprep.mubr.msk.f32.mxu1 %vm171_vm1, %v13339_v42  ;;  %10955 = vmatprep.mubr.msk.f32.mxu0 %vm171_vm1, %v13099_v38  ;;  %v13473_v38 = vld [vmem:[#allocation3 + $0x180] sm:$0xff] }
 0x2c3   : > { %10906 = vmatmul.mubr.msk.f32.gmra.mxu1 %vm171_vm1, %v13345_v29  ;;  %10956 = vmatmul.mubr.msk.f32.gmra.mxu0 %vm171_vm1, %v13107_v8  ;;  %v13369_v8 = vld [vmem:[#allocation3 + $0x9a] sm:$0xff] }
 0x2c4   : > { %10908 = vmatprep.mubr.msk.f32.mxu1 %vm171_vm1, %v13351_v3  ;;  %10958 = vmatprep.mubr.msk.f32.mxu0 %vm171_vm1, %v13115_v15  ;;  %v13375_v15 = vld [vmem:[#allocation3 + $0xaa] sm:$0xff] }
 0x2c7   : > { %10909 = vmatmul.mubr.msk.f32.gmra.mxu1 %vm171_vm1, %v13357_v37  ;;  %10959 = vmatmul.mubr.msk.f32.gmra.mxu0 %vm171_vm1, %v13123_v19  ;;  %v13381_v19 = vld [vmem:[#allocation3 + $0xb2] sm:$0xff] }
 0x2c8   : > { %10911 = vmatprep.mubr.msk.f32.mxu1 %vm171_vm1, %v13363_v47  ;;  %10961 = vmatprep.mubr.msk.f32.mxu0 %vm171_vm1, %v13131_v21  ;;  %v13387_v21 = vld [vmem:[#allocation3 + $0xc2] sm:$0xff] }
 0x2cb   : > { %10912 = vmatmul.mubr.msk.f32.gmra.mxu1 %vm171_vm1, %v13369_v8  ;;  %10962 = vmatmul.mubr.msk.f32.gmra.mxu0 %vm171_vm1, %v13139_v24  ;;  %v13393_v24 = vld [vmem:[#allocation3 + $0xca] sm:$0xff] }
 0x2cc   : > { %10914 = vmatprep.mubr.msk.f32.mxu1 %vm171_vm1, %v13375_v15  ;;  %10964 = vmatprep.mubr.msk.f32.mxu0 %vm171_vm1, %v13147_v52  ;;  %v13399_v52 = vld [vmem:[#allocation3 + $0xda] sm:$0xff] }
 0x2cf   : > { %10915 = vmatmul.mubr.msk.f32.gmra.mxu1 %vm171_vm1, %v13381_v19  ;;  %10965 = vmatmul.mubr.msk.f32.gmra.mxu0 %vm171_vm1, %v13155_v6  ;;  %v13405_v6 = vld [vmem:[#allocation3 + $0xe2] sm:$0xff] }
 0x2d0   : > { %10917 = vmatprep.mubr.msk.f32.mxu1 %vm171_vm1, %v13387_v21  ;;  %10967 = vmatprep.mubr.msk.f32.mxu0 %vm171_vm1, %v13163_v23  ;;  %v13411_v23 = vld [vmem:[#allocation3 + $0xf2] sm:$0xff] }
 0x2d3   : > { %10918 = vmatmul.mubr.msk.f32.gmra.mxu1 %vm171_vm1, %v13393_v24  ;;  %10968 = vmatmul.mubr.msk.f32.gmra.mxu0 %vm171_vm1, %v13171_v60  ;;  %v13417_v60 = vld [vmem:[#allocation3 + $0xfa] sm:$0xff] }
 0x2d4   : > { %10920 = vmatprep.mubr.msk.f32.mxu1 %vm171_vm1, %v13399_v52  ;;  %10970 = vmatprep.mubr.msk.f32.mxu0 %vm171_vm1, %v13179_v45  ;;  %v13423_v45 = vld [vmem:[#allocation3 + $0x10a] sm:$0xff] }
 0x2d7   : > { %10921 = vmatmul.mubr.msk.f32.gmra.mxu1 %vm171_vm1, %v13405_v6  ;;  %10971 = vmatmul.mubr.msk.f32.gmra.mxu0 %vm171_vm1, %v13187_v5  ;;  %v13429_v5 = vld [vmem:[#allocation3 + $0x112] sm:$0xff] }
 0x2d8   : > { %10923 = vmatprep.mubr.msk.f32.mxu1 %vm171_vm1, %v13411_v23  ;;  %10973 = vmatprep.mubr.msk.f32.mxu0 %vm171_vm1, %v13195_v59  ;;  %v13435_v59 = vld [vmem:[#allocation3 + $0x122] sm:$0xff] }
 0x2db   : > { %10924 = vmatmul.mubr.msk.f32.gmra.mxu1 %vm171_vm1, %v13417_v60  ;;  %10974 = vmatmul.mubr.msk.f32.gmra.mxu0 %vm171_vm1, %v13203_v34  ;;  %v13441_v34 = vld [vmem:[#allocation3 + $0x12a] sm:$0xff] }
 0x2dc   : > { %10926 = vmatprep.mubr.msk.f32.mxu1 %vm171_vm1, %v13423_v45  ;;  %10976 = vmatprep.mubr.msk.f32.mxu0 %vm171_vm1, %v13211_v28  ;;  %v13447_v28 = vld [vmem:[#allocation3 + $0x13a] sm:$0xff] }
 0x2df   : > { %10927 = vmatmul.mubr.msk.f32.gmra.mxu1 %vm171_vm1, %v13429_v5  ;;  %10977 = vmatmul.mubr.msk.f32.gmra.mxu0 %vm171_vm1, %v13219_v44  ;;  %v13453_v44 = vld [vmem:[#allocation3 + $0x142] sm:$0xff] }
 0x2e0   : > { %10929 = vmatprep.mubr.msk.f32.mxu1 %vm171_vm1, %v13435_v59  ;;  %10979 = vmatprep.mubr.msk.f32.mxu0 %vm171_vm1, %v13227_v43  ;;  %v13459_v43 = vld [vmem:[#allocation3 + $0x152] sm:$0xff] }
 0x2e3   : > { %10930 = vmatmul.mubr.msk.f32.gmra.mxu1 %vm171_vm1, %v13441_v34  ;;  %10980 = vmatmul.mubr.msk.f32.gmra.mxu0 %vm171_vm1, %v13235_v16  ;;  %v13465_v16 = vld [vmem:[#allocation3 + $0x15a] sm:$0xff] }
 0x2e4   : > { %10932 = vmatprep.mubr.msk.f32.mxu1 %vm171_vm1, %v13447_v28  ;;  %10982 = vmatprep.mubr.msk.f32.mxu0 %vm171_vm1, %v13243_v0  ;;  %v13471_v0 = vld [vmem:[#allocation3 + $0x16a] sm:$0xff] }
 0x2e7   : > { %10933 = vmatmul.mubr.msk.f32.gmra.mxu1 %vm171_vm1, %v13453_v44  ;;  %10983 = vmatmul.mubr.msk.f32.gmra.mxu0 %vm171_vm1, %v13251_v56  ;;  %v13479_v56 = vld [vmem:[#allocation3 + $0x172] sm:$0xff] }
 0x2e8   : > { %10935 = vmatprep.mubr.msk.f32.mxu1 %vm171_vm1, %v13459_v43  ;;  %10985 = vmatprep.mubr.msk.f32.mxu0 %vm171_vm1, %v13259_v17  ;;  %v13481_v17 = vld [vmem:[#allocation3 + $0x188] sm:$0xff] }
 0x2eb   : > { %10936 = vmatmul.mubr.msk.f32.gmra.mxu1 %vm171_vm1, %v13465_v16  ;;  %10986 = vmatmul.mubr.msk.f32.gmra.mxu0 %vm171_vm1, %v13267_v12  ;;  %v13498_v12 = vld [vmem:[%s14442_s2 + $0x20] sm:$0xf] }
 0x2ec   : > { %10938 = vmatprep.mubr.msk.f32.mxu1 %vm171_vm1, %v13471_v0  ;;  %10988 = vmatprep.mubr.msk.f32.mxu0 %vm171_vm1, %v13473_v38 }
 0x2ef   : > { %10939 = vmatmul.mubr.msk.f32.gmra.mxu1 %vm171_vm1, %v13479_v56  ;;  %10989 = vmatmul.mubr.msk.f32.gmra.mxu0 %vm171_vm1, %v13481_v17 }
 0x2f0   : > { %10993 = vmatprep.mubr.msk.f32.mxu1 %vm171_vm1, %v12989_v41  ;;  %11043 = vmatprep.mubr.msk.f32.mxu0 %vm171_vm1, %v13282_v22  ;;  %v14537_v41 = vld [vmem:[#allocation11_spill] sm:$0xff] }
 0x2f3   : > { %10994 = vmatmul.mubr.msk.f32.vlgmr.msra.gmra.mxu1 %vm171_vm1, %v13001_v27  ;;  %11044 = vmatmul.mubr.msk.f32.vlgmr.msra.gmra.mxu0 %vm171_vm1, %v13303_v61  ;;  %v14538_v27 = vld [vmem:[#allocation12_spill] sm:$0xff]  ;;  %v14548_v61 = vld [vmem:[#allocation9_spill] sm:$0xff] }
 0x2f4   : > { %11092 = vmatpush3.msk.msra.mxu1 %vm447_vm0, %v13287_v53  ;;  %10996 = vmatprep.mubr.msk.f32.mxu1 %vm171_vm1, %v13025_v18 }
 0x2f5   : > { %11046 = vmatprep.mubr.msk.f32.mxu0 %vm171_vm1, %v13313_v57  ;;  %11142 = vmatpush3.msk.msra.mxu0 %vm447_vm0, %v13292_v31  ;;  %v14547_v31 = vld [vmem:[#allocation8_spill] sm:$0xff] }
 0x2f6   : > { %11191 = vmatprep.subr.msk.mxu1 %vm447_vm0, %v13498_v12 }
 0x2f7   : > { %10997 = vmatmul.mubr.msk.f32.gmra.mxu1 %vm171_vm1, %v13054_v32  ;;  %11047 = vmatmul.mubr.msk.f32.gmra.mxu0 %vm171_vm1, %v13319_v36 }
 0x2f8   : > { %10999 = vmatprep.mubr.msk.f32.mxu1 %vm171_vm1, %v13065_v51  ;;  %11049 = vmatprep.mubr.msk.f32.mxu0 %vm171_vm1, %v13325_v58  ;;  %v14539_v58 = vld [vmem:[#allocation13_spill] sm:$0xff] }
 0x2fb   : > { %11000 = vmatmul.mubr.msk.f32.gmra.mxu1 %vm171_vm1, %v13077_v35  ;;  %11050 = vmatmul.mubr.msk.f32.gmra.mxu0 %vm171_vm1, %v13333_v9 }
 0x2fc   : > { %11002 = vmatprep.mubr.msk.f32.mxu1 %vm171_vm1, %v13085_v49  ;;  %11052 = vmatprep.mubr.msk.f32.mxu0 %vm171_vm1, %v13339_v42 }
 0x2ff   : > { %11003 = vmatmul.mubr.msk.f32.gmra.mxu1 %vm171_vm1, %v13093_v63  ;;  %11053 = vmatmul.mubr.msk.f32.gmra.mxu0 %vm171_vm1, %v13345_v29  ;;  %v7803_v29 = vld [vmem:[#allocation3 + $0xb1] sm:$0xff] }
 0x300   : > { %11005 = vmatprep.mubr.msk.f32.mxu1 %vm171_vm1, %v13101_v2  ;;  %11055 = vmatprep.mubr.msk.f32.mxu0 %vm171_vm1, %v13351_v3 }
 0x303   : > { %11006 = vmatmul.mubr.msk.f32.gmra.mxu1 %vm171_vm1, %v13109_v13  ;;  %11056 = vmatmul.mubr.msk.f32.gmra.mxu0 %vm171_vm1, %v13357_v37 }
 0x304   : > { %11008 = vmatprep.mubr.msk.f32.mxu1 %vm171_vm1, %v13117_v40  ;;  %11058 = vmatprep.mubr.msk.f32.mxu0 %vm171_vm1, %v13363_v47 }
 0x307   : > { %11009 = vmatmul.mubr.msk.f32.gmra.mxu1 %vm171_vm1, %v13125_v20  ;;  %11059 = vmatmul.mubr.msk.f32.gmra.mxu0 %vm171_vm1, %v13369_v8  ;;  %v14540_v8 = vld [vmem:[#allocation14_spill] sm:$0xff] }
 0x308   : > { %11011 = vmatprep.mubr.msk.f32.mxu1 %vm171_vm1, %v13133_v4  ;;  %11061 = vmatprep.mubr.msk.f32.mxu0 %vm171_vm1, %v13375_v15  ;;  %v14541_v15 = vld [vmem:[#allocation15_spill] sm:$0xff] }
 0x30b   : > { %11012 = vmatmul.mubr.msk.f32.gmra.mxu1 %vm171_vm1, %v13141_v30  ;;  %11062 = vmatmul.mubr.msk.f32.gmra.mxu0 %vm171_vm1, %v13381_v19  ;;  %v13618_v19 = vld [vmem:[#allocation3 + $0x181] sm:$0xff]  ;;  %v13623_v30 = vld [vmem:[#allocation3 + $0x189] sm:$0xff] }
 0x30c   : > { %11014 = vmatprep.mubr.msk.f32.mxu1 %vm171_vm1, %v13149_v55  ;;  %11064 = vmatprep.mubr.msk.f32.mxu0 %vm171_vm1, %v13387_v21  ;;  %v6913_v21 = vld [vmem:[#allocation3 + $0x182] sm:$0xff] }
 0x30f   : > { %11015 = vmatmul.mubr.msk.f32.gmra.mxu1 %vm171_vm1, %v13157_v25  ;;  %11065 = vmatmul.mubr.msk.f32.gmra.mxu0 %vm171_vm1, %v13393_v24  ;;  %v14542_v25 = vld [vmem:[#allocation25_spill] sm:$0xff]  ;;  %v14549_v24 = vld [vmem:[#allocation10_spill] sm:$0xff] }
 0x310   : > { %11017 = vmatprep.mubr.msk.f32.mxu1 %vm171_vm1, %v13165_v54  ;;  %11067 = vmatprep.mubr.msk.f32.mxu0 %vm171_vm1, %v13399_v52  ;;  %v6914_v52 = vld [vmem:[#allocation3 + $0x18a] sm:$0xff]  ;;  %v14543_v54 = vld [vmem:[#allocation26_spill] sm:$0xff] }
 0x313   : > { %11018 = vmatmul.mubr.msk.f32.gmra.mxu1 %vm171_vm1, %v13173_v1  ;;  %11068 = vmatmul.mubr.msk.f32.gmra.mxu0 %vm171_vm1, %v13405_v6 }
 0x314   : > { %11020 = vmatprep.mubr.msk.f32.mxu1 %vm171_vm1, %v13181_v26  ;;  %11070 = vmatprep.mubr.msk.f32.mxu0 %vm171_vm1, %v13411_v23 }
 0x317   : > { %11021 = vmatmul.mubr.msk.f32.gmra.mxu1 %vm171_vm1, %v13189_v14  ;;  %11071 = vmatmul.mubr.msk.f32.gmra.mxu0 %vm171_vm1, %v13417_v60 }
 0x318   : > { %11023 = vmatprep.mubr.msk.f32.mxu1 %vm171_vm1, %v13197_v62  ;;  %11073 = vmatprep.mubr.msk.f32.mxu0 %vm171_vm1, %v13423_v45 }
 0x31b   : > { %11024 = vmatmul.mubr.msk.f32.gmra.mxu1 %vm171_vm1, %v13205_v11  ;;  %11074 = vmatmul.mubr.msk.f32.gmra.mxu0 %vm171_vm1, %v13429_v5  ;;  %v14545_v11 = vld [vmem:[#allocation6_spill] sm:$0xff]  ;;  %v7351_v5 = vld [vmem:[#allocation3 + $0xc8] sm:$0xff] }
 0x31c   : > { %11026 = vmatprep.mubr.msk.f32.mxu1 %vm171_vm1, %v13213_v10  ;;  %11076 = vmatprep.mubr.msk.f32.mxu0 %vm171_vm1, %v13435_v59  ;;  %v7805_v59 = vld [vmem:[#allocation3 + $0xc9] sm:$0xff] }
 0x31f   : > { %11027 = vmatmul.mubr.msk.f32.gmra.mxu1 %vm171_vm1, %v13221_v46  ;;  %11077 = vmatmul.mubr.msk.f32.gmra.mxu0 %vm171_vm1, %v13441_v34 }
 0x320   : > { %11029 = vmatprep.mubr.msk.f32.mxu1 %vm171_vm1, %v13229_v33  ;;  %11079 = vmatprep.mubr.msk.f32.mxu0 %vm171_vm1, %v13447_v28 }
 0x323   : > { %11030 = vmatmul.mubr.msk.f32.gmra.mxu1 %vm171_vm1, %v14537_v41  ;;  %11080 = vmatmul.mubr.msk.f32.gmra.mxu0 %vm171_vm1, %v13453_v44 }
 0x324   : > { %11032 = vmatprep.mubr.msk.f32.mxu1 %vm171_vm1, %v14538_v27  ;;  %11082 = vmatprep.mubr.msk.f32.mxu0 %vm171_vm1, %v13459_v43  ;;  %v7352_v43 = vld [vmem:[#allocation3 + $0xd8] sm:$0xff]  ;;  %v7353_v27 = vld [vmem:[#allocation3 + $0xe0] sm:$0xff] }
 0x327   : > { %11033 = vmatmul.mubr.msk.f32.gmra.mxu1 %vm171_vm1, %v14539_v58  ;;  %11083 = vmatmul.mubr.msk.f32.gmra.mxu0 %vm171_vm1, %v13465_v16  ;;  %v7806_v16 = vld [vmem:[#allocation3 + $0xd9] sm:$0xff]  ;;  %v7807_v58 = vld [vmem:[#allocation3 + $0xe1] sm:$0xff] }
 0x328   : > { %11035 = vmatprep.mubr.msk.f32.mxu1 %vm171_vm1, %v14540_v8  ;;  %11085 = vmatprep.mubr.msk.f32.mxu0 %vm171_vm1, %v13471_v0 }
 0x32b   : > { %11036 = vmatmul.mubr.msk.f32.gmra.mxu1 %vm171_vm1, %v14541_v15  ;;  %11086 = vmatmul.mubr.msk.f32.gmra.mxu0 %vm171_vm1, %v13479_v56 }
 0x32c   : > { %11038 = vmatprep.mubr.msk.f32.mxu1 %vm171_vm1, %v13618_v19  ;;  %11088 = vmatprep.mubr.msk.f32.mxu0 %vm171_vm1, %v6913_v21 }
 0x32f   : > { %11039 = vmatmul.mubr.msk.f32.gmra.mxu1 %vm171_vm1, %v13623_v30  ;;  %11089 = vmatmul.mubr.msk.f32.gmra.mxu0 %vm171_vm1, %v6914_v52  ;;  %v7354_v52 = vld [vmem:[#allocation3 + $0xf0] sm:$0xff] }
 0x330   : > { %11093 = vmatprep.mubr.msk.f32.mxu1 %vm171_vm1, %v14542_v25  ;;  %11143 = vmatprep.mubr.msk.f32.mxu0 %vm171_vm1, %v13025_v18  ;;  %v7808_v25 = vld [vmem:[#allocation3 + $0xf1] sm:$0xff] }
 0x333   : > { %11094 = vmatmul.mubr.msk.f32.vlgmr.msra.gmra.mxu1 %vm171_vm1, %v14543_v54  ;;  %11144 = vmatmul.mubr.msk.f32.vlgmr.msra.gmra.mxu0 %vm171_vm1, %v13054_v32 }
 0x334   : > { %11192 = vmatpush3.msk.msra.mxu1 %vm447_vm0, %v13498_v12  ;;  %11096 = vmatprep.mubr.msk.f32.mxu1 %vm171_vm1, %v13063_v39 }
 0x335   : > { %11146 = vmatprep.mubr.msk.f32.mxu0 %vm171_vm1, %v13065_v51 }
 0x337   : > { %v10798_v1 = vpop.f32.mrf.mxu1  ;;  %v10848_v26 = vpop.f32.mrf.mxu0  ;;  %11097 = vmatmul.mubr.msk.f32.gmra.mxu1 %vm171_vm1, %v13075_v7  ;;  %11147 = vmatmul.mubr.msk.f32.gmra.mxu0 %vm171_vm1, %v13077_v35  ;;  %v14544_v7 = vld [vmem:[#allocation5_spill] sm:$0xff] }
 0x338   : > { %5038 = vst.msk [vmem:[#allocation4 + $0x18] sm:$0xff] %vm171_vm1, %v10798_v1  ;;  %11099 = vmatprep.mubr.msk.f32.mxu1 %vm171_vm1, %v13083_v48  ;;  %11149 = vmatprep.mubr.msk.f32.mxu0 %vm171_vm1, %v13085_v49 }
 0x339   : > { %v4886_v18 = vpop.f32.mrf.mxu1  ;;  %v5276_v32 = vpop.f32.mrf.mxu0 }
 0x33a   : > { %5037 = vst.msk [vmem:[#allocation4 + $0x10] sm:$0xff] %vm171_vm1, %v4886_v18 }
 0x33b   : > { %v10801_v39 = vpop.f32.mrf.mxu1  ;;  %v10851_v51 = vpop.f32.mrf.mxu0  ;;  %11100 = vmatmul.mubr.msk.f32.gmra.mxu1 %vm171_vm1, %v13091_v50  ;;  %11150 = vmatmul.mubr.msk.f32.gmra.mxu0 %vm171_vm1, %v13093_v63  ;;  %v14546_v63 = vld [vmem:[#allocation7_spill] sm:$0xff] }
 0x33c   : > { %5040 = vst.msk [vmem:[#allocation4 + $0x28] sm:$0xff] %vm171_vm1, %v10801_v39  ;;  %11102 = vmatprep.mubr.msk.f32.mxu1 %vm171_vm1, %v14544_v7  ;;  %11152 = vmatprep.mubr.msk.f32.mxu0 %vm171_vm1, %v13101_v2  ;;  %v7355_v39 = vld [vmem:[#allocation3 + $0xf8] sm:$0xff] }
 0x33d   : > { %v4896_v35 = vpop.f32.mrf.mxu1  ;;  %v5286_v48 = vpop.f32.mrf.mxu0 }
 0x33e   : > { %5039 = vst.msk [vmem:[#allocation4 + $0x20] sm:$0xff] %vm171_vm1, %v4896_v35 }
 0x33f   : > { %v5428_v49 = vld [vmem:[#allocation4 + $0x18] sm:$0xff]  ;;  %v10804_v14 = vpop.f32.mrf.mxu1  ;;  %v10854_v62 = vpop.f32.mrf.mxu0  ;;  %11103 = vmatmul.mubr.msk.f32.gmra.mxu1 %vm171_vm1, %v14545_v11  ;;  %11153 = vmatmul.mubr.msk.f32.gmra.mxu0 %vm171_vm1, %v13109_v13 }
 0x340   : > { %v5460_v50 = vadd.f32 %v10848_v26, %v5428_v49  ;;  %5042 = vst.msk [vmem:[#allocation4 + $0x38] sm:$0xff] %vm171_vm1, %v10804_v14  ;;  %11105 = vmatprep.mubr.msk.f32.mxu1 %vm171_vm1, %v14546_v63  ;;  %11155 = vmatprep.mubr.msk.f32.mxu0 %vm171_vm1, %v13117_v40  ;;  %v7356_v49 = vld [vmem:[#allocation3 + $0x108] sm:$0xff] }
 0x341   : > { %v5427_v2 = vld [vmem:[#allocation4 + $0x10] sm:$0xff]  ;;  %v4906_v10 = vpop.f32.mrf.mxu1  ;;  %v5296_v46 = vpop.f32.mrf.mxu0  ;;  %v7810_v14 = vld [vmem:[#allocation3 + $0x109] sm:$0xff] }
 0x342   : > { %5492 = vst.msk [vmem:[#allocation4 + $0x18] sm:$0xff] %vm171_vm1, %v5460_v50  ;;  %v5459_v33 = vadd.f32 %v5427_v2, %v5276_v32  ;;  %5041 = vst.msk [vmem:[#allocation4 + $0x30] sm:$0xff] %vm171_vm1, %v4906_v10  ;;  %v7357_v10 = vld [vmem:[#allocation3 + $0x110] sm:$0xff] }
 0x343   : > { %v5430_v22 = vld [vmem:[#allocation4 + $0x28] sm:$0xff]  ;;  %v10807_v53 = vpop.f32.mrf.mxu1  ;;  %v10857_v13 = vpop.f32.mrf.mxu0  ;;  %11106 = vmatmul.mubr.msk.f32.gmra.mxu1 %vm171_vm1, %v14547_v31  ;;  %11156 = vmatmul.mubr.msk.f32.gmra.mxu0 %vm171_vm1, %v13125_v20  ;;  %v7349_v20 = vld [vmem:[#allocation3 + $0xb0] sm:$0xff]  ;;  %v7812_v31 = vld [vmem:[#allocation3 + $0x121] sm:$0xff] }
 0x344   : > { %5491 = vst.msk [vmem:[#allocation4 + $0x10] sm:$0xff] %vm171_vm1, %v5459_v33  ;;  %v5462_v40 = vadd.f32 %v10851_v51, %v5430_v22  ;;  %5044 = vst.msk [vmem:[#allocation4 + $0x48] sm:$0xff] %vm171_vm1, %v10807_v53  ;;  %11108 = vmatprep.mubr.msk.f32.mxu1 %vm171_vm1, %v14548_v61  ;;  %11158 = vmatprep.mubr.msk.f32.mxu0 %vm171_vm1, %v13133_v4  ;;  %v7809_v51 = vld [vmem:[#allocation3 + $0xf9] sm:$0xff] }
 0x345   : > { %v5429_v57 = vld [vmem:[#allocation4 + $0x20] sm:$0xff]  ;;  %v4916_v36 = vpop.f32.mrf.mxu1  ;;  %v5306_v9 = vpop.f32.mrf.mxu0 }
 0x346   : > { %5494 = vst.msk [vmem:[#allocation4 + $0x28] sm:$0xff] %vm171_vm1, %v5462_v40  ;;  %v5461_v42 = vadd.f32 %v5429_v57, %v5286_v48  ;;  %5043 = vst.msk [vmem:[#allocation4 + $0x40] sm:$0xff] %vm171_vm1, %v4916_v36 }
 0x347   : > { %v5432_v3 = vld [vmem:[#allocation4 + $0x38] sm:$0xff]  ;;  %v10810_v37 = vpop.f32.mrf.mxu1  ;;  %v10860_v47 = vpop.f32.mrf.mxu0  ;;  %11109 = vmatmul.mubr.msk.f32.gmra.mxu1 %vm171_vm1, %v7349_v20  ;;  %11159 = vmatmul.mubr.msk.f32.gmra.mxu0 %vm171_vm1, %v7803_v29 }
 0x348   : > { %5493 = vst.msk [vmem:[#allocation4 + $0x20] sm:$0xff] %vm171_vm1, %v5461_v42  ;;  %v5464_v4 = vadd.f32 %v10854_v62, %v5432_v3  ;;  %5046 = vst.msk [vmem:[#allocation4 + $0x58] sm:$0xff] %vm171_vm1, %v10810_v37  ;;  %11111 = vmatprep.mubr.msk.f32.mxu1 %vm171_vm1, %v14549_v24  ;;  %11161 = vmatprep.mubr.msk.f32.mxu0 %vm171_vm1, %v13149_v55  ;;  %v7359_v42 = vld [vmem:[#allocation3 + $0x128] sm:$0xff] }
 0x349   : > { %v5431_v6 = vld [vmem:[#allocation4 + $0x30] sm:$0xff]  ;;  %v4926_v23 = vpop.f32.mrf.mxu1  ;;  %v5316_v60 = vpop.f32.mrf.mxu0  ;;  %v7813_v20 = vld [vmem:[#allocation3 + $0x129] sm:$0xff] }
 0x34a   : > { %5496 = vst.msk [vmem:[#allocation4 + $0x38] sm:$0xff] %vm171_vm1, %v5464_v4  ;;  %v5463_v45 = vadd.f32 %v5431_v6, %v5296_v46  ;;  %5045 = vst.msk [vmem:[#allocation4 + $0x50] sm:$0xff] %vm171_vm1, %v4926_v23  ;;  %v7811_v46 = vld [vmem:[#allocation3 + $0x111] sm:$0xff]  ;;  %v7814_v4 = vld [vmem:[#allocation3 + $0x139] sm:$0xff] }
 0x34b   : > { %v5434_v34 = vld [vmem:[#allocation4 + $0x48] sm:$0xff]  ;;  %v10813_v28 = vpop.f32.mrf.mxu1  ;;  %v10863_v44 = vpop.f32.mrf.mxu0  ;;  %11112 = vmatmul.mubr.msk.f32.gmra.mxu1 %vm171_vm1, %v7351_v5  ;;  %11162 = vmatmul.mubr.msk.f32.gmra.mxu0 %vm171_vm1, %v7805_v59  ;;  %v7361_v5 = vld [vmem:[#allocation3 + $0x140] sm:$0xff] }
 0x34c   : > { %5495 = vst.msk [vmem:[#allocation4 + $0x30] sm:$0xff] %vm171_vm1, %v5463_v45  ;;  %v5466_v55 = vadd.f32 %v10857_v13, %v5434_v34  ;;  %5048 = vst.msk [vmem:[#allocation4 + $0x68] sm:$0xff] %vm171_vm1, %v10813_v28  ;;  %11114 = vmatprep.mubr.msk.f32.mxu1 %vm171_vm1, %v7352_v43  ;;  %11164 = vmatprep.mubr.msk.f32.mxu0 %vm171_vm1, %v7806_v16  ;;  %v7358_v13 = vld [vmem:[#allocation3 + $0x120] sm:$0xff]  ;;  %v7362_v43 = vld [vmem:[#allocation3 + $0x150] sm:$0xff] }
 0x34d   : > { %v5433_v0 = vld [vmem:[#allocation4 + $0x40] sm:$0xff]  ;;  %v4936_v56 = vpop.f32.mrf.mxu1  ;;  %v5326_v12 = vpop.f32.mrf.mxu0  ;;  %v7815_v59 = vld [vmem:[#allocation3 + $0x141] sm:$0xff] }
 0x34e   : > { %5498 = vst.msk [vmem:[#allocation4 + $0x48] sm:$0xff] %vm171_vm1, %v5466_v55  ;;  %v5465_v41 = vadd.f32 %v5433_v0, %v5306_v9  ;;  %5047 = vst.msk [vmem:[#allocation4 + $0x60] sm:$0xff] %vm171_vm1, %v4936_v56  ;;  %v7816_v16 = vld [vmem:[#allocation3 + $0x151] sm:$0xff] }
 0x34f   : > { %v5436_v8 = vld [vmem:[#allocation4 + $0x58] sm:$0xff]  ;;  %v10816_v15 = vpop.f32.mrf.mxu1  ;;  %v10866_v21 = vpop.f32.mrf.mxu0  ;;  %11115 = vmatmul.mubr.msk.f32.gmra.mxu1 %vm171_vm1, %v7353_v27  ;;  %11165 = vmatmul.mubr.msk.f32.gmra.mxu0 %vm171_vm1, %v7807_v58  ;;  %v7363_v27 = vld [vmem:[#allocation3 + $0x158] sm:$0xff] }
 0x350   : > { %5497 = vst.msk [vmem:[#allocation4 + $0x40] sm:$0xff] %vm171_vm1, %v5465_v41  ;;  %v5468_v54 = vadd.f32 %v10860_v47, %v5436_v8  ;;  %5050 = vst.msk [vmem:[#allocation4 + $0x78] sm:$0xff] %vm171_vm1, %v10816_v15  ;;  %11117 = vmatprep.mubr.msk.f32.mxu1 %vm171_vm1, %v7354_v52  ;;  %11167 = vmatprep.mubr.msk.f32.mxu0 %vm171_vm1, %v7808_v25  ;;  %v7360_v47 = vld [vmem:[#allocation3 + $0x138] sm:$0xff]  ;;  %v7364_v52 = vld [vmem:[#allocation3 + $0x168] sm:$0xff] }
 0x351   : > { %v5435_v1 = vld [vmem:[#allocation4 + $0x50] sm:$0xff]  ;;  %v4946_v26 = vpop.f32.mrf.mxu1  ;;  %v5336_v18 = vpop.f32.mrf.mxu0  ;;  %v7818_v25 = vld [vmem:[#allocation3 + $0x169] sm:$0xff] }
 0x352   : > { %5500 = vst.msk [vmem:[#allocation4 + $0x58] sm:$0xff] %vm171_vm1, %v5468_v54  ;;  %v5467_v32 = vadd.f32 %v5435_v1, %v5316_v60  ;;  %5049 = vst.msk [vmem:[#allocation4 + $0x70] sm:$0xff] %vm171_vm1, %v4946_v26  ;;  %v7817_v58 = vld [vmem:[#allocation3 + $0x159] sm:$0xff] }
 0x353   : > { %v5438_v7 = vld [vmem:[#allocation4 + $0x68] sm:$0xff]  ;;  %v10819_v35 = vpop.f32.mrf.mxu1  ;;  %v10869_v48 = vpop.f32.mrf.mxu0  ;;  %11118 = vmatmul.mubr.msk.f32.gmra.mxu1 %vm171_vm1, %v7355_v39  ;;  %11168 = vmatmul.mubr.msk.f32.gmra.mxu0 %vm171_vm1, %v7809_v51  ;;  %v7365_v39 = vld [vmem:[#allocation3 + $0x170] sm:$0xff] }
 0x354   : > { %5499 = vst.msk [vmem:[#allocation4 + $0x50] sm:$0xff] %vm171_vm1, %v5467_v32  ;;  %v5470_v62 = vadd.f32 %v10863_v44, %v5438_v7  ;;  %5052 = vst.msk [vmem:[#allocation4 + $0x88] sm:$0xff] %vm171_vm1, %v10819_v35  ;;  %11120 = vmatprep.mubr.msk.f32.mxu1 %vm171_vm1, %v7356_v49  ;;  %11170 = vmatprep.mubr.msk.f32.mxu0 %vm171_vm1, %v7810_v14  ;;  %v7819_v51 = vld [vmem:[#allocation3 + $0x171] sm:$0xff] }
 0x355   : > { %v5437_v11 = vld [vmem:[#allocation4 + $0x60] sm:$0xff]  ;;  %v4956_v50 = vpop.f32.mrf.mxu1  ;;  %v5346_v63 = vpop.f32.mrf.mxu0 }
 0x356   : > { %5502 = vst.msk [vmem:[#allocation4 + $0x68] sm:$0xff] %vm171_vm1, %v5470_v62  ;;  %v5469_v2 = vadd.f32 %v5437_v11, %v5326_v12  ;;  %5051 = vst.msk [vmem:[#allocation4 + $0x80] sm:$0xff] %vm171_vm1, %v4956_v50  ;;  %v7368_v50 = vld [vmem:[#allocation3 + $0x198] sm:$0xff] }
 0x357   : > { %v5440_v33 = vld [vmem:[#allocation4 + $0x78] sm:$0xff]  ;;  %v10822_v22 = vpop.f32.mrf.mxu1  ;;  %v10872_v53 = vpop.f32.mrf.mxu0  ;;  %11121 = vmatmul.mubr.msk.f32.gmra.mxu1 %vm171_vm1, %v7357_v10  ;;  %11171 = vmatmul.mubr.msk.f32.gmra.mxu0 %vm171_vm1, %v7811_v46 }
 0x358   : > { %5501 = vst.msk [vmem:[#allocation4 + $0x60] sm:$0xff] %vm171_vm1, %v5469_v2  ;;  %v5472_v40 = vadd.f32 %v10866_v21, %v5440_v33  ;;  %5054 = vst.msk [vmem:[#allocation4 + $0x98] sm:$0xff] %vm171_vm1, %v10822_v22  ;;  %11123 = vmatprep.mubr.msk.f32.mxu1 %vm171_vm1, %v7358_v13  ;;  %11173 = vmatprep.mubr.msk.f32.mxu0 %vm171_vm1, %v7812_v31  ;;  %v7823_v22 = vld [vmem:[#allocation3 + $0x1a1] sm:$0xff] }
 0x359   : > { %v5439_v61 = vld [vmem:[#allocation4 + $0x70] sm:$0xff]  ;;  %v4966_v57 = vpop.f32.mrf.mxu1  ;;  %v5356_v36 = vpop.f32.mrf.mxu0 }
 0x35a   : > { %5504 = vst.msk [vmem:[#allocation4 + $0x78] sm:$0xff] %vm171_vm1, %v5472_v40  ;;  %v5471_v9 = vadd.f32 %v5439_v61, %v5336_v18  ;;  %5053 = vst.msk [vmem:[#allocation4 + $0x90] sm:$0xff] %vm171_vm1, %v4966_v57  ;;  %v8246_v57 = vld [vmem:[#allocation3 + $0x32] sm:$0xff] }
 0x35b   : > { %v5442_v29 = vld [vmem:[#allocation4 + $0x88] sm:$0xff]  ;;  %v10825_v3 = vpop.f32.mrf.mxu1  ;;  %v10875_v37 = vpop.f32.mrf.mxu0  ;;  %11124 = vmatmul.mubr.msk.f32.gmra.mxu1 %vm171_vm1, %v7359_v42  ;;  %11174 = vmatmul.mubr.msk.f32.gmra.mxu0 %vm171_vm1, %v7813_v20 }
 0x35c   : > { %5503 = vst.msk [vmem:[#allocation4 + $0x70] sm:$0xff] %vm171_vm1, %v5471_v9  ;;  %v5474_v24 = vadd.f32 %v10869_v48, %v5442_v29  ;;  %5056 = vst.msk [vmem:[#allocation4 + $0xa8] sm:$0xff] %vm171_vm1, %v10825_v3  ;;  %11126 = vmatprep.mubr.msk.f32.mxu1 %vm171_vm1, %v7360_v47  ;;  %11176 = vmatprep.mubr.msk.f32.mxu0 %vm171_vm1, %v7814_v4  ;;  %v8247_v3 = vld [vmem:[#allocation3 + $0x3a] sm:$0xff] }
 0x35d   : > { %v5441_v6 = vld [vmem:[#allocation4 + $0x80] sm:$0xff]  ;;  %v4976_v23 = vpop.f32.mrf.mxu1  ;;  %v5366_v60 = vpop.f32.mrf.mxu0  ;;  %v5880_v4 = vld [vmem:[#allocation4 + $0x8] sm:$0xff] }
 0x35e   : > { %5506 = vst.msk [vmem:[#allocation4 + $0x88] sm:$0xff] %vm171_vm1, %v5474_v24  ;;  %v5473_v45 = vadd.f32 %v5441_v6, %v5346_v63  ;;  %5055 = vst.msk [vmem:[#allocation4 + $0xa0] sm:$0xff] %vm171_vm1, %v4976_v23  ;;  %v7822_v63 = vld [vmem:[#allocation3 + $0x199] sm:$0xff]  ;;  %v8248_v6 = vld [vmem:[#allocation3 + $0x4a] sm:$0xff] }
 0x35f   : > { %v5444_v34 = vld [vmem:[#allocation4 + $0x98] sm:$0xff]  ;;  %v10828_v28 = vpop.f32.mrf.mxu1  ;;  %v10878_v44 = vpop.f32.mrf.mxu0  ;;  %11127 = vmatmul.mubr.msk.f32.gmra.mxu1 %vm171_vm1, %v7361_v5  ;;  %11177 = vmatmul.mubr.msk.f32.gmra.mxu0 %vm171_vm1, %v7815_v59  ;;  %v5879_v59 = vld [vmem:[#allocation4] sm:$0xff] }
 0x360   : > { %5505 = vst.msk [vmem:[#allocation4 + $0x80] sm:$0xff] %vm171_vm1, %v5473_v45  ;;  %v5476_v55 = vadd.f32 %v10872_v53, %v5444_v34  ;;  %5058 = vst.msk [vmem:[#allocation4 + $0xb8] sm:$0xff] %vm171_vm1, %v10828_v28  ;;  %11129 = vmatprep.mubr.msk.f32.mxu1 %vm171_vm1, %v7362_v43  ;;  %11179 = vmatprep.mubr.msk.f32.mxu0 %vm171_vm1, %v7816_v16  ;;  %v8249_v43 = vld [vmem:[#allocation3 + $0x52] sm:$0xff] }
 0x361   : > { %v5443_v0 = vld [vmem:[#allocation4 + $0x90] sm:$0xff]  ;;  %v4986_v56 = vpop.f32.mrf.mxu1  ;;  %v5376_v12 = vpop.f32.mrf.mxu0 }
 0x362   : > { %5508 = vst.msk [vmem:[#allocation4 + $0x98] sm:$0xff] %vm171_vm1, %v5476_v55  ;;  %v5475_v41 = vadd.f32 %v5443_v0, %v5356_v36  ;;  %5057 = vst.msk [vmem:[#allocation4 + $0xb0] sm:$0xff] %vm171_vm1, %v4986_v56  ;;  %v5882_v0 = vld [vmem:[#allocation4 + $0x18] sm:$0xff] }
 0x363   : > { %v5446_v8 = vld [vmem:[#allocation4 + $0xa8] sm:$0xff]  ;;  %v10831_v15 = vpop.f32.mrf.mxu1  ;;  %v10881_v21 = vpop.f32.mrf.mxu0  ;;  %11130 = vmatmul.mubr.msk.f32.gmra.mxu1 %vm171_vm1, %v7363_v27  ;;  %11180 = vmatmul.mubr.msk.f32.gmra.mxu0 %vm171_vm1, %v7817_v58 }
 0x364   : > { %5507 = vst.msk [vmem:[#allocation4 + $0x90] sm:$0xff] %vm171_vm1, %v5475_v41  ;;  %v5478_v54 = vadd.f32 %v10875_v37, %v5446_v8  ;;  %5060 = vst.msk [vmem:[#allocation4 + $0xc8] sm:$0xff] %vm171_vm1, %v10831_v15  ;;  %11132 = vmatprep.mubr.msk.f32.mxu1 %vm171_vm1, %v7364_v52  ;;  %11182 = vmatprep.mubr.msk.f32.mxu0 %vm171_vm1, %v7818_v25  ;;  %v5881_v15 = vld [vmem:[#allocation4 + $0x10] sm:$0xff] }
 0x365   : > { %v5445_v1 = vld [vmem:[#allocation4 + $0xa0] sm:$0xff]  ;;  %v4996_v26 = vpop.f32.mrf.mxu1  ;;  %v5386_v18 = vpop.f32.mrf.mxu0 }
 0x366   : > { %5510 = vst.msk [vmem:[#allocation4 + $0xa8] sm:$0xff] %vm171_vm1, %v5478_v54  ;;  %v5477_v32 = vadd.f32 %v5445_v1, %v5366_v60  ;;  %5059 = vst.msk [vmem:[#allocation4 + $0xc0] sm:$0xff] %vm171_vm1, %v4996_v26  ;;  %v8251_v54 = vld [vmem:[#allocation3 + $0x6a] sm:$0xff]  ;;  %v5884_v26 = vld [vmem:[#allocation4 + $0x28] sm:$0xff] }
 0x367   : > { %v5448_v7 = vld [vmem:[#allocation4 + $0xb8] sm:$0xff]  ;;  %v10834_v35 = vpop.f32.mrf.mxu1  ;;  %v10884_v48 = vpop.f32.mrf.mxu0  ;;  %11133 = vmatmul.mubr.msk.f32.gmra.mxu1 %vm171_vm1, %v7365_v39  ;;  %11183 = vmatmul.mubr.msk.f32.gmra.mxu0 %vm171_vm1, %v7819_v51 }
 0x368   : > { %5509 = vst.msk [vmem:[#allocation4 + $0xa0] sm:$0xff] %vm171_vm1, %v5477_v32  ;;  %v5480_v49 = vadd.f32 %v10878_v44, %v5448_v7  ;;  %5062 = vst.msk [vmem:[#allocation4 + $0xd8] sm:$0xff] %vm171_vm1, %v10834_v35  ;;  %11135 = vmatprep.mubr.msk.f32.mxu1 %vm171_vm1, %v13473_v38  ;;  %11185 = vmatprep.mubr.msk.f32.mxu0 %vm171_vm1, %v13618_v19  ;;  %v7369_v19 = vld [vmem:[#allocation3 + $0x1a0] sm:$0xff]  ;;  %v5883_v35 = vld [vmem:[#allocation4 + $0x20] sm:$0xff] }
 0x369   : > { %v5447_v14 = vld [vmem:[#allocation4 + $0xb0] sm:$0xff]  ;;  %v5006_v62 = vpop.f32.mrf.mxu1  ;;  %v5396_v11 = vpop.f32.mrf.mxu0 }
 0x36a   : > { %5512 = vst.msk [vmem:[#allocation4 + $0xb8] sm:$0xff] %vm171_vm1, %v5480_v49  ;;  %v5479_v2 = vadd.f32 %v5447_v14, %v5376_v12  ;;  %5061 = vst.msk [vmem:[#allocation4 + $0xd0] sm:$0xff] %vm171_vm1, %v5006_v62  ;;  %v8250_v12 = vld [vmem:[#allocation3 + $0x62] sm:$0xff]  ;;  %v8252_v32 = vld [vmem:[#allocation3 + $0x7a] sm:$0xff] }
 0x36b   : > { %v5450_v10 = vld [vmem:[#allocation4 + $0xc8] sm:$0xff]  ;;  %v10837_v46 = vpop.f32.mrf.mxu1  ;;  %v10887_v33 = vpop.f32.mrf.mxu0  ;;  %11136 = vmatmul.mubr.msk.f32.gmra.mxu1 %vm171_vm1, %v13481_v17  ;;  %11186 = vmatmul.mubr.msk.f32.gmra.mxu0 %vm171_vm1, %v13623_v30  ;;  %v8253_v62 = vld [vmem:[#allocation3 + $0x82] sm:$0xff] }
 0x36c   : > { %5511 = vst.msk [vmem:[#allocation4 + $0xb0] sm:$0xff] %vm171_vm1, %v5479_v2  ;;  %v5482_v38 = vadd.f32 %v10881_v21, %v5450_v10  ;;  %5064 = vst.msk [vmem:[#allocation4 + $0xe8] sm:$0xff] %vm171_vm1, %v10837_v46  ;;  %11138 = vmatprep.mubr.msk.f32.mxu1 %vm171_vm1, %v7368_v50  ;;  %11188 = vmatprep.mubr.msk.f32.mxu0 %vm171_vm1, %v7822_v63  ;;  %v5886_v63 = vld [vmem:[#allocation4 + $0x38] sm:$0xff]  ;;  %v8254_v10 = vld [vmem:[#allocation3 + $0x92] sm:$0xff] }
 0x36d   : > { %v5449_v53 = vld [vmem:[#allocation4 + $0xc0] sm:$0xff]  ;;  %v5016_v13 = vpop.f32.mrf.mxu1  ;;  %v5406_v31 = vpop.f32.mrf.mxu0 }
 0x36e   : > { %5514 = vst.msk [vmem:[#allocation4 + $0xc8] sm:$0xff] %vm171_vm1, %v5482_v38  ;;  %v5481_v17 = vadd.f32 %v5449_v53, %v5386_v18  ;;  %5063 = vst.msk [vmem:[#allocation4 + $0xe0] sm:$0xff] %vm171_vm1, %v5016_v13 }
 0x36f   : > { %v5452_v30 = vld [vmem:[#allocation4 + $0xd8] sm:$0xff]  ;;  %v10840_v40 = vpop.f32.mrf.mxu1  ;;  %v10890_v61 = vpop.f32.mrf.mxu0  ;;  %11139 = vmatmul.mubr.msk.f32.gmra.mxu1 %vm171_vm1, %v7369_v19  ;;  %11189 = vmatmul.mubr.msk.f32.gmra.mxu0 %vm171_vm1, %v7823_v22  ;;  %v5885_v22 = vld [vmem:[#allocation4 + $0x30] sm:$0xff] }
 0x370   : > { %5513 = vst.msk [vmem:[#allocation4 + $0xc0] sm:$0xff] %vm171_vm1, %v5481_v17  ;;  %v5484_v36 = vadd.f32 %v10884_v48, %v5452_v30  ;;  %5066 = vst.msk [vmem:[#allocation4 + $0xf8] sm:$0xff] %vm171_vm1, %v10840_v40  ;;  %11193 = vmatprep.mubr.msk.f32.mxu1 %vm171_vm1, %v8246_v57  ;;  %v8255_v17 = vld [vmem:[#allocation3 + $0x9a] sm:$0xff] }
 0x371   : > { %v5451_v9 = vld [vmem:[#allocation4 + $0xd0] sm:$0xff]  ;;  %v5026_v42 = vpop.f32.mrf.mxu1  ;;  %v5416_v20 = vpop.f32.mrf.mxu0 }
 0x372   : > { %5516 = vst.msk [vmem:[#allocation4 + $0xd8] sm:$0xff] %vm171_vm1, %v5484_v36  ;;  %v5483_v29 = vadd.f32 %v5451_v9, %v5396_v11  ;;  %5065 = vst.msk [vmem:[#allocation4 + $0xf0] sm:$0xff] %vm171_vm1, %v5026_v42  ;;  %v8256_v36 = vld [vmem:[#allocation3 + $0xaa] sm:$0xff] }
 0x373   : > { %v5454_v37 = vld [vmem:[#allocation4 + $0xe8] sm:$0xff]  ;;  %v10895_v47 = vpop.f32.mrf.mxu1  ;;  %v10945_v24 = vpop.f32.mrf.mxu0  ;;  %11194 = vmatmul.mubr.msk.f32.vlgmr.msra.gmra.mxu1 %vm171_vm1, %v8247_v3  ;;  %v5887_v3 = vld [vmem:[#allocation4 + $0x40] sm:$0xff] }
 0x374   : > { %5515 = vst.msk [vmem:[#allocation4 + $0xd0] sm:$0xff] %vm171_vm1, %v5483_v29  ;;  %v5486_v23 = vadd.f32 %v10887_v33, %v5454_v37  ;;  %v5912_v60 = vadd.f32 %v10895_v47, %v5880_v4  ;;  %11196 = vmatprep.mubr.msk.f32.mxu1 %vm171_vm1, %v8248_v6 }
 0x375   : > { %v5453_v45 = vld [vmem:[#allocation4 + $0xe0] sm:$0xff]  ;;  %v5720_v5 = vpop.f32.mrf.mxu1  ;;  %v6174_v34 = vpop.f32.mrf.mxu0 }
 0x376   : > { %5518 = vst.msk [vmem:[#allocation4 + $0xe8] sm:$0xff] %vm171_vm1, %v5486_v23  ;;  %v5485_v28 = vadd.f32 %v5453_v45, %v5406_v31  ;;  %5944 = vst.msk [vmem:[#allocation4 + $0x8] sm:$0xff] %vm171_vm1, %v5912_v60  ;;  %v5911_v44 = vadd.f32 %v5879_v59, %v5720_v5  ;;  %v5890_v60 = vld [vmem:[#allocation4 + $0x58] sm:$0xff] }
 0x377   : > { %v5456_v16 = vld [vmem:[#allocation4 + $0xf8] sm:$0xff]  ;;  %v10898_v55 = vpop.f32.mrf.mxu1  ;;  %v10948_v56 = vpop.f32.mrf.mxu0  ;;  %11197 = vmatmul.mubr.msk.f32.gmra.mxu1 %vm171_vm1, %v8249_v43  ;;  %v5889_v43 = vld [vmem:[#allocation4 + $0x50] sm:$0xff] }
 0x378   : > { %5517 = vst.msk [vmem:[#allocation4 + $0xe0] sm:$0xff] %vm171_vm1, %v5485_v28  ;;  %v5488_v41 = vadd.f32 %v10890_v61, %v5456_v16  ;;  %5943 = vst.msk [vmem:[#allocation4] sm:$0xff] %vm171_vm1, %v5911_v44  ;;  %v5914_v27 = vadd.f32 %v10898_v55, %v5882_v0  ;;  %11199 = vmatprep.mubr.msk.f32.mxu1 %vm171_vm1, %v8250_v12  ;;  %v5888_v61 = vld [vmem:[#allocation4 + $0x48] sm:$0xff]  ;;  %v8258_v5 = vld [vmem:[#allocation3 + $0xc2] sm:$0xff] }
 0x379   : > { %v5455_v58 = vld [vmem:[#allocation4 + $0xf0] sm:$0xff]  ;;  %v5730_v8 = vpop.f32.mrf.mxu1  ;;  %v6184_v21 = vpop.f32.mrf.mxu0 }
 0x37a   : > { %5520 = vst.msk [vmem:[#allocation4 + $0xf8] sm:$0xff] %vm171_vm1, %v5488_v41  ;;  %v5487_v52 = vadd.f32 %v5455_v58, %v5416_v20  ;;  %5946 = vst.msk [vmem:[#allocation4 + $0x18] sm:$0xff] %vm171_vm1, %v5914_v27  ;;  %v5913_v25 = vadd.f32 %v5881_v15, %v5730_v8  ;;  %v5892_v27 = vld [vmem:[#allocation4 + $0x68] sm:$0xff] }
 0x37b   : > { %v10901_v1 = vpop.f32.mrf.mxu1  ;;  %v10951_v18 = vpop.f32.mrf.mxu0  ;;  %11200 = vmatmul.mubr.msk.f32.gmra.mxu1 %vm171_vm1, %v8251_v54  ;;  %v8260_v8 = vld [vmem:[#allocation3 + $0xda] sm:$0xff]  ;;  %v5891_v54 = vld [vmem:[#allocation4 + $0x60] sm:$0xff] }
 0x37c   : > { %5519 = vst.msk [vmem:[#allocation4 + $0xf0] sm:$0xff] %vm171_vm1, %v5487_v52  ;;  %5945 = vst.msk [vmem:[#allocation4 + $0x10] sm:$0xff] %vm171_vm1, %v5913_v25  ;;  %v5916_v39 = vadd.f32 %v10901_v1, %v5884_v26  ;;  %11202 = vmatprep.mubr.msk.f32.mxu1 %vm171_vm1, %v8252_v32  ;;  %v8261_v32 = vld [vmem:[#allocation3 + $0xe2] sm:$0xff] }
 0x37d   : > { %v6334_v51 = vld [vmem:[#allocation4 + $0x8] sm:$0xff]  ;;  %v5740_v7 = vpop.f32.mrf.mxu1  ;;  %v6194_v48 = vpop.f32.mrf.mxu0 }
 0x37e   : > { %v6366_v49 = vadd.f32 %v10945_v24, %v6334_v51  ;;  %5948 = vst.msk [vmem:[#allocation4 + $0x28] sm:$0xff] %vm171_vm1, %v5916_v39  ;;  %v5915_v14 = vadd.f32 %v5883_v35, %v5740_v7  ;;  %v8257_v24 = vld [vmem:[#allocation3 + $0xb2] sm:$0xff]  ;;  %v5894_v7 = vld [vmem:[#allocation4 + $0x78] sm:$0xff] }
 0x37f   : > { %v6333_v11 = vld [vmem:[#allocation4] sm:$0xff]  ;;  %v10904_v50 = vpop.f32.mrf.mxu1  ;;  %v10954_v2 = vpop.f32.mrf.mxu0  ;;  %11203 = vmatmul.mubr.msk.f32.gmra.mxu1 %vm171_vm1, %v8253_v62 }
 0x380   : > { %6398 = vst.msk [vmem:[#allocation4 + $0x8] sm:$0xff] %vm171_vm1, %v6366_v49  ;;  %v6365_v46 = vadd.f32 %v6333_v11, %v6174_v34  ;;  %5947 = vst.msk [vmem:[#allocation4 + $0x20] sm:$0xff] %vm171_vm1, %v5915_v14  ;;  %v5918_v33 = vadd.f32 %v10904_v50, %v5886_v63  ;;  %11205 = vmatprep.mubr.msk.f32.mxu1 %vm171_vm1, %v8254_v10  ;;  %v5893_v50 = vld [vmem:[#allocation4 + $0x70] sm:$0xff] }
 0x381   : > { %v6336_v38 = vld [vmem:[#allocation4 + $0x18] sm:$0xff]  ;;  %v5750_v19 = vpop.f32.mrf.mxu1  ;;  %v6204_v53 = vpop.f32.mrf.mxu0 }
 0x382   : > { %6397 = vst.msk [vmem:[#allocation4] sm:$0xff] %vm171_vm1, %v6365_v46  ;;  %v6368_v13 = vadd.f32 %v10948_v56, %v6336_v38  ;;  %5950 = vst.msk [vmem:[#allocation4 + $0x38] sm:$0xff] %vm171_vm1, %v5918_v33  ;;  %v5917_v31 = vadd.f32 %v5885_v22, %v5750_v19  ;;  %v8259_v56 = vld [vmem:[#allocation3 + $0xca] sm:$0xff]  ;;  %v8263_v46 = vld [vmem:[#allocation3 + $0xfa] sm:$0xff] }
 0x383   : > { %v6335_v30 = vld [vmem:[#allocation4 + $0x10] sm:$0xff]  ;;  %v10907_v40 = vpop.f32.mrf.mxu1  ;;  %v10957_v57 = vpop.f32.mrf.mxu0  ;;  %11206 = vmatmul.mubr.msk.f32.gmra.mxu1 %vm171_vm1, %v8255_v17  ;;  %v5896_v19 = vld [vmem:[#allocation4 + $0x88] sm:$0xff] }
 0x384   : > { %6400 = vst.msk [vmem:[#allocation4 + $0x18] sm:$0xff] %vm171_vm1, %v6368_v13  ;;  %v6367_v9 = vadd.f32 %v6335_v30, %v6184_v21  ;;  %5949 = vst.msk [vmem:[#allocation4 + $0x30] sm:$0xff] %vm171_vm1, %v5917_v31  ;;  %v5920_v42 = vadd.f32 %v10907_v40, %v5888_v61  ;;  %11208 = vmatprep.mubr.msk.f32.mxu1 %vm171_vm1, %v8256_v36  ;;  %v5895_v40 = vld [vmem:[#allocation4 + $0x80] sm:$0xff] }
 0x385   : > { %v6338_v20 = vld [vmem:[#allocation4 + $0x28] sm:$0xff]  ;;  %v5760_v29 = vpop.f32.mrf.mxu1  ;;  %v6214_v37 = vpop.f32.mrf.mxu0 }
 0x386   : > { %6399 = vst.msk [vmem:[#allocation4 + $0x10] sm:$0xff] %vm171_vm1, %v6367_v9  ;;  %v6370_v47 = vadd.f32 %v10951_v18, %v6338_v20  ;;  %5952 = vst.msk [vmem:[#allocation4 + $0x48] sm:$0xff] %vm171_vm1, %v5920_v42  ;;  %v5919_v4 = vadd.f32 %v5887_v3, %v5760_v29  ;;  %v8265_v9 = vld [vmem:[#allocation3 + $0x112] sm:$0xff]  ;;  %v5898_v29 = vld [vmem:[#allocation4 + $0x98] sm:$0xff] }
 0x387   : > { %v6337_v6 = vld [vmem:[#allocation4 + $0x20] sm:$0xff]  ;;  %v10910_v23 = vpop.f32.mrf.mxu1  ;;  %v10960_v45 = vpop.f32.mrf.mxu0  ;;  %11209 = vmatmul.mubr.msk.f32.gmra.mxu1 %vm171_vm1, %v8257_v24 }
 0x388   : > { %6402 = vst.msk [vmem:[#allocation4 + $0x28] sm:$0xff] %vm171_vm1, %v6370_v47  ;;  %v6369_v59 = vadd.f32 %v6337_v6, %v6194_v48  ;;  %5951 = vst.msk [vmem:[#allocation4 + $0x40] sm:$0xff] %vm171_vm1, %v5919_v4  ;;  %v5922_v34 = vadd.f32 %v10910_v23, %v5890_v60  ;;  %11211 = vmatprep.mubr.msk.f32.mxu1 %vm171_vm1, %v8258_v5  ;;  %v8262_v48 = vld [vmem:[#allocation3 + $0xf2] sm:$0xff]  ;;  %v5897_v23 = vld [vmem:[#allocation4 + $0x90] sm:$0xff] }
 0x389   : > { %v6340_v28 = vld [vmem:[#allocation4 + $0x38] sm:$0xff]  ;;  %v5770_v44 = vpop.f32.mrf.mxu1  ;;  %v6224_v16 = vpop.f32.mrf.mxu0 }
 0x38a   : > { %6401 = vst.msk [vmem:[#allocation4 + $0x20] sm:$0xff] %vm171_vm1, %v6369_v59  ;;  %v6372_v55 = vadd.f32 %v10954_v2, %v6340_v28  ;;  %5954 = vst.msk [vmem:[#allocation4 + $0x58] sm:$0xff] %vm171_vm1, %v5922_v34  ;;  %v5921_v0 = vadd.f32 %v5889_v43, %v5770_v44  ;;  %v8267_v59 = vld [vmem:[#allocation3 + $0x12a] sm:$0xff]  ;;  %v5900_v44 = vld [vmem:[#allocation4 + $0xa8] sm:$0xff] }
 0x38b   : > { %v6339_v12 = vld [vmem:[#allocation4 + $0x30] sm:$0xff]  ;;  %v10913_v41 = vpop.f32.mrf.mxu1  ;;  %v10963_v58 = vpop.f32.mrf.mxu0  ;;  %11212 = vmatmul.mubr.msk.f32.gmra.mxu1 %vm171_vm1, %v8259_v56 }
 0x38c   : > { %6404 = vst.msk [vmem:[#allocation4 + $0x38] sm:$0xff] %vm171_vm1, %v6372_v55  ;;  %v6371_v15 = vadd.f32 %v6339_v12, %v6204_v53  ;;  %5953 = vst.msk [vmem:[#allocation4 + $0x50] sm:$0xff] %vm171_vm1, %v5921_v0  ;;  %v5924_v21 = vadd.f32 %v10913_v41, %v5892_v27  ;;  %11214 = vmatprep.mubr.msk.f32.mxu1 %vm171_vm1, %v8260_v8  ;;  %v8264_v53 = vld [vmem:[#allocation3 + $0x10a] sm:$0xff] }
 0x38d   : > { %v6342_v52 = vld [vmem:[#allocation4 + $0x48] sm:$0xff]  ;;  %v5780_v25 = vpop.f32.mrf.mxu1  ;;  %v6234_v1 = vpop.f32.mrf.mxu0  ;;  %v5899_v41 = vld [vmem:[#allocation4 + $0xa0] sm:$0xff] }
 0x38e   : > { %6403 = vst.msk [vmem:[#allocation4 + $0x30] sm:$0xff] %vm171_vm1, %v6371_v15  ;;  %v6374_v26 = vadd.f32 %v10957_v57, %v6342_v52  ;;  %5956 = vst.msk [vmem:[#allocation4 + $0x68] sm:$0xff] %vm171_vm1, %v5924_v21  ;;  %v5923_v18 = vadd.f32 %v5891_v54, %v5780_v25  ;;  %v8269_v15 = vld [vmem:[#allocation3 + $0x142] sm:$0xff] }
 0x38f   : > { %v6341_v39 = vld [vmem:[#allocation4 + $0x40] sm:$0xff]  ;;  %v10916_v51 = vpop.f32.mrf.mxu1  ;;  %v10966_v35 = vpop.f32.mrf.mxu0  ;;  %11215 = vmatmul.mubr.msk.f32.gmra.mxu1 %vm171_vm1, %v8261_v32  ;;  %v5902_v25 = vld [vmem:[#allocation4 + $0xb8] sm:$0xff] }
 0x390   : > { %6406 = vst.msk [vmem:[#allocation4 + $0x48] sm:$0xff] %vm171_vm1, %v6374_v26  ;;  %v6373_v49 = vadd.f32 %v6341_v39, %v6214_v37  ;;  %5955 = vst.msk [vmem:[#allocation4 + $0x60] sm:$0xff] %vm171_vm1, %v5923_v18  ;;  %v5926_v14 = vadd.f32 %v10916_v51, %v5894_v7  ;;  %11217 = vmatprep.mubr.msk.f32.mxu1 %vm171_vm1, %v8262_v48  ;;  %v8266_v37 = vld [vmem:[#allocation3 + $0x122] sm:$0xff] }
 0x391   : > { %v6344_v62 = vld [vmem:[#allocation4 + $0x58] sm:$0xff]  ;;  %v5790_v11 = vpop.f32.mrf.mxu1  ;;  %v6244_v63 = vpop.f32.mrf.mxu0  ;;  %v5901_v51 = vld [vmem:[#allocation4 + $0xb0] sm:$0xff] }
 0x392   : > { %6405 = vst.msk [vmem:[#allocation4 + $0x40] sm:$0xff] %vm171_vm1, %v6373_v49  ;;  %v6376_v2 = vadd.f32 %v10960_v45, %v6344_v62  ;;  %5958 = vst.msk [vmem:[#allocation4 + $0x78] sm:$0xff] %vm171_vm1, %v5926_v14  ;;  %v5925_v10 = vadd.f32 %v5893_v50, %v5790_v11  ;;  %v8271_v49 = vld [vmem:[#allocation3 + $0x15a] sm:$0xff] }
 0x393   : > { %v6343_v33 = vld [vmem:[#allocation4 + $0x50] sm:$0xff]  ;;  %v10919_v38 = vpop.f32.mrf.mxu1  ;;  %v10969_v22 = vpop.f32.mrf.mxu0  ;;  %11218 = vmatmul.mubr.msk.f32.gmra.mxu1 %vm171_vm1, %v8263_v46  ;;  %v5904_v11 = vld [vmem:[#allocation4 + $0xc8] sm:$0xff] }
 0x394   : > { %6408 = vst.msk [vmem:[#allocation4 + $0x58] sm:$0xff] %vm171_vm1, %v6376_v2  ;;  %v6375_v13 = vadd.f32 %v6343_v33, %v6224_v16  ;;  %5957 = vst.msk [vmem:[#allocation4 + $0x70] sm:$0xff] %vm171_vm1, %v5925_v10  ;;  %v5928_v31 = vadd.f32 %v10919_v38, %v5896_v19  ;;  %11220 = vmatprep.mubr.msk.f32.mxu1 %vm171_vm1, %v8264_v53  ;;  %v8268_v16 = vld [vmem:[#allocation3 + $0x13a] sm:$0xff]  ;;  %v5903_v38 = vld [vmem:[#allocation4 + $0xc0] sm:$0xff] }
 0x395   : > { %v6346_v17 = vld [vmem:[#allocation4 + $0x68] sm:$0xff]  ;;  %v5800_v30 = vpop.f32.mrf.mxu1  ;;  %v6254_v61 = vpop.f32.mrf.mxu0 }
 0x396   : > { %6407 = vst.msk [vmem:[#allocation4 + $0x50] sm:$0xff] %vm171_vm1, %v6375_v13  ;;  %v6378_v57 = vadd.f32 %v10963_v58, %v6346_v17  ;;  %5960 = vst.msk [vmem:[#allocation4 + $0x88] sm:$0xff] %vm171_vm1, %v5928_v31  ;;  %v5927_v36 = vadd.f32 %v5895_v40, %v5800_v30  ;;  %v8273_v13 = vld [vmem:[#allocation3 + $0x172] sm:$0xff]  ;;  %v5906_v30 = vld [vmem:[#allocation4 + $0xd8] sm:$0xff] }
 0x397   : > { %v6345_v42 = vld [vmem:[#allocation4 + $0x60] sm:$0xff]  ;;  %v10922_v20 = vpop.f32.mrf.mxu1  ;;  %v10972_v3 = vpop.f32.mrf.mxu0  ;;  %11221 = vmatmul.mubr.msk.f32.gmra.mxu1 %vm171_vm1, %v8265_v9 }
 0x398   : > { %6410 = vst.msk [vmem:[#allocation4 + $0x68] sm:$0xff] %vm171_vm1, %v6378_v57  ;;  %v6377_v47 = vadd.f32 %v6345_v42, %v6234_v1  ;;  %5959 = vst.msk [vmem:[#allocation4 + $0x80] sm:$0xff] %vm171_vm1, %v5927_v36  ;;  %v5930_v4 = vadd.f32 %v10922_v20, %v5898_v29  ;;  %11223 = vmatprep.mubr.msk.f32.mxu1 %vm171_vm1, %v8266_v37  ;;  %v8270_v1 = vld [vmem:[#allocation3 + $0x152] sm:$0xff]  ;;  %v5905_v20 = vld [vmem:[#allocation4 + $0xd0] sm:$0xff] }
 0x399   : > { %v6348_v24 = vld [vmem:[#allocation4 + $0x78] sm:$0xff]  ;;  %v5810_v6 = vpop.f32.mrf.mxu1  ;;  %v6264_v60 = vpop.f32.mrf.mxu0 }
 0x39a   : > { %6409 = vst.msk [vmem:[#allocation4 + $0x60] sm:$0xff] %vm171_vm1, %v6377_v47  ;;  %v6380_v45 = vadd.f32 %v10966_v35, %v6348_v24  ;;  %5962 = vst.msk [vmem:[#allocation4 + $0x98] sm:$0xff] %vm171_vm1, %v5930_v4  ;;  %v5929_v5 = vadd.f32 %v5897_v23, %v5810_v6  ;;  %v8275_v4 = vld [vmem:[#allocation3 + $0x18a] sm:$0xff]  ;;  %v5908_v23 = vld [vmem:[#allocation4 + $0xe8] sm:$0xff] }
 0x39b   : > { %v6347_v34 = vld [vmem:[#allocation4 + $0x70] sm:$0xff]  ;;  %v10925_v28 = vpop.f32.mrf.mxu1  ;;  %v10975_v43 = vpop.f32.mrf.mxu0  ;;  %11224 = vmatmul.mubr.msk.f32.gmra.mxu1 %vm171_vm1, %v8267_v59 }
 0x39c   : > { %6412 = vst.msk [vmem:[#allocation4 + $0x78] sm:$0xff] %vm171_vm1, %v6380_v45  ;;  %v6379_v55 = vadd.f32 %v6347_v34, %v6244_v63  ;;  %5961 = vst.msk [vmem:[#allocation4 + $0x90] sm:$0xff] %vm171_vm1, %v5929_v5  ;;  %v5932_v0 = vadd.f32 %v10925_v28, %v5900_v44  ;;  %11226 = vmatprep.mubr.msk.f32.mxu1 %vm171_vm1, %v8268_v16  ;;  %v8272_v63 = vld [vmem:[#allocation3 + $0x16a] sm:$0xff]  ;;  %v8277_v59 = vld [vmem:[#allocation3 + $0x1a2] sm:$0xff] }
 0x39d   : > { %v6350_v56 = vld [vmem:[#allocation4 + $0x88] sm:$0xff]  ;;  %v5820_v12 = vpop.f32.mrf.mxu1  ;;  %v6274_v27 = vpop.f32.mrf.mxu0  ;;  %v5907_v44 = vld [vmem:[#allocation4 + $0xe0] sm:$0xff] }
 0x39e   : > { %6411 = vst.msk [vmem:[#allocation4 + $0x70] sm:$0xff] %vm171_vm1, %v6379_v55  ;;  %v6382_v58 = vadd.f32 %v10969_v22, %v6350_v56  ;;  %5964 = vst.msk [vmem:[#allocation4 + $0xa8] sm:$0xff] %vm171_vm1, %v5932_v0  ;;  %v5931_v8 = vadd.f32 %v5899_v41, %v5820_v12  ;;  %v5910_v12 = vld [vmem:[#allocation4 + $0xf8] sm:$0xff] }
 0x39f   : > { %v6349_v21 = vld [vmem:[#allocation4 + $0x80] sm:$0xff]  ;;  %v10928_v52 = vpop.f32.mrf.mxu1  ;;  %v10978_v54 = vpop.f32.mrf.mxu0  ;;  %11227 = vmatmul.mubr.msk.f32.gmra.mxu1 %vm171_vm1, %v8269_v15 }
 0x3a0   : > { %6414 = vst.msk [vmem:[#allocation4 + $0x88] sm:$0xff] %vm171_vm1, %v6382_v58  ;;  %v6381_v26 = vadd.f32 %v6349_v21, %v6254_v61  ;;  %5963 = vst.msk [vmem:[#allocation4 + $0xa0] sm:$0xff] %vm171_vm1, %v5931_v8  ;;  %v5934_v18 = vadd.f32 %v10928_v52, %v5902_v25  ;;  %11229 = vmatprep.mubr.msk.f32.mxu1 %vm171_vm1, %v8270_v1  ;;  %v8274_v61 = vld [vmem:[#allocation3 + $0x182] sm:$0xff] }
 0x3a1   : > { %v6352_v32 = vld [vmem:[#allocation4 + $0x98] sm:$0xff]  ;;  %v5830_v39 = vpop.f32.mrf.mxu1  ;;  %v6284_v7 = vpop.f32.mrf.mxu0  ;;  %v5909_v21 = vld [vmem:[#allocation4 + $0xf0] sm:$0xff] }
 0x3a2   : > { %6413 = vst.msk [vmem:[#allocation4 + $0x80] sm:$0xff] %vm171_vm1, %v6381_v26  ;;  %v6384_v35 = vadd.f32 %v10972_v3, %v6352_v32  ;;  %5966 = vst.msk [vmem:[#allocation4 + $0xb8] sm:$0xff] %vm171_vm1, %v5934_v18  ;;  %v5933_v48 = vadd.f32 %v5901_v51, %v5830_v39  ;;  %v8276_v3 = vld [vmem:[#allocation3 + $0x19a] sm:$0xff] }
 0x3a3   : > { %v6351_v14 = vld [vmem:[#allocation4 + $0x90] sm:$0xff]  ;;  %v10931_v62 = vpop.f32.mrf.mxu1  ;;  %v10981_v50 = vpop.f32.mrf.mxu0  ;;  %11230 = vmatmul.mubr.msk.f32.gmra.mxu1 %vm171_vm1, %v8271_v49  ;;  %v6788_v18 = vld [vmem:[#allocation4 + $0x8] sm:$0xff] }
 0x3a4   : > { %6416 = vst.msk [vmem:[#allocation4 + $0x98] sm:$0xff] %vm171_vm1, %v6384_v35  ;;  %v6383_v2 = vadd.f32 %v6351_v14, %v6264_v60  ;;  %5965 = vst.msk [vmem:[#allocation4 + $0xb0] sm:$0xff] %vm171_vm1, %v5933_v48  ;;  %v5936_v10 = vadd.f32 %v10931_v62, %v5904_v11  ;;  %11232 = vmatprep.mubr.msk.f32.mxu1 %vm171_vm1, %v8272_v63  ;;  %v6787_v48 = vld [vmem:[#allocation4] sm:$0xff]  ;;  %v6790_v63 = vld [vmem:[#allocation4 + $0x18] sm:$0xff] }
 0x3a5   : > { %v6354_v46 = vld [vmem:[#allocation4 + $0xa8] sm:$0xff]  ;;  %v5840_v33 = vpop.f32.mrf.mxu1  ;;  %v6294_v19 = vpop.f32.mrf.mxu0 }
 0x3a6   : > { %6415 = vst.msk [vmem:[#allocation4 + $0x90] sm:$0xff] %vm171_vm1, %v6383_v2  ;;  %v6386_v22 = vadd.f32 %v10975_v43, %v6354_v46  ;;  %5968 = vst.msk [vmem:[#allocation4 + $0xc8] sm:$0xff] %vm171_vm1, %v5936_v10  ;;  %v5935_v53 = vadd.f32 %v5903_v38, %v5840_v33 }
 0x3a7   : > { %v6353_v31 = vld [vmem:[#allocation4 + $0xa0] sm:$0xff]  ;;  %v10934_v17 = vpop.f32.mrf.mxu1  ;;  %v10984_v40 = vpop.f32.mrf.mxu0  ;;  %11233 = vmatmul.mubr.msk.f32.gmra.mxu1 %vm171_vm1, %v8273_v13 }
 0x3a8   : > { %6418 = vst.msk [vmem:[#allocation4 + $0xa8] sm:$0xff] %vm171_vm1, %v6386_v22  ;;  %v6385_v57 = vadd.f32 %v6353_v31, %v6274_v27  ;;  %5967 = vst.msk [vmem:[#allocation4 + $0xc0] sm:$0xff] %vm171_vm1, %v5935_v53  ;;  %v5938_v36 = vadd.f32 %v10934_v17, %v5906_v30  ;;  %11235 = vmatprep.mubr.msk.f32.mxu1 %vm171_vm1, %v8274_v61  ;;  %v6792_v30 = vld [vmem:[#allocation4 + $0x28] sm:$0xff] }
 0x3a9   : > { %v6356_v9 = vld [vmem:[#allocation4 + $0xb8] sm:$0xff]  ;;  %v5850_v42 = vpop.f32.mrf.mxu1  ;;  %v6304_v29 = vpop.f32.mrf.mxu0 }
 0x3aa   : > { %6417 = vst.msk [vmem:[#allocation4 + $0xa0] sm:$0xff] %vm171_vm1, %v6385_v57  ;;  %v6388_v37 = vadd.f32 %v10978_v54, %v6356_v9  ;;  %5970 = vst.msk [vmem:[#allocation4 + $0xd8] sm:$0xff] %vm171_vm1, %v5938_v36  ;;  %v5937_v47 = vadd.f32 %v5905_v20, %v5850_v42  ;;  %v6791_v42 = vld [vmem:[#allocation4 + $0x20] sm:$0xff] }
 0x3ab   : > { %v6355_v24 = vld [vmem:[#allocation4 + $0xb0] sm:$0xff]  ;;  %v10937_v6 = vpop.f32.mrf.mxu1  ;;  %v10987_v60 = vpop.f32.mrf.mxu0  ;;  %11236 = vmatmul.mubr.msk.f32.gmra.mxu1 %vm171_vm1, %v8275_v4  ;;  %v6794_v4 = vld [vmem:[#allocation4 + $0x38] sm:$0xff] }
 0x3ac   : > { %6420 = vst.msk [vmem:[#allocation4 + $0xb8] sm:$0xff] %vm171_vm1, %v6388_v37  ;;  %v6387_v45 = vadd.f32 %v6355_v24, %v6284_v7  ;;  %5969 = vst.msk [vmem:[#allocation4 + $0xd0] sm:$0xff] %vm171_vm1, %v5937_v47  ;;  %v5940_v5 = vadd.f32 %v10937_v6, %v5908_v23  ;;  %11238 = vmatprep.mubr.msk.f32.mxu1 %vm171_vm1, %v8276_v3 }
 0x3ad   : > { %v6358_v34 = vld [vmem:[#allocation4 + $0xc8] sm:$0xff]  ;;  %v5860_v28 = vpop.f32.mrf.mxu1  ;;  %v6314_v43 = vpop.f32.mrf.mxu0 }
 0x3ae   : > { %6419 = vst.msk [vmem:[#allocation4 + $0xb0] sm:$0xff] %vm171_vm1, %v6387_v45  ;;  %v6390_v16 = vadd.f32 %v10981_v50, %v6358_v34  ;;  %5972 = vst.msk [vmem:[#allocation4 + $0xe8] sm:$0xff] %vm171_vm1, %v5940_v5  ;;  %v5939_v55 = vadd.f32 %v5907_v44, %v5860_v28  ;;  %v6793_v5 = vld [vmem:[#allocation4 + $0x30] sm:$0xff] }
 0x3af   : > { %v6357_v0 = vld [vmem:[#allocation4 + $0xc0] sm:$0xff]  ;;  %v10940_v56 = vpop.f32.mrf.mxu1  ;;  %v10990_v41 = vpop.f32.mrf.mxu0  ;;  %11239 = vmatmul.mubr.msk.f32.gmra.mxu1 %vm171_vm1, %v8277_v59 }
 0x3b0   : > { %6422 = vst.msk [vmem:[#allocation4 + $0xc8] sm:$0xff] %vm171_vm1, %v6390_v16  ;;  %v6389_v27 = vadd.f32 %v6357_v0, %v6294_v19  ;;  %5971 = vst.msk [vmem:[#allocation4 + $0xe0] sm:$0xff] %vm171_vm1, %v5939_v55  ;;  %v5942_v58 = vadd.f32 %v10940_v56, %v5910_v12  ;;  %v6789_v19 = vld [vmem:[#allocation4 + $0x10] sm:$0xff]  ;;  %v6796_v16 = vld [vmem:[#allocation4 + $0x48] sm:$0xff] }
 0x3b1   : > { %v6360_v8 = vld [vmem:[#allocation4 + $0xd8] sm:$0xff]  ;;  %v5870_v15 = vpop.f32.mrf.mxu1  ;;  %v6324_v52 = vpop.f32.mrf.mxu0 }
 0x3b2   : > { %6421 = vst.msk [vmem:[#allocation4 + $0xc0] sm:$0xff] %vm171_vm1, %v6389_v27  ;;  %v6392_v25 = vadd.f32 %v10984_v40, %v6360_v8  ;;  %5974 = vst.msk [vmem:[#allocation4 + $0xf8] sm:$0xff] %vm171_vm1, %v5942_v58  ;;  %v5941_v54 = vadd.f32 %v5909_v21, %v5870_v15  ;;  %v6795_v27 = vld [vmem:[#allocation4 + $0x40] sm:$0xff] }
 0x3b3   : > { %v6359_v1 = vld [vmem:[#allocation4 + $0xd0] sm:$0xff]  ;;  %v10995_v26 = vpop.f32.mrf.mxu1  ;;  %v11045_v32 = vpop.f32.mrf.mxu0 }
 0x3b4   : > { %6424 = vst.msk [vmem:[#allocation4 + $0xd8] sm:$0xff] %vm171_vm1, %v6392_v25  ;;  %v6391_v39 = vadd.f32 %v6359_v1, %v6304_v29  ;;  %5973 = vst.msk [vmem:[#allocation4 + $0xf0] sm:$0xff] %vm171_vm1, %v5941_v54  ;;  %v6820_v51 = vadd.f32 %v10995_v26, %v6788_v18  ;;  %v6798_v25 = vld [vmem:[#allocation4 + $0x58] sm:$0xff] }
 0x3b5   : > { %v6362_v7 = vld [vmem:[#allocation4 + $0xe8] sm:$0xff]  ;;  %v6628_v35 = vpop.f32.mrf.mxu1  ;;  %v7082_v49 = vpop.f32.mrf.mxu0 }
 0x3b6   : > { %6423 = vst.msk [vmem:[#allocation4 + $0xd0] sm:$0xff] %vm171_vm1, %v6391_v39  ;;  %v6394_v14 = vadd.f32 %v10987_v60, %v6362_v7  ;;  %6852 = vst.msk [vmem:[#allocation4 + $0x8] sm:$0xff] %vm171_vm1, %v6820_v51  ;;  %v6819_v62 = vadd.f32 %v6787_v48, %v6628_v35  ;;  %v6797_v39 = vld [vmem:[#allocation4 + $0x50] sm:$0xff] }
 0x3b7   : > { %v6361_v11 = vld [vmem:[#allocation4 + $0xe0] sm:$0xff]  ;;  %v10998_v50 = vpop.f32.mrf.mxu1  ;;  %v11048_v2 = vpop.f32.mrf.mxu0 }
 0x3b8   : > { %6426 = vst.msk [vmem:[#allocation4 + $0xe8] sm:$0xff] %vm171_vm1, %v6394_v14  ;;  %v6393_v10 = vadd.f32 %v6361_v11, %v6314_v43  ;;  %6851 = vst.msk [vmem:[#allocation4] sm:$0xff] %vm171_vm1, %v6819_v62  ;;  %v6822_v46 = vadd.f32 %v10998_v50, %v6790_v63  ;;  %v6800_v14 = vld [vmem:[#allocation4 + $0x68] sm:$0xff] }
 0x3b9   : > { %v6364_v33 = vld [vmem:[#allocation4 + $0xf8] sm:$0xff]  ;;  %v6638_v38 = vpop.f32.mrf.mxu1  ;;  %v7092_v22 = vpop.f32.mrf.mxu0 }
 0x3ba   : > { %6425 = vst.msk [vmem:[#allocation4 + $0xe0] sm:$0xff] %vm171_vm1, %v6393_v10  ;;  %v6396_v53 = vadd.f32 %v10990_v41, %v6364_v33  ;;  %6854 = vst.msk [vmem:[#allocation4 + $0x18] sm:$0xff] %vm171_vm1, %v6822_v46  ;;  %v6821_v13 = vadd.f32 %v6789_v19, %v6638_v38  ;;  %v6799_v10 = vld [vmem:[#allocation4 + $0x60] sm:$0xff] }
 0x3bb   : > { %v6363_v31 = vld [vmem:[#allocation4 + $0xf0] sm:$0xff]  ;;  %v11001_v17 = vpop.f32.mrf.mxu1  ;;  %v11051_v40 = vpop.f32.mrf.mxu0 }
 0x3bc   : > { %6428 = vst.msk [vmem:[#allocation4 + $0xf8] sm:$0xff] %vm171_vm1, %v6396_v53  ;;  %v6395_v61 = vadd.f32 %v6363_v31, %v6324_v52  ;;  %6853 = vst.msk [vmem:[#allocation4 + $0x10] sm:$0xff] %vm171_vm1, %v6821_v13  ;;  %v6824_v57 = vadd.f32 %v11001_v17, %v6792_v30  ;;  %v6802_v53 = vld [vmem:[#allocation4 + $0x78] sm:$0xff] }
 0x3bd   : > { %v7242_v36 = vld [vmem:[#allocation4 + $0x8] sm:$0xff]  ;;  %v6648_v9 = vpop.f32.mrf.mxu1  ;;  %v7102_v20 = vpop.f32.mrf.mxu0 }
 0x3be   : > { %6427 = vst.msk [vmem:[#allocation4 + $0xf0] sm:$0xff] %vm171_vm1, %v6395_v61  ;;  %v7274_v29 = vadd.f32 %v11045_v32, %v7242_v36  ;;  %6856 = vst.msk [vmem:[#allocation4 + $0x28] sm:$0xff] %vm171_vm1, %v6824_v57  ;;  %v6823_v3 = vadd.f32 %v6791_v42, %v6648_v9  ;;  %v6801_v61 = vld [vmem:[#allocation4 + $0x70] sm:$0xff] }
 0x3bf   : > { %v7241_v37 = vld [vmem:[#allocation4] sm:$0xff]  ;;  %v11004_v47 = vpop.f32.mrf.mxu1  ;;  %v11054_v24 = vpop.f32.mrf.mxu0 }
 0x3c0   : > { %7306 = vst.msk [vmem:[#allocation4 + $0x8] sm:$0xff] %vm171_vm1, %v7274_v29  ;;  %v7273_v6 = vadd.f32 %v7241_v37, %v7082_v49  ;;  %6855 = vst.msk [vmem:[#allocation4 + $0x20] sm:$0xff] %vm171_vm1, %v6823_v3  ;;  %v6826_v23 = vadd.f32 %v11004_v47, %v6794_v4  ;;  %v6804_v29 = vld [vmem:[#allocation4 + $0x88] sm:$0xff] }
 0x3c1   : > { %v7244_v60 = vld [vmem:[#allocation4 + $0x18] sm:$0xff]  ;;  %v6658_v45 = vpop.f32.mrf.mxu1  ;;  %v7112_v59 = vpop.f32.mrf.mxu0 }
 0x3c2   : > { %7305 = vst.msk [vmem:[#allocation4] sm:$0xff] %vm171_vm1, %v7273_v6  ;;  %v7276_v34 = vadd.f32 %v11048_v2, %v7244_v60  ;;  %6858 = vst.msk [vmem:[#allocation4 + $0x38] sm:$0xff] %vm171_vm1, %v6826_v23  ;;  %v6825_v28 = vadd.f32 %v6793_v5, %v6658_v45  ;;  %v6803_v6 = vld [vmem:[#allocation4 + $0x80] sm:$0xff] }
 0x3c3   : > { %v7243_v44 = vld [vmem:[#allocation4 + $0x10] sm:$0xff]  ;;  %v11007_v43 = vpop.f32.mrf.mxu1  ;;  %v11057_v55 = vpop.f32.mrf.mxu0 }
 0x3c4   : > { %7308 = vst.msk [vmem:[#allocation4 + $0x18] sm:$0xff] %vm171_vm1, %v7276_v34  ;;  %v7275_v0 = vadd.f32 %v7243_v44, %v7092_v22  ;;  %6857 = vst.msk [vmem:[#allocation4 + $0x30] sm:$0xff] %vm171_vm1, %v6825_v28  ;;  %v6828_v56 = vadd.f32 %v11007_v43, %v6796_v16  ;;  %v6806_v34 = vld [vmem:[#allocation4 + $0x98] sm:$0xff] }
 0x3c5   : > { %v7246_v12 = vld [vmem:[#allocation4 + $0x28] sm:$0xff]  ;;  %v6668_v41 = vpop.f32.mrf.mxu1  ;;  %v7122_v58 = vpop.f32.mrf.mxu0 }
 0x3c6   : > { %7307 = vst.msk [vmem:[#allocation4 + $0x10] sm:$0xff] %vm171_vm1, %v7275_v0  ;;  %v7278_v8 = vadd.f32 %v11051_v40, %v7246_v12  ;;  %6860 = vst.msk [vmem:[#allocation4 + $0x48] sm:$0xff] %vm171_vm1, %v6828_v56  ;;  %v6827_v15 = vadd.f32 %v6795_v27, %v6668_v41  ;;  %v6805_v0 = vld [vmem:[#allocation4 + $0x90] sm:$0xff] }
 0x3c7   : > { %v7245_v21 = vld [vmem:[#allocation4 + $0x20] sm:$0xff]  ;;  %v11010_v52 = vpop.f32.mrf.mxu1  ;;  %v11060_v54 = vpop.f32.mrf.mxu0 }
 0x3c8   : > { %7310 = vst.msk [vmem:[#allocation4 + $0x28] sm:$0xff] %vm171_vm1, %v7278_v8  ;;  %v7277_v1 = vadd.f32 %v7245_v21, %v7102_v20  ;;  %6859 = vst.msk [vmem:[#allocation4 + $0x40] sm:$0xff] %vm171_vm1, %v6827_v15  ;;  %v6830_v26 = vadd.f32 %v11010_v52, %v6798_v25  ;;  %v6808_v8 = vld [vmem:[#allocation4 + $0xa8] sm:$0xff] }
 0x3c9   : > { %v7248_v18 = vld [vmem:[#allocation4 + $0x38] sm:$0xff]  ;;  %v6678_v32 = vpop.f32.mrf.mxu1  ;;  %v7132_v51 = vpop.f32.mrf.mxu0 }
 0x3ca   : > { %7309 = vst.msk [vmem:[#allocation4 + $0x20] sm:$0xff] %vm171_vm1, %v7277_v1  ;;  %v7280_v7 = vadd.f32 %v11054_v24, %v7248_v18  ;;  %6862 = vst.msk [vmem:[#allocation4 + $0x58] sm:$0xff] %vm171_vm1, %v6830_v26  ;;  %v6829_v35 = vadd.f32 %v6797_v39, %v6678_v32  ;;  %v6807_v1 = vld [vmem:[#allocation4 + $0xa0] sm:$0xff] }
 0x3cb   : > { %v7247_v48 = vld [vmem:[#allocation4 + $0x30] sm:$0xff]  ;;  %v11013_v49 = vpop.f32.mrf.mxu1  ;;  %v11063_v62 = vpop.f32.mrf.mxu0 }
 0x3cc   : > { %7312 = vst.msk [vmem:[#allocation4 + $0x38] sm:$0xff] %vm171_vm1, %v7280_v7  ;;  %v7279_v11 = vadd.f32 %v7247_v48, %v7112_v59  ;;  %6861 = vst.msk [vmem:[#allocation4 + $0x50] sm:$0xff] %vm171_vm1, %v6829_v35  ;;  %v6832_v50 = vadd.f32 %v11013_v49, %v6800_v14  ;;  %v6810_v7 = vld [vmem:[#allocation4 + $0xb8] sm:$0xff] }
 0x3cd   : > { %v7250_v63 = vld [vmem:[#allocation4 + $0x48] sm:$0xff]  ;;  %v6688_v2 = vpop.f32.mrf.mxu1  ;;  %v7142_v46 = vpop.f32.mrf.mxu0 }
 0x3ce   : > { %7311 = vst.msk [vmem:[#allocation4 + $0x30] sm:$0xff] %vm171_vm1, %v7279_v11  ;;  %v7282_v33 = vadd.f32 %v11057_v55, %v7250_v63  ;;  %6864 = vst.msk [vmem:[#allocation4 + $0x68] sm:$0xff] %vm171_vm1, %v6832_v50  ;;  %v6831_v38 = vadd.f32 %v6799_v10, %v6688_v2  ;;  %v6809_v11 = vld [vmem:[#allocation4 + $0xb0] sm:$0xff] }
 0x3cf   : > { %v7249_v19 = vld [vmem:[#allocation4 + $0x40] sm:$0xff]  ;;  %v11016_v22 = vpop.f32.mrf.mxu1  ;;  %v11066_v13 = vpop.f32.mrf.mxu0 }
 0x3d0   : > { %7314 = vst.msk [vmem:[#allocation4 + $0x48] sm:$0xff] %vm171_vm1, %v7282_v33  ;;  %v7281_v31 = vadd.f32 %v7249_v19, %v7122_v58  ;;  %6863 = vst.msk [vmem:[#allocation4 + $0x60] sm:$0xff] %vm171_vm1, %v6831_v38  ;;  %v6834_v17 = vadd.f32 %v11016_v22, %v6802_v53  ;;  %v6812_v33 = vld [vmem:[#allocation4 + $0xc8] sm:$0xff] }
 0x3d1   : > { %v7252_v30 = vld [vmem:[#allocation4 + $0x58] sm:$0xff]  ;;  %v6698_v40 = vpop.f32.mrf.mxu1  ;;  %v7152_v57 = vpop.f32.mrf.mxu0 }
 0x3d2   : > { %7313 = vst.msk [vmem:[#allocation4 + $0x40] sm:$0xff] %vm171_vm1, %v7281_v31  ;;  %v7284_v36 = vadd.f32 %v11060_v54, %v7252_v30  ;;  %6866 = vst.msk [vmem:[#allocation4 + $0x78] sm:$0xff] %vm171_vm1, %v6834_v17  ;;  %v6833_v9 = vadd.f32 %v6801_v61, %v6698_v40  ;;  %v6811_v31 = vld [vmem:[#allocation4 + $0xc0] sm:$0xff] }
 0x3d3   : > { %v7251_v42 = vld [vmem:[#allocation4 + $0x50] sm:$0xff]  ;;  %v11019_v20 = vpop.f32.mrf.mxu1  ;;  %v11069_v3 = vpop.f32.mrf.mxu0 }
 0x3d4   : > { %7316 = vst.msk [vmem:[#allocation4 + $0x58] sm:$0xff] %vm171_vm1, %v7284_v36  ;;  %v7283_v37 = vadd.f32 %v7251_v42, %v7132_v51  ;;  %6865 = vst.msk [vmem:[#allocation4 + $0x70] sm:$0xff] %vm171_vm1, %v6833_v9  ;;  %v6836_v47 = vadd.f32 %v11019_v20, %v6804_v29  ;;  %v6814_v36 = vld [vmem:[#allocation4 + $0xd8] sm:$0xff] }
 0x3d5   : > { %v7254_v4 = vld [vmem:[#allocation4 + $0x68] sm:$0xff]  ;;  %v6708_v24 = vpop.f32.mrf.mxu1  ;;  %v7162_v23 = vpop.f32.mrf.mxu0 }
 0x3d6   : > { %7315 = vst.msk [vmem:[#allocation4 + $0x50] sm:$0xff] %vm171_vm1, %v7283_v37  ;;  %v7286_v60 = vadd.f32 %v11063_v62, %v7254_v4  ;;  %6868 = vst.msk [vmem:[#allocation4 + $0x88] sm:$0xff] %vm171_vm1, %v6836_v47  ;;  %v6835_v45 = vadd.f32 %v6803_v6, %v6708_v24  ;;  %v6813_v37 = vld [vmem:[#allocation4 + $0xd0] sm:$0xff] }
 0x3d7   : > { %v7253_v5 = vld [vmem:[#allocation4 + $0x60] sm:$0xff]  ;;  %v11022_v59 = vpop.f32.mrf.mxu1  ;;  %v11072_v28 = vpop.f32.mrf.mxu0 }
 0x3d8   : > { %7318 = vst.msk [vmem:[#allocation4 + $0x68] sm:$0xff] %vm171_vm1, %v7286_v60  ;;  %v7285_v44 = vadd.f32 %v7253_v5, %v7142_v46  ;;  %6867 = vst.msk [vmem:[#allocation4 + $0x80] sm:$0xff] %vm171_vm1, %v6835_v45  ;;  %v6838_v43 = vadd.f32 %v11022_v59, %v6806_v34  ;;  %v6816_v60 = vld [vmem:[#allocation4 + $0xe8] sm:$0xff] }
 0x3d9   : > { %v7256_v16 = vld [vmem:[#allocation4 + $0x78] sm:$0xff]  ;;  %v6718_v55 = vpop.f32.mrf.mxu1  ;;  %v7172_v56 = vpop.f32.mrf.mxu0 }
 0x3da   : > { %7317 = vst.msk [vmem:[#allocation4 + $0x60] sm:$0xff] %vm171_vm1, %v7285_v44  ;;  %v7288_v12 = vadd.f32 %v11066_v13, %v7256_v16  ;;  %6870 = vst.msk [vmem:[#allocation4 + $0x98] sm:$0xff] %vm171_vm1, %v6838_v43  ;;  %v6837_v41 = vadd.f32 %v6805_v0, %v6718_v55  ;;  %v6815_v44 = vld [vmem:[#allocation4 + $0xe0] sm:$0xff] }
 0x3db   : > { %v7255_v27 = vld [vmem:[#allocation4 + $0x70] sm:$0xff]  ;;  %v11025_v58 = vpop.f32.mrf.mxu1  ;;  %v11075_v15 = vpop.f32.mrf.mxu0 }
 0x3dc   : > { %7320 = vst.msk [vmem:[#allocation4 + $0x78] sm:$0xff] %vm171_vm1, %v7288_v12  ;;  %v7287_v21 = vadd.f32 %v7255_v27, %v7152_v57  ;;  %6869 = vst.msk [vmem:[#allocation4 + $0x90] sm:$0xff] %vm171_vm1, %v6837_v41  ;;  %v6840_v52 = vadd.f32 %v11025_v58, %v6808_v8  ;;  %v6818_v12 = vld [vmem:[#allocation4 + $0xf8] sm:$0xff] }
 0x3dd   : > { %v7258_v25 = vld [vmem:[#allocation4 + $0x88] sm:$0xff]  ;;  %v6728_v54 = vpop.f32.mrf.mxu1  ;;  %v7182_v26 = vpop.f32.mrf.mxu0 }
 0x3de   : > { %7319 = vst.msk [vmem:[#allocation4 + $0x70] sm:$0xff] %vm171_vm1, %v7287_v21  ;;  %v7290_v18 = vadd.f32 %v11069_v3, %v7258_v25  ;;  %6872 = vst.msk [vmem:[#allocation4 + $0xa8] sm:$0xff] %vm171_vm1, %v6840_v52  ;;  %v6839_v32 = vadd.f32 %v6807_v1, %v6728_v54  ;;  %v6817_v21 = vld [vmem:[#allocation4 + $0xf0] sm:$0xff] }
 0x3df   : > { %v7257_v39 = vld [vmem:[#allocation4 + $0x80] sm:$0xff]  ;;  %v11028_v51 = vpop.f32.mrf.mxu1  ;;  %v11078_v35 = vpop.f32.mrf.mxu0 }
 0x3e0   : > { %7322 = vst.msk [vmem:[#allocation4 + $0x88] sm:$0xff] %vm171_vm1, %v7290_v18  ;;  %v7289_v48 = vadd.f32 %v7257_v39, %v7162_v23  ;;  %6871 = vst.msk [vmem:[#allocation4 + $0xa0] sm:$0xff] %vm171_vm1, %v6839_v32  ;;  %v6842_v49 = vadd.f32 %v11028_v51, %v6810_v7  ;;  %v7697_v18 = vld [vmem:[#allocation4 + $0x8] sm:$0xff] }
 0x3e1   : > { %v7260_v14 = vld [vmem:[#allocation4 + $0x98] sm:$0xff]  ;;  %v6738_v62 = vpop.f32.mrf.mxu1  ;;  %v7192_v50 = vpop.f32.mrf.mxu0 }
 0x3e2   : > { %7321 = vst.msk [vmem:[#allocation4 + $0x80] sm:$0xff] %vm171_vm1, %v7289_v48  ;;  %v7292_v63 = vadd.f32 %v11072_v28, %v7260_v14  ;;  %6874 = vst.msk [vmem:[#allocation4 + $0xb8] sm:$0xff] %vm171_vm1, %v6842_v49  ;;  %v6841_v2 = vadd.f32 %v6809_v11, %v6738_v62  ;;  %v7696_v48 = vld [vmem:[#allocation4] sm:$0xff] }
 0x3e3   : > { %v7259_v10 = vld [vmem:[#allocation4 + $0x90] sm:$0xff]  ;;  %v11031_v46 = vpop.f32.mrf.mxu1  ;;  %v11081_v38 = vpop.f32.mrf.mxu0 }
 0x3e4   : > { %7324 = vst.msk [vmem:[#allocation4 + $0x98] sm:$0xff] %vm171_vm1, %v7292_v63  ;;  %v7291_v19 = vadd.f32 %v7259_v10, %v7172_v56  ;;  %6873 = vst.msk [vmem:[#allocation4 + $0xb0] sm:$0xff] %vm171_vm1, %v6841_v2  ;;  %v6844_v22 = vadd.f32 %v11031_v46, %v6812_v33  ;;  %v7699_v63 = vld [vmem:[#allocation4 + $0x18] sm:$0xff] }
 0x3e5   : > { %v7262_v53 = vld [vmem:[#allocation4 + $0xa8] sm:$0xff]  ;;  %v6748_v13 = vpop.f32.mrf.mxu1  ;;  %v7202_v17 = vpop.f32.mrf.mxu0 }
 0x3e6   : > { %7323 = vst.msk [vmem:[#allocation4 + $0x90] sm:$0xff] %vm171_vm1, %v7291_v19  ;;  %v7294_v30 = vadd.f32 %v11075_v15, %v7262_v53  ;;  %6876 = vst.msk [vmem:[#allocation4 + $0xc8] sm:$0xff] %vm171_vm1, %v6844_v22  ;;  %v6843_v40 = vadd.f32 %v6811_v31, %v6748_v13  ;;  %v7698_v19 = vld [vmem:[#allocation4 + $0x10] sm:$0xff] }
 0x3e7   : > { %v7261_v61 = vld [vmem:[#allocation4 + $0xa0] sm:$0xff]  ;;  %v11034_v57 = vpop.f32.mrf.mxu1  ;;  %v11084_v9 = vpop.f32.mrf.mxu0 }
 0x3e8   : > { %7326 = vst.msk [vmem:[#allocation4 + $0xa8] sm:$0xff] %vm171_vm1, %v7294_v30  ;;  %v7293_v42 = vadd.f32 %v7261_v61, %v7182_v26  ;;  %6875 = vst.msk [vmem:[#allocation4 + $0xc0] sm:$0xff] %vm171_vm1, %v6843_v40  ;;  %v6846_v20 = vadd.f32 %v11034_v57, %v6814_v36  ;;  %v7701_v30 = vld [vmem:[#allocation4 + $0x28] sm:$0xff] }
 0x3e9   : > { %v7264_v29 = vld [vmem:[#allocation4 + $0xb8] sm:$0xff]  ;;  %v6758_v3 = vpop.f32.mrf.mxu1  ;;  %v7212_v47 = vpop.f32.mrf.mxu0 }
 0x3ea   : > { %7325 = vst.msk [vmem:[#allocation4 + $0xa0] sm:$0xff] %vm171_vm1, %v7293_v42  ;;  %v7296_v4 = vadd.f32 %v11078_v35, %v7264_v29  ;;  %6878 = vst.msk [vmem:[#allocation4 + $0xd8] sm:$0xff] %vm171_vm1, %v6846_v20  ;;  %v6845_v24 = vadd.f32 %v6813_v37, %v6758_v3  ;;  %v7700_v42 = vld [vmem:[#allocation4 + $0x20] sm:$0xff] }
 0x3eb   : > { %v7263_v6 = vld [vmem:[#allocation4 + $0xb0] sm:$0xff]  ;;  %v11037_v23 = vpop.f32.mrf.mxu1  ;;  %v11087_v45 = vpop.f32.mrf.mxu0 }
 0x3ec   : > { %7328 = vst.msk [vmem:[#allocation4 + $0xb8] sm:$0xff] %vm171_vm1, %v7296_v4  ;;  %v7295_v5 = vadd.f32 %v7263_v6, %v7192_v50  ;;  %6877 = vst.msk [vmem:[#allocation4 + $0xd0] sm:$0xff] %vm171_vm1, %v6845_v24  ;;  %v6848_v59 = vadd.f32 %v11037_v23, %v6816_v60  ;;  %v7703_v4 = vld [vmem:[#allocation4 + $0x38] sm:$0xff] }
 0x3ed   : > { %v7266_v34 = vld [vmem:[#allocation4 + $0xc8] sm:$0xff]  ;;  %v6768_v28 = vpop.f32.mrf.mxu1  ;;  %v7222_v43 = vpop.f32.mrf.mxu0 }
 0x3ee   : > { %7327 = vst.msk [vmem:[#allocation4 + $0xb0] sm:$0xff] %vm171_vm1, %v7295_v5  ;;  %v7298_v16 = vadd.f32 %v11081_v38, %v7266_v34  ;;  %6880 = vst.msk [vmem:[#allocation4 + $0xe8] sm:$0xff] %vm171_vm1, %v6848_v59  ;;  %v6847_v55 = vadd.f32 %v6815_v44, %v6768_v28  ;;  %v7702_v5 = vld [vmem:[#allocation4 + $0x30] sm:$0xff] }
 0x3ef   : > { %v7265_v0 = vld [vmem:[#allocation4 + $0xc0] sm:$0xff]  ;;  %v11040_v56 = vpop.f32.mrf.mxu1  ;;  %v11090_v41 = vpop.f32.mrf.mxu0 }
 0x3f0   : > { %7330 = vst.msk [vmem:[#allocation4 + $0xc8] sm:$0xff] %vm171_vm1, %v7298_v16  ;;  %v7297_v27 = vadd.f32 %v7265_v0, %v7202_v17  ;;  %6879 = vst.msk [vmem:[#allocation4 + $0xe0] sm:$0xff] %vm171_vm1, %v6847_v55  ;;  %v6850_v58 = vadd.f32 %v11040_v56, %v6818_v12  ;;  %v7705_v16 = vld [vmem:[#allocation4 + $0x48] sm:$0xff] }
 0x3f1   : > { %v7268_v8 = vld [vmem:[#allocation4 + $0xd8] sm:$0xff]  ;;  %v6778_v15 = vpop.f32.mrf.mxu1  ;;  %v7232_v52 = vpop.f32.mrf.mxu0 }
 0x3f2   : > { %7329 = vst.msk [vmem:[#allocation4 + $0xc0] sm:$0xff] %vm171_vm1, %v7297_v27  ;;  %v7300_v25 = vadd.f32 %v11084_v9, %v7268_v8  ;;  %6882 = vst.msk [vmem:[#allocation4 + $0xf8] sm:$0xff] %vm171_vm1, %v6850_v58  ;;  %v6849_v54 = vadd.f32 %v6817_v21, %v6778_v15  ;;  %v7704_v27 = vld [vmem:[#allocation4 + $0x40] sm:$0xff] }
 0x3f3   : > { %v7267_v1 = vld [vmem:[#allocation4 + $0xd0] sm:$0xff]  ;;  %v11095_v26 = vpop.f32.mrf.mxu1  ;;  %v11145_v32 = vpop.f32.mrf.mxu0 }
 0x3f4   : > { %7332 = vst.msk [vmem:[#allocation4 + $0xd8] sm:$0xff] %vm171_vm1, %v7300_v25  ;;  %v7299_v39 = vadd.f32 %v7267_v1, %v7212_v47  ;;  %6881 = vst.msk [vmem:[#allocation4 + $0xf0] sm:$0xff] %vm171_vm1, %v6849_v54  ;;  %v7729_v51 = vadd.f32 %v11095_v26, %v7697_v18  ;;  %v7707_v25 = vld [vmem:[#allocation4 + $0x58] sm:$0xff] }
 0x3f5   : > { %v7270_v7 = vld [vmem:[#allocation4 + $0xe8] sm:$0xff]  ;;  %v7537_v35 = vpop.f32.mrf.mxu1  ;;  %v7991_v49 = vpop.f32.mrf.mxu0 }
 0x3f6   : > { %7331 = vst.msk [vmem:[#allocation4 + $0xd0] sm:$0xff] %vm171_vm1, %v7299_v39  ;;  %v7302_v14 = vadd.f32 %v11087_v45, %v7270_v7  ;;  %7761 = vst.msk [vmem:[#allocation4 + $0x8] sm:$0xff] %vm171_vm1, %v7729_v51  ;;  %v7728_v62 = vadd.f32 %v7696_v48, %v7537_v35  ;;  %v7706_v39 = vld [vmem:[#allocation4 + $0x50] sm:$0xff] }
 0x3f7   : > { %v7269_v11 = vld [vmem:[#allocation4 + $0xe0] sm:$0xff]  ;;  %v11098_v50 = vpop.f32.mrf.mxu1  ;;  %v11148_v2 = vpop.f32.mrf.mxu0 }
 0x3f8   : > { %7334 = vst.msk [vmem:[#allocation4 + $0xe8] sm:$0xff] %vm171_vm1, %v7302_v14  ;;  %v7301_v10 = vadd.f32 %v7269_v11, %v7222_v43  ;;  %7760 = vst.msk [vmem:[#allocation4] sm:$0xff] %vm171_vm1, %v7728_v62  ;;  %v7731_v46 = vadd.f32 %v11098_v50, %v7699_v63  ;;  %v7709_v14 = vld [vmem:[#allocation4 + $0x68] sm:$0xff] }
 0x3f9   : > { %v7272_v33 = vld [vmem:[#allocation4 + $0xf8] sm:$0xff]  ;;  %v7547_v38 = vpop.f32.mrf.mxu1  ;;  %v8001_v22 = vpop.f32.mrf.mxu0 }
 0x3fa   : > { %7333 = vst.msk [vmem:[#allocation4 + $0xe0] sm:$0xff] %vm171_vm1, %v7301_v10  ;;  %v7304_v53 = vadd.f32 %v11090_v41, %v7272_v33  ;;  %7763 = vst.msk [vmem:[#allocation4 + $0x18] sm:$0xff] %vm171_vm1, %v7731_v46  ;;  %v7730_v13 = vadd.f32 %v7698_v19, %v7547_v38  ;;  %v7708_v10 = vld [vmem:[#allocation4 + $0x60] sm:$0xff] }
 0x3fb   : > { %v7271_v31 = vld [vmem:[#allocation4 + $0xf0] sm:$0xff]  ;;  %v11101_v17 = vpop.f32.mrf.mxu1  ;;  %v11151_v40 = vpop.f32.mrf.mxu0 }
 0x3fc   : > { %7336 = vst.msk [vmem:[#allocation4 + $0xf8] sm:$0xff] %vm171_vm1, %v7304_v53  ;;  %v7303_v61 = vadd.f32 %v7271_v31, %v7232_v52  ;;  %7762 = vst.msk [vmem:[#allocation4 + $0x10] sm:$0xff] %vm171_vm1, %v7730_v13  ;;  %v7733_v57 = vadd.f32 %v11101_v17, %v7701_v30  ;;  %v7711_v53 = vld [vmem:[#allocation4 + $0x78] sm:$0xff] }
 0x3fd   : > { %v8151_v36 = vld [vmem:[#allocation4 + $0x8] sm:$0xff]  ;;  %v7557_v9 = vpop.f32.mrf.mxu1  ;;  %v8011_v20 = vpop.f32.mrf.mxu0 }
 0x3fe   : > { %7335 = vst.msk [vmem:[#allocation4 + $0xf0] sm:$0xff] %vm171_vm1, %v7303_v61  ;;  %v8183_v29 = vadd.f32 %v11145_v32, %v8151_v36  ;;  %7765 = vst.msk [vmem:[#allocation4 + $0x28] sm:$0xff] %vm171_vm1, %v7733_v57  ;;  %v7732_v3 = vadd.f32 %v7700_v42, %v7557_v9  ;;  %v7710_v61 = vld [vmem:[#allocation4 + $0x70] sm:$0xff] }
 0x3ff   : > { %v8150_v37 = vld [vmem:[#allocation4] sm:$0xff]  ;;  %v11104_v47 = vpop.f32.mrf.mxu1  ;;  %v11154_v24 = vpop.f32.mrf.mxu0 }
 0x400   : > { %8215 = vst.msk [vmem:[#allocation4 + $0x8] sm:$0xff] %vm171_vm1, %v8183_v29  ;;  %v8182_v6 = vadd.f32 %v8150_v37, %v7991_v49  ;;  %7764 = vst.msk [vmem:[#allocation4 + $0x20] sm:$0xff] %vm171_vm1, %v7732_v3  ;;  %v7735_v23 = vadd.f32 %v11104_v47, %v7703_v4  ;;  %v7713_v29 = vld [vmem:[#allocation4 + $0x88] sm:$0xff] }
 0x401   : > { %v8153_v60 = vld [vmem:[#allocation4 + $0x18] sm:$0xff]  ;;  %v7567_v45 = vpop.f32.mrf.mxu1  ;;  %v8021_v59 = vpop.f32.mrf.mxu0 }
 0x402   : > { %8214 = vst.msk [vmem:[#allocation4] sm:$0xff] %vm171_vm1, %v8182_v6  ;;  %v8185_v34 = vadd.f32 %v11148_v2, %v8153_v60  ;;  %7767 = vst.msk [vmem:[#allocation4 + $0x38] sm:$0xff] %vm171_vm1, %v7735_v23  ;;  %v7734_v28 = vadd.f32 %v7702_v5, %v7567_v45  ;;  %v7712_v6 = vld [vmem:[#allocation4 + $0x80] sm:$0xff] }
 0x403   : > { %v8152_v44 = vld [vmem:[#allocation4 + $0x10] sm:$0xff]  ;;  %v11107_v43 = vpop.f32.mrf.mxu1  ;;  %v11157_v55 = vpop.f32.mrf.mxu0 }
 0x404   : > { %8217 = vst.msk [vmem:[#allocation4 + $0x18] sm:$0xff] %vm171_vm1, %v8185_v34  ;;  %v8184_v0 = vadd.f32 %v8152_v44, %v8001_v22  ;;  %7766 = vst.msk [vmem:[#allocation4 + $0x30] sm:$0xff] %vm171_vm1, %v7734_v28  ;;  %v7737_v56 = vadd.f32 %v11107_v43, %v7705_v16  ;;  %v7715_v34 = vld [vmem:[#allocation4 + $0x98] sm:$0xff] }
 0x405   : > { %v8155_v12 = vld [vmem:[#allocation4 + $0x28] sm:$0xff]  ;;  %v7577_v41 = vpop.f32.mrf.mxu1  ;;  %v8031_v58 = vpop.f32.mrf.mxu0 }
 0x406   : > { %8216 = vst.msk [vmem:[#allocation4 + $0x10] sm:$0xff] %vm171_vm1, %v8184_v0  ;;  %v8187_v8 = vadd.f32 %v11151_v40, %v8155_v12  ;;  %7769 = vst.msk [vmem:[#allocation4 + $0x48] sm:$0xff] %vm171_vm1, %v7737_v56  ;;  %v7736_v15 = vadd.f32 %v7704_v27, %v7577_v41  ;;  %v7714_v0 = vld [vmem:[#allocation4 + $0x90] sm:$0xff] }
 0x407   : > { %v8154_v21 = vld [vmem:[#allocation4 + $0x20] sm:$0xff]  ;;  %v11110_v52 = vpop.f32.mrf.mxu1  ;;  %v11160_v54 = vpop.f32.mrf.mxu0 }
 0x408   : > { %8219 = vst.msk [vmem:[#allocation4 + $0x28] sm:$0xff] %vm171_vm1, %v8187_v8  ;;  %v8186_v1 = vadd.f32 %v8154_v21, %v8011_v20  ;;  %7768 = vst.msk [vmem:[#allocation4 + $0x40] sm:$0xff] %vm171_vm1, %v7736_v15  ;;  %v7739_v26 = vadd.f32 %v11110_v52, %v7707_v25  ;;  %v7717_v8 = vld [vmem:[#allocation4 + $0xa8] sm:$0xff] }
 0x409   : > { %v8157_v18 = vld [vmem:[#allocation4 + $0x38] sm:$0xff]  ;;  %v7587_v32 = vpop.f32.mrf.mxu1  ;;  %v8041_v51 = vpop.f32.mrf.mxu0 }
 0x40a   : > { %8218 = vst.msk [vmem:[#allocation4 + $0x20] sm:$0xff] %vm171_vm1, %v8186_v1  ;;  %v8189_v7 = vadd.f32 %v11154_v24, %v8157_v18  ;;  %7771 = vst.msk [vmem:[#allocation4 + $0x58] sm:$0xff] %vm171_vm1, %v7739_v26  ;;  %v7738_v35 = vadd.f32 %v7706_v39, %v7587_v32  ;;  %v7716_v1 = vld [vmem:[#allocation4 + $0xa0] sm:$0xff] }
 0x40b   : > { %v8156_v48 = vld [vmem:[#allocation4 + $0x30] sm:$0xff]  ;;  %v11113_v49 = vpop.f32.mrf.mxu1  ;;  %v11163_v62 = vpop.f32.mrf.mxu0 }
 0x40c   : > { %8221 = vst.msk [vmem:[#allocation4 + $0x38] sm:$0xff] %vm171_vm1, %v8189_v7  ;;  %v8188_v11 = vadd.f32 %v8156_v48, %v8021_v59  ;;  %7770 = vst.msk [vmem:[#allocation4 + $0x50] sm:$0xff] %vm171_vm1, %v7738_v35  ;;  %v7741_v50 = vadd.f32 %v11113_v49, %v7709_v14  ;;  %v7719_v7 = vld [vmem:[#allocation4 + $0xb8] sm:$0xff] }
 0x40d   : > { %v8159_v63 = vld [vmem:[#allocation4 + $0x48] sm:$0xff]  ;;  %v7597_v2 = vpop.f32.mrf.mxu1  ;;  %v8051_v46 = vpop.f32.mrf.mxu0 }
 0x40e   : > { %8220 = vst.msk [vmem:[#allocation4 + $0x30] sm:$0xff] %vm171_vm1, %v8188_v11  ;;  %v8191_v33 = vadd.f32 %v11157_v55, %v8159_v63  ;;  %7773 = vst.msk [vmem:[#allocation4 + $0x68] sm:$0xff] %vm171_vm1, %v7741_v50  ;;  %v7740_v38 = vadd.f32 %v7708_v10, %v7597_v2  ;;  %v7718_v11 = vld [vmem:[#allocation4 + $0xb0] sm:$0xff] }
 0x40f   : > { %v8158_v19 = vld [vmem:[#allocation4 + $0x40] sm:$0xff]  ;;  %v11116_v22 = vpop.f32.mrf.mxu1  ;;  %v11166_v13 = vpop.f32.mrf.mxu0 }
 0x410   : > { %8223 = vst.msk [vmem:[#allocation4 + $0x48] sm:$0xff] %vm171_vm1, %v8191_v33  ;;  %v8190_v31 = vadd.f32 %v8158_v19, %v8031_v58  ;;  %7772 = vst.msk [vmem:[#allocation4 + $0x60] sm:$0xff] %vm171_vm1, %v7740_v38  ;;  %v7743_v17 = vadd.f32 %v11116_v22, %v7711_v53  ;;  %v7721_v33 = vld [vmem:[#allocation4 + $0xc8] sm:$0xff] }
 0x411   : > { %v8161_v30 = vld [vmem:[#allocation4 + $0x58] sm:$0xff]  ;;  %v7607_v40 = vpop.f32.mrf.mxu1  ;;  %v8061_v57 = vpop.f32.mrf.mxu0 }
 0x412   : > { %8222 = vst.msk [vmem:[#allocation4 + $0x40] sm:$0xff] %vm171_vm1, %v8190_v31  ;;  %v8193_v36 = vadd.f32 %v11160_v54, %v8161_v30  ;;  %7775 = vst.msk [vmem:[#allocation4 + $0x78] sm:$0xff] %vm171_vm1, %v7743_v17  ;;  %v7742_v9 = vadd.f32 %v7710_v61, %v7607_v40  ;;  %v7720_v31 = vld [vmem:[#allocation4 + $0xc0] sm:$0xff] }
 0x413   : > { %v8160_v42 = vld [vmem:[#allocation4 + $0x50] sm:$0xff]  ;;  %v11119_v20 = vpop.f32.mrf.mxu1  ;;  %v11169_v3 = vpop.f32.mrf.mxu0 }
 0x414   : > { %8225 = vst.msk [vmem:[#allocation4 + $0x58] sm:$0xff] %vm171_vm1, %v8193_v36  ;;  %v8192_v37 = vadd.f32 %v8160_v42, %v8041_v51  ;;  %7774 = vst.msk [vmem:[#allocation4 + $0x70] sm:$0xff] %vm171_vm1, %v7742_v9  ;;  %v7745_v47 = vadd.f32 %v11119_v20, %v7713_v29  ;;  %v7723_v36 = vld [vmem:[#allocation4 + $0xd8] sm:$0xff] }
 0x415   : > { %v8163_v4 = vld [vmem:[#allocation4 + $0x68] sm:$0xff]  ;;  %v7617_v24 = vpop.f32.mrf.mxu1  ;;  %v8071_v23 = vpop.f32.mrf.mxu0 }
 0x416   : > { %8224 = vst.msk [vmem:[#allocation4 + $0x50] sm:$0xff] %vm171_vm1, %v8192_v37  ;;  %v8195_v60 = vadd.f32 %v11163_v62, %v8163_v4  ;;  %7777 = vst.msk [vmem:[#allocation4 + $0x88] sm:$0xff] %vm171_vm1, %v7745_v47  ;;  %v7744_v45 = vadd.f32 %v7712_v6, %v7617_v24  ;;  %v7722_v37 = vld [vmem:[#allocation4 + $0xd0] sm:$0xff] }
 0x417   : > { %v8162_v5 = vld [vmem:[#allocation4 + $0x60] sm:$0xff]  ;;  %v11122_v59 = vpop.f32.mrf.mxu1  ;;  %v11172_v28 = vpop.f32.mrf.mxu0 }
 0x418   : > { %8227 = vst.msk [vmem:[#allocation4 + $0x68] sm:$0xff] %vm171_vm1, %v8195_v60  ;;  %v8194_v44 = vadd.f32 %v8162_v5, %v8051_v46  ;;  %7776 = vst.msk [vmem:[#allocation4 + $0x80] sm:$0xff] %vm171_vm1, %v7744_v45  ;;  %v7747_v43 = vadd.f32 %v11122_v59, %v7715_v34  ;;  %v7725_v60 = vld [vmem:[#allocation4 + $0xe8] sm:$0xff] }
 0x419   : > { %v8165_v16 = vld [vmem:[#allocation4 + $0x78] sm:$0xff]  ;;  %v7627_v55 = vpop.f32.mrf.mxu1  ;;  %v8081_v56 = vpop.f32.mrf.mxu0 }
 0x41a   : > { %8226 = vst.msk [vmem:[#allocation4 + $0x60] sm:$0xff] %vm171_vm1, %v8194_v44  ;;  %v8197_v12 = vadd.f32 %v11166_v13, %v8165_v16  ;;  %7779 = vst.msk [vmem:[#allocation4 + $0x98] sm:$0xff] %vm171_vm1, %v7747_v43  ;;  %v7746_v41 = vadd.f32 %v7714_v0, %v7627_v55 }
 0x41b   : > { %v8164_v27 = vld [vmem:[#allocation4 + $0x70] sm:$0xff]  ;;  %v11125_v58 = vpop.f32.mrf.mxu1  ;;  %v11175_v15 = vpop.f32.mrf.mxu0 }
 0x41c   : > { %8229 = vst.msk [vmem:[#allocation4 + $0x78] sm:$0xff] %vm171_vm1, %v8197_v12  ;;  %v8196_v21 = vadd.f32 %v8164_v27, %v8061_v57  ;;  %7778 = vst.msk [vmem:[#allocation4 + $0x90] sm:$0xff] %vm171_vm1, %v7746_v41  ;;  %v7749_v52 = vadd.f32 %v11125_v58, %v7717_v8  ;;  %v7726_v8 = vld [vmem:[#allocation4 + $0xf0] sm:$0xff] }
 0x41d   : > { %v8167_v25 = vld [vmem:[#allocation4 + $0x88] sm:$0xff]  ;;  %v7637_v54 = vpop.f32.mrf.mxu1  ;;  %v8091_v26 = vpop.f32.mrf.mxu0 }
 0x41e   : > { %8228 = vst.msk [vmem:[#allocation4 + $0x70] sm:$0xff] %vm171_vm1, %v8196_v21  ;;  %v8199_v18 = vadd.f32 %v11169_v3, %v8167_v25  ;;  %7781 = vst.msk [vmem:[#allocation4 + $0xa8] sm:$0xff] %vm171_vm1, %v7749_v52  ;;  %v7748_v32 = vadd.f32 %v7716_v1, %v7637_v54  ;;  %v8605_v1 = vld [vmem:[#allocation4 + $0x8] sm:$0xff] }
 0x41f   : > { %v8166_v39 = vld [vmem:[#allocation4 + $0x80] sm:$0xff]  ;;  %v11128_v51 = vpop.f32.mrf.mxu1  ;;  %v11178_v35 = vpop.f32.mrf.mxu0 }
 0x420   : > { %8231 = vst.msk [vmem:[#allocation4 + $0x88] sm:$0xff] %vm171_vm1, %v8199_v18  ;;  %v8198_v48 = vadd.f32 %v8166_v39, %v8071_v23  ;;  %7780 = vst.msk [vmem:[#allocation4 + $0xa0] sm:$0xff] %vm171_vm1, %v7748_v32  ;;  %v7751_v49 = vadd.f32 %v11128_v51, %v7719_v7  ;;  %v8604_v51 = vld [vmem:[#allocation4] sm:$0xff] }
 0x421   : > { %v8169_v14 = vld [vmem:[#allocation4 + $0x98] sm:$0xff]  ;;  %v7647_v62 = vpop.f32.mrf.mxu1  ;;  %v8101_v50 = vpop.f32.mrf.mxu0 }
 0x422   : > { %8230 = vst.msk [vmem:[#allocation4 + $0x80] sm:$0xff] %vm171_vm1, %v8198_v48  ;;  %v8201_v63 = vadd.f32 %v11172_v28, %v8169_v14  ;;  %7783 = vst.msk [vmem:[#allocation4 + $0xb8] sm:$0xff] %vm171_vm1, %v7751_v49  ;;  %v7750_v2 = vadd.f32 %v7718_v11, %v7647_v62  ;;  %v7724_v28 = vld [vmem:[#allocation4 + $0xe0] sm:$0xff]  ;;  %v8607_v62 = vld [vmem:[#allocation4 + $0x18] sm:$0xff] }
 0x423   : > { %v8168_v10 = vld [vmem:[#allocation4 + $0x90] sm:$0xff]  ;;  %v11131_v46 = vpop.f32.mrf.mxu1  ;;  %v11181_v38 = vpop.f32.mrf.mxu0 }
 0x424   : > { %8233 = vst.msk [vmem:[#allocation4 + $0x98] sm:$0xff] %vm171_vm1, %v8201_v63  ;;  %v8200_v19 = vadd.f32 %v8168_v10, %v8081_v56  ;;  %7782 = vst.msk [vmem:[#allocation4 + $0xb0] sm:$0xff] %vm171_vm1, %v7750_v2  ;;  %v7753_v22 = vadd.f32 %v11131_v46, %v7721_v33  ;;  %v7727_v56 = vld [vmem:[#allocation4 + $0xf8] sm:$0xff]  ;;  %v8606_v10 = vld [vmem:[#allocation4 + $0x10] sm:$0xff] }
 0x425   : > { %v8171_v53 = vld [vmem:[#allocation4 + $0xa8] sm:$0xff]  ;;  %v7657_v13 = vpop.f32.mrf.mxu1  ;;  %v8111_v17 = vpop.f32.mrf.mxu0 }
 0x426   : > { %8232 = vst.msk [vmem:[#allocation4 + $0x90] sm:$0xff] %vm171_vm1, %v8200_v19  ;;  %v8203_v30 = vadd.f32 %v11175_v15, %v8171_v53  ;;  %7785 = vst.msk [vmem:[#allocation4 + $0xc8] sm:$0xff] %vm171_vm1, %v7753_v22  ;;  %v7752_v40 = vadd.f32 %v7720_v31, %v7657_v13  ;;  %v8609_v53 = vld [vmem:[#allocation4 + $0x28] sm:$0xff] }
 0x427   : > { %v8170_v61 = vld [vmem:[#allocation4 + $0xa0] sm:$0xff]  ;;  %v11134_v57 = vpop.f32.mrf.mxu1  ;;  %v11184_v9 = vpop.f32.mrf.mxu0 }
 0x428   : > { %8235 = vst.msk [vmem:[#allocation4 + $0xa8] sm:$0xff] %vm171_vm1, %v8203_v30  ;;  %v8202_v42 = vadd.f32 %v8170_v61, %v8091_v26  ;;  %7784 = vst.msk [vmem:[#allocation4 + $0xc0] sm:$0xff] %vm171_vm1, %v7752_v40  ;;  %v7755_v20 = vadd.f32 %v11134_v57, %v7723_v36  ;;  %v8608_v40 = vld [vmem:[#allocation4 + $0x20] sm:$0xff] }
 0x429   : > { %v8173_v29 = vld [vmem:[#allocation4 + $0xb8] sm:$0xff]  ;;  %v7667_v3 = vpop.f32.mrf.mxu1  ;;  %v8121_v6 = vpop.f32.mrf.mxu0 }
 0x42a   : > { %8234 = vst.msk [vmem:[#allocation4 + $0xa0] sm:$0xff] %vm171_vm1, %v8202_v42  ;;  %v8205_v47 = vadd.f32 %v11178_v35, %v8173_v29  ;;  %7787 = vst.msk [vmem:[#allocation4 + $0xd8] sm:$0xff] %vm171_vm1, %v7755_v20  ;;  %v7754_v4 = vadd.f32 %v7722_v37, %v7667_v3 }
 0x42b   : > { %v8172_v24 = vld [vmem:[#allocation4 + $0xb0] sm:$0xff]  ;;  %v11137_v23 = vpop.f32.mrf.mxu1  ;;  %v11187_v55 = vpop.f32.mrf.mxu0 }
 0x42c   : > { %8237 = vst.msk [vmem:[#allocation4 + $0xb8] sm:$0xff] %vm171_vm1, %v8205_v47  ;;  %v8204_v45 = vadd.f32 %v8172_v24, %v8101_v50  ;;  %7786 = vst.msk [vmem:[#allocation4 + $0xd0] sm:$0xff] %vm171_vm1, %v7754_v4  ;;  %v7757_v5 = vadd.f32 %v11137_v23, %v7725_v60  ;;  %v8610_v4 = vld [vmem:[#allocation4 + $0x30] sm:$0xff] }
 0x42d   : > { %v8175_v59 = vld [vmem:[#allocation4 + $0xc8] sm:$0xff]  ;;  %v7677_v34 = vpop.f32.mrf.mxu1  ;;  %v8131_v25 = vpop.f32.mrf.mxu0 }
 0x42e   : > { %8236 = vst.msk [vmem:[#allocation4 + $0xb0] sm:$0xff] %vm171_vm1, %v8204_v45  ;;  %v8207_v44 = vadd.f32 %v11181_v38, %v8175_v59  ;;  %7789 = vst.msk [vmem:[#allocation4 + $0xe8] sm:$0xff] %vm171_vm1, %v7757_v5  ;;  %v7756_v43 = vadd.f32 %v7724_v28, %v7677_v34  ;;  %v8613_v34 = vld [vmem:[#allocation4 + $0x48] sm:$0xff] }
 0x42f   : > { %v8174_v16 = vld [vmem:[#allocation4 + $0xc0] sm:$0xff]  ;;  %v11140_v0 = vpop.f32.mrf.mxu1  ;;  %v11190_v7 = vpop.f32.mrf.mxu0 }
 0x430   : > { %8239 = vst.msk [vmem:[#allocation4 + $0xc8] sm:$0xff] %vm171_vm1, %v8207_v44  ;;  %v8206_v12 = vadd.f32 %v8174_v16, %v8111_v17  ;;  %7788 = vst.msk [vmem:[#allocation4 + $0xe0] sm:$0xff] %vm171_vm1, %v7756_v43  ;;  %v7759_v41 = vadd.f32 %v11140_v0, %v7727_v56 }
 0x431   : > { %v8177_v27 = vld [vmem:[#allocation4 + $0xd8] sm:$0xff]  ;;  %v7687_v58 = vpop.f32.mrf.mxu1  ;;  %v8141_v46 = vpop.f32.mrf.mxu0 }
 0x432   : > { %8238 = vst.msk [vmem:[#allocation4 + $0xc0] sm:$0xff] %vm171_vm1, %v8206_v12  ;;  %v8209_v15 = vadd.f32 %v11184_v9, %v8177_v27  ;;  %7791 = vst.msk [vmem:[#allocation4 + $0xf8] sm:$0xff] %vm171_vm1, %v7759_v41  ;;  %v7758_v21 = vadd.f32 %v7726_v8, %v7687_v58  ;;  %v8611_v9 = vld [vmem:[#allocation4 + $0x38] sm:$0xff]  ;;  %v8612_v41 = vld [vmem:[#allocation4 + $0x40] sm:$0xff] }
 0x433   : > { %v8176_v52 = vld [vmem:[#allocation4 + $0xd0] sm:$0xff]  ;;  %v11195_v54 = vpop.f32.mrf.mxu1 }
 0x434   : > { %8241 = vst.msk [vmem:[#allocation4 + $0xd8] sm:$0xff] %vm171_vm1, %v8209_v15  ;;  %v8208_v26 = vadd.f32 %v8176_v52, %v8121_v6  ;;  %7790 = vst.msk [vmem:[#allocation4 + $0xf0] sm:$0xff] %vm171_vm1, %v7758_v21  ;;  %v8637_v18 = vadd.f32 %v11195_v54, %v8605_v1  ;;  %v8615_v1 = vld [vmem:[#allocation4 + $0x58] sm:$0xff] }
 0x435   : > { %v8179_v32 = vld [vmem:[#allocation4 + $0xe8] sm:$0xff]  ;;  %v8445_v39 = vpop.f32.mrf.mxu1 }
 0x436   : > { %8240 = vst.msk [vmem:[#allocation4 + $0xd0] sm:$0xff] %vm171_vm1, %v8208_v26  ;;  %v8211_v35 = vadd.f32 %v11187_v55, %v8179_v32  ;;  %8669 = vst.msk [vmem:[#allocation4 + $0x8] sm:$0xff] %vm171_vm1, %v8637_v18  ;;  %v8636_v48 = vadd.f32 %v8604_v51, %v8445_v39 }
 0x437   : > { %v8178_v49 = vld [vmem:[#allocation4 + $0xe0] sm:$0xff]  ;;  %v11198_v14 = vpop.f32.mrf.mxu1 }
 0x438   : > { %8243 = vst.msk [vmem:[#allocation4 + $0xe8] sm:$0xff] %vm171_vm1, %v8211_v35  ;;  %v8210_v11 = vadd.f32 %v8178_v49, %v8131_v25  ;;  %8668 = vst.msk [vmem:[#allocation4] sm:$0xff] %vm171_vm1, %v8636_v48  ;;  %v8639_v50 = vadd.f32 %v11198_v14, %v8607_v62  ;;  %v8614_v49 = vld [vmem:[#allocation4 + $0x50] sm:$0xff] }
 0x439   : > { %v8181_v63 = vld [vmem:[#allocation4 + $0xf8] sm:$0xff]  ;;  %v8455_v2 = vpop.f32.mrf.mxu1 }
 0x43a   : > { %8242 = vst.msk [vmem:[#allocation4 + $0xe0] sm:$0xff] %vm171_vm1, %v8210_v11  ;;  %8671 = vst.msk [vmem:[#allocation4 + $0x18] sm:$0xff] %vm171_vm1, %v8639_v50  ;;  %v8213_v33 = vadd.f32 %v11190_v7, %v8181_v63  ;;  %v8638_v38 = vadd.f32 %v8606_v10, %v8455_v2 }
 0x43b   : > { %v8180_v19 = vld [vmem:[#allocation4 + $0xf0] sm:$0xff]  ;;  %v11201_v22 = vpop.f32.mrf.mxu1 }
 0x43c   : > { %8245 = vst.msk [vmem:[#allocation4 + $0xf8] sm:$0xff] %vm171_vm1, %v8213_v33  ;;  %8670 = vst.msk [vmem:[#allocation4 + $0x10] sm:$0xff] %vm171_vm1, %v8638_v38  ;;  %v8212_v13 = vadd.f32 %v8180_v19, %v8141_v46  ;;  %v8641_v31 = vadd.f32 %v11201_v22, %v8609_v53  ;;  %v8617_v33 = vld [vmem:[#allocation4 + $0x68] sm:$0xff] }
 0x43d   : > { %v14009_v17 = vld [vmem:[#allocation4 + $0x8] sm:$0xff]  ;;  %v8465_v30 = vpop.f32.mrf.mxu1 }
 0x43e   : > { %8244 = vst.msk [vmem:[#allocation4 + $0xf0] sm:$0xff] %vm171_vm1, %v8212_v13  ;;  %8673 = vst.msk [vmem:[#allocation4 + $0x28] sm:$0xff] %vm171_vm1, %v8641_v31  ;;  %v8640_v61 = vadd.f32 %v8608_v40, %v8465_v30  ;;  %v8802_v42 = vmul.f32 %v14009_v17, %v14009_v17  ;;  %v8733_v24 = vsel %vm171_vm1, %v14009_v17, 0.0 }
 0x43f   : > { %v14013_v57 = vld [vmem:[#allocation4] sm:$0xff]  ;;  %v11204_v36 = vpop.f32.mrf.mxu1 }
 0x440   : > { %v8732_v20 = vsel %vm171_vm1, %v14013_v57, 0.0  ;;  %v8801_v29 = vmul.f32 %v14013_v57, %v14013_v57  ;;  %8672 = vst.msk [vmem:[#allocation4 + $0x20] sm:$0xff] %vm171_vm1, %v8640_v61  ;;  %v8643_v3 = vadd.f32 %v11204_v36, %v8611_v9  ;;  %v8834_v28 = vsel %vm171_vm1, %v8802_v42, 0.0  ;;  %v8616_v61 = vld [vmem:[#allocation4 + $0x60] sm:$0xff] }
 0x441   : > { %v14022_v37 = vld [vmem:[#allocation4 + $0x18] sm:$0xff]  ;;  %v8475_v47 = vpop.f32.mrf.mxu1  ;;  %v8734_v60 = vadd.f32 %v8733_v24, %v8732_v20 }
 0x442   : > { %v8833_v6 = vsel %vm171_vm1, %v8801_v29, 0.0  ;;  %8675 = vst.msk [vmem:[#allocation4 + $0x38] sm:$0xff] %vm171_vm1, %v8643_v3  ;;  %v8642_v23 = vadd.f32 %v8610_v4, %v8475_v47  ;;  %v8804_v45 = vmul.f32 %v14022_v37, %v14022_v37  ;;  %v8737_v27 = vsel %vm171_vm1, %v14022_v37, 0.0  ;;  %v8619_v24 = vld [vmem:[#allocation4 + $0x78] sm:$0xff] }
 0x443   : > { %v14030_v5 = vld [vmem:[#allocation4 + $0x10] sm:$0xff]  ;;  %v11207_v59 = vpop.f32.mrf.mxu1  ;;  %v8835_v55 = vadd.f32 %v8834_v28, %v8833_v6 }
 0x444   : > { %v8735_v44 = vsel %vm171_vm1, %v14030_v5, 0.0  ;;  %v8803_v43 = vmul.f32 %v14030_v5, %v14030_v5  ;;  %8674 = vst.msk [vmem:[#allocation4 + $0x30] sm:$0xff] %vm171_vm1, %v8642_v23  ;;  %v8645_v16 = vadd.f32 %v11207_v59, %v8613_v34  ;;  %v8838_v15 = vsel %vm171_vm1, %v8804_v45, 0.0 }
 0x445   : > { %v8736_v0 = vadd.f32 %v8735_v44, %v8734_v60  ;;  %v14038_v56 = vld [vmem:[#allocation4 + $0x28] sm:$0xff]  ;;  %v8485_v12 = vpop.f32.mrf.mxu1 }
 0x446   : > { %v8836_v58 = vsel %vm171_vm1, %v8803_v43, 0.0  ;;  %8677 = vst.msk [vmem:[#allocation4 + $0x48] sm:$0xff] %vm171_vm1, %v8645_v16  ;;  %v8644_v8 = vadd.f32 %v8612_v41, %v8485_v12  ;;  %v8806_v26 = vmul.f32 %v14038_v56, %v14038_v56  ;;  %v8741_v14 = vsel %vm171_vm1, %v14038_v56, 0.0  ;;  %v8618_v43 = vld [vmem:[#allocation4 + $0x70] sm:$0xff] }
 0x447   : > { %v8837_v21 = vadd.f32 %v8836_v58, %v8835_v55  ;;  %v14045_v52 = vld [vmem:[#allocation4 + $0x20] sm:$0xff]  ;;  %v8738_v25 = vadd.f32 %v8737_v27, %v8736_v0  ;;  %v11210_v54 = vpop.f32.mrf.mxu1 }
 0x448   : > { %v8739_v18 = vsel %vm171_vm1, %v14045_v52, 0.0  ;;  %v8805_v32 = vmul.f32 %v14045_v52, %v14045_v52  ;;  %8676 = vst.msk [vmem:[#allocation4 + $0x40] sm:$0xff] %vm171_vm1, %v8644_v8  ;;  %v8647_v39 = vadd.f32 %v11210_v54, %v8615_v1  ;;  %v8842_v38 = vsel %vm171_vm1, %v8806_v26, 0.0 }
 0x449   : > { %v8740_v51 = vadd.f32 %v8739_v18, %v8738_v25  ;;  %v8839_v7 = vadd.f32 %v8838_v15, %v8837_v21  ;;  %v14054_v35 = vld [vmem:[#allocation4 + $0x38] sm:$0xff]  ;;  %v8495_v48 = vpop.f32.mrf.mxu1  ;;  %v8621_v15 = vld [vmem:[#allocation4 + $0x88] sm:$0xff] }
 0x44a   : > { %v8840_v62 = vsel %vm171_vm1, %v8805_v32, 0.0  ;;  %8679 = vst.msk [vmem:[#allocation4 + $0x58] sm:$0xff] %vm171_vm1, %v8647_v39  ;;  %v8646_v11 = vadd.f32 %v8614_v49, %v8495_v48  ;;  %v8808_v63 = vmul.f32 %v14054_v35, %v14054_v35  ;;  %v8745_v36 = vsel %vm171_vm1, %v14054_v35, 0.0 }
 0x44b   : > { %v8841_v50 = vadd.f32 %v8840_v62, %v8839_v7  ;;  %v14062_v2 = vld [vmem:[#allocation4 + $0x30] sm:$0xff]  ;;  %v8742_v10 = vadd.f32 %v8741_v14, %v8740_v51  ;;  %v11213_v46 = vpop.f32.mrf.mxu1  ;;  %v8620_v51 = vld [vmem:[#allocation4 + $0x80] sm:$0xff] }
 0x44c   : > { %v8743_v19 = vsel %vm171_vm1, %v14062_v2, 0.0  ;;  %v8807_v22 = vmul.f32 %v14062_v2, %v14062_v2  ;;  %8678 = vst.msk [vmem:[#allocation4 + $0x50] sm:$0xff] %vm171_vm1, %v8646_v11  ;;  %v8649_v53 = vadd.f32 %v11213_v46, %v8617_v33  ;;  %v8846_v20 = vsel %vm171_vm1, %v8808_v63, 0.0 }
 0x44d   : > { %v8744_v13 = vadd.f32 %v8743_v19, %v8742_v10  ;;  %v8843_v31 = vadd.f32 %v8842_v38, %v8841_v50  ;;  %v14070_v30 = vld [vmem:[#allocation4 + $0x48] sm:$0xff]  ;;  %v8505_v40 = vpop.f32.mrf.mxu1  ;;  %v8623_v10 = vld [vmem:[#allocation4 + $0x98] sm:$0xff] }
 0x44e   : > { %v8844_v9 = vsel %vm171_vm1, %v8807_v22, 0.0  ;;  %8681 = vst.msk [vmem:[#allocation4 + $0x68] sm:$0xff] %vm171_vm1, %v8649_v53  ;;  %v8648_v42 = vadd.f32 %v8616_v61, %v8505_v40  ;;  %v8810_v6 = vmul.f32 %v14070_v30, %v14070_v30  ;;  %v8749_v16 = vsel %vm171_vm1, %v14070_v30, 0.0  ;;  %v8622_v40 = vld [vmem:[#allocation4 + $0x90] sm:$0xff] }
 0x44f   : > { %v8845_v29 = vadd.f32 %v8844_v9, %v8843_v31  ;;  %v14077_v3 = vld [vmem:[#allocation4 + $0x40] sm:$0xff]  ;;  %v8746_v47 = vadd.f32 %v8745_v36, %v8744_v13  ;;  %v11216_v4 = vpop.f32.mrf.mxu1 }
 0x450   : > { %v8747_v23 = vsel %vm171_vm1, %v14077_v3, 0.0  ;;  %v8809_v60 = vmul.f32 %v14077_v3, %v14077_v3  ;;  %8680 = vst.msk [vmem:[#allocation4 + $0x60] sm:$0xff] %vm171_vm1, %v8648_v42  ;;  %v8651_v45 = vadd.f32 %v11216_v4, %v8619_v24  ;;  %v8850_v21 = vsel %vm171_vm1, %v8810_v6, 0.0  ;;  %v8625_v24 = vld [vmem:[#allocation4 + $0xa8] sm:$0xff] }
 0x451   : > { %v8748_v59 = vadd.f32 %v8747_v23, %v8746_v47  ;;  %v8847_v34 = vadd.f32 %v8846_v20, %v8845_v29  ;;  %v14086_v28 = vld [vmem:[#allocation4 + $0x58] sm:$0xff]  ;;  %v8515_v44 = vpop.f32.mrf.mxu1 }
 0x452   : > { %v8848_v55 = vsel %vm171_vm1, %v8809_v60, 0.0  ;;  %8683 = vst.msk [vmem:[#allocation4 + $0x78] sm:$0xff] %vm171_vm1, %v8651_v45  ;;  %v8650_v0 = vadd.f32 %v8618_v43, %v8515_v44  ;;  %v8812_v41 = vmul.f32 %v14086_v28, %v14086_v28  ;;  %v8753_v7 = vsel %vm171_vm1, %v14086_v28, 0.0 }
 0x453   : > { %v8849_v12 = vadd.f32 %v8848_v55, %v8847_v34  ;;  %v14094_v27 = vld [vmem:[#allocation4 + $0x50] sm:$0xff]  ;;  %v8750_v58 = vadd.f32 %v8749_v16, %v8748_v59  ;;  %v11219_v8 = vpop.f32.mrf.mxu1  ;;  %v8624_v16 = vld [vmem:[#allocation4 + $0xa0] sm:$0xff] }
 0x454   : > { %v8751_v25 = vsel %vm171_vm1, %v14094_v27, 0.0  ;;  %v8811_v54 = vmul.f32 %v14094_v27, %v14094_v27  ;;  %8682 = vst.msk [vmem:[#allocation4 + $0x70] sm:$0xff] %vm171_vm1, %v8650_v0  ;;  %v8653_v1 = vadd.f32 %v11219_v8, %v8621_v15  ;;  %v8854_v14 = vsel %vm171_vm1, %v8812_v41, 0.0 }
 0x455   : > { %v8752_v26 = vadd.f32 %v8751_v25, %v8750_v58  ;;  %v8851_v18 = vadd.f32 %v8850_v21, %v8849_v12  ;;  %v14102_v32 = vld [vmem:[#allocation4 + $0x68] sm:$0xff]  ;;  %v8525_v39 = vpop.f32.mrf.mxu1  ;;  %v8627_v25 = vld [vmem:[#allocation4 + $0xb8] sm:$0xff] }
 0x456   : > { %v8852_v48 = vsel %vm171_vm1, %v8811_v54, 0.0  ;;  %8685 = vst.msk [vmem:[#allocation4 + $0x88] sm:$0xff] %vm171_vm1, %v8653_v1  ;;  %v8652_v49 = vadd.f32 %v8620_v51, %v8525_v39  ;;  %v8814_v46 = vmul.f32 %v14102_v32, %v14102_v32  ;;  %v8757_v61 = vsel %vm171_vm1, %v14102_v32, 0.0 }
 0x457   : > { %v8853_v62 = vadd.f32 %v8852_v48, %v8851_v18  ;;  %v14109_v11 = vld [vmem:[#allocation4 + $0x60] sm:$0xff]  ;;  %v8754_v50 = vadd.f32 %v8753_v7, %v8752_v26  ;;  %v11222_v63 = vpop.f32.mrf.mxu1 }
 0x458   : > { %v8755_v33 = vsel %vm171_vm1, %v14109_v11, 0.0  ;;  %v8813_v38 = vmul.f32 %v14109_v11, %v14109_v11  ;;  %8684 = vst.msk [vmem:[#allocation4 + $0x80] sm:$0xff] %vm171_vm1, %v8652_v49  ;;  %v8655_v19 = vadd.f32 %v11222_v63, %v8623_v10  ;;  %v8858_v6 = vsel %vm171_vm1, %v8814_v46, 0.0  ;;  %v8626_v49 = vld [vmem:[#allocation4 + $0xb0] sm:$0xff] }
 0x459   : > { %v8756_v22 = vadd.f32 %v8755_v33, %v8754_v50  ;;  %v8855_v53 = vadd.f32 %v8854_v14, %v8853_v62  ;;  %v14118_v13 = vld [vmem:[#allocation4 + $0x78] sm:$0xff]  ;;  %v8535_v31 = vpop.f32.mrf.mxu1 }
 0x45a   : > { %v8856_v36 = vsel %vm171_vm1, %v8813_v38, 0.0  ;;  %8687 = vst.msk [vmem:[#allocation4 + $0x98] sm:$0xff] %vm171_vm1, %v8655_v19  ;;  %v8654_v9 = vadd.f32 %v8622_v40, %v8535_v31  ;;  %v8816_v20 = vmul.f32 %v14118_v13, %v14118_v13  ;;  %v8761_v55 = vsel %vm171_vm1, %v14118_v13, 0.0  ;;  %v8629_v19 = vld [vmem:[#allocation4 + $0xc8] sm:$0xff] }
 0x45b   : > { %v8857_v42 = vadd.f32 %v8856_v36, %v8855_v53  ;;  %v14126_v29 = vld [vmem:[#allocation4 + $0x70] sm:$0xff]  ;;  %v8758_v47 = vadd.f32 %v8757_v61, %v8756_v22  ;;  %v11225_v4 = vpop.f32.mrf.mxu1 }
 0x45c   : > { %v8759_v23 = vsel %vm171_vm1, %v14126_v29, 0.0  ;;  %v8815_v60 = vmul.f32 %v14126_v29, %v14126_v29  ;;  %8686 = vst.msk [vmem:[#allocation4 + $0x90] sm:$0xff] %vm171_vm1, %v8654_v9  ;;  %v8657_v45 = vadd.f32 %v11225_v4, %v8625_v24  ;;  %v8862_v41 = vsel %vm171_vm1, %v8816_v20, 0.0  ;;  %v8628_v20 = vld [vmem:[#allocation4 + $0xc0] sm:$0xff] }
 0x45d   : > { %v8760_v59 = vadd.f32 %v8759_v23, %v8758_v47  ;;  %v8859_v34 = vadd.f32 %v8858_v6, %v8857_v42  ;;  %v14134_v44 = vld [vmem:[#allocation4 + $0x88] sm:$0xff]  ;;  %v8545_v43 = vpop.f32.mrf.mxu1 }
 0x45e   : > { %v8860_v0 = vsel %vm171_vm1, %v8815_v60, 0.0  ;;  %8689 = vst.msk [vmem:[#allocation4 + $0xa8] sm:$0xff] %vm171_vm1, %v8657_v45  ;;  %v8656_v12 = vadd.f32 %v8624_v16, %v8545_v43  ;;  %v8818_v54 = vmul.f32 %v14134_v44, %v14134_v44  ;;  %v8765_v14 = vsel %vm171_vm1, %v14134_v44, 0.0 }
 0x45f   : > { %v8861_v58 = vadd.f32 %v8860_v0, %v8859_v34  ;;  %v14141_v8 = vld [vmem:[#allocation4 + $0x80] sm:$0xff]  ;;  %v8762_v15 = vadd.f32 %v8761_v55, %v8760_v59  ;;  %v11228_v21 = vpop.f32.mrf.mxu1  ;;  %v8631_v34 = vld [vmem:[#allocation4 + $0xd8] sm:$0xff] }
 0x460   : > { %v8763_v1 = vsel %vm171_vm1, %v14141_v8, 0.0  ;;  %v8817_v26 = vmul.f32 %v14141_v8, %v14141_v8  ;;  %8688 = vst.msk [vmem:[#allocation4 + $0xa0] sm:$0xff] %vm171_vm1, %v8656_v12  ;;  %v8659_v18 = vadd.f32 %v11228_v21, %v8627_v25  ;;  %v8866_v22 = vsel %vm171_vm1, %v8818_v54, 0.0  ;;  %v8630_v21 = vld [vmem:[#allocation4 + $0xd0] sm:$0xff] }
 0x461   : > { %v8764_v39 = vadd.f32 %v8763_v1, %v8762_v15  ;;  %v8863_v51 = vadd.f32 %v8862_v41, %v8861_v58  ;;  %v14150_v7 = vld [vmem:[#allocation4 + $0x98] sm:$0xff]  ;;  %v8555_v48 = vpop.f32.mrf.mxu1 }
 0x462   : > { %v8864_v62 = vsel %vm171_vm1, %v8817_v26, 0.0  ;;  %8691 = vst.msk [vmem:[#allocation4 + $0xb8] sm:$0xff] %vm171_vm1, %v8659_v18  ;;  %v8658_v50 = vadd.f32 %v8626_v49, %v8555_v48  ;;  %v8820_v10 = vmul.f32 %v14150_v7, %v14150_v7  ;;  %v8769_v47 = vsel %vm171_vm1, %v14150_v7, 0.0  ;;  %v8633_v49 = vld [vmem:[#allocation4 + $0xe8] sm:$0xff] }
 0x463   : > { %v8865_v63 = vadd.f32 %v8864_v62, %v8863_v51  ;;  %v14158_v46 = vld [vmem:[#allocation4 + $0x90] sm:$0xff]  ;;  %v8766_v33 = vadd.f32 %v8765_v14, %v8764_v39  ;;  %v11231_v38 = vpop.f32.mrf.mxu1 }
 0x464   : > { %v8767_v53 = vsel %vm171_vm1, %v14158_v46, 0.0  ;;  %v8819_v31 = vmul.f32 %v14158_v46, %v14158_v46  ;;  %8690 = vst.msk [vmem:[#allocation4 + $0xb0] sm:$0xff] %vm171_vm1, %v8658_v50  ;;  %v8661_v40 = vadd.f32 %v11231_v38, %v8629_v19  ;;  %v8870_v6 = vsel %vm171_vm1, %v8820_v10, 0.0 }
 0x465   : > { %v8768_v61 = vadd.f32 %v8767_v53, %v8766_v33  ;;  %v8867_v36 = vadd.f32 %v8866_v22, %v8865_v63  ;;  %v14166_v9 = vld [vmem:[#allocation4 + $0xa8] sm:$0xff]  ;;  %v8565_v42 = vpop.f32.mrf.mxu1  ;;  %v8632_v22 = vld [vmem:[#allocation4 + $0xe0] sm:$0xff] }
 0x466   : > { %v8868_v4 = vsel %vm171_vm1, %v8819_v31, 0.0  ;;  %8693 = vst.msk [vmem:[#allocation4 + $0xc8] sm:$0xff] %vm171_vm1, %v8661_v40  ;;  %v8660_v24 = vadd.f32 %v8628_v20, %v8565_v42  ;;  %v8822_v43 = vmul.f32 %v14166_v9, %v14166_v9  ;;  %v8773_v25 = vsel %vm171_vm1, %v14166_v9, 0.0 }
 0x467   : > { %v8869_v23 = vadd.f32 %v8868_v4, %v8867_v36  ;;  %v14173_v60 = vld [vmem:[#allocation4 + $0xa0] sm:$0xff]  ;;  %v8770_v45 = vadd.f32 %v8769_v47, %v8768_v61  ;;  %v11234_v59 = vpop.f32.mrf.mxu1  ;;  %v8635_v4 = vld [vmem:[#allocation4 + $0xf8] sm:$0xff] }
 0x468   : > { %v8771_v16 = vsel %vm171_vm1, %v14173_v60, 0.0  ;;  %v8821_v55 = vmul.f32 %v14173_v60, %v14173_v60  ;;  %8692 = vst.msk [vmem:[#allocation4 + $0xc0] sm:$0xff] %vm171_vm1, %v8660_v24  ;;  %v8663_v0 = vadd.f32 %v11234_v59, %v8631_v34  ;;  %v8874_v14 = vsel %vm171_vm1, %v8822_v43, 0.0 }
 0x469   : > { %v8772_v12 = vadd.f32 %v8771_v16, %v8770_v45  ;;  %v8871_v41 = vadd.f32 %v8870_v6, %v8869_v23  ;;  %v14182_v58 = vld [vmem:[#allocation4 + $0xb8] sm:$0xff]  ;;  %v8575_v15 = vpop.f32.mrf.mxu1 }
 0x46a   : > { %v8872_v54 = vsel %vm171_vm1, %v8821_v55, 0.0  ;;  %8695 = vst.msk [vmem:[#allocation4 + $0xd8] sm:$0xff] %vm171_vm1, %v8663_v0  ;;  %v8662_v1 = vadd.f32 %v8630_v21, %v8575_v15  ;;  %v8824_v18 = vmul.f32 %v14182_v58, %v14182_v58  ;;  %v8777_v53 = vsel %vm171_vm1, %v14182_v58, 0.0  ;;  %v8634_v55 = vld [vmem:[#allocation4 + $0xf0] sm:$0xff] }
 0x46b   : > { %v8873_v26 = vadd.f32 %v8872_v54, %v8871_v41  ;;  %v14190_v39 = vld [vmem:[#allocation4 + $0xb0] sm:$0xff]  ;;  %v8774_v51 = vadd.f32 %v8773_v25, %v8772_v12  ;;  %v11237_v48 = vpop.f32.mrf.mxu1 }
 0x46c   : > { %v8775_v62 = vsel %vm171_vm1, %v14190_v39, 0.0  ;;  %v8823_v50 = vmul.f32 %v14190_v39, %v14190_v39  ;;  %8694 = vst.msk [vmem:[#allocation4 + $0xd0] sm:$0xff] %vm171_vm1, %v8662_v1  ;;  %v8665_v63 = vadd.f32 %v11237_v48, %v8633_v49  ;;  %v8878_v61 = vsel %vm171_vm1, %v8824_v18, 0.0 }
 0x46d   : > { %v8776_v10 = vadd.f32 %v8775_v62, %v8774_v51  ;;  %v8875_v33 = vadd.f32 %v8874_v14, %v8873_v26  ;;  %v14198_v38 = vld [vmem:[#allocation4 + $0xc8] sm:$0xff]  ;;  %v8585_v19 = vpop.f32.mrf.mxu1 }
 0x46e   : > { %v8876_v31 = vsel %vm171_vm1, %v8823_v50, 0.0  ;;  %8697 = vst.msk [vmem:[#allocation4 + $0xe8] sm:$0xff] %vm171_vm1, %v8665_v63  ;;  %v8664_v40 = vadd.f32 %v8632_v22, %v8585_v19  ;;  %v8826_v24 = vmul.f32 %v14198_v38, %v14198_v38  ;;  %v8781_v0 = vsel %vm171_vm1, %v14198_v38, 0.0 }
 0x46f   : > { %v8877_v36 = vadd.f32 %v8876_v31, %v8875_v33  ;;  %v14205_v42 = vld [vmem:[#allocation4 + $0xc0] sm:$0xff]  ;;  %v8778_v20 = vadd.f32 %v8777_v53, %v8776_v10  ;;  %v11240_v47 = vpop.f32.mrf.mxu1 }
 0x470   : > { %v8779_v6 = vsel %vm171_vm1, %v14205_v42, 0.0  ;;  %v8825_v23 = vmul.f32 %v14205_v42, %v14205_v42  ;;  %8696 = vst.msk [vmem:[#allocation4 + $0xe0] sm:$0xff] %vm171_vm1, %v8664_v40  ;;  %v8667_v45 = vadd.f32 %v11240_v47, %v8635_v4  ;;  %v8882_v54 = vsel %vm171_vm1, %v8826_v24, 0.0 }
 0x471   : > { %v8780_v59 = vadd.f32 %v8779_v6, %v8778_v20  ;;  %v8879_v34 = vadd.f32 %v8878_v61, %v8877_v36  ;;  %v14214_v43 = vld [vmem:[#allocation4 + $0xd8] sm:$0xff]  ;;  %v8595_v16 = vpop.f32.mrf.mxu1 }
 0x472   : > { %v8880_v12 = vsel %vm171_vm1, %v8825_v23, 0.0  ;;  %8699 = vst.msk [vmem:[#allocation4 + $0xf8] sm:$0xff] %vm171_vm1, %v8667_v45  ;;  %v8666_v41 = vadd.f32 %v8634_v55, %v8595_v16  ;;  %v8828_v1 = vmul.f32 %v14214_v43, %v14214_v43  ;;  %v8785_v14 = vsel %vm171_vm1, %v14214_v43, 0.0 }
 0x473   : > { %v8881_v15 = vadd.f32 %v8880_v12, %v8879_v34  ;;  %v14220_v21 = vld [vmem:[#allocation4 + $0xd0] sm:$0xff]  ;;  %v8782_v25 = vadd.f32 %v8781_v0, %v8780_v59 }
 0x474   : > { %v8783_v26 = vsel %vm171_vm1, %v14220_v21, 0.0  ;;  %v8827_v18 = vmul.f32 %v14220_v21, %v14220_v21  ;;  %8698 = vst.msk [vmem:[#allocation4 + $0xf0] sm:$0xff] %vm171_vm1, %v8666_v41  ;;  %v8886_v33 = vsel %vm171_vm1, %v8828_v1, 0.0 }
 0x475   : > { %v8784_v51 = vadd.f32 %v8783_v26, %v8782_v25  ;;  %v8883_v48 = vadd.f32 %v8882_v54, %v8881_v15  ;;  %v14230_v49 = vld [vmem:[#allocation4 + $0xe8] sm:$0xff] }
 0x476   : > { %v8884_v62 = vsel %vm171_vm1, %v8827_v18, 0.0  ;;  %v8830_v19 = vmul.f32 %v14230_v49, %v14230_v49  ;;  %v8789_v36 = vsel %vm171_vm1, %v14230_v49, 0.0 }
 0x477   : > { %v8885_v50 = vadd.f32 %v8884_v62, %v8883_v48  ;;  %v14235_v63 = vld [vmem:[#allocation4 + $0xe0] sm:$0xff]  ;;  %v8786_v10 = vadd.f32 %v8785_v14, %v8784_v51 }
 0x478   : > { %v8787_v22 = vsel %vm171_vm1, %v14235_v63, 0.0  ;;  %v8829_v53 = vmul.f32 %v14235_v63, %v14235_v63  ;;  %v8890_v6 = vsel %vm171_vm1, %v8830_v19, 0.0 }
 0x479   : > { %v8788_v31 = vadd.f32 %v8787_v22, %v8786_v10  ;;  %v8887_v40 = vadd.f32 %v8886_v33, %v8885_v50  ;;  %v14244_v61 = vld [vmem:[#allocation4 + $0xf8] sm:$0xff] }
 0x47a   : > { %v8888_v20 = vsel %vm171_vm1, %v8829_v53, 0.0  ;;  %v8832_v23 = vmul.f32 %v14244_v61, %v14244_v61  ;;  %v8793_v55 = vsel %vm171_vm1, %v14244_v61, 0.0 }
 0x47b   : > { %v8889_v47 = vadd.f32 %v8888_v20, %v8887_v40  ;;  %v14249_v4 = vld [vmem:[#allocation4 + $0xf0] sm:$0xff]  ;;  %v8790_v24 = vadd.f32 %v8789_v36, %v8788_v31 }
 0x47c   : > { %v8791_v45 = vsel %vm171_vm1, %v14249_v4, 0.0  ;;  %v8831_v59 = vmul.f32 %v14249_v4, %v14249_v4  ;;  %v8894_v15 = vsel %vm171_vm1, %v8832_v23, 0.0 }
 0x47d   : > { %v8792_v34 = vadd.f32 %v8791_v45, %v8790_v24  ;;  %v8891_v16 = vadd.f32 %v8890_v6, %v8889_v47 }
 0x47e   : > { %v8892_v0 = vsel %vm171_vm1, %v8831_v59, 0.0 }
 0x47f   : > { %v8794_v12 = vadd.f32 %v8793_v55, %v8792_v34  ;;  %v8893_v41 = vadd.f32 %v8892_v0, %v8891_v16 }
 0x481   : > { %v8795_v25 = vrot.slane %v8794_v12, 4  ;;  %v8895_v54 = vadd.f32 %v8894_v15, %v8893_v41 }
 0x483   : > { %v8796_v1 = vadd.f32 %v8795_v25, %v8794_v12  ;;  %v8896_v26 = vrot.slane %v8895_v54, 4 }
 0x485   : > { %v8797_v18 = vrot.slane %v8796_v1, 2  ;;  %v8897_v51 = vadd.f32 %v8896_v26, %v8895_v54 }
 0x487   : > { %v8798_v48 = vadd.f32 %v8797_v18, %v8796_v1  ;;  %v8898_v14 = vrot.slane %v8897_v51, 2 }
 0x489   : > { %v8799_v62 = vrot.slane %v8798_v48, 1  ;;  %v8899_v50 = vadd.f32 %v8898_v14, %v8897_v51 }
 0x48b   : > { %v8800_v10 = vadd.f32 %v8799_v62, %v8798_v48  ;;  %v8900_v33 = vrot.slane %v8899_v50, 1 }
 0x48d   : > { %v8901_v19 = vadd.f32 %v8900_v33, %v8899_v50  ;;  %v14262_v22 = vmul.f32 0.00390625, %v8800_v10 }
 0x48f   : > { %v8903_v53 = vmul.f32 0.00390625, %v8901_v19  ;;  %v8904_v31 = vmul.f32 %v14262_v22, %v14262_v22  ;;  %v8907_v47 = vsub.f32 %v14013_v57, %v14262_v22  ;;  %v8908_v24 = vsub.f32 %v14009_v17, %v14262_v22 }
 0x490   : > { %v8909_v6 = vsub.f32 %v14030_v5, %v14262_v22  ;;  %v8910_v23 = vsub.f32 %v14022_v37, %v14262_v22  ;;  %v8911_v45 = vsub.f32 %v14045_v52, %v14262_v22  ;;  %v8912_v59 = vsub.f32 %v14038_v56, %v14262_v22 }
 0x491   : > { %v8905_v40 = vsub.f32 %v8903_v53, %v8904_v31  ;;  %v8913_v34 = vsub.f32 %v14062_v2, %v14262_v22  ;;  %v8914_v57 = vsub.f32 %v14054_v35, %v14262_v22  ;;  %v8915_v17 = vsub.f32 %v14077_v3, %v14262_v22 }
 0x492   : > { %v8916_v5 = vsub.f32 %v14070_v30, %v14262_v22  ;;  %v8917_v37 = vsub.f32 %v14094_v27, %v14262_v22  ;;  %v8918_v52 = vsub.f32 %v14086_v28, %v14262_v22  ;;  %v8919_v56 = vsub.f32 %v14109_v11, %v14262_v22 }
 0x493   : > { %v8906_v36 = vmax.f32 %v8905_v40, 0.0  ;;  %v8920_v2 = vsub.f32 %v14102_v32, %v14262_v22  ;;  %v8921_v35 = vsub.f32 %v14126_v29, %v14262_v22  ;;  %v8922_v3 = vsub.f32 %v14118_v13, %v14262_v22 }
 0x494   : > { %v8923_v30 = vsub.f32 %v14141_v8, %v14262_v22  ;;  %v8924_v27 = vsub.f32 %v14134_v44, %v14262_v22  ;;  %v8925_v28 = vsub.f32 %v14158_v46, %v14262_v22  ;;  %v8926_v11 = vsub.f32 %v14150_v7, %v14262_v22 }
 0x495   : > { %v8939_v20 = vadd.f32 1e-05, %v8906_v36  ;;  %v8927_v32 = vsub.f32 %v14173_v60, %v14262_v22  ;;  %v8928_v29 = vsub.f32 %v14166_v9, %v14262_v22  ;;  %v8929_v13 = vsub.f32 %v14190_v39, %v14262_v22 }
 0x496   : > { %v8930_v8 = vsub.f32 %v14182_v58, %v14262_v22  ;;  %v8931_v44 = vsub.f32 %v14205_v42, %v14262_v22  ;;  %v8932_v46 = vsub.f32 %v14198_v38, %v14262_v22  ;;  %v8933_v7 = vsub.f32 %v14220_v21, %v14262_v22 }
 0x497   : > { %11252 = vrsqrt.f32 %v8939_v20  ;;  %v8934_v60 = vsub.f32 %v14214_v43, %v14262_v22  ;;  %v8935_v9 = vsub.f32 %v14235_v63, %v14262_v22  ;;  %v8936_v39 = vsub.f32 %v14230_v49, %v14262_v22 }
 0x498   : > { %v8937_v58 = vsub.f32 %v14249_v4, %v14262_v22  ;;  %v8938_v42 = vsub.f32 %v14244_v61, %v14262_v22 }
 0x4a4   : > { %v11253_v16 = vpop.eup %11252 }
 0x4a5   : > { %v8941_v38 = vmul.f32 %v11253_v16, %v8907_v47  ;;  %v8942_v55 = vmul.f32 %v11253_v16, %v8908_v24  ;;  %v8943_v0 = vmul.f32 %v11253_v16, %v8909_v6  ;;  %v8944_v21 = vmul.f32 %v11253_v16, %v8910_v23  ;;  %v11254_v24 = vld [vmem:[#allocation2 + $0x19] sm:$0xff]  ;;  %v11255_v23 = vld [vmem:[#allocation2 + $0x21] sm:$0xff] }
 0x4a6   : > { %v8945_v12 = vmul.f32 %v11253_v16, %v8911_v45  ;;  %v8946_v41 = vmul.f32 %v11253_v16, %v8912_v59  ;;  %v8947_v43 = vmul.f32 %v11253_v16, %v8913_v34  ;;  %v8948_v15 = vmul.f32 %v11253_v16, %v8914_v57  ;;  %v11256_v59 = vld [vmem:[#allocation2 + $0x31] sm:$0xff]  ;;  %v11257_v57 = vld [vmem:[#allocation2 + $0x39] sm:$0xff] }
 0x4a7   : > { %v8949_v25 = vmul.f32 %v11253_v16, %v8915_v17  ;;  %v8950_v54 = vmul.f32 %v11253_v16, %v8916_v5  ;;  %v8951_v63 = vmul.f32 %v11253_v16, %v8917_v37  ;;  %v8952_v1 = vmul.f32 %v11253_v16, %v8918_v52  ;;  %v11258_v5 = vld [vmem:[#allocation2 + $0x49] sm:$0xff]  ;;  %v11259_v52 = vld [vmem:[#allocation2 + $0x51] sm:$0xff] }
 0x4a8   : > { %v8953_v26 = vmul.f32 %v11253_v16, %v8919_v56  ;;  %v8954_v49 = vmul.f32 %v11253_v16, %v8920_v2  ;;  %v8955_v18 = vmul.f32 %v11253_v16, %v8921_v35  ;;  %v8956_v4 = vmul.f32 %v11253_v16, %v8922_v3  ;;  %v11260_v2 = vld [vmem:[#allocation2 + $0x61] sm:$0xff]  ;;  %v11261_v3 = vld [vmem:[#allocation2 + $0x69] sm:$0xff] }
 0x4a9   : > { %v8957_v51 = vmul.f32 %v11253_v16, %v8923_v30  ;;  %v8958_v48 = vmul.f32 %v11253_v16, %v8924_v27  ;;  %v8959_v61 = vmul.f32 %v11253_v16, %v8925_v28  ;;  %v8960_v14 = vmul.f32 %v11253_v16, %v8926_v11  ;;  %v11262_v27 = vld [vmem:[#allocation2 + $0x79] sm:$0xff]  ;;  %v11263_v11 = vld [vmem:[#allocation2 + $0x81] sm:$0xff] }
 0x4aa   : > { %v14330_v62 = vmul.f32 %v11253_v16, %v8927_v32  ;;  %v14332_v50 = vmul.f32 %v11253_v16, %v8928_v29  ;;  %v14334_v10 = vmul.f32 %v11253_v16, %v8929_v13  ;;  %v14336_v33 = vmul.f32 %v11253_v16, %v8930_v8  ;;  %v11264_v29 = vld [vmem:[#allocation2 + $0x91] sm:$0xff]  ;;  %v11265_v8 = vld [vmem:[#allocation2 + $0x99] sm:$0xff] }
 0x4ab   : > { %v14338_v19 = vmul.f32 %v11253_v16, %v8931_v44  ;;  %v14340_v22 = vmul.f32 %v11253_v16, %v8932_v46  ;;  %v14342_v53 = vmul.f32 %v11253_v16, %v8933_v7  ;;  %v14344_v31 = vmul.f32 %v11253_v16, %v8934_v60  ;;  %v11266_v46 = vld [vmem:[#allocation2 + $0xa9] sm:$0xff]  ;;  %v11267_v60 = vld [vmem:[#allocation2 + $0xb1] sm:$0xff] }
 0x4ac   : > { %v14353_v40 = vmul.f32 %v11253_v16, %v8935_v9  ;;  %v14355_v36 = vmul.f32 %v11253_v16, %v8936_v39  ;;  %v14357_v20 = vmul.f32 %v11253_v16, %v8937_v58  ;;  %v14359_v47 = vmul.f32 %v11253_v16, %v8938_v42  ;;  %v11268_v9 = vld [vmem:[#allocation2 + $0xc1] sm:$0xff]  ;;  %v11269_v58 = vld [vmem:[#allocation2 + $0xc9] sm:$0xff] }
 0x4ad   : > { %v9005_v6 = vadd.f32 %v11254_v24, %v8941_v38  ;;  %v9006_v45 = vadd.f32 %v11255_v23, %v8942_v55  ;;  %v9007_v34 = vadd.f32 %v11256_v59, %v8943_v0  ;;  %v9008_v17 = vadd.f32 %v11257_v57, %v8944_v21  ;;  %v9003_v38 = vld [vmem:[#allocation2 + $0x181] sm:$0xff]  ;;  %v11270_v55 = vld [vmem:[#allocation2 + $0xd9] sm:$0xff]  ;;  %v11284_v23 = vld [vmem:[#allocation2 + $0x189] sm:$0xff] }
 0x4ae   : > { %v9009_v37 = vadd.f32 %v11258_v5, %v8945_v12  ;;  %v9010_v56 = vadd.f32 %v11259_v52, %v8946_v41  ;;  %v9011_v35 = vadd.f32 %v11260_v2, %v8947_v43  ;;  %v9012_v30 = vadd.f32 %v11261_v3, %v8948_v15  ;;  %v11271_v21 = vld [vmem:[#allocation2 + $0xe1] sm:$0xff]  ;;  %v11272_v41 = vld [vmem:[#allocation2 + $0xf1] sm:$0xff]  ;;  %v11273_v15 = vld [vmem:[#allocation2 + $0xf9] sm:$0xff] }
 0x4af   : > { %v9013_v28 = vadd.f32 %v11262_v27, %v8949_v25  ;;  %v9014_v32 = vadd.f32 %v11263_v11, %v8950_v54  ;;  %v9015_v13 = vadd.f32 %v11264_v29, %v8951_v63  ;;  %v9016_v44 = vadd.f32 %v11265_v8, %v8952_v1  ;;  %9037 = vst.msk [vmem:[%s14351_s6] sm:$0xff] %vm171_vm1, %v9005_v6  ;;  %v11274_v54 = vld [vmem:[#allocation2 + $0x109] sm:$0xff]  ;;  %v11275_v1 = vld [vmem:[#allocation2 + $0x111] sm:$0xff] }
 0x4b0   : > { %9038 = vst.msk [vmem:[%s14351_s6 + $0x8] sm:$0xff] %vm171_vm1, %v9006_v45  ;;  %9039 = vst.msk [vmem:[%s14351_s6 + $0x10] sm:$0xff] %vm171_vm1, %v9007_v34  ;;  %v9017_v7 = vadd.f32 %v11266_v46, %v8953_v26  ;;  %v9018_v16 = vadd.f32 %v11267_v60, %v8954_v49  ;;  %v9019_v39 = vadd.f32 %v11268_v9, %v8955_v18  ;;  %v11276_v49 = vld [vmem:[#allocation2 + $0x121] sm:$0xff] }
 0x4b1   : > { %9040 = vst.msk [vmem:[%s14351_s6 + $0x18] sm:$0xff] %vm171_vm1, %v9008_v17  ;;  %v9020_v42 = vadd.f32 %v11269_v58, %v8956_v4  ;;  %9041 = vst.msk [vmem:[%s14351_s6 + $0x20] sm:$0xff] %vm171_vm1, %v9009_v37  ;;  %v9021_v0 = vadd.f32 %v11270_v55, %v8957_v51  ;;  %v9022_v12 = vadd.f32 %v11271_v21, %v8958_v48  ;;  %v11277_v4 = vld [vmem:[#allocation2 + $0x129] sm:$0xff]  ;;  %v11278_v48 = vld [vmem:[#allocation2 + $0x139] sm:$0xff] }
 0x4b2   : > { %9042 = vst.msk [vmem:[%s14351_s6 + $0x28] sm:$0xff] %vm171_vm1, %v9010_v56  ;;  %9043 = vst.msk [vmem:[%s14351_s6 + $0x30] sm:$0xff] %vm171_vm1, %v9011_v35  ;;  %v9023_v43 = vadd.f32 %v11272_v41, %v8959_v61  ;;  %v9024_v25 = vadd.f32 %v11273_v15, %v8960_v14  ;;  %v9025_v63 = vadd.f32 %v11274_v54, %v14330_v62  ;;  %v11279_v14 = vld [vmem:[#allocation2 + $0x141] sm:$0xff] }
 0x4b3   : > { %9044 = vst.msk [vmem:[%s14351_s6 + $0x38] sm:$0xff] %vm171_vm1, %v9012_v30  ;;  %9045 = vst.msk [vmem:[%s14351_s6 + $0x40] sm:$0xff] %vm171_vm1, %v9013_v28  ;;  %v9026_v26 = vadd.f32 %v11275_v1, %v14332_v50  ;;  %v9027_v18 = vadd.f32 %v11276_v49, %v14334_v10  ;;  %v9028_v51 = vadd.f32 %v11277_v4, %v14336_v33  ;;  %v11280_v50 = vld [vmem:[#allocation2 + $0x151] sm:$0xff]  ;;  %v11281_v33 = vld [vmem:[#allocation2 + $0x159] sm:$0xff] }
 0x4b4   : > { %9046 = vst.msk [vmem:[%s14351_s6 + $0x48] sm:$0xff] %vm171_vm1, %v9014_v32  ;;  %9047 = vst.msk [vmem:[%s14351_s6 + $0x50] sm:$0xff] %vm171_vm1, %v9015_v13  ;;  %v9029_v61 = vadd.f32 %v11278_v48, %v14338_v19  ;;  %v9030_v62 = vadd.f32 %v11279_v14, %v14340_v22  ;;  %v9031_v10 = vadd.f32 %v11280_v50, %v14342_v53  ;;  %v11282_v19 = vld [vmem:[#allocation2 + $0x169] sm:$0xff]  ;;  %v11283_v53 = vld [vmem:[#allocation2 + $0x171] sm:$0xff] }
 0x4b5   : > { %9048 = vst.msk [vmem:[%s14351_s6 + $0x58] sm:$0xff] %vm171_vm1, %v9016_v44  ;;  %9049 = vst.msk [vmem:[%s14351_s6 + $0x60] sm:$0xff] %vm171_vm1, %v9017_v7  ;;  %v9032_v24 = vadd.f32 %v11281_v33, %v14344_v31  ;;  %v9033_v22 = vadd.f32 %v11282_v19, %v14353_v40  ;;  %v9034_v31 = vadd.f32 %v11283_v53, %v14355_v36 }
 0x4b6   : > { %9050 = vst.msk [vmem:[%s14351_s6 + $0x68] sm:$0xff] %vm171_vm1, %v9018_v16  ;;  %9051 = vst.msk [vmem:[%s14351_s6 + $0x70] sm:$0xff] %vm171_vm1, %v9019_v39  ;;  %v9035_v6 = vadd.f32 %v9003_v38, %v14357_v20  ;;  %v9036_v45 = vadd.f32 %v11284_v23, %v14359_v47 }
 0x4b7   : > { %9052 = vst.msk [vmem:[%s14351_s6 + $0x78] sm:$0xff] %vm171_vm1, %v9020_v42  ;;  %9053 = vst.msk [vmem:[%s14351_s6 + $0x80] sm:$0xff] %vm171_vm1, %v9021_v0 }
 0x4b8   : > { %9054 = vst.msk [vmem:[%s14351_s6 + $0x88] sm:$0xff] %vm171_vm1, %v9022_v12  ;;  %9055 = vst.msk [vmem:[%s14351_s6 + $0x90] sm:$0xff] %vm171_vm1, %v9023_v43 }
 0x4b9   : > { %9056 = vst.msk [vmem:[%s14351_s6 + $0x98] sm:$0xff] %vm171_vm1, %v9024_v25  ;;  %9057 = vst.msk [vmem:[%s14351_s6 + $0xa0] sm:$0xff] %vm171_vm1, %v9025_v63 }
 0x4ba   : > { %9058 = vst.msk [vmem:[%s14351_s6 + $0xa8] sm:$0xff] %vm171_vm1, %v9026_v26  ;;  %9059 = vst.msk [vmem:[%s14351_s6 + $0xb0] sm:$0xff] %vm171_vm1, %v9027_v18 }
 0x4bb   : > { %9060 = vst.msk [vmem:[%s14351_s6 + $0xb8] sm:$0xff] %vm171_vm1, %v9028_v51  ;;  %9061 = vst.msk [vmem:[%s14351_s6 + $0xc0] sm:$0xff] %vm171_vm1, %v9029_v61 }
 0x4bc   : > { %9062 = vst.msk [vmem:[%s14351_s6 + $0xc8] sm:$0xff] %vm171_vm1, %v9030_v62  ;;  %9063 = vst.msk [vmem:[%s14351_s6 + $0xd0] sm:$0xff] %vm171_vm1, %v9031_v10 }
 0x4bd   : > { %9064 = vst.msk [vmem:[%s14351_s6 + $0xd8] sm:$0xff] %vm171_vm1, %v9032_v24  ;;  %9065 = vst.msk [vmem:[%s14351_s6 + $0xe0] sm:$0xff] %vm171_vm1, %v9033_v22 }
 0x4be   : > { %9066 = vst.msk [vmem:[%s14351_s6 + $0xe8] sm:$0xff] %vm171_vm1, %v9034_v31  ;;  %9067 = vst.msk [vmem:[%s14351_s6 + $0xf0] sm:$0xff] %vm171_vm1, %v9035_v6 }
 0x4bf   : > { %9068 = vst.msk [vmem:[%s14351_s6 + $0xf8] sm:$0xff] %vm171_vm1, %v9036_v45 }
 0x4c0 PF: > { %s13_s12 = sadd.s32 1, %s11291_s12  }
 0x4c1   : > { %p10_p4 = scmp.ge.s32.totalorder %s13_s12, 4  }
 0x4c3   :  { %12 = sbr.rel (!%p10_p4) target bundleno = 1 (0x1), region = 84 }

</bundles_post_ra>
